<compile_context>
chip_gen: v7x
topology: tpu7x:2x2x1
jax: 0.10.0
libtpu: 0.0.40
codegen_flags: <defaults>
</compile_context>

<pallas_src>
import functools
import math

import numpy as np
import jax
import jax.numpy as jnp
from jax.experimental import pallas as pl
from jax.experimental.pallas import tpu as pltpu

# ---------------------------------------------------------------------------
# Small synthetic config (stands in for config.MODEL.*). Channel widths are
# scaled down for a runnable demo (real module: 1024 / 512 / 2048).
# ---------------------------------------------------------------------------
POOLER_RESOLUTION = 8          # P
POOLER_SCALE = 0.25            # POOLER_SCALES = (0.25,)
SAMPLING_RATIO = 2             # POOLER_SAMPLING_RATIO
CIN = 16                       # backbone channels (!= "1024" -> trans_conv exists)
HEAD_IN = 128                  # stage-4 input width   (1024 at full scale)
BOTTLENECK = 64                # stage-4 bottleneck    (512 at full scale)
HEAD_OUT = 256                 # stage-4 output width  (2048 at full scale)
N_IMG, HF, WF = 2, 16, 16      # feature-map batch / spatial
R_ROIS = 6                     # total proposals (3 per image, grouped by image)
IMG_SIZE = HF / POOLER_SCALE

LANE = 128
VMEM_LIMIT = 48 * 1024 * 1024  # explicit scoped-VMEM limit (fits v5e/v6e/v7x)


# ---------------------------------------------------------------------------
# Small helpers
# ---------------------------------------------------------------------------
def _round_up(x, m):
    return (x + m - 1) // m * m


def _pad_to(a, axis, target):
    pad = target - a.shape[axis]
    if pad <= 0:
        return a
    widths = [(0, 0)] * a.ndim
    widths[axis] = (0, pad)
    return jnp.pad(a, widths)


def _lane_tile(d, cap=512):
    for t in (cap, 256, 128):
        if d % t == 0:
            return t
    return d   # fallback: full dim (always legal)


def _largest_divisor_leq(n, cap):
    for d in range(min(n, cap), 0, -1):
        if n % d == 0:
            return d
    return 1


# ---------------------------------------------------------------------------
# Pallas kernel 1: ROIAlign as (interp-matrix @ features), several ROIs per
# grid step (one image's worth). Per-ROI image selection via scalar prefetch.
# ---------------------------------------------------------------------------
def _roi_align_kernel(img_ref, w_ref, f_ref, o_ref):
    del img_ref   # only used by the feature index_map
    rb, pp, hw = w_ref.shape
    o_ref[...] = jnp.dot(w_ref[...].reshape(rb * pp, hw), f_ref[0],
                         preferred_element_type=jnp.float32).astype(o_ref.dtype)


def roi_align_pallas(w_interp, feat_flat, tile_img, rb):
    r, pp, hw = w_interp.shape
    _, _, c = feat_flat.shape
    return pl.pallas_call(
        _roi_align_kernel,
        out_shape=jax.ShapeDtypeStruct((r * pp, c), jnp.bfloat16),
        grid_spec=pltpu.PrefetchScalarGridSpec(
            num_scalar_prefetch=1,
            grid=(r // rb,),
            in_specs=[
                pl.BlockSpec((rb, pp, hw), lambda t, img: (t, 0, 0)),
                pl.BlockSpec((1, hw, c), lambda t, img: (img[t], 0, 0)),
            ],
            out_specs=pl.BlockSpec((rb * pp, c), lambda t, img: (t, 0)),
        ),
        compiler_params=pltpu.CompilerParams(
            dimension_semantics=("parallel",),
            vmem_limit_bytes=VMEM_LIMIT),
    )(tile_img, w_interp, feat_flat)


# ---------------------------------------------------------------------------
# Pallas kernel 2: tiled  Y = act(X @ W + bias [+ residual])
# (1x1 convs; FrozenBN already folded into W/bias). M/N/K tiled, f32 VMEM acc.
# ---------------------------------------------------------------------------
def _mm_kernel(x_ref, w_ref, b_ref, o_ref, acc_ref, *, relu):
    @pl.when(pl.program_id(2) == 0)
    def _():
        acc_ref[...] = jnp.zeros_like(acc_ref)
    acc_ref[...] += jnp.dot(x_ref[...], w_ref[...],
                            preferred_element_type=jnp.float32)

    @pl.when(pl.program_id(2) == pl.num_programs(2) - 1)
    def _():
        acc = acc_ref[...] + b_ref[...]
        if relu:
            acc = jnp.maximum(acc, 0.0)
        o_ref[...] = acc.astype(o_ref.dtype)


def _mm_res_kernel(x_ref, w_ref, b_ref, r_ref, o_ref, acc_ref, *, relu):
    @pl.when(pl.program_id(2) == 0)
    def _():
        acc_ref[...] = jnp.zeros_like(acc_ref)
    acc_ref[...] += jnp.dot(x_ref[...], w_ref[...],
                            preferred_element_type=jnp.float32)

    @pl.when(pl.program_id(2) == pl.num_programs(2) - 1)
    def _():
        acc = acc_ref[...] + b_ref[...] + r_ref[...].astype(jnp.float32)
        if relu:
            acc = jnp.maximum(acc, 0.0)
        o_ref[...] = acc.astype(o_ref.dtype)


def fused_matmul_bias(x, w, bias, *, relu=False, residual=None,
                      out_dtype=jnp.bfloat16):
    m, k = x.shape
    n = w.shape[1]

    tm = min(512, _round_up(m, 8))           # capped M tile -> bounded VMEM
    m_pad = _round_up(m, tm)
    tk = _lane_tile(k)
    tn = _lane_tile(n)

    if m_pad != m:
        x = jnp.pad(x, ((0, m_pad - m), (0, 0)))
        if residual is not None:
            residual = jnp.pad(residual, ((0, m_pad - m), (0, 0)))

    bias2 = bias.reshape(1, n).astype(jnp.float32)
    grid = (m_pad // tm, n // tn, k // tk)   # reduction axis last

    in_specs = [
        pl.BlockSpec((tm, tk), lambda i, j, kk: (i, kk)),
        pl.BlockSpec((tk, tn), lambda i, j, kk: (kk, j)),
        pl.BlockSpec((1, tn), lambda i, j, kk: (0, j)),
    ]
    args = [x, w, bias2]
    if residual is None:
        kernel = functools.partial(_mm_kernel, relu=relu)
    else:
        kernel = functools.partial(_mm_res_kernel, relu=relu)
        in_specs.append(pl.BlockSpec((tm, tn), lambda i, j, kk: (i, j)))
        args.append(residual)

    out = pl.pallas_call(
        kernel,
        out_shape=jax.ShapeDtypeStruct((m_pad, n), out_dtype),
        grid=grid,
        in_specs=in_specs,
        out_specs=pl.BlockSpec((tm, tn), lambda i, j, kk: (i, j)),
        scratch_shapes=[pltpu.VMEM((tm, tn), jnp.float32)],
        compiler_params=pltpu.CompilerParams(
            dimension_semantics=("parallel", "parallel", "arbitrary"),
            vmem_limit_bytes=VMEM_LIMIT),
    )(*args)
    return out[:m] if m_pad != m else out


# ---------------------------------------------------------------------------
# Pallas kernel 3: 3x3 conv (pad=1) + bias (+ReLU), im2col fused in-kernel.
# The activation is given with pixels flattened (row-major) and zero guard
# rows; each of the 9 taps is a shifted pixel-row slice masked at the spatial
# boundaries, accumulated with one MXU dot per tap. No 9x HBM im2col tensor.
# ---------------------------------------------------------------------------
def _conv3x3_kernel(x_ref, w_ref, m_ref, b_ref, o_ref, *, relu, hh, ww):
    rb = x_ref.shape[0]
    cin = x_ref.shape[-1]
    tn = o_ref.shape[-1]
    p2 = hh * ww
    guard = ww + 1
    acc = jnp.zeros((rb * p2, tn), jnp.float32)
    for kh in range(3):
        for kw in range(3):
            s = (kh - 1) * ww + (kw - 1)
            win = x_ref[:, guard + s: guard + s + p2, :]      # (rb, p2, cin)
            win = win * m_ref[kh * 3 + kw]                    # boundary mask (p2, 1)
            acc = acc + jnp.dot(win.reshape(rb * p2, cin), w_ref[kh, kw],
                                preferred_element_type=jnp.float32)
    acc = acc + b_ref[...]
    if relu:
        acc = jnp.maximum(acc, 0.0)
    o_ref[...] = acc.astype(o_ref.dtype)


def _conv3x3_masks(h, w):
    m = np.zeros((9, h * w, 1), np.float32)
    for kh in range(3):
        for kw in range(3):
            dh, dw = kh - 1, kw - 1
            for y in range(h):
                for x in range(w):
                    if 0 <= y + dh < h and 0 <= x + dw < w:
                        m[kh * 3 + kw, y * w + x, 0] = 1.0
    return m


def conv3x3(x, w, bias, *, relu, rb_cap=8):
    r, h, wsp, cin = x.shape
    cout = w.shape[-1]
    p2 = h * wsp
    guard = wsp + 1
    rb = _largest_divisor_leq(r, rb_cap)
    tn = _lane_tile(cout)

    xpad = jnp.pad(x.reshape(r, p2, cin), ((0, 0), (guard, guard), (0, 0)))
    masks = jnp.asarray(_conv3x3_masks(h, wsp), jnp.bfloat16)
    bias2 = bias.reshape(1, cout).astype(jnp.float32)

    kernel = functools.partial(_conv3x3_kernel, relu=relu, hh=h, ww=wsp)
    y = pl.pallas_call(
        kernel,
        out_shape=jax.ShapeDtypeStruct((r * p2, cout), jnp.bfloat16),
        grid=(r // rb, cout // tn),
        in_specs=[
            pl.BlockSpec((rb, p2 + 2 * guard, cin), lambda i, j: (i, 0, 0)),
            pl.BlockSpec((3, 3, cin, tn), lambda i, j: (0, 0, 0, j)),
            pl.BlockSpec((9, p2, 1), lambda i, j: (0, 0, 0)),
            pl.BlockSpec((1, tn), lambda i, j: (0, j)),
        ],
        out_specs=pl.BlockSpec((rb * p2, tn), lambda i, j: (i, j)),
        compiler_params=pltpu.CompilerParams(
            dimension_semantics=("parallel", "parallel"),
            vmem_limit_bytes=VMEM_LIMIT),
    )(xpad, w, masks, bias2)
    return y.reshape(r, h, wsp, cout)


# ---------------------------------------------------------------------------
# Conv wrappers / bottleneck block
# ---------------------------------------------------------------------------
def conv1x1(x, w, bias, *, relu, residual=None):
    r, h, wsp, cin = x.shape
    cout = w.shape[1]
    res2 = residual.reshape(r * h * wsp, cout) if residual is not None else None
    y = fused_matmul_bias(x.reshape(r * h * wsp, cin), w, bias,
                          relu=relu, residual=res2)
    return y.reshape(r, h, wsp, cout)


def bottleneck_block(x, p, *, stride, has_downsample):
    # BottleneckWithFixedBatchNorm, stride_in_1x1=True (FrozenBN folded offline)
    if stride == 2:
        x_in = x[:, ::2, ::2, :]   # single subsample reused by both branches
    else:
        x_in = x
    if has_downsample:
        residual = conv1x1(x_in, p["wd"], p["bd"], relu=False)
    else:
        residual = x
    h = conv1x1(x_in, p["w1"], p["b1"], relu=True)
    h = conv3x3(h, p["w2"], p["b2"], relu=True)
    # out = relu(conv3(h) + bias + residual)
    return conv1x1(h, p["w3"], p["b3"], relu=True, residual=residual)


# ---------------------------------------------------------------------------
# Exact bilinear-interpolation matrix for legacy (aligned=False) ROIAlign.
# ---------------------------------------------------------------------------
def roi_align_matrix(boxes, hf, wf, pooled, spatial_scale, sampling_ratio):
    r = boxes.shape[0]
    s = sampling_ratio
    x1 = boxes[:, 0] * spatial_scale
    y1 = boxes[:, 1] * spatial_scale
    x2 = boxes[:, 2] * spatial_scale
    y2 = boxes[:, 3] * spatial_scale
    roi_w = jnp.maximum(x2 - x1, 1.0)
    roi_h = jnp.maximum(y2 - y1, 1.0)
    bin_w = roi_w / pooled
    bin_h = roi_h / pooled
    pidx = jnp.arange(pooled, dtype=jnp.float32)
    sidx = jnp.arange(s, dtype=jnp.float32)
    ys = (y1[:, None, None] + pidx[None, :, None] * bin_h[:, None, None]
          + (sidx[None, None, :] + 0.5) * bin_h[:, None, None] / s)
    xs = (x1[:, None, None] + pidx[None, :, None] * bin_w[:, None, None]
          + (sidx[None, None, :] + 0.5) * bin_w[:, None, None] / s)
    shp = (r, pooled, pooled, s, s)
    y = jnp.broadcast_to(ys[:, :, None, :, None], shp)
    x = jnp.broadcast_to(xs[:, None, :, None, :], shp)
    valid = (y >= -1.0) & (y <= hf) & (x >= -1.0) & (x <= wf)
    yc = jnp.maximum(y, 0.0)
    xc = jnp.maximum(x, 0.0)
    y_lo = jnp.floor(yc).astype(jnp.int32)
    x_lo = jnp.floor(xc).astype(jnp.int32)
    y_top = y_lo >= hf - 1
    x_top = x_lo >= wf - 1
    y_hi = jnp.where(y_top, hf - 1, y_lo + 1)
    x_hi = jnp.where(x_top, wf - 1, x_lo + 1)
    y_lo = jnp.where(y_top, hf - 1, y_lo)
    x_lo = jnp.where(x_top, wf - 1, x_lo)
    yc = jnp.where(y_top, y_lo.astype(jnp.float32), yc)
    xc = jnp.where(x_top, x_lo.astype(jnp.float32), xc)
    ly = yc - y_lo.astype(jnp.float32)
    lx = xc - x_lo.astype(jnp.float32)
    hy = 1.0 - ly
    hx = 1.0 - lx
    count = float(s * s)
    r_idx = jnp.broadcast_to(jnp.arange(r)[:, None, None, None, None], shp)
    bin_idx = jnp.broadcast_to(
        (jnp.arange(pooled)[:, None] * pooled
         + jnp.arange(pooled)[None, :])[None, :, :, None, None], shp)
    m = jnp.zeros((r, pooled * pooled, hf * wf), jnp.float32)
    for wgt, yy, xx in ((hy * hx, y_lo, x_lo), (hy * lx, y_lo, x_hi),
                        (ly * hx, y_hi, x_lo), (ly * lx, y_hi, x_hi)):
        wgt = jnp.where(valid, wgt, 0.0) / count
        m = m.at[r_idx, bin_idx, yy * wf + xx].add(wgt)
    return m


# ---------------------------------------------------------------------------
# Parameters: torch-like f32 init, then offline fold (BN scale) / pad / bf16.
# ---------------------------------------------------------------------------
def init_params(key):
    ks = iter(jax.random.split(key, 64))

    def conv_w(shape, std=None):
        fan_in = 1
        for d in shape[:-1]:
            fan_in *= d
        std = std if std is not None else 1.0 / math.sqrt(fan_in)
        return std * jax.random.normal(next(ks), shape, jnp.float32)

    def bn(c):
        return (1.0 + 0.1 * jax.random.normal(next(ks), (c,), jnp.float32),
                0.1 * jax.random.normal(next(ks), (c,), jnp.float32))

    def block(cin, cout, bott, downsample):
        p = {}
        p["w1"] = conv_w((cin, bott))
        p["s1"], p["b1"] = bn(bott)
        p["w2"] = conv_w((3, 3, bott, bott))
        p["s2"], p["b2"] = bn(bott)
        p["w3"] = conv_w((bott, cout))
        p["s3"], p["b3"] = bn(cout)
        if downsample:
            p["wd"] = conv_w((cin, cout))
            p["sd"], p["bd"] = bn(cout)
        return p

    return {
        # torch.nn.init.normal_(std=0.01), bias = 0  (reference trans_conv init)
        "trans_w": conv_w((3, 3, CIN, HEAD_IN), std=0.01),
        "trans_b": jnp.zeros((HEAD_IN,), jnp.float32),
        "blocks": [
            block(HEAD_IN, HEAD_OUT, BOTTLENECK, downsample=True),   # stride 2
            block(HEAD_OUT, HEAD_OUT, BOTTLENECK, downsample=False),
            block(HEAD_OUT, HEAD_OUT, BOTTLENECK, downsample=False),
        ],
    }


def prepare_params(raw):
    """Fold FrozenBN scales into the conv weights, zero-pad channel dims to
    multiples of 128 (lane-dense outputs), and cast weights to bf16."""
    cp = _round_up(CIN, LANE)
    hin_p = _round_up(HEAD_IN, LANE)
    bot_p = _round_up(BOTTLENECK, LANE)
    hout_p = _round_up(HEAD_OUT, LANE)

    def fold_1x1(w, s, b, cin_p, cout_p):
        wf = _pad_to(_pad_to(w * s[None, :], 0, cin_p), 1, cout_p)
        return wf.astype(jnp.bfloat16), _pad_to(b, 0, cout_p).astype(jnp.float32)

    def fold_3x3(w, s, b, cin_p, cout_p):
        wf = _pad_to(_pad_to(w * s[None, None, None, :], 2, cin_p), 3, cout_p)
        return wf.astype(jnp.bfloat16), _pad_to(b, 0, cout_p).astype(jnp.float32)

    out = {}
    out["trans_w"], out["trans_b"] = fold_3x3(
        raw["trans_w"], jnp.ones((HEAD_IN,), jnp.float32), raw["trans_b"],
        cp, hin_p)

    blocks = []
    for bi, p in enumerate(raw["blocks"]):
        cin_p = hin_p if bi == 0 else hout_p
        q = {}
        q["w1"], q["b1"] = fold_1x1(p["w1"], p["s1"], p["b1"], cin_p, bot_p)
        q["w2"], q["b2"] = fold_3x3(p["w2"], p["s2"], p["b2"], bot_p, bot_p)
        q["w3"], q["b3"] = fold_1x1(p["w3"], p["s3"], p["b3"], bot_p, hout_p)
        if "wd" in p:
            q["wd"], q["bd"] = fold_1x1(p["wd"], p["sd"], p["bd"], cin_p, hout_p)
        blocks.append(q)
    out["blocks"] = blocks
    return out


# ---------------------------------------------------------------------------
# Full forward (matches ResNet50Conv5ROIFeatureExtractor.forward).
# ---------------------------------------------------------------------------
def roi_feature_extractor(feat_nchw, boxes, batch_idx, params):
    n, c, hf, wf = feat_nchw.shape
    r = boxes.shape[0]
    P = POOLER_RESOLUTION
    cp = _round_up(c, LANE)

    assert r % n == 0                    # fixed ROI count per image, image-grouped
    rois_per_img = r // n
    rb = _largest_divisor_leq(rois_per_img, 16)

    # --- Pooler (single-scale legacy ROIAlign) ---
    w_interp = roi_align_matrix(boxes, hf, wf, P, POOLER_SCALE,
                                SAMPLING_RATIO).astype(jnp.bfloat16)
    feat = jnp.transpose(feat_nchw, (0, 2, 3, 1)).reshape(n, hf * wf, c)
    feat = _pad_to(feat, 2, cp).astype(jnp.bfloat16)
    tile_img = batch_idx[::rb].astype(jnp.int32)      # image id of each ROI tile
    pooled = roi_align_pallas(w_interp, feat, tile_img, rb)     # (R*P*P, cp)
    x = pooled.reshape(r, P, P, cp)                              # NHWC, bf16

    # --- trans_conv: 3x3 conv + bias (no BN / no ReLU in the reference) ---
    x = conv3x3(x, params["trans_w"], params["trans_b"], relu=False)

    # --- ResNetHead stage 4: 3 bottleneck blocks, first one stride 2 ---
    x = bottleneck_block(x, params["blocks"][0], stride=2, has_downsample=True)
    x = bottleneck_block(x, params["blocks"][1], stride=1, has_downsample=False)
    x = bottleneck_block(x, params["blocks"][2], stride=1, has_downsample=False)

    x = x[..., :HEAD_OUT]                                        # drop channel pad
    return jnp.transpose(x, (0, 3, 1, 2)).astype(jnp.float32)    # NCHW


# ---------------------------------------------------------------------------
if __name__ == "__main__":
    key = jax.random.PRNGKey(0)
    k_feat, k_xy, k_wh, k_param = jax.random.split(key, 4)

    # Backbone feature map (NCHW, as PyTorch would feed it).
    feat = jax.random.normal(k_feat, (N_IMG, CIN, HF, WF), jnp.float32)

    # Proposals: 3 boxes per image, image coordinates (x1, y1, x2, y2), grouped.
    xy1 = jax.random.uniform(k_xy, (R_ROIS, 2), minval=0.0, maxval=IMG_SIZE * 0.5)
    wh = jax.random.uniform(k_wh, (R_ROIS, 2), minval=IMG_SIZE * 0.2,
                            maxval=IMG_SIZE * 0.5)
    boxes = jnp.concatenate([xy1, jnp.minimum(xy1 + wh, IMG_SIZE - 1.0)], axis=-1)
    batch_idx = jnp.array([0, 0, 0, 1, 1, 1], jnp.int32)

    params = prepare_params(init_params(k_param))

    fwd = jax.jit(lambda f, b, i: roi_feature_extractor(f, b, i, params))
    out = fwd(feat, boxes, batch_idx)
    out = jax.block_until_ready(out)

    assert out.shape == (R_ROIS, HEAD_OUT, POOLER_RESOLUTION // 2,
                         POOLER_RESOLUTION // 2), out.shape
    assert bool(jnp.all(jnp.isfinite(out)))
    print("KERNEL_OK")
</pallas_src>

<mosaic_0001>
module attributes {stable_mosaic.version = 11 : i64} {
  func.func private @main(%arg0: i32) attributes {dimension_semantics = [#tpu.dimension_semantics<core_parallel>], iteration_bounds = array<i64: 2>, tpu.core_type = #tpu.core_type<sc_scalar_subcore>, window_params = []} {
    return
  }
}

module attributes {stable_mosaic.version = 11 : i64} {
  func.func private @main(%arg0: i32) attributes {dimension_semantics = [#tpu.dimension_semantics<core_parallel>], iteration_bounds = array<i64: 2>, tpu.core_type = #tpu.core_type<sc_scalar_subcore>, window_params = []} {
    return
  }
}

module attributes {stable_mosaic.version = 11 : i64} {
  func.func @_roi_align_kernel(%arg0: i32, %arg1: memref<2xi32, #tpu.memory_space<smem>>, %arg2: memref<3x64x256xbf16, #tpu.memory_space<vmem>>, %arg3: memref<1x256x128xbf16, #tpu.memory_space<vmem>>, %arg4: memref<192x128xbf16, #tpu.memory_space<vmem>>) attributes {dimension_semantics = [#tpu.dimension_semantics<parallel>], iteration_bounds = array<i64: 2>, scalar_prefetch = 1 : i64, scratch_operands = 0 : i64, tpu.core_type = #tpu.core_type<tc>, window_params = [{transform_indices = @transform_0, window_bounds = array<i64: 3, 64, 256>}, {transform_indices = @transform_1, window_bounds = array<i64: 1, 256, 128>}, {transform_indices = @transform_2, window_bounds = array<i64: 192, 128>}]} {
    %c0 = arith.constant 0 : index
    %c0_0 = arith.constant 0 : index
    %c0_1 = arith.constant 0 : index
    %0 = vector.load %arg2[%c0, %c0_0, %c0_1] : memref<3x64x256xbf16, #tpu.memory_space<vmem>>, vector<3x64x256xbf16>
    %1 = vector.shape_cast %0 : vector<3x64x256xbf16> to vector<192x256xbf16>
    %c0_2 = arith.constant 0 : index
    %c0_3 = arith.constant 0 : index
    %c0_4 = arith.constant 0 : index
    %2 = vector.load %arg3[%c0_2, %c0_3, %c0_4] : memref<1x256x128xbf16, #tpu.memory_space<vmem>>, vector<1x256x128xbf16>
    %3 = vector.shape_cast %2 : vector<1x256x128xbf16> to vector<256x128xbf16>
    %cst = arith.constant dense<0.000000e+00> : vector<192x128xf32>
    %4 = tpu.matmul %1, %3, %cst {dimension_numbers = #tpu.dot_dimension_numbers<[1], [0], [0], [1], [0, 0, 1, 1], [], []>} : vector<192x256xbf16>, vector<256x128xbf16>, vector<192x128xf32> -> vector<192x128xf32>
    %5 = arith.truncf %4 : vector<192x128xf32> to vector<192x128xbf16>
    %c0_5 = arith.constant 0 : index
    %c0_6 = arith.constant 0 : index
    %6 = vector.load %arg4[%c0_5, %c0_6] : memref<192x128xbf16, #tpu.memory_space<vmem>>, vector<192x128xbf16>
    tpu.vector_store %arg4[%c0_5, %c0_6], %5 {strides = array<i32>} : memref<192x128xbf16, #tpu.memory_space<vmem>>, vector<192x128xbf16>,
    return
  }
  func.func @transform_0(%arg0: i32, %arg1: memref<2xi32, #tpu.memory_space<smem>>) -> (i32, i32, i32) {
    %c0_i32 = arith.constant 0 : i32
    %c0_i32_0 = arith.constant 0 : i32
    %c0_i32_1 = arith.constant 0 : i32
    return %arg0, %c0_i32, %c0_i32_0 : i32, i32, i32
  }
  func.func @transform_1(%arg0: i32, %arg1: memref<2xi32, #tpu.memory_space<smem>>) -> (i32, i32, i32) {
    %0 = arith.index_cast %arg0 : i32 to index
    %1 = memref.load %arg1[%0] : memref<2xi32, #tpu.memory_space<smem>>
    %c0_i32 = arith.constant 0 : i32
    %c0_i32_0 = arith.constant 0 : i32
    %c0_i32_1 = arith.constant 0 : i32
    return %1, %c0_i32, %c0_i32_0 : i32, i32, i32
  }
  func.func @transform_2(%arg0: i32, %arg1: memref<2xi32, #tpu.memory_space<smem>>) -> (i32, i32) {
    %c0_i32 = arith.constant 0 : i32
    %c0_i32_0 = arith.constant 0 : i32
    return %arg0, %c0_i32 : i32, i32
  }
}

module attributes {stable_mosaic.version = 11 : i64} {
  func.func @_conv3x3_kernel(%arg0: i32, %arg1: i32, %arg2: memref<6x82x128xbf16, #tpu.memory_space<vmem>>, %arg3: memref<3x3x128x128xbf16, #tpu.memory_space<vmem>>, %arg4: memref<9x64x1xbf16, #tpu.memory_space<vmem>>, %arg5: memref<1x128xf32, #tpu.memory_space<vmem>>, %arg6: memref<384x128xbf16, #tpu.memory_space<vmem>>) attributes {dimension_semantics = [#tpu.dimension_semantics<parallel>, #tpu.dimension_semantics<parallel>], iteration_bounds = array<i64: 1, 1>, scalar_prefetch = 0 : i64, scratch_operands = 0 : i64, tpu.core_type = #tpu.core_type<tc>, window_params = [{transform_indices = @transform_0, window_bounds = array<i64: 6, 82, 128>}, {transform_indices = @transform_1, window_bounds = array<i64: 3, 3, 128, 128>}, {pipeline_mode = #tpu.pipeline_mode<synchronous>, transform_indices = @transform_2, window_bounds = array<i64: 9, 64, 1>}, {transform_indices = @transform_3, window_bounds = array<i64: 1, 128>}, {transform_indices = @transform_4, window_bounds = array<i64: 384, 128>}]} {
    %cst = arith.constant 0.000000e+00 : f32
    %0 = vector.broadcast %cst : f32 to vector<384x128xf32>
    %c0 = arith.constant 0 : index
    %c0_0 = arith.constant 0 : index
    %c0_1 = arith.constant 0 : index
    %1 = vector.load %arg2[%c0, %c0_0, %c0_1] : memref<6x82x128xbf16, #tpu.memory_space<vmem>>, vector<6x64x128xbf16>
    %c0_2 = arith.constant 0 : index
    %c0_3 = arith.constant 0 : index
    %c0_4 = arith.constant 0 : index
    %2 = vector.load %arg4[%c0_2, %c0_3, %c0_4] : memref<9x64x1xbf16, #tpu.memory_space<vmem>>, vector<1x64x1xbf16>
    %3 = vector.shape_cast %2 : vector<1x64x1xbf16> to vector<64x1xbf16>
    %4 = vector.shape_cast %3 : vector<64x1xbf16> to vector<1x64x1xbf16>
    %5 = vector.broadcast %4 : vector<1x64x1xbf16> to vector<6x64x128xbf16>
    %6 = arith.mulf %1, %5 : vector<6x64x128xbf16>
    %7 = vector.shape_cast %6 : vector<6x64x128xbf16> to vector<384x128xbf16>
    %c0_5 = arith.constant 0 : index
    %c0_6 = arith.constant 0 : index
    %c0_7 = arith.constant 0 : index
    %c0_8 = arith.constant 0 : index
    %8 = vector.load %arg3[%c0_5, %c0_6, %c0_7, %c0_8] : memref<3x3x128x128xbf16, #tpu.memory_space<vmem>>, vector<1x1x128x128xbf16>
    %9 = vector.shape_cast %8 : vector<1x1x128x128xbf16> to vector<128x128xbf16>
    %cst_9 = arith.constant dense<0.000000e+00> : vector<384x128xf32>
    %10 = tpu.matmul %7, %9, %cst_9 {dimension_numbers = #tpu.dot_dimension_numbers<[1], [0], [0], [1], [0, 0, 1, 1], [], []>} : vector<384x128xbf16>, vector<128x128xbf16>, vector<384x128xf32> -> vector<384x128xf32>
    %11 = arith.addf %0, %10 : vector<384x128xf32>
    %c0_10 = arith.constant 0 : index
    %c1 = arith.constant 1 : index
    %c0_11 = arith.constant 0 : index
    %12 = vector.load %arg2[%c0_10, %c1, %c0_11] : memref<6x82x128xbf16, #tpu.memory_space<vmem>>, vector<6x64x128xbf16>
    %c1_12 = arith.constant 1 : index
    %c0_13 = arith.constant 0 : index
    %c0_14 = arith.constant 0 : index
    %13 = vector.load %arg4[%c1_12, %c0_13, %c0_14] : memref<9x64x1xbf16, #tpu.memory_space<vmem>>, vector<1x64x1xbf16>
    %14 = vector.shape_cast %13 : vector<1x64x1xbf16> to vector<64x1xbf16>
    %15 = vector.shape_cast %14 : vector<64x1xbf16> to vector<1x64x1xbf16>
    %16 = vector.broadcast %15 : vector<1x64x1xbf16> to vector<6x64x128xbf16>
    %17 = arith.mulf %12, %16 : vector<6x64x128xbf16>
    %18 = vector.shape_cast %17 : vector<6x64x128xbf16> to vector<384x128xbf16>
    %c0_15 = arith.constant 0 : index
    %c1_16 = arith.constant 1 : index
    %c0_17 = arith.constant 0 : index
    %c0_18 = arith.constant 0 : index
    %19 = vector.load %arg3[%c0_15, %c1_16, %c0_17, %c0_18] : memref<3x3x128x128xbf16, #tpu.memory_space<vmem>>, vector<1x1x128x128xbf16>
    %20 = vector.shape_cast %19 : vector<1x1x128x128xbf16> to vector<128x128xbf16>
    %cst_19 = arith.constant dense<0.000000e+00> : vector<384x128xf32>
    %21 = tpu.matmul %18, %20, %cst_19 {dimension_numbers = #tpu.dot_dimension_numbers<[1], [0], [0], [1], [0, 0, 1, 1], [], []>} : vector<384x128xbf16>, vector<128x128xbf16>, vector<384x128xf32> -> vector<384x128xf32>
    %22 = arith.addf %11, %21 : vector<384x128xf32>
    %c0_20 = arith.constant 0 : index
    %c2 = arith.constant 2 : index
    %c0_21 = arith.constant 0 : index
    %23 = vector.load %arg2[%c0_20, %c2, %c0_21] : memref<6x82x128xbf16, #tpu.memory_space<vmem>>, vector<6x64x128xbf16>
    %c2_22 = arith.constant 2 : index
    %c0_23 = arith.constant 0 : index
    %c0_24 = arith.constant 0 : index
    %24 = vector.load %arg4[%c2_22, %c0_23, %c0_24] : memref<9x64x1xbf16, #tpu.memory_space<vmem>>, vector<1x64x1xbf16>
    %25 = vector.shape_cast %24 : vector<1x64x1xbf16> to vector<64x1xbf16>
    %26 = vector.shape_cast %25 : vector<64x1xbf16> to vector<1x64x1xbf16>
    %27 = vector.broadcast %26 : vector<1x64x1xbf16> to vector<6x64x128xbf16>
    %28 = arith.mulf %23, %27 : vector<6x64x128xbf16>
    %29 = vector.shape_cast %28 : vector<6x64x128xbf16> to vector<384x128xbf16>
    %c0_25 = arith.constant 0 : index
    %c2_26 = arith.constant 2 : index
    %c0_27 = arith.constant 0 : index
    %c0_28 = arith.constant 0 : index
    %30 = vector.load %arg3[%c0_25, %c2_26, %c0_27, %c0_28] : memref<3x3x128x128xbf16, #tpu.memory_space<vmem>>, vector<1x1x128x128xbf16>
    %31 = vector.shape_cast %30 : vector<1x1x128x128xbf16> to vector<128x128xbf16>
    %cst_29 = arith.constant dense<0.000000e+00> : vector<384x128xf32>
    %32 = tpu.matmul %29, %31, %cst_29 {dimension_numbers = #tpu.dot_dimension_numbers<[1], [0], [0], [1], [0, 0, 1, 1], [], []>} : vector<384x128xbf16>, vector<128x128xbf16>, vector<384x128xf32> -> vector<384x128xf32>
    %33 = arith.addf %22, %32 : vector<384x128xf32>
    %c0_30 = arith.constant 0 : index
    %c8 = arith.constant 8 : index
    %c0_31 = arith.constant 0 : index
    %34 = vector.load %arg2[%c0_30, %c8, %c0_31] : memref<6x82x128xbf16, #tpu.memory_space<vmem>>, vector<6x64x128xbf16>
    %c3 = arith.constant 3 : index
    %c0_32 = arith.constant 0 : index
    %c0_33 = arith.constant 0 : index
    %35 = vector.load %arg4[%c3, %c0_32, %c0_33] : memref<9x64x1xbf16, #tpu.memory_space<vmem>>, vector<1x64x1xbf16>
    %36 = vector.shape_cast %35 : vector<1x64x1xbf16> to vector<64x1xbf16>
    %37 = vector.shape_cast %36 : vector<64x1xbf16> to vector<1x64x1xbf16>
    %38 = vector.broadcast %37 : vector<1x64x1xbf16> to vector<6x64x128xbf16>
    %39 = arith.mulf %34, %38 : vector<6x64x128xbf16>
    %40 = vector.shape_cast %39 : vector<6x64x128xbf16> to vector<384x128xbf16>
    %c1_34 = arith.constant 1 : index
    %c0_35 = arith.constant 0 : index
    %c0_36 = arith.constant 0 : index
    %c0_37 = arith.constant 0 : index
    %41 = vector.load %arg3[%c1_34, %c0_35, %c0_36, %c0_37] : memref<3x3x128x128xbf16, #tpu.memory_space<vmem>>, vector<1x1x128x128xbf16>
    %42 = vector.shape_cast %41 : vector<1x1x128x128xbf16> to vector<128x128xbf16>
    %cst_38 = arith.constant dense<0.000000e+00> : vector<384x128xf32>
    %43 = tpu.matmul %40, %42, %cst_38 {dimension_numbers = #tpu.dot_dimension_numbers<[1], [0], [0], [1], [0, 0, 1, 1], [], []>} : vector<384x128xbf16>, vector<128x128xbf16>, vector<384x128xf32> -> vector<384x128xf32>
    %44 = arith.addf %33, %43 : vector<384x128xf32>
    %c0_39 = arith.constant 0 : index
    %c9 = arith.constant 9 : index
    %c0_40 = arith.constant 0 : index
    %45 = vector.load %arg2[%c0_39, %c9, %c0_40] : memref<6x82x128xbf16, #tpu.memory_space<vmem>>, vector<6x64x128xbf16>
    %c4 = arith.constant 4 : index
    %c0_41 = arith.constant 0 : index
    %c0_42 = arith.constant 0 : index
    %46 = vector.load %arg4[%c4, %c0_41, %c0_42] : memref<9x64x1xbf16, #tpu.memory_space<vmem>>, vector<1x64x1xbf16>
    %47 = vector.shape_cast %46 : vector<1x64x1xbf16> to vector<64x1xbf16>
    %48 = vector.shape_cast %47 : vector<64x1xbf16> to vector<1x64x1xbf16>
    %49 = vector.broadcast %48 : vector<1x64x1xbf16> to vector<6x64x128xbf16>
    %50 = arith.mulf %45, %49 : vector<6x64x128xbf16>
    %51 = vector.shape_cast %50 : vector<6x64x128xbf16> to vector<384x128xbf16>
    %c1_43 = arith.constant 1 : index
    %c1_44 = arith.constant 1 : index
    %c0_45 = arith.constant 0 : index
    %c0_46 = arith.constant 0 : index
    %52 = vector.load %arg3[%c1_43, %c1_44, %c0_45, %c0_46] : memref<3x3x128x128xbf16, #tpu.memory_space<vmem>>, vector<1x1x128x128xbf16>
    %53 = vector.shape_cast %52 : vector<1x1x128x128xbf16> to vector<128x128xbf16>
    %cst_47 = arith.constant dense<0.000000e+00> : vector<384x128xf32>
    %54 = tpu.matmul %51, %53, %cst_47 {dimension_numbers = #tpu.dot_dimension_numbers<[1], [0], [0], [1], [0, 0, 1, 1], [], []>} : vector<384x128xbf16>, vector<128x128xbf16>, vector<384x128xf32> -> vector<384x128xf32>
    %55 = arith.addf %44, %54 : vector<384x128xf32>
    %c0_48 = arith.constant 0 : index
    %c10 = arith.constant 10 : index
    %c0_49 = arith.constant 0 : index
    %56 = vector.load %arg2[%c0_48, %c10, %c0_49] : memref<6x82x128xbf16, #tpu.memory_space<vmem>>, vector<6x64x128xbf16>
    %c5 = arith.constant 5 : index
    %c0_50 = arith.constant 0 : index
    %c0_51 = arith.constant 0 : index
    %57 = vector.load %arg4[%c5, %c0_50, %c0_51] : memref<9x64x1xbf16, #tpu.memory_space<vmem>>, vector<1x64x1xbf16>
    %58 = vector.shape_cast %57 : vector<1x64x1xbf16> to vector<64x1xbf16>
    %59 = vector.shape_cast %58 : vector<64x1xbf16> to vector<1x64x1xbf16>
    %60 = vector.broadcast %59 : vector<1x64x1xbf16> to vector<6x64x128xbf16>
    %61 = arith.mulf %56, %60 : vector<6x64x128xbf16>
    %62 = vector.shape_cast %61 : vector<6x64x128xbf16> to vector<384x128xbf16>
    %c1_52 = arith.constant 1 : index
    %c2_53 = arith.constant 2 : index
    %c0_54 = arith.constant 0 : index
    %c0_55 = arith.constant 0 : index
    %63 = vector.load %arg3[%c1_52, %c2_53, %c0_54, %c0_55] : memref<3x3x128x128xbf16, #tpu.memory_space<vmem>>, vector<1x1x128x128xbf16>
    %64 = vector.shape_cast %63 : vector<1x1x128x128xbf16> to vector<128x128xbf16>
    %cst_56 = arith.constant dense<0.000000e+00> : vector<384x128xf32>
    %65 = tpu.matmul %62, %64, %cst_56 {dimension_numbers = #tpu.dot_dimension_numbers<[1], [0], [0], [1], [0, 0, 1, 1], [], []>} : vector<384x128xbf16>, vector<128x128xbf16>, vector<384x128xf32> -> vector<384x128xf32>
    %66 = arith.addf %55, %65 : vector<384x128xf32>
    %c0_57 = arith.constant 0 : index
    %c16 = arith.constant 16 : index
    %c0_58 = arith.constant 0 : index
    %67 = vector.load %arg2[%c0_57, %c16, %c0_58] : memref<6x82x128xbf16, #tpu.memory_space<vmem>>, vector<6x64x128xbf16>
    %c6 = arith.constant 6 : index
    %c0_59 = arith.constant 0 : index
    %c0_60 = arith.constant 0 : index
    %68 = vector.load %arg4[%c6, %c0_59, %c0_60] : memref<9x64x1xbf16, #tpu.memory_space<vmem>>, vector<1x64x1xbf16>
    %69 = vector.shape_cast %68 : vector<1x64x1xbf16> to vector<64x1xbf16>
    %70 = vector.shape_cast %69 : vector<64x1xbf16> to vector<1x64x1xbf16>
    %71 = vector.broadcast %70 : vector<1x64x1xbf16> to vector<6x64x128xbf16>
    %72 = arith.mulf %67, %71 : vector<6x64x128xbf16>
    %73 = vector.shape_cast %72 : vector<6x64x128xbf16> to vector<384x128xbf16>
    %c2_61 = arith.constant 2 : index
    %c0_62 = arith.constant 0 : index
    %c0_63 = arith.constant 0 : index
    %c0_64 = arith.constant 0 : index
    %74 = vector.load %arg3[%c2_61, %c0_62, %c0_63, %c0_64] : memref<3x3x128x128xbf16, #tpu.memory_space<vmem>>, vector<1x1x128x128xbf16>
    %75 = vector.shape_cast %74 : vector<1x1x128x128xbf16> to vector<128x128xbf16>
    %cst_65 = arith.constant dense<0.000000e+00> : vector<384x128xf32>
    %76 = tpu.matmul %73, %75, %cst_65 {dimension_numbers = #tpu.dot_dimension_numbers<[1], [0], [0], [1], [0, 0, 1, 1], [], []>} : vector<384x128xbf16>, vector<128x128xbf16>, vector<384x128xf32> -> vector<384x128xf32>
    %77 = arith.addf %66, %76 : vector<384x128xf32>
    %c0_66 = arith.constant 0 : index
    %c17 = arith.constant 17 : index
    %c0_67 = arith.constant 0 : index
    %78 = vector.load %arg2[%c0_66, %c17, %c0_67] : memref<6x82x128xbf16, #tpu.memory_space<vmem>>, vector<6x64x128xbf16>
    %c7 = arith.constant 7 : index
    %c0_68 = arith.constant 0 : index
    %c0_69 = arith.constant 0 : index
    %79 = vector.load %arg4[%c7, %c0_68, %c0_69] : memref<9x64x1xbf16, #tpu.memory_space<vmem>>, vector<1x64x1xbf16>
    %80 = vector.shape_cast %79 : vector<1x64x1xbf16> to vector<64x1xbf16>
    %81 = vector.shape_cast %80 : vector<64x1xbf16> to vector<1x64x1xbf16>
    %82 = vector.broadcast %81 : vector<1x64x1xbf16> to vector<6x64x128xbf16>
    %83 = arith.mulf %78, %82 : vector<6x64x128xbf16>
    %84 = vector.shape_cast %83 : vector<6x64x128xbf16> to vector<384x128xbf16>
    %c2_70 = arith.constant 2 : index
    %c1_71 = arith.constant 1 : index
    %c0_72 = arith.constant 0 : index
    %c0_73 = arith.constant 0 : index
    %85 = vector.load %arg3[%c2_70, %c1_71, %c0_72, %c0_73] : memref<3x3x128x128xbf16, #tpu.memory_space<vmem>>, vector<1x1x128x128xbf16>
    %86 = vector.shape_cast %85 : vector<1x1x128x128xbf16> to vector<128x128xbf16>
    %cst_74 = arith.constant dense<0.000000e+00> : vector<384x128xf32>
    %87 = tpu.matmul %84, %86, %cst_74 {dimension_numbers = #tpu.dot_dimension_numbers<[1], [0], [0], [1], [0, 0, 1, 1], [], []>} : vector<384x128xbf16>, vector<128x128xbf16>, vector<384x128xf32> -> vector<384x128xf32>
    %88 = arith.addf %77, %87 : vector<384x128xf32>
    %c0_75 = arith.constant 0 : index
    %c18 = arith.constant 18 : index
    %c0_76 = arith.constant 0 : index
    %89 = vector.load %arg2[%c0_75, %c18, %c0_76] : memref<6x82x128xbf16, #tpu.memory_space<vmem>>, vector<6x64x128xbf16>
    %c8_77 = arith.constant 8 : index
    %c0_78 = arith.constant 0 : index
    %c0_79 = arith.constant 0 : index
    %90 = vector.load %arg4[%c8_77, %c0_78, %c0_79] : memref<9x64x1xbf16, #tpu.memory_space<vmem>>, vector<1x64x1xbf16>
    %91 = vector.shape_cast %90 : vector<1x64x1xbf16> to vector<64x1xbf16>
    %92 = vector.shape_cast %91 : vector<64x1xbf16> to vector<1x64x1xbf16>
    %93 = vector.broadcast %92 : vector<1x64x1xbf16> to vector<6x64x128xbf16>
    %94 = arith.mulf %89, %93 : vector<6x64x128xbf16>
    %95 = vector.shape_cast %94 : vector<6x64x128xbf16> to vector<384x128xbf16>
    %c2_80 = arith.constant 2 : index
    %c2_81 = arith.constant 2 : index
    %c0_82 = arith.constant 0 : index
    %c0_83 = arith.constant 0 : index
    %96 = vector.load %arg3[%c2_80, %c2_81, %c0_82, %c0_83] : memref<3x3x128x128xbf16, #tpu.memory_space<vmem>>, vector<1x1x128x128xbf16>
    %97 = vector.shape_cast %96 : vector<1x1x128x128xbf16> to vector<128x128xbf16>
    %cst_84 = arith.constant dense<0.000000e+00> : vector<384x128xf32>
    %98 = tpu.matmul %95, %97, %cst_84 {dimension_numbers = #tpu.dot_dimension_numbers<[1], [0], [0], [1], [0, 0, 1, 1], [], []>} : vector<384x128xbf16>, vector<128x128xbf16>, vector<384x128xf32> -> vector<384x128xf32>
    %99 = arith.addf %88, %98 : vector<384x128xf32>
    %c0_85 = arith.constant 0 : index
    %c0_86 = arith.constant 0 : index
    %100 = vector.load %arg5[%c0_85, %c0_86] : memref<1x128xf32, #tpu.memory_space<vmem>>, vector<1x128xf32>
    %101 = vector.broadcast %100 : vector<1x128xf32> to vector<384x128xf32>
    %102 = arith.addf %99, %101 : vector<384x128xf32>
    %103 = arith.truncf %102 : vector<384x128xf32> to vector<384x128xbf16>
    %c0_87 = arith.constant 0 : index
    %c0_88 = arith.constant 0 : index
    %104 = vector.load %arg6[%c0_87, %c0_88] : memref<384x128xbf16, #tpu.memory_space<vmem>>, vector<384x128xbf16>
    tpu.vector_store %arg6[%c0_87, %c0_88], %103 {strides = array<i32>} : memref<384x128xbf16, #tpu.memory_space<vmem>>, vector<384x128xbf16>,
    return
  }
  func.func @transform_0(%arg0: i32, %arg1: i32) -> (i32, i32, i32) {
    %c0_i32 = arith.constant 0 : i32
    %c0_i32_0 = arith.constant 0 : i32
    %c0_i32_1 = arith.constant 0 : i32
    return %arg0, %c0_i32, %c0_i32_0 : i32, i32, i32
  }
  func.func @transform_1(%arg0: i32, %arg1: i32) -> (i32, i32, i32, i32) {
    %c0_i32 = arith.constant 0 : i32
    %c0_i32_0 = arith.constant 0 : i32
    %c0_i32_1 = arith.constant 0 : i32
    %c0_i32_2 = arith.constant 0 : i32
    return %c0_i32, %c0_i32_0, %c0_i32_1, %arg1 : i32, i32, i32, i32
  }
  func.func @transform_2(%arg0: i32, %arg1: i32) -> (i32, i32, i32) {
    %c0_i32 = arith.constant 0 : i32
    %c0_i32_0 = arith.constant 0 : i32
    %c0_i32_1 = arith.constant 0 : i32
    %c0_i32_2 = arith.constant 0 : i32
    return %c0_i32, %c0_i32_0, %c0_i32_1 : i32, i32, i32
  }
  func.func @transform_3(%arg0: i32, %arg1: i32) -> (i32, i32) {
    %c0_i32 = arith.constant 0 : i32
    %c0_i32_0 = arith.constant 0 : i32
    return %c0_i32, %arg1 : i32, i32
  }
  func.func @transform_4(%arg0: i32, %arg1: i32) -> (i32, i32) {
    %c0_i32 = arith.constant 0 : i32
    return %arg0, %arg1 : i32, i32
  }
}

module attributes {stable_mosaic.version = 11 : i64} {
  func.func @_mm_kernel(%arg0: i32, %arg1: i32, %arg2: i32, %arg3: memref<96x128xbf16, #tpu.memory_space<vmem>>, %arg4: memref<128x128xbf16, #tpu.memory_space<vmem>>, %arg5: memref<1x128xf32, #tpu.memory_space<vmem>>, %arg6: memref<96x128xbf16, #tpu.memory_space<vmem>>, %arg7: memref<96x128xf32, #tpu.memory_space<vmem>>) attributes {dimension_semantics = [#tpu.dimension_semantics<parallel>, #tpu.dimension_semantics<parallel>, #tpu.dimension_semantics<arbitrary>], iteration_bounds = array<i64: 1, 1, 1>, scalar_prefetch = 0 : i64, scratch_operands = 1 : i64, tpu.core_type = #tpu.core_type<tc>, window_params = [{transform_indices = @transform_0, window_bounds = array<i64: 96, 128>}, {transform_indices = @transform_1, window_bounds = array<i64: 128, 128>}, {transform_indices = @transform_2, window_bounds = array<i64: 1, 128>}, {transform_indices = @transform_3, window_bounds = array<i64: 96, 128>}]} {
    %c0_i32 = arith.constant 0 : i32
    %0 = arith.cmpi eq, %arg2, %c0_i32 : i32
    %1 = arith.extui %0 : i1 to i32
    %c0_i32_0 = arith.constant 0 : i32
    %2 = arith.cmpi ne, %1, %c0_i32_0 : i32
    scf.if %2 {
      %cst_10 = arith.constant 0.000000e+00 : f32
      %12 = vector.broadcast %cst_10 : f32 to vector<96x128xf32>
      %c0_11 = arith.constant 0 : index
      %c0_12 = arith.constant 0 : index
      %13 = vector.load %arg7[%c0_11, %c0_12] : memref<96x128xf32, #tpu.memory_space<vmem>>, vector<96x128xf32>
      tpu.vector_store %arg7[%c0_11, %c0_12], %12 {strides = array<i32>} : memref<96x128xf32, #tpu.memory_space<vmem>>, vector<96x128xf32>,
    } else {
    }
    %c0 = arith.constant 0 : index
    %c0_1 = arith.constant 0 : index
    %3 = vector.load %arg7[%c0, %c0_1] : memref<96x128xf32, #tpu.memory_space<vmem>>, vector<96x128xf32>
    %c0_2 = arith.constant 0 : index
    %c0_3 = arith.constant 0 : index
    %4 = vector.load %arg3[%c0_2, %c0_3] : memref<96x128xbf16, #tpu.memory_space<vmem>>, vector<96x128xbf16>
    %c0_4 = arith.constant 0 : index
    %c0_5 = arith.constant 0 : index
    %5 = vector.load %arg4[%c0_4, %c0_5] : memref<128x128xbf16, #tpu.memory_space<vmem>>, vector<128x128xbf16>
    %cst = arith.constant dense<0.000000e+00> : vector<96x128xf32>
    %6 = tpu.matmul %4, %5, %cst {dimension_numbers = #tpu.dot_dimension_numbers<[1], [0], [0], [1], [0, 0, 1, 1], [], []>} : vector<96x128xbf16>, vector<128x128xbf16>, vector<96x128xf32> -> vector<96x128xf32>
    %7 = arith.addf %3, %6 : vector<96x128xf32>
    %c0_6 = arith.constant 0 : index
    %c0_7 = arith.constant 0 : index
    %8 = vector.load %arg7[%c0_6, %c0_7] : memref<96x128xf32, #tpu.memory_space<vmem>>, vector<96x128xf32>
    tpu.vector_store %arg7[%c0_6, %c0_7], %7 {strides = array<i32>} : memref<96x128xf32, #tpu.memory_space<vmem>>, vector<96x128xf32>,
    %c0_i32_8 = arith.constant 0 : i32
    %9 = arith.cmpi eq, %arg2, %c0_i32_8 : i32
    %10 = arith.extui %9 : i1 to i32
    %c0_i32_9 = arith.constant 0 : i32
    %11 = arith.cmpi ne, %10, %c0_i32_9 : i32
    scf.if %11 {
      %c0_10 = arith.constant 0 : index
      %c0_11 = arith.constant 0 : index
      %12 = vector.load %arg7[%c0_10, %c0_11] : memref<96x128xf32, #tpu.memory_space<vmem>>, vector<96x128xf32>
      %c0_12 = arith.constant 0 : index
      %c0_13 = arith.constant 0 : index
      %13 = vector.load %arg5[%c0_12, %c0_13] : memref<1x128xf32, #tpu.memory_space<vmem>>, vector<1x128xf32>
      %14 = vector.broadcast %13 : vector<1x128xf32> to vector<96x128xf32>
      %15 = arith.addf %12, %14 : vector<96x128xf32>
      %cst_14 = arith.constant 0.000000e+00 : f32
      %16 = vector.broadcast %cst_14 : f32 to vector<96x128xf32>
      %17 = arith.maximumf %15, %16 : vector<96x128xf32>
      %18 = arith.truncf %17 : vector<96x128xf32> to vector<96x128xbf16>
      %c0_15 = arith.constant 0 : index
      %c0_16 = arith.constant 0 : index
      %19 = vector.load %arg6[%c0_15, %c0_16] : memref<96x128xbf16, #tpu.memory_space<vmem>>, vector<96x128xbf16>
      tpu.vector_store %arg6[%c0_15, %c0_16], %18 {strides = array<i32>} : memref<96x128xbf16, #tpu.memory_space<vmem>>, vector<96x128xbf16>,
    } else {
    }
    return
  }
  func.func @transform_0(%arg0: i32, %arg1: i32, %arg2: i32) -> (i32, i32) {
    %c0_i32 = arith.constant 0 : i32
    return %arg0, %arg2 : i32, i32
  }
  func.func @transform_1(%arg0: i32, %arg1: i32, %arg2: i32) -> (i32, i32) {
    %c0_i32 = arith.constant 0 : i32
    return %arg2, %arg1 : i32, i32
  }
  func.func @transform_2(%arg0: i32, %arg1: i32, %arg2: i32) -> (i32, i32) {
    %c0_i32 = arith.constant 0 : i32
    %c0_i32_0 = arith.constant 0 : i32
    return %c0_i32, %arg1 : i32, i32
  }
  func.func @transform_3(%arg0: i32, %arg1: i32, %arg2: i32) -> (i32, i32) {
    %c0_i32 = arith.constant 0 : i32
    return %arg0, %arg1 : i32, i32
  }
}

module attributes {stable_mosaic.version = 11 : i64} {
  func.func @_conv3x3_kernel(%arg0: i32, %arg1: i32, %arg2: memref<6x26x128xbf16, #tpu.memory_space<vmem>>, %arg3: memref<3x3x128x128xbf16, #tpu.memory_space<vmem>>, %arg4: memref<9x16x1xbf16, #tpu.memory_space<vmem>>, %arg5: memref<1x128xf32, #tpu.memory_space<vmem>>, %arg6: memref<96x128xbf16, #tpu.memory_space<vmem>>) attributes {dimension_semantics = [#tpu.dimension_semantics<parallel>, #tpu.dimension_semantics<parallel>], iteration_bounds = array<i64: 1, 1>, scalar_prefetch = 0 : i64, scratch_operands = 0 : i64, tpu.core_type = #tpu.core_type<tc>, window_params = [{transform_indices = @transform_0, window_bounds = array<i64: 6, 26, 128>}, {transform_indices = @transform_1, window_bounds = array<i64: 3, 3, 128, 128>}, {pipeline_mode = #tpu.pipeline_mode<synchronous>, transform_indices = @transform_2, window_bounds = array<i64: 9, 16, 1>}, {transform_indices = @transform_3, window_bounds = array<i64: 1, 128>}, {transform_indices = @transform_4, window_bounds = array<i64: 96, 128>}]} {
    %cst = arith.constant 0.000000e+00 : f32
    %0 = vector.broadcast %cst : f32 to vector<96x128xf32>
    %c0 = arith.constant 0 : index
    %c0_0 = arith.constant 0 : index
    %c0_1 = arith.constant 0 : index
    %1 = vector.load %arg2[%c0, %c0_0, %c0_1] : memref<6x26x128xbf16, #tpu.memory_space<vmem>>, vector<6x16x128xbf16>
    %c0_2 = arith.constant 0 : index
    %c0_3 = arith.constant 0 : index
    %c0_4 = arith.constant 0 : index
    %2 = vector.load %arg4[%c0_2, %c0_3, %c0_4] : memref<9x16x1xbf16, #tpu.memory_space<vmem>>, vector<1x16x1xbf16>
    %3 = vector.shape_cast %2 : vector<1x16x1xbf16> to vector<16x1xbf16>
    %4 = vector.shape_cast %3 : vector<16x1xbf16> to vector<1x16x1xbf16>
    %5 = vector.broadcast %4 : vector<1x16x1xbf16> to vector<6x16x128xbf16>
    %6 = arith.mulf %1, %5 : vector<6x16x128xbf16>
    %7 = vector.shape_cast %6 : vector<6x16x128xbf16> to vector<96x128xbf16>
    %c0_5 = arith.constant 0 : index
    %c0_6 = arith.constant 0 : index
    %c0_7 = arith.constant 0 : index
    %c0_8 = arith.constant 0 : index
    %8 = vector.load %arg3[%c0_5, %c0_6, %c0_7, %c0_8] : memref<3x3x128x128xbf16, #tpu.memory_space<vmem>>, vector<1x1x128x128xbf16>
    %9 = vector.shape_cast %8 : vector<1x1x128x128xbf16> to vector<128x128xbf16>
    %cst_9 = arith.constant dense<0.000000e+00> : vector<96x128xf32>
    %10 = tpu.matmul %7, %9, %cst_9 {dimension_numbers = #tpu.dot_dimension_numbers<[1], [0], [0], [1], [0, 0, 1, 1], [], []>} : vector<96x128xbf16>, vector<128x128xbf16>, vector<96x128xf32> -> vector<96x128xf32>
    %11 = arith.addf %0, %10 : vector<96x128xf32>
    %c0_10 = arith.constant 0 : index
    %c1 = arith.constant 1 : index
    %c0_11 = arith.constant 0 : index
    %12 = vector.load %arg2[%c0_10, %c1, %c0_11] : memref<6x26x128xbf16, #tpu.memory_space<vmem>>, vector<6x16x128xbf16>
    %c1_12 = arith.constant 1 : index
    %c0_13 = arith.constant 0 : index
    %c0_14 = arith.constant 0 : index
    %13 = vector.load %arg4[%c1_12, %c0_13, %c0_14] : memref<9x16x1xbf16, #tpu.memory_space<vmem>>, vector<1x16x1xbf16>
    %14 = vector.shape_cast %13 : vector<1x16x1xbf16> to vector<16x1xbf16>
    %15 = vector.shape_cast %14 : vector<16x1xbf16> to vector<1x16x1xbf16>
    %16 = vector.broadcast %15 : vector<1x16x1xbf16> to vector<6x16x128xbf16>
    %17 = arith.mulf %12, %16 : vector<6x16x128xbf16>
    %18 = vector.shape_cast %17 : vector<6x16x128xbf16> to vector<96x128xbf16>
    %c0_15 = arith.constant 0 : index
    %c1_16 = arith.constant 1 : index
    %c0_17 = arith.constant 0 : index
    %c0_18 = arith.constant 0 : index
    %19 = vector.load %arg3[%c0_15, %c1_16, %c0_17, %c0_18] : memref<3x3x128x128xbf16, #tpu.memory_space<vmem>>, vector<1x1x128x128xbf16>
    %20 = vector.shape_cast %19 : vector<1x1x128x128xbf16> to vector<128x128xbf16>
    %cst_19 = arith.constant dense<0.000000e+00> : vector<96x128xf32>
    %21 = tpu.matmul %18, %20, %cst_19 {dimension_numbers = #tpu.dot_dimension_numbers<[1], [0], [0], [1], [0, 0, 1, 1], [], []>} : vector<96x128xbf16>, vector<128x128xbf16>, vector<96x128xf32> -> vector<96x128xf32>
    %22 = arith.addf %11, %21 : vector<96x128xf32>
    %c0_20 = arith.constant 0 : index
    %c2 = arith.constant 2 : index
    %c0_21 = arith.constant 0 : index
    %23 = vector.load %arg2[%c0_20, %c2, %c0_21] : memref<6x26x128xbf16, #tpu.memory_space<vmem>>, vector<6x16x128xbf16>
    %c2_22 = arith.constant 2 : index
    %c0_23 = arith.constant 0 : index
    %c0_24 = arith.constant 0 : index
    %24 = vector.load %arg4[%c2_22, %c0_23, %c0_24] : memref<9x16x1xbf16, #tpu.memory_space<vmem>>, vector<1x16x1xbf16>
    %25 = vector.shape_cast %24 : vector<1x16x1xbf16> to vector<16x1xbf16>
    %26 = vector.shape_cast %25 : vector<16x1xbf16> to vector<1x16x1xbf16>
    %27 = vector.broadcast %26 : vector<1x16x1xbf16> to vector<6x16x128xbf16>
    %28 = arith.mulf %23, %27 : vector<6x16x128xbf16>
    %29 = vector.shape_cast %28 : vector<6x16x128xbf16> to vector<96x128xbf16>
    %c0_25 = arith.constant 0 : index
    %c2_26 = arith.constant 2 : index
    %c0_27 = arith.constant 0 : index
    %c0_28 = arith.constant 0 : index
    %30 = vector.load %arg3[%c0_25, %c2_26, %c0_27, %c0_28] : memref<3x3x128x128xbf16, #tpu.memory_space<vmem>>, vector<1x1x128x128xbf16>
    %31 = vector.shape_cast %30 : vector<1x1x128x128xbf16> to vector<128x128xbf16>
    %cst_29 = arith.constant dense<0.000000e+00> : vector<96x128xf32>
    %32 = tpu.matmul %29, %31, %cst_29 {dimension_numbers = #tpu.dot_dimension_numbers<[1], [0], [0], [1], [0, 0, 1, 1], [], []>} : vector<96x128xbf16>, vector<128x128xbf16>, vector<96x128xf32> -> vector<96x128xf32>
    %33 = arith.addf %22, %32 : vector<96x128xf32>
    %c0_30 = arith.constant 0 : index
    %c4 = arith.constant 4 : index
    %c0_31 = arith.constant 0 : index
    %34 = vector.load %arg2[%c0_30, %c4, %c0_31] : memref<6x26x128xbf16, #tpu.memory_space<vmem>>, vector<6x16x128xbf16>
    %c3 = arith.constant 3 : index
    %c0_32 = arith.constant 0 : index
    %c0_33 = arith.constant 0 : index
    %35 = vector.load %arg4[%c3, %c0_32, %c0_33] : memref<9x16x1xbf16, #tpu.memory_space<vmem>>, vector<1x16x1xbf16>
    %36 = vector.shape_cast %35 : vector<1x16x1xbf16> to vector<16x1xbf16>
    %37 = vector.shape_cast %36 : vector<16x1xbf16> to vector<1x16x1xbf16>
    %38 = vector.broadcast %37 : vector<1x16x1xbf16> to vector<6x16x128xbf16>
    %39 = arith.mulf %34, %38 : vector<6x16x128xbf16>
    %40 = vector.shape_cast %39 : vector<6x16x128xbf16> to vector<96x128xbf16>
    %c1_34 = arith.constant 1 : index
    %c0_35 = arith.constant 0 : index
    %c0_36 = arith.constant 0 : index
    %c0_37 = arith.constant 0 : index
    %41 = vector.load %arg3[%c1_34, %c0_35, %c0_36, %c0_37] : memref<3x3x128x128xbf16, #tpu.memory_space<vmem>>, vector<1x1x128x128xbf16>
    %42 = vector.shape_cast %41 : vector<1x1x128x128xbf16> to vector<128x128xbf16>
    %cst_38 = arith.constant dense<0.000000e+00> : vector<96x128xf32>
    %43 = tpu.matmul %40, %42, %cst_38 {dimension_numbers = #tpu.dot_dimension_numbers<[1], [0], [0], [1], [0, 0, 1, 1], [], []>} : vector<96x128xbf16>, vector<128x128xbf16>, vector<96x128xf32> -> vector<96x128xf32>
    %44 = arith.addf %33, %43 : vector<96x128xf32>
    %c0_39 = arith.constant 0 : index
    %c5 = arith.constant 5 : index
    %c0_40 = arith.constant 0 : index
    %45 = vector.load %arg2[%c0_39, %c5, %c0_40] : memref<6x26x128xbf16, #tpu.memory_space<vmem>>, vector<6x16x128xbf16>
    %c4_41 = arith.constant 4 : index
    %c0_42 = arith.constant 0 : index
    %c0_43 = arith.constant 0 : index
    %46 = vector.load %arg4[%c4_41, %c0_42, %c0_43] : memref<9x16x1xbf16, #tpu.memory_space<vmem>>, vector<1x16x1xbf16>
    %47 = vector.shape_cast %46 : vector<1x16x1xbf16> to vector<16x1xbf16>
    %48 = vector.shape_cast %47 : vector<16x1xbf16> to vector<1x16x1xbf16>
    %49 = vector.broadcast %48 : vector<1x16x1xbf16> to vector<6x16x128xbf16>
    %50 = arith.mulf %45, %49 : vector<6x16x128xbf16>
    %51 = vector.shape_cast %50 : vector<6x16x128xbf16> to vector<96x128xbf16>
    %c1_44 = arith.constant 1 : index
    %c1_45 = arith.constant 1 : index
    %c0_46 = arith.constant 0 : index
    %c0_47 = arith.constant 0 : index
    %52 = vector.load %arg3[%c1_44, %c1_45, %c0_46, %c0_47] : memref<3x3x128x128xbf16, #tpu.memory_space<vmem>>, vector<1x1x128x128xbf16>
    %53 = vector.shape_cast %52 : vector<1x1x128x128xbf16> to vector<128x128xbf16>
    %cst_48 = arith.constant dense<0.000000e+00> : vector<96x128xf32>
    %54 = tpu.matmul %51, %53, %cst_48 {dimension_numbers = #tpu.dot_dimension_numbers<[1], [0], [0], [1], [0, 0, 1, 1], [], []>} : vector<96x128xbf16>, vector<128x128xbf16>, vector<96x128xf32> -> vector<96x128xf32>
    %55 = arith.addf %44, %54 : vector<96x128xf32>
    %c0_49 = arith.constant 0 : index
    %c6 = arith.constant 6 : index
    %c0_50 = arith.constant 0 : index
    %56 = vector.load %arg2[%c0_49, %c6, %c0_50] : memref<6x26x128xbf16, #tpu.memory_space<vmem>>, vector<6x16x128xbf16>
    %c5_51 = arith.constant 5 : index
    %c0_52 = arith.constant 0 : index
    %c0_53 = arith.constant 0 : index
    %57 = vector.load %arg4[%c5_51, %c0_52, %c0_53] : memref<9x16x1xbf16, #tpu.memory_space<vmem>>, vector<1x16x1xbf16>
    %58 = vector.shape_cast %57 : vector<1x16x1xbf16> to vector<16x1xbf16>
    %59 = vector.shape_cast %58 : vector<16x1xbf16> to vector<1x16x1xbf16>
    %60 = vector.broadcast %59 : vector<1x16x1xbf16> to vector<6x16x128xbf16>
    %61 = arith.mulf %56, %60 : vector<6x16x128xbf16>
    %62 = vector.shape_cast %61 : vector<6x16x128xbf16> to vector<96x128xbf16>
    %c1_54 = arith.constant 1 : index
    %c2_55 = arith.constant 2 : index
    %c0_56 = arith.constant 0 : index
    %c0_57 = arith.constant 0 : index
    %63 = vector.load %arg3[%c1_54, %c2_55, %c0_56, %c0_57] : memref<3x3x128x128xbf16, #tpu.memory_space<vmem>>, vector<1x1x128x128xbf16>
    %64 = vector.shape_cast %63 : vector<1x1x128x128xbf16> to vector<128x128xbf16>
    %cst_58 = arith.constant dense<0.000000e+00> : vector<96x128xf32>
    %65 = tpu.matmul %62, %64, %cst_58 {dimension_numbers = #tpu.dot_dimension_numbers<[1], [0], [0], [1], [0, 0, 1, 1], [], []>} : vector<96x128xbf16>, vector<128x128xbf16>, vector<96x128xf32> -> vector<96x128xf32>
    %66 = arith.addf %55, %65 : vector<96x128xf32>
    %c0_59 = arith.constant 0 : index
    %c8 = arith.constant 8 : index
    %c0_60 = arith.constant 0 : index
    %67 = vector.load %arg2[%c0_59, %c8, %c0_60] : memref<6x26x128xbf16, #tpu.memory_space<vmem>>, vector<6x16x128xbf16>
    %c6_61 = arith.constant 6 : index
    %c0_62 = arith.constant 0 : index
    %c0_63 = arith.constant 0 : index
    %68 = vector.load %arg4[%c6_61, %c0_62, %c0_63] : memref<9x16x1xbf16, #tpu.memory_space<vmem>>, vector<1x16x1xbf16>
    %69 = vector.shape_cast %68 : vector<1x16x1xbf16> to vector<16x1xbf16>
    %70 = vector.shape_cast %69 : vector<16x1xbf16> to vector<1x16x1xbf16>
    %71 = vector.broadcast %70 : vector<1x16x1xbf16> to vector<6x16x128xbf16>
    %72 = arith.mulf %67, %71 : vector<6x16x128xbf16>
    %73 = vector.shape_cast %72 : vector<6x16x128xbf16> to vector<96x128xbf16>
    %c2_64 = arith.constant 2 : index
    %c0_65 = arith.constant 0 : index
    %c0_66 = arith.constant 0 : index
    %c0_67 = arith.constant 0 : index
    %74 = vector.load %arg3[%c2_64, %c0_65, %c0_66, %c0_67] : memref<3x3x128x128xbf16, #tpu.memory_space<vmem>>, vector<1x1x128x128xbf16>
    %75 = vector.shape_cast %74 : vector<1x1x128x128xbf16> to vector<128x128xbf16>
    %cst_68 = arith.constant dense<0.000000e+00> : vector<96x128xf32>
    %76 = tpu.matmul %73, %75, %cst_68 {dimension_numbers = #tpu.dot_dimension_numbers<[1], [0], [0], [1], [0, 0, 1, 1], [], []>} : vector<96x128xbf16>, vector<128x128xbf16>, vector<96x128xf32> -> vector<96x128xf32>
    %77 = arith.addf %66, %76 : vector<96x128xf32>
    %c0_69 = arith.constant 0 : index
    %c9 = arith.constant 9 : index
    %c0_70 = arith.constant 0 : index
    %78 = vector.load %arg2[%c0_69, %c9, %c0_70] : memref<6x26x128xbf16, #tpu.memory_space<vmem>>, vector<6x16x128xbf16>
    %c7 = arith.constant 7 : index
    %c0_71 = arith.constant 0 : index
    %c0_72 = arith.constant 0 : index
    %79 = vector.load %arg4[%c7, %c0_71, %c0_72] : memref<9x16x1xbf16, #tpu.memory_space<vmem>>, vector<1x16x1xbf16>
    %80 = vector.shape_cast %79 : vector<1x16x1xbf16> to vector<16x1xbf16>
    %81 = vector.shape_cast %80 : vector<16x1xbf16> to vector<1x16x1xbf16>
    %82 = vector.broadcast %81 : vector<1x16x1xbf16> to vector<6x16x128xbf16>
    %83 = arith.mulf %78, %82 : vector<6x16x128xbf16>
    %84 = vector.shape_cast %83 : vector<6x16x128xbf16> to vector<96x128xbf16>
    %c2_73 = arith.constant 2 : index
    %c1_74 = arith.constant 1 : index
    %c0_75 = arith.constant 0 : index
    %c0_76 = arith.constant 0 : index
    %85 = vector.load %arg3[%c2_73, %c1_74, %c0_75, %c0_76] : memref<3x3x128x128xbf16, #tpu.memory_space<vmem>>, vector<1x1x128x128xbf16>
    %86 = vector.shape_cast %85 : vector<1x1x128x128xbf16> to vector<128x128xbf16>
    %cst_77 = arith.constant dense<0.000000e+00> : vector<96x128xf32>
    %87 = tpu.matmul %84, %86, %cst_77 {dimension_numbers = #tpu.dot_dimension_numbers<[1], [0], [0], [1], [0, 0, 1, 1], [], []>} : vector<96x128xbf16>, vector<128x128xbf16>, vector<96x128xf32> -> vector<96x128xf32>
    %88 = arith.addf %77, %87 : vector<96x128xf32>
    %c0_78 = arith.constant 0 : index
    %c10 = arith.constant 10 : index
    %c0_79 = arith.constant 0 : index
    %89 = vector.load %arg2[%c0_78, %c10, %c0_79] : memref<6x26x128xbf16, #tpu.memory_space<vmem>>, vector<6x16x128xbf16>
    %c8_80 = arith.constant 8 : index
    %c0_81 = arith.constant 0 : index
    %c0_82 = arith.constant 0 : index
    %90 = vector.load %arg4[%c8_80, %c0_81, %c0_82] : memref<9x16x1xbf16, #tpu.memory_space<vmem>>, vector<1x16x1xbf16>
    %91 = vector.shape_cast %90 : vector<1x16x1xbf16> to vector<16x1xbf16>
    %92 = vector.shape_cast %91 : vector<16x1xbf16> to vector<1x16x1xbf16>
    %93 = vector.broadcast %92 : vector<1x16x1xbf16> to vector<6x16x128xbf16>
    %94 = arith.mulf %89, %93 : vector<6x16x128xbf16>
    %95 = vector.shape_cast %94 : vector<6x16x128xbf16> to vector<96x128xbf16>
    %c2_83 = arith.constant 2 : index
    %c2_84 = arith.constant 2 : index
    %c0_85 = arith.constant 0 : index
    %c0_86 = arith.constant 0 : index
    %96 = vector.load %arg3[%c2_83, %c2_84, %c0_85, %c0_86] : memref<3x3x128x128xbf16, #tpu.memory_space<vmem>>, vector<1x1x128x128xbf16>
    %97 = vector.shape_cast %96 : vector<1x1x128x128xbf16> to vector<128x128xbf16>
    %cst_87 = arith.constant dense<0.000000e+00> : vector<96x128xf32>
    %98 = tpu.matmul %95, %97, %cst_87 {dimension_numbers = #tpu.dot_dimension_numbers<[1], [0], [0], [1], [0, 0, 1, 1], [], []>} : vector<96x128xbf16>, vector<128x128xbf16>, vector<96x128xf32> -> vector<96x128xf32>
    %99 = arith.addf %88, %98 : vector<96x128xf32>
    %c0_88 = arith.constant 0 : index
    %c0_89 = arith.constant 0 : index
    %100 = vector.load %arg5[%c0_88, %c0_89] : memref<1x128xf32, #tpu.memory_space<vmem>>, vector<1x128xf32>
    %101 = vector.broadcast %100 : vector<1x128xf32> to vector<96x128xf32>
    %102 = arith.addf %99, %101 : vector<96x128xf32>
    %cst_90 = arith.constant 0.000000e+00 : f32
    %103 = vector.broadcast %cst_90 : f32 to vector<96x128xf32>
    %104 = arith.maximumf %102, %103 : vector<96x128xf32>
    %105 = arith.truncf %104 : vector<96x128xf32> to vector<96x128xbf16>
    %c0_91 = arith.constant 0 : index
    %c0_92 = arith.constant 0 : index
    %106 = vector.load %arg6[%c0_91, %c0_92] : memref<96x128xbf16, #tpu.memory_space<vmem>>, vector<96x128xbf16>
    tpu.vector_store %arg6[%c0_91, %c0_92], %105 {strides = array<i32>} : memref<96x128xbf16, #tpu.memory_space<vmem>>, vector<96x128xbf16>,
    return
  }
  func.func @transform_0(%arg0: i32, %arg1: i32) -> (i32, i32, i32) {
    %c0_i32 = arith.constant 0 : i32
    %c0_i32_0 = arith.constant 0 : i32
    %c0_i32_1 = arith.constant 0 : i32
    return %arg0, %c0_i32, %c0_i32_0 : i32, i32, i32
  }
  func.func @transform_1(%arg0: i32, %arg1: i32) -> (i32, i32, i32, i32) {
    %c0_i32 = arith.constant 0 : i32
    %c0_i32_0 = arith.constant 0 : i32
    %c0_i32_1 = arith.constant 0 : i32
    %c0_i32_2 = arith.constant 0 : i32
    return %c0_i32, %c0_i32_0, %c0_i32_1, %arg1 : i32, i32, i32, i32
  }
  func.func @transform_2(%arg0: i32, %arg1: i32) -> (i32, i32, i32) {
    %c0_i32 = arith.constant 0 : i32
    %c0_i32_0 = arith.constant 0 : i32
    %c0_i32_1 = arith.constant 0 : i32
    %c0_i32_2 = arith.constant 0 : i32
    return %c0_i32, %c0_i32_0, %c0_i32_1 : i32, i32, i32
  }
  func.func @transform_3(%arg0: i32, %arg1: i32) -> (i32, i32) {
    %c0_i32 = arith.constant 0 : i32
    %c0_i32_0 = arith.constant 0 : i32
    return %c0_i32, %arg1 : i32, i32
  }
  func.func @transform_4(%arg0: i32, %arg1: i32) -> (i32, i32) {
    %c0_i32 = arith.constant 0 : i32
    return %arg0, %arg1 : i32, i32
  }
}

module attributes {stable_mosaic.version = 11 : i64} {
  func.func @_mm_kernel(%arg0: i32, %arg1: i32, %arg2: i32, %arg3: memref<96x128xbf16, #tpu.memory_space<vmem>>, %arg4: memref<128x256xbf16, #tpu.memory_space<vmem>>, %arg5: memref<1x256xf32, #tpu.memory_space<vmem>>, %arg6: memref<96x256xbf16, #tpu.memory_space<vmem>>, %arg7: memref<96x256xf32, #tpu.memory_space<vmem>>) attributes {dimension_semantics = [#tpu.dimension_semantics<parallel>, #tpu.dimension_semantics<parallel>, #tpu.dimension_semantics<arbitrary>], iteration_bounds = array<i64: 1, 1, 1>, scalar_prefetch = 0 : i64, scratch_operands = 1 : i64, tpu.core_type = #tpu.core_type<tc>, window_params = [{transform_indices = @transform_0, window_bounds = array<i64: 96, 128>}, {transform_indices = @transform_1, window_bounds = array<i64: 128, 256>}, {transform_indices = @transform_2, window_bounds = array<i64: 1, 256>}, {transform_indices = @transform_3, window_bounds = array<i64: 96, 256>}]} {
    %c0_i32 = arith.constant 0 : i32
    %0 = arith.cmpi eq, %arg2, %c0_i32 : i32
    %1 = arith.extui %0 : i1 to i32
    %c0_i32_0 = arith.constant 0 : i32
    %2 = arith.cmpi ne, %1, %c0_i32_0 : i32
    scf.if %2 {
      %cst_10 = arith.constant 0.000000e+00 : f32
      %12 = vector.broadcast %cst_10 : f32 to vector<96x256xf32>
      %c0_11 = arith.constant 0 : index
      %c0_12 = arith.constant 0 : index
      %13 = vector.load %arg7[%c0_11, %c0_12] : memref<96x256xf32, #tpu.memory_space<vmem>>, vector<96x256xf32>
      tpu.vector_store %arg7[%c0_11, %c0_12], %12 {strides = array<i32>} : memref<96x256xf32, #tpu.memory_space<vmem>>, vector<96x256xf32>,
    } else {
    }
    %c0 = arith.constant 0 : index
    %c0_1 = arith.constant 0 : index
    %3 = vector.load %arg7[%c0, %c0_1] : memref<96x256xf32, #tpu.memory_space<vmem>>, vector<96x256xf32>
    %c0_2 = arith.constant 0 : index
    %c0_3 = arith.constant 0 : index
    %4 = vector.load %arg3[%c0_2, %c0_3] : memref<96x128xbf16, #tpu.memory_space<vmem>>, vector<96x128xbf16>
    %c0_4 = arith.constant 0 : index
    %c0_5 = arith.constant 0 : index
    %5 = vector.load %arg4[%c0_4, %c0_5] : memref<128x256xbf16, #tpu.memory_space<vmem>>, vector<128x256xbf16>
    %cst = arith.constant dense<0.000000e+00> : vector<96x256xf32>
    %6 = tpu.matmul %4, %5, %cst {dimension_numbers = #tpu.dot_dimension_numbers<[1], [0], [0], [1], [0, 0, 1, 1], [], []>} : vector<96x128xbf16>, vector<128x256xbf16>, vector<96x256xf32> -> vector<96x256xf32>
    %7 = arith.addf %3, %6 : vector<96x256xf32>
    %c0_6 = arith.constant 0 : index
    %c0_7 = arith.constant 0 : index
    %8 = vector.load %arg7[%c0_6, %c0_7] : memref<96x256xf32, #tpu.memory_space<vmem>>, vector<96x256xf32>
    tpu.vector_store %arg7[%c0_6, %c0_7], %7 {strides = array<i32>} : memref<96x256xf32, #tpu.memory_space<vmem>>, vector<96x256xf32>,
    %c0_i32_8 = arith.constant 0 : i32
    %9 = arith.cmpi eq, %arg2, %c0_i32_8 : i32
    %10 = arith.extui %9 : i1 to i32
    %c0_i32_9 = arith.constant 0 : i32
    %11 = arith.cmpi ne, %10, %c0_i32_9 : i32
    scf.if %11 {
      %c0_10 = arith.constant 0 : index
      %c0_11 = arith.constant 0 : index
      %12 = vector.load %arg7[%c0_10, %c0_11] : memref<96x256xf32, #tpu.memory_space<vmem>>, vector<96x256xf32>
      %c0_12 = arith.constant 0 : index
      %c0_13 = arith.constant 0 : index
      %13 = vector.load %arg5[%c0_12, %c0_13] : memref<1x256xf32, #tpu.memory_space<vmem>>, vector<1x256xf32>
      %14 = vector.broadcast %13 : vector<1x256xf32> to vector<96x256xf32>
      %15 = arith.addf %12, %14 : vector<96x256xf32>
      %16 = arith.truncf %15 : vector<96x256xf32> to vector<96x256xbf16>
      %c0_14 = arith.constant 0 : index
      %c0_15 = arith.constant 0 : index
      %17 = vector.load %arg6[%c0_14, %c0_15] : memref<96x256xbf16, #tpu.memory_space<vmem>>, vector<96x256xbf16>
      tpu.vector_store %arg6[%c0_14, %c0_15], %16 {strides = array<i32>} : memref<96x256xbf16, #tpu.memory_space<vmem>>, vector<96x256xbf16>,
    } else {
    }
    return
  }
  func.func @transform_0(%arg0: i32, %arg1: i32, %arg2: i32) -> (i32, i32) {
    %c0_i32 = arith.constant 0 : i32
    return %arg0, %arg2 : i32, i32
  }
  func.func @transform_1(%arg0: i32, %arg1: i32, %arg2: i32) -> (i32, i32) {
    %c0_i32 = arith.constant 0 : i32
    return %arg2, %arg1 : i32, i32
  }
  func.func @transform_2(%arg0: i32, %arg1: i32, %arg2: i32) -> (i32, i32) {
    %c0_i32 = arith.constant 0 : i32
    %c0_i32_0 = arith.constant 0 : i32
    return %c0_i32, %arg1 : i32, i32
  }
  func.func @transform_3(%arg0: i32, %arg1: i32, %arg2: i32) -> (i32, i32) {
    %c0_i32 = arith.constant 0 : i32
    return %arg0, %arg1 : i32, i32
  }
}

module attributes {stable_mosaic.version = 11 : i64} {
  func.func @_mm_res_kernel(%arg0: i32, %arg1: i32, %arg2: i32, %arg3: memref<96x128xbf16, #tpu.memory_space<vmem>>, %arg4: memref<128x256xbf16, #tpu.memory_space<vmem>>, %arg5: memref<1x256xf32, #tpu.memory_space<vmem>>, %arg6: memref<96x256xbf16, #tpu.memory_space<vmem>>, %arg7: memref<96x256xbf16, #tpu.memory_space<vmem>>, %arg8: memref<96x256xf32, #tpu.memory_space<vmem>>) attributes {dimension_semantics = [#tpu.dimension_semantics<parallel>, #tpu.dimension_semantics<parallel>, #tpu.dimension_semantics<arbitrary>], iteration_bounds = array<i64: 1, 1, 1>, scalar_prefetch = 0 : i64, scratch_operands = 1 : i64, tpu.core_type = #tpu.core_type<tc>, window_params = [{transform_indices = @transform_0, window_bounds = array<i64: 96, 128>}, {transform_indices = @transform_1, window_bounds = array<i64: 128, 256>}, {transform_indices = @transform_2, window_bounds = array<i64: 1, 256>}, {transform_indices = @transform_3, window_bounds = array<i64: 96, 256>}, {transform_indices = @transform_4, window_bounds = array<i64: 96, 256>}]} {
    %c0_i32 = arith.constant 0 : i32
    %0 = arith.cmpi eq, %arg2, %c0_i32 : i32
    %1 = arith.extui %0 : i1 to i32
    %c0_i32_0 = arith.constant 0 : i32
    %2 = arith.cmpi ne, %1, %c0_i32_0 : i32
    scf.if %2 {
      %cst_10 = arith.constant 0.000000e+00 : f32
      %12 = vector.broadcast %cst_10 : f32 to vector<96x256xf32>
      %c0_11 = arith.constant 0 : index
      %c0_12 = arith.constant 0 : index
      %13 = vector.load %arg8[%c0_11, %c0_12] : memref<96x256xf32, #tpu.memory_space<vmem>>, vector<96x256xf32>
      tpu.vector_store %arg8[%c0_11, %c0_12], %12 {strides = array<i32>} : memref<96x256xf32, #tpu.memory_space<vmem>>, vector<96x256xf32>,
    } else {
    }
    %c0 = arith.constant 0 : index
    %c0_1 = arith.constant 0 : index
    %3 = vector.load %arg8[%c0, %c0_1] : memref<96x256xf32, #tpu.memory_space<vmem>>, vector<96x256xf32>
    %c0_2 = arith.constant 0 : index
    %c0_3 = arith.constant 0 : index
    %4 = vector.load %arg3[%c0_2, %c0_3] : memref<96x128xbf16, #tpu.memory_space<vmem>>, vector<96x128xbf16>
    %c0_4 = arith.constant 0 : index
    %c0_5 = arith.constant 0 : index
    %5 = vector.load %arg4[%c0_4, %c0_5] : memref<128x256xbf16, #tpu.memory_space<vmem>>, vector<128x256xbf16>
    %cst = arith.constant dense<0.000000e+00> : vector<96x256xf32>
    %6 = tpu.matmul %4, %5, %cst {dimension_numbers = #tpu.dot_dimension_numbers<[1], [0], [0], [1], [0, 0, 1, 1], [], []>} : vector<96x128xbf16>, vector<128x256xbf16>, vector<96x256xf32> -> vector<96x256xf32>
    %7 = arith.addf %3, %6 : vector<96x256xf32>
    %c0_6 = arith.constant 0 : index
    %c0_7 = arith.constant 0 : index
    %8 = vector.load %arg8[%c0_6, %c0_7] : memref<96x256xf32, #tpu.memory_space<vmem>>, vector<96x256xf32>
    tpu.vector_store %arg8[%c0_6, %c0_7], %7 {strides = array<i32>} : memref<96x256xf32, #tpu.memory_space<vmem>>, vector<96x256xf32>,
    %c0_i32_8 = arith.constant 0 : i32
    %9 = arith.cmpi eq, %arg2, %c0_i32_8 : i32
    %10 = arith.extui %9 : i1 to i32
    %c0_i32_9 = arith.constant 0 : i32
    %11 = arith.cmpi ne, %10, %c0_i32_9 : i32
    scf.if %11 {
      %c0_10 = arith.constant 0 : index
      %c0_11 = arith.constant 0 : index
      %12 = vector.load %arg8[%c0_10, %c0_11] : memref<96x256xf32, #tpu.memory_space<vmem>>, vector<96x256xf32>
      %c0_12 = arith.constant 0 : index
      %c0_13 = arith.constant 0 : index
      %13 = vector.load %arg5[%c0_12, %c0_13] : memref<1x256xf32, #tpu.memory_space<vmem>>, vector<1x256xf32>
      %14 = vector.broadcast %13 : vector<1x256xf32> to vector<96x256xf32>
      %15 = arith.addf %12, %14 : vector<96x256xf32>
      %c0_14 = arith.constant 0 : index
      %c0_15 = arith.constant 0 : index
      %16 = vector.load %arg6[%c0_14, %c0_15] : memref<96x256xbf16, #tpu.memory_space<vmem>>, vector<96x256xbf16>
      %17 = arith.extf %16 : vector<96x256xbf16> to vector<96x256xf32>
      %18 = arith.addf %15, %17 : vector<96x256xf32>
      %cst_16 = arith.constant 0.000000e+00 : f32
      %19 = vector.broadcast %cst_16 : f32 to vector<96x256xf32>
      %20 = arith.maximumf %18, %19 : vector<96x256xf32>
      %21 = arith.truncf %20 : vector<96x256xf32> to vector<96x256xbf16>
      %c0_17 = arith.constant 0 : index
      %c0_18 = arith.constant 0 : index
      %22 = vector.load %arg7[%c0_17, %c0_18] : memref<96x256xbf16, #tpu.memory_space<vmem>>, vector<96x256xbf16>
      tpu.vector_store %arg7[%c0_17, %c0_18], %21 {strides = array<i32>} : memref<96x256xbf16, #tpu.memory_space<vmem>>, vector<96x256xbf16>,
    } else {
    }
    return
  }
  func.func @transform_0(%arg0: i32, %arg1: i32, %arg2: i32) -> (i32, i32) {
    %c0_i32 = arith.constant 0 : i32
    return %arg0, %arg2 : i32, i32
  }
  func.func @transform_1(%arg0: i32, %arg1: i32, %arg2: i32) -> (i32, i32) {
    %c0_i32 = arith.constant 0 : i32
    return %arg2, %arg1 : i32, i32
  }
  func.func @transform_2(%arg0: i32, %arg1: i32, %arg2: i32) -> (i32, i32) {
    %c0_i32 = arith.constant 0 : i32
    %c0_i32_0 = arith.constant 0 : i32
    return %c0_i32, %arg1 : i32, i32
  }
  func.func @transform_3(%arg0: i32, %arg1: i32, %arg2: i32) -> (i32, i32) {
    %c0_i32 = arith.constant 0 : i32
    return %arg0, %arg1 : i32, i32
  }
  func.func @transform_4(%arg0: i32, %arg1: i32, %arg2: i32) -> (i32, i32) {
    %c0_i32 = arith.constant 0 : i32
    return %arg0, %arg1 : i32, i32
  }
}

module attributes {stable_mosaic.version = 11 : i64} {
  func.func @_mm_kernel(%arg0: i32, %arg1: i32, %arg2: i32, %arg3: memref<96x256xbf16, #tpu.memory_space<vmem>>, %arg4: memref<256x128xbf16, #tpu.memory_space<vmem>>, %arg5: memref<1x128xf32, #tpu.memory_space<vmem>>, %arg6: memref<96x128xbf16, #tpu.memory_space<vmem>>, %arg7: memref<96x128xf32, #tpu.memory_space<vmem>>) attributes {dimension_semantics = [#tpu.dimension_semantics<parallel>, #tpu.dimension_semantics<parallel>, #tpu.dimension_semantics<arbitrary>], iteration_bounds = array<i64: 1, 1, 1>, scalar_prefetch = 0 : i64, scratch_operands = 1 : i64, tpu.core_type = #tpu.core_type<tc>, window_params = [{transform_indices = @transform_0, window_bounds = array<i64: 96, 256>}, {transform_indices = @transform_1, window_bounds = array<i64: 256, 128>}, {transform_indices = @transform_2, window_bounds = array<i64: 1, 128>}, {transform_indices = @transform_3, window_bounds = array<i64: 96, 128>}]} {
    %c0_i32 = arith.constant 0 : i32
    %0 = arith.cmpi eq, %arg2, %c0_i32 : i32
    %1 = arith.extui %0 : i1 to i32
    %c0_i32_0 = arith.constant 0 : i32
    %2 = arith.cmpi ne, %1, %c0_i32_0 : i32
    scf.if %2 {
      %cst_10 = arith.constant 0.000000e+00 : f32
      %12 = vector.broadcast %cst_10 : f32 to vector<96x128xf32>
      %c0_11 = arith.constant 0 : index
      %c0_12 = arith.constant 0 : index
      %13 = vector.load %arg7[%c0_11, %c0_12] : memref<96x128xf32, #tpu.memory_space<vmem>>, vector<96x128xf32>
      tpu.vector_store %arg7[%c0_11, %c0_12], %12 {strides = array<i32>} : memref<96x128xf32, #tpu.memory_space<vmem>>, vector<96x128xf32>,
    } else {
    }
    %c0 = arith.constant 0 : index
    %c0_1 = arith.constant 0 : index
    %3 = vector.load %arg7[%c0, %c0_1] : memref<96x128xf32, #tpu.memory_space<vmem>>, vector<96x128xf32>
    %c0_2 = arith.constant 0 : index
    %c0_3 = arith.constant 0 : index
    %4 = vector.load %arg3[%c0_2, %c0_3] : memref<96x256xbf16, #tpu.memory_space<vmem>>, vector<96x256xbf16>
    %c0_4 = arith.constant 0 : index
    %c0_5 = arith.constant 0 : index
    %5 = vector.load %arg4[%c0_4, %c0_5] : memref<256x128xbf16, #tpu.memory_space<vmem>>, vector<256x128xbf16>
    %cst = arith.constant dense<0.000000e+00> : vector<96x128xf32>
    %6 = tpu.matmul %4, %5, %cst {dimension_numbers = #tpu.dot_dimension_numbers<[1], [0], [0], [1], [0, 0, 1, 1], [], []>} : vector<96x256xbf16>, vector<256x128xbf16>, vector<96x128xf32> -> vector<96x128xf32>
    %7 = arith.addf %3, %6 : vector<96x128xf32>
    %c0_6 = arith.constant 0 : index
    %c0_7 = arith.constant 0 : index
    %8 = vector.load %arg7[%c0_6, %c0_7] : memref<96x128xf32, #tpu.memory_space<vmem>>, vector<96x128xf32>
    tpu.vector_store %arg7[%c0_6, %c0_7], %7 {strides = array<i32>} : memref<96x128xf32, #tpu.memory_space<vmem>>, vector<96x128xf32>,
    %c0_i32_8 = arith.constant 0 : i32
    %9 = arith.cmpi eq, %arg2, %c0_i32_8 : i32
    %10 = arith.extui %9 : i1 to i32
    %c0_i32_9 = arith.constant 0 : i32
    %11 = arith.cmpi ne, %10, %c0_i32_9 : i32
    scf.if %11 {
      %c0_10 = arith.constant 0 : index
      %c0_11 = arith.constant 0 : index
      %12 = vector.load %arg7[%c0_10, %c0_11] : memref<96x128xf32, #tpu.memory_space<vmem>>, vector<96x128xf32>
      %c0_12 = arith.constant 0 : index
      %c0_13 = arith.constant 0 : index
      %13 = vector.load %arg5[%c0_12, %c0_13] : memref<1x128xf32, #tpu.memory_space<vmem>>, vector<1x128xf32>
      %14 = vector.broadcast %13 : vector<1x128xf32> to vector<96x128xf32>
      %15 = arith.addf %12, %14 : vector<96x128xf32>
      %cst_14 = arith.constant 0.000000e+00 : f32
      %16 = vector.broadcast %cst_14 : f32 to vector<96x128xf32>
      %17 = arith.maximumf %15, %16 : vector<96x128xf32>
      %18 = arith.truncf %17 : vector<96x128xf32> to vector<96x128xbf16>
      %c0_15 = arith.constant 0 : index
      %c0_16 = arith.constant 0 : index
      %19 = vector.load %arg6[%c0_15, %c0_16] : memref<96x128xbf16, #tpu.memory_space<vmem>>, vector<96x128xbf16>
      tpu.vector_store %arg6[%c0_15, %c0_16], %18 {strides = array<i32>} : memref<96x128xbf16, #tpu.memory_space<vmem>>, vector<96x128xbf16>,
    } else {
    }
    return
  }
  func.func @transform_0(%arg0: i32, %arg1: i32, %arg2: i32) -> (i32, i32) {
    %c0_i32 = arith.constant 0 : i32
    return %arg0, %arg2 : i32, i32
  }
  func.func @transform_1(%arg0: i32, %arg1: i32, %arg2: i32) -> (i32, i32) {
    %c0_i32 = arith.constant 0 : i32
    return %arg2, %arg1 : i32, i32
  }
  func.func @transform_2(%arg0: i32, %arg1: i32, %arg2: i32) -> (i32, i32) {
    %c0_i32 = arith.constant 0 : i32
    %c0_i32_0 = arith.constant 0 : i32
    return %c0_i32, %arg1 : i32, i32
  }
  func.func @transform_3(%arg0: i32, %arg1: i32, %arg2: i32) -> (i32, i32) {
    %c0_i32 = arith.constant 0 : i32
    return %arg0, %arg1 : i32, i32
  }
}

</mosaic_0001>

<bundles_post_ra>
// kernel: _lambda_.12
= control target key start
LH: loop header
LB: loop body
LE: loop exit
PB: predicated region body
PF: predicated region fallthrough
CT: control target
= control target key end

     0   :  { %s1241_s0 = inlined_call_operand.vmem [shape: s32[2], index: 0, kind: input, shape index: {}]   ;;  %s1242_s1 = inlined_call_operand.vmem [shape: bf16[6,64,256], index: 1, kind: input, shape index: {}]   ;;  %s1243_s2 = inlined_call_operand.vmem [shape: bf16[2,256,128], index: 2, kind: input, shape index: {}]   ;;  %s1244_s3 = inlined_call_operand.vmem [shape: bf16[384,128], index: 3, kind: output, shape index: {}]  }
   0x1   :  { %s8_s14 = sshll.u32 %s1241_s0, 4  ;;  %s9_s14 = int_to_ptr.vmem [resolvable:$true] %s8_s14 }
   0x2   :  { %s1112_s15 = scalar_lea.vmem %s9_s14, 16  ;;  %p1117_p1 = scmp.lt.s32.totalorder %s9_s14, %s9_s14 }
   0x3   :  { %p1113_p0 = scmp.ne.s32.totalorder %s9_s14, %s1112_s15  ;;  %p1118_p2 = scmp.lt.s32.totalorder %s1112_s15, %s1112_s15 }
   0x5   :  { %p1119_p3 = por %p1118_p2, %p1117_p1 }
   0x7   :  { %p1120_p4 = pnand %p1119_p3, %p1113_p0 }
   0x9   :  { %1123 = shalt.err (!%p1120_p4)  }
   0xa   :  { %s1134_s16 = smov [#allocation3]  }
   0xb   :  { %11 = dma.vmem_to_smem %s9_s14, 16, %s1134_s16, [#allocation2] }
   0xc   :  { %1128 = dma.done.wait [#allocation2], 16 }
   0xd   :  { %1129 = vsyncadd [#allocation2], 4294967280 }
   0xe   :  { %13 = sfence }
   0xf   :  { %s1158_s17 = smov 0  }
  0x10 LB: > { %s1164_s0 = sadd.s32 4294967295, %s1132_s17   ;;  %p778_p5 = scmp.ge.s32.totalorder %s1132_s17, 1  ;;  %s1132_s17 = sphi %s1158_s17, %s19_s17  }
  0x11   : > { %p135_p6 = scmp.lt.s32.totalorder %s1132_s17, 3 }
  0x13   : > { %p136_p7 = pnand %p778_p5, %p135_p6 }
  0x14   : > { %s171_s18 = sld [smem:[#allocation3 + %s1164_s0]] (!%p136_p7)  ;;  %s164_s19 = smul.u32 (!%p136_p7), 3, %s1164_s0 }
  0x15   : > { %139 = sbr.rel (%p136_p7) target bundleno = 326 (0x146), region = 28 }
  0x16   : > { %p165_p8 = scmp.lt.s32.totalorder (!%p136_p7), %s164_s19, 5  ;;  %s178_s28 = smul.u32 (!%p136_p7), 24, %s1164_s0 }
  0x18   : > { %p179_p10 = scmp.lt.s32.totalorder (!%p136_p7), %s178_s28, 47 }
  0x1a   : > { %p172_p9 = scmp.lt.s32.totalorder (!%p136_p7), %s171_s18, 1 }
  0x1c   : > { %s1246_s19 = smov (!%p165_p8, %s164_s19), 5  ;;  %s1248_s18 = smov (!%p172_p9, %s171_s18), 1 }
  0x1d   : > { %s850_s20 = sshll.u32 %s1246_s19, 6  ;;  %s851_s24 = sshll.u32 %s1248_s18, 7 }
  0x1e   : > { %s1173_s23 = scalar_lea.vmem %s1242_s1, %s850_s20  ;;  %s1180_s27 = scalar_lea.vmem %s1243_s2, %s851_s24 }
  0x1f   : > { %v1078_v0 = vld [vmem:[%s1173_s23 + $0x4] ss:$8 sps:$4 sm:$0xff]   ;;  %v1064_v6 = vld [vmem:[%s1180_s27 + $0x50] sm:$0xff]   ;;  %v1066_v8 = vld [vmem:[%s1180_s27 + $0x58] sm:$0xff]   ;;  %s1250_s28 = smov (!%p179_p10, %s178_s28), 47 }
  0x20   : > { %v1081_v1 = vld [vmem:[%s1173_s23 + $0x64] ss:$8 sps:$4 sm:$0xff]   ;;  %489 = vmatprep.mubr.bf16.mxu0 %v1078_v0  ;;  %v1065_v7 = vld [vmem:[%s1180_s27 + $0x10] sm:$0xff]   ;;  %v1067_v9 = vld [vmem:[%s1180_s27 + $0x18] sm:$0xff]   ;;  %s783_s29 = sshll.u32 %s1250_s28, 2 }
  0x21   : > { %v1060_v2 = vld [vmem:[%s1180_s27 + $0x40] sm:$0xff]   ;;  %537 = vmatprep.mubr.bf16.mxu1 %v1081_v1  ;;  %v1062_v4 = vld [vmem:[%s1180_s27 + $0x48] sm:$0xff]   ;;  %v1072_v14 = vld [vmem:[%s1180_s27 + $0x70] sm:$0xff]   ;;  %s1224_s5 = scalar_lea.vmem %s1244_s3, %s783_s29 }
  0x22   : > { %v1061_v3 = vld [vmem:[%s1180_s27] sm:$0xff]   ;;  %947 = vmatprep.subr.bf16.mxu0 %v1060_v2  ;;  %1035 = vmatprep.subr.bf16.mxu1 %v1060_v2  ;;  %v1063_v5 = vld [vmem:[%s1180_s27 + $0x8] sm:$0xff]   ;;  %v1073_v15 = vld [vmem:[%s1180_s27 + $0x30] sm:$0xff]  }
  0x23   : > { %948 = vmatpush3.bf16.msra.mxu0 %v1061_v3  ;;  %1043 = vmatpush3.bf16.msra.mxu1 %v1061_v3  ;;  %v1068_v10 = vld [vmem:[%s1180_s27 + $0x60] sm:$0xff]   ;;  %v1070_v12 = vld [vmem:[%s1180_s27 + $0x68] sm:$0xff]   ;;  %v1074_v16 = vld [vmem:[%s1180_s27 + $0x78] sm:$0xff]  }
  0x24   : > { %949 = vmatprep.subr.bf16.mxu0 %v1062_v4  ;;  %1036 = vmatprep.subr.bf16.mxu1 %v1062_v4  ;;  %v1069_v11 = vld [vmem:[%s1180_s27 + $0x20] sm:$0xff]   ;;  %v1071_v13 = vld [vmem:[%s1180_s27 + $0x28] sm:$0xff]   ;;  %v1075_v17 = vld [vmem:[%s1180_s27 + $0x38] sm:$0xff]  }
  0x25   : > { %v1076_v18 = vld [vmem:[%s1173_s23] ss:$8 sps:$4 sm:$0xff]   ;;  %v1082_v20 = vld [vmem:[%s1173_s23 + $0x14] ss:$8 sps:$4 sm:$0xff]   ;;  %v1086_v22 = vld [vmem:[%s1173_s23 + $0x10] ss:$8 sps:$4 sm:$0xff]  }
  0x26   : > { %v1079_v19 = vld [vmem:[%s1173_s23 + $0x60] ss:$8 sps:$4 sm:$0xff]   ;;  %v1084_v21 = vld [vmem:[%s1173_s23 + $0x74] ss:$8 sps:$4 sm:$0xff]   ;;  %v1087_v23 = vld [vmem:[%s1173_s23 + $0x70] ss:$8 sps:$4 sm:$0xff]  }
  0x27   : > { %950 = vmatpush3.bf16.msra.mxu0 %v1063_v5  ;;  %1044 = vmatpush3.bf16.msra.mxu1 %v1063_v5  ;;  %v1088_v24 = vld [vmem:[%s1173_s23 + $0x24] ss:$8 sps:$4 sm:$0xff]   ;;  %v1092_v26 = vld [vmem:[%s1173_s23 + $0x20] ss:$8 sps:$4 sm:$0xff]   ;;  %v1094_v28 = vld [vmem:[%s1173_s23 + $0x34] ss:$8 sps:$4 sm:$0xff]  }
  0x28   : > { %951 = vmatprep.subr.bf16.mxu0 %v1064_v6  ;;  %1037 = vmatprep.subr.bf16.mxu1 %v1064_v6  ;;  %v1090_v25 = vld [vmem:[%s1173_s23 + $0x84] ss:$8 sps:$4 sm:$0xff]   ;;  %v1093_v27 = vld [vmem:[%s1173_s23 + $0x80] ss:$8 sps:$4 sm:$0xff]   ;;  %v1096_v29 = vld [vmem:[%s1173_s23 + $0x94] ss:$8 sps:$4 sm:$0xff]  }
  0x29   : > { %v1098_v30 = vld [vmem:[%s1173_s23 + $0x30] ss:$8 sps:$4 sm:$0xff]   ;;  %v1100_v32 = vld [vmem:[%s1173_s23 + $0x44] ss:$8 sps:$4 sm:$0xff]   ;;  %v1104_v34 = vld [vmem:[%s1173_s23 + $0x40] ss:$8 sps:$4 sm:$0xff]  }
  0x2a   : > { %v1099_v31 = vld [vmem:[%s1173_s23 + $0x90] ss:$8 sps:$4 sm:$0xff]   ;;  %v1102_v33 = vld [vmem:[%s1173_s23 + $0xa4] ss:$8 sps:$4 sm:$0xff]   ;;  %v1105_v35 = vld [vmem:[%s1173_s23 + $0xa0] ss:$8 sps:$4 sm:$0xff]  }
  0x2b   : > { %952 = vmatpush3.bf16.msra.mxu0 %v1065_v7  ;;  %1045 = vmatpush3.bf16.msra.mxu1 %v1065_v7  ;;  %v1106_v36 = vld [vmem:[%s1173_s23 + $0x54] ss:$8 sps:$4 sm:$0xff]   ;;  %v1110_v38 = vld [vmem:[%s1173_s23 + $0x50] ss:$8 sps:$4 sm:$0xff]  }
  0x2c   : > { %953 = vmatprep.subr.bf16.mxu0 %v1066_v8  ;;  %1038 = vmatprep.subr.bf16.mxu1 %v1066_v8  ;;  %v1108_v37 = vld [vmem:[%s1173_s23 + $0xb4] ss:$8 sps:$4 sm:$0xff]   ;;  %v1111_v39 = vld [vmem:[%s1173_s23 + $0xb0] ss:$8 sps:$4 sm:$0xff]  }
  0x2f   : > { %954 = vmatpush3.bf16.msra.mxu0 %v1067_v9  ;;  %1046 = vmatpush3.bf16.msra.mxu1 %v1067_v9 }
  0x30   : > { %955 = vmatprep.subr.bf16.mxu0 %v1068_v10  ;;  %1039 = vmatprep.subr.bf16.mxu1 %v1068_v10 }
  0x33   : > { %956 = vmatpush3.bf16.msra.mxu0 %v1069_v11  ;;  %1047 = vmatpush3.bf16.msra.mxu1 %v1069_v11 }
  0x34   : > { %957 = vmatprep.subr.bf16.mxu0 %v1070_v12  ;;  %1040 = vmatprep.subr.bf16.mxu1 %v1070_v12 }
  0x37   : > { %958 = vmatpush3.bf16.msra.mxu0 %v1071_v13  ;;  %1048 = vmatpush3.bf16.msra.mxu1 %v1071_v13 }
  0x38   : > { %959 = vmatprep.subr.bf16.mxu0 %v1072_v14  ;;  %1041 = vmatprep.subr.bf16.mxu1 %v1072_v14 }
  0x3b   : > { %960 = vmatpush3.bf16.msra.mxu0 %v1073_v15  ;;  %1049 = vmatpush3.bf16.msra.mxu1 %v1073_v15 }
  0x3c   : > { %961 = vmatprep.subr.bf16.mxu0 %v1074_v16  ;;  %1042 = vmatprep.subr.bf16.mxu1 %v1074_v16 }
  0x3f   : > { %962 = vmatpush3.bf16.msra.mxu0 %v1075_v17  ;;  %1050 = vmatpush3.bf16.msra.mxu1 %v1075_v17 }
  0x42   : > { %490 = vmatmul.mubr.bf16.vlgmr.msra.gmra.mrb[0].mxu0 %v1076_v18  ;;  %538 = vmatmul.mubr.bf16.vlgmr.msra.gmra.mrb[0].mxu1 %v1079_v19 }
  0x43   : > { %497 = vmatprep.mubr.bf16.mxu0 %v1082_v20  ;;  %545 = vmatprep.mubr.bf16.mxu1 %v1084_v21 }
  0x4a   : > { %498 = vmatmul.mubr.bf16.gmra.mrb[4].mxu0 %v1086_v22  ;;  %546 = vmatmul.mubr.bf16.gmra.mrb[4].mxu1 %v1087_v23 }
  0x4b   : > { %505 = vmatprep.mubr.bf16.mxu0 %v1088_v24  ;;  %553 = vmatprep.mubr.bf16.mxu1 %v1090_v25 }
  0x52   : > { %506 = vmatmul.mubr.bf16.gmra.mrb[8].mxu0 %v1092_v26  ;;  %554 = vmatmul.mubr.bf16.gmra.mrb[8].mxu1 %v1093_v27 }
  0x53   : > { %513 = vmatprep.mubr.bf16.mxu0 %v1094_v28  ;;  %561 = vmatprep.mubr.bf16.mxu1 %v1096_v29 }
  0x5a   : > { %514 = vmatmul.mubr.bf16.gmra.mrb[12].mxu0 %v1098_v30  ;;  %562 = vmatmul.mubr.bf16.gmra.mrb[12].mxu1 %v1099_v31 }
  0x5b   : > { %521 = vmatprep.mubr.bf16.mxu0 %v1100_v32  ;;  %569 = vmatprep.mubr.bf16.mxu1 %v1102_v33 }
  0x62   : > { %522 = vmatmul.mubr.bf16.gmra.mrb[16].mxu0 %v1104_v34  ;;  %570 = vmatmul.mubr.bf16.gmra.mrb[16].mxu1 %v1105_v35 }
  0x63   : > { %529 = vmatprep.mubr.bf16.mxu0 %v1106_v36  ;;  %577 = vmatprep.mubr.bf16.mxu1 %v1108_v37 }
  0x6a   : > { %530 = vmatmul.mubr.bf16.gmra.mrb[20].mxu0 %v1110_v38  ;;  %578 = vmatmul.mubr.bf16.gmra.mrb[20].mxu1 %v1111_v39 }
 0x115   : > { %v963_v40 = vpop.f32.mrb[0].mxu0  ;;  %v999_v41 = vpop.f32.mrb[0].mxu1 }
 0x116   : > { %v964_v42 = vpop.f32.mrb[1].mxu0  ;;  %v1000_v43 = vpop.f32.mrb[1].mxu1 }
 0x117   : > { %v965_v44 = vadd.f32 %v964_v42, %v963_v40  ;;  %v1001_v45 = vadd.f32 %v1000_v43, %v999_v41  ;;  %v966_v46 = vpop.f32.mrb[2].mxu0  ;;  %v1002_v47 = vpop.f32.mrb[2].mxu1 }
 0x118   : > { %v967_v48 = vpop.f32.mrb[3].mxu0  ;;  %v1003_v49 = vpop.f32.mrb[3].mxu1 }
 0x119   : > { %v968_v50 = vadd.f32 %v967_v48, %v966_v46  ;;  %v1004_v51 = vadd.f32 %v1003_v49, %v1002_v47 }
 0x11b   : > { %v879_v52 = vpack.c.bf16 %v968_v50, %v965_v44  ;;  %v909_v53 = vpack.c.bf16 %v1004_v51, %v1001_v45 }
 0x11d   : > { %880 = vst [vmem:[%s1224_s5] sm:$0xff] %v879_v52   ;;  %941 = vst [vmem:[%s1224_s5 + $0x30] sm:$0xff] %v909_v53   ;;  %v969_v54 = vpop.f32.mrb[4].mxu0  ;;  %v1005_v55 = vpop.f32.mrb[4].mxu1 }
 0x11e   : > { %v970_v56 = vpop.f32.mrb[5].mxu0  ;;  %v1006_v57 = vpop.f32.mrb[5].mxu1 }
 0x11f   : > { %v971_v58 = vadd.f32 %v970_v56, %v969_v54  ;;  %v1007_v59 = vadd.f32 %v1006_v57, %v1005_v55  ;;  %v972_v60 = vpop.f32.mrb[6].mxu0  ;;  %v1008_v61 = vpop.f32.mrb[6].mxu1 }
 0x120   : > { %v973_v62 = vpop.f32.mrb[7].mxu0  ;;  %v1009_v63 = vpop.f32.mrb[7].mxu1 }
 0x121   : > { %v974_v0 = vadd.f32 %v973_v62, %v972_v60  ;;  %v1010_v1 = vadd.f32 %v1009_v63, %v1008_v61 }
 0x123   : > { %v884_v2 = vpack.c.bf16 %v974_v0, %v971_v58  ;;  %v914_v3 = vpack.c.bf16 %v1010_v1, %v1007_v59 }
 0x125   : > { %936 = vst [vmem:[%s1224_s5 + $0x8] sm:$0xff] %v884_v2   ;;  %942 = vst [vmem:[%s1224_s5 + $0x38] sm:$0xff] %v914_v3   ;;  %v975_v4 = vpop.f32.mrb[8].mxu0  ;;  %v1011_v5 = vpop.f32.mrb[8].mxu1 }
 0x126   : > { %v976_v6 = vpop.f32.mrb[9].mxu0  ;;  %v1012_v7 = vpop.f32.mrb[9].mxu1 }
 0x127   : > { %v977_v8 = vadd.f32 %v976_v6, %v975_v4  ;;  %v1013_v9 = vadd.f32 %v1012_v7, %v1011_v5  ;;  %v978_v10 = vpop.f32.mrb[10].mxu0  ;;  %v1014_v11 = vpop.f32.mrb[10].mxu1 }
 0x128   : > { %v979_v12 = vpop.f32.mrb[11].mxu0  ;;  %v1015_v13 = vpop.f32.mrb[11].mxu1 }
 0x129   : > { %v980_v14 = vadd.f32 %v979_v12, %v978_v10  ;;  %v1016_v15 = vadd.f32 %v1015_v13, %v1014_v11 }
 0x12b   : > { %v889_v16 = vpack.c.bf16 %v980_v14, %v977_v8  ;;  %v919_v17 = vpack.c.bf16 %v1016_v15, %v1013_v9 }
 0x12d   : > { %937 = vst [vmem:[%s1224_s5 + $0x10] sm:$0xff] %v889_v16   ;;  %943 = vst [vmem:[%s1224_s5 + $0x40] sm:$0xff] %v919_v17   ;;  %v981_v18 = vpop.f32.mrb[12].mxu0  ;;  %v1017_v19 = vpop.f32.mrb[12].mxu1 }
 0x12e   : > { %v982_v20 = vpop.f32.mrb[13].mxu0  ;;  %v1018_v21 = vpop.f32.mrb[13].mxu1 }
 0x12f   : > { %v983_v22 = vadd.f32 %v982_v20, %v981_v18  ;;  %v1019_v23 = vadd.f32 %v1018_v21, %v1017_v19  ;;  %v984_v24 = vpop.f32.mrb[14].mxu0  ;;  %v1020_v25 = vpop.f32.mrb[14].mxu1 }
 0x130   : > { %v985_v26 = vpop.f32.mrb[15].mxu0  ;;  %v1021_v27 = vpop.f32.mrb[15].mxu1 }
 0x131   : > { %v986_v28 = vadd.f32 %v985_v26, %v984_v24  ;;  %v1022_v29 = vadd.f32 %v1021_v27, %v1020_v25 }
 0x133   : > { %v894_v30 = vpack.c.bf16 %v986_v28, %v983_v22  ;;  %v924_v31 = vpack.c.bf16 %v1022_v29, %v1019_v23 }
 0x135   : > { %938 = vst [vmem:[%s1224_s5 + $0x18] sm:$0xff] %v894_v30   ;;  %944 = vst [vmem:[%s1224_s5 + $0x48] sm:$0xff] %v924_v31   ;;  %v987_v32 = vpop.f32.mrb[16].mxu0  ;;  %v1023_v33 = vpop.f32.mrb[16].mxu1 }
 0x136   : > { %v988_v34 = vpop.f32.mrb[17].mxu0  ;;  %v1024_v35 = vpop.f32.mrb[17].mxu1 }
 0x137   : > { %v989_v36 = vadd.f32 %v988_v34, %v987_v32  ;;  %v1025_v37 = vadd.f32 %v1024_v35, %v1023_v33  ;;  %v990_v38 = vpop.f32.mrb[18].mxu0  ;;  %v1026_v39 = vpop.f32.mrb[18].mxu1 }
 0x138   : > { %v991_v40 = vpop.f32.mrb[19].mxu0  ;;  %v1027_v41 = vpop.f32.mrb[19].mxu1 }
 0x139   : > { %v992_v42 = vadd.f32 %v991_v40, %v990_v38  ;;  %v1028_v43 = vadd.f32 %v1027_v41, %v1026_v39 }
 0x13b   : > { %v899_v44 = vpack.c.bf16 %v992_v42, %v989_v36  ;;  %v929_v45 = vpack.c.bf16 %v1028_v43, %v1025_v37 }
 0x13d   : > { %939 = vst [vmem:[%s1224_s5 + $0x20] sm:$0xff] %v899_v44   ;;  %945 = vst [vmem:[%s1224_s5 + $0x50] sm:$0xff] %v929_v45   ;;  %v993_v46 = vpop.f32.mrb[20].mxu0  ;;  %v1029_v47 = vpop.f32.mrb[20].mxu1 }
 0x13e   : > { %v994_v48 = vpop.f32.mrb[21].mxu0  ;;  %v1030_v49 = vpop.f32.mrb[21].mxu1 }
 0x13f   : > { %v995_v50 = vadd.f32 %v994_v48, %v993_v46  ;;  %v1031_v51 = vadd.f32 %v1030_v49, %v1029_v47  ;;  %v996_v52 = vpop.f32.mrb[22].mxu0  ;;  %v1032_v53 = vpop.f32.mrb[22].mxu1 }
 0x140   : > { %v997_v54 = vpop.f32.mrb[23].mxu0  ;;  %v1033_v55 = vpop.f32.mrb[23].mxu1 }
 0x141   : > { %v998_v56 = vadd.f32 %v997_v54, %v996_v52  ;;  %v1034_v57 = vadd.f32 %v1033_v55, %v1032_v53 }
 0x143   : > { %v904_v58 = vpack.c.bf16 %v998_v56, %v995_v50  ;;  %v934_v59 = vpack.c.bf16 %v1034_v57, %v1031_v51 }
 0x145   : > { %940 = vst [vmem:[%s1224_s5 + $0x28] sm:$0xff] %v904_v58   ;;  %946 = vst [vmem:[%s1224_s5 + $0x58] sm:$0xff] %v934_v59  }
 0x146 PF: > { %s19_s17 = sadd.s32 1, %s1132_s17  }
 0x147   : > { %p16_p11 = scmp.ge.s32.totalorder %s19_s17, 4  }
 0x149   :  { %18 = sbr.rel (!%p16_p11) target bundleno = 16 (0x10), region = 61 }

// kernel: _lambda_.15
= control target key start
LH: loop header
LB: loop body
LE: loop exit
PB: predicated region body
PF: predicated region fallthrough
CT: control target
= control target key end

     0   :  { %s599_s1 = inlined_call_operand.vmem [shape: bf16[128,128], index: 1, kind: input, shape index: {}]   ;;  %s600_s0 = inlined_call_operand.vmem [shape: bf16[96,128], index: 0, kind: input, shape index: {}]   ;;  %s601_s2 = inlined_call_operand.vmem [shape: f32[1,128], index: 2, kind: input, shape index: {}]   ;;  %s602_s3 = inlined_call_operand.vmem [shape: bf16[96,128], index: 3, kind: output, shape index: {}]  }
   0x1   :  { %v502_v0 = vld [vmem:[%s599_s1] sm:$0xff]   ;;  %v503_v1 = vld [vmem:[%s599_s1 + $0x8] sm:$0xff]   ;;  %v504_v2 = vld [vmem:[%s599_s1 + $0x10] sm:$0xff]  }
   0x2   :  { %486 = vmatprep.subr.bf16.mxu1 %v502_v0  ;;  %458 = vmatprep.subr.bf16.mxu0 %v502_v0  ;;  %v505_v3 = vld [vmem:[%s599_s1 + $0x18] sm:$0xff]   ;;  %v510_v4 = vld [vmem:[%s600_s0 + $0x10] sm:$0xff]   ;;  %v512_v5 = vld [vmem:[%s600_s0] sm:$0xff]  }
   0x3   :  { %494 = vmatpush3.bf16.msra.mxu1 %v502_v0  ;;  %459 = vmatpush3.bf16.msra.mxu0 %v502_v0  ;;  %v506_v6 = vld [vmem:[%s599_s1 + $0x20] sm:$0xff]   ;;  %v507_v7 = vld [vmem:[%s599_s1 + $0x28] sm:$0xff]   ;;  %v508_v8 = vld [vmem:[%s599_s1 + $0x30] sm:$0xff]  }
   0x4   :  { %487 = vmatprep.subr.bf16.mxu1 %v503_v1  ;;  %460 = vmatprep.subr.bf16.mxu0 %v503_v1  ;;  %v509_v9 = vld [vmem:[%s599_s1 + $0x38] sm:$0xff]   ;;  %v513_v11 = vld [vmem:[%s600_s0 + $0x8] sm:$0xff]   ;;  %v514_v12 = vld [vmem:[%s600_s0 + $0x20] sm:$0xff]  }
   0x5   :  { %478 = vmatprep.mubr.bf16.mxu1 %v510_v4  ;;  %474 = vmatprep.mubr.bf16.mxu0 %v512_v5  ;;  %v511_v10 = vld [vmem:[%s600_s0 + $0x18] sm:$0xff]   ;;  %v515_v13 = vld [vmem:[%s600_s0 + $0x28] sm:$0xff]   ;;  %v384_v14 = vld [vmem:[%s601_s2] ss:$0 sm:$0xff] }
   0x7   :  { %495 = vmatpush3.bf16.msra.mxu1 %v503_v1  ;;  %461 = vmatpush3.bf16.msra.mxu0 %v503_v1 }
   0x8   :  { %488 = vmatprep.subr.bf16.mxu1 %v504_v2  ;;  %462 = vmatprep.subr.bf16.mxu0 %v504_v2 }
   0xb   :  { %496 = vmatpush3.bf16.msra.mxu1 %v504_v2  ;;  %463 = vmatpush3.bf16.msra.mxu0 %v504_v2 }
   0xc   :  { %489 = vmatprep.subr.bf16.mxu1 %v505_v3  ;;  %464 = vmatprep.subr.bf16.mxu0 %v505_v3 }
   0xf   :  { %497 = vmatpush3.bf16.msra.mxu1 %v505_v3  ;;  %465 = vmatpush3.bf16.msra.mxu0 %v505_v3 }
  0x10   :  { %490 = vmatprep.subr.bf16.mxu1 %v506_v6  ;;  %466 = vmatprep.subr.bf16.mxu0 %v506_v6 }
  0x13   :  { %498 = vmatpush3.bf16.msra.mxu1 %v506_v6  ;;  %467 = vmatpush3.bf16.msra.mxu0 %v506_v6 }
  0x14   :  { %491 = vmatprep.subr.bf16.mxu1 %v507_v7  ;;  %468 = vmatprep.subr.bf16.mxu0 %v507_v7 }
  0x17   :  { %499 = vmatpush3.bf16.msra.mxu1 %v507_v7  ;;  %469 = vmatpush3.bf16.msra.mxu0 %v507_v7 }
  0x18   :  { %492 = vmatprep.subr.bf16.mxu1 %v508_v8  ;;  %470 = vmatprep.subr.bf16.mxu0 %v508_v8 }
  0x1b   :  { %500 = vmatpush3.bf16.msra.mxu1 %v508_v8  ;;  %471 = vmatpush3.bf16.msra.mxu0 %v508_v8 }
  0x1c   :  { %493 = vmatprep.subr.bf16.mxu1 %v509_v9  ;;  %472 = vmatprep.subr.bf16.mxu0 %v509_v9 }
  0x1f   :  { %501 = vmatpush3.bf16.msra.mxu1 %v509_v9  ;;  %473 = vmatpush3.bf16.msra.mxu0 %v509_v9 }
  0x22   :  { %479 = vmatmul.mubr.bf16.vlgmr.msra.gmra.mrb[0].mxu1 %v511_v10  ;;  %475 = vmatmul.mubr.bf16.vlgmr.msra.gmra.mrb[0].mxu0 %v513_v11 }
  0x23   :  { %482 = vmatprep.mubr.bf16.mxu1 %v514_v12 }
  0x2a   :  { %483 = vmatmul.mubr.bf16.gmra.mrb[4].mxu1 %v515_v13 }
  0xf5   :  { %v480_v15 = vpop.f32.mrb[0].mxu1  ;;  %v476_v16 = vpop.f32.mrb[0].mxu0 }
  0xf6   :  { %v288_v17 = vadd.f32 %v480_v15, %v384_v14  ;;  %v205_v18 = vpop.f32.mrb[1].mxu1  ;;  %v284_v19 = vadd.f32 %v476_v16, %v384_v14  ;;  %v189_v20 = vpop.f32.mrb[1].mxu0 }
  0xf7   :  { %v286_v21 = vadd.f32 %v384_v14, %v205_v18  ;;  %v481_v22 = vpop.f32.mrb[2].mxu1  ;;  %v282_v23 = vadd.f32 %v384_v14, %v189_v20  ;;  %v477_v24 = vpop.f32.mrb[2].mxu0 }
  0xf8   :  { %v289_v25 = vadd.f32 %v481_v22, %v384_v14  ;;  %v208_v26 = vpop.f32.mrb[3].mxu1  ;;  %v296_v27 = vmax.f32 %v284_v19, 0.0  ;;  %v285_v28 = vadd.f32 %v477_v24, %v384_v14  ;;  %v192_v29 = vpop.f32.mrb[3].mxu0  ;;  %v300_v33 = vmax.f32 %v288_v17, 0.0 }
  0xf9   :  { %v287_v30 = vadd.f32 %v384_v14, %v208_v26  ;;  %v294_v31 = vmax.f32 %v282_v23, 0.0  ;;  %v283_v32 = vadd.f32 %v384_v14, %v192_v29  ;;  %v298_v36 = vmax.f32 %v286_v21, 0.0 }
  0xfa   :  { %v301_v34 = vmax.f32 %v289_v25, 0.0  ;;  %v297_v35 = vmax.f32 %v285_v28, 0.0 }
  0xfb   :  { %v299_v37 = vmax.f32 %v287_v30, 0.0  ;;  %v295_v38 = vmax.f32 %v283_v32, 0.0 }
  0xfc   :  { %v427_v39 = vpack.c.bf16 %v301_v34, %v300_v33  ;;  %v417_v40 = vpack.c.bf16 %v297_v35, %v296_v27 }
  0xfd   :  { %v422_v41 = vpack.c.bf16 %v299_v37, %v298_v36  ;;  %v412_v42 = vpack.c.bf16 %v295_v38, %v294_v31  ;;  %v484_v43 = vpop.f32.mrb[4].mxu1 }
  0xfe   :  { %441 = vst [vmem:[%s602_s3 + $0x18] sm:$0xff] %v427_v39   ;;  %439 = vst [vmem:[%s602_s3 + $0x8] sm:$0xff] %v417_v40   ;;  %v292_v44 = vadd.f32 %v484_v43, %v384_v14  ;;  %v221_v45 = vpop.f32.mrb[5].mxu1 }
  0xff   :  { %440 = vst [vmem:[%s602_s3 + $0x10] sm:$0xff] %v422_v41   ;;  %413 = vst [vmem:[%s602_s3] sm:$0xff] %v412_v42   ;;  %v290_v46 = vadd.f32 %v384_v14, %v221_v45  ;;  %v485_v47 = vpop.f32.mrb[6].mxu1 }
 0x100   :  { %v293_v48 = vadd.f32 %v485_v47, %v384_v14  ;;  %v224_v49 = vpop.f32.mrb[7].mxu1  ;;  %v304_v51 = vmax.f32 %v292_v44, 0.0 }
 0x101   :  { %v291_v50 = vadd.f32 %v384_v14, %v224_v49  ;;  %v302_v53 = vmax.f32 %v290_v46, 0.0 }
 0x102   :  { %v305_v52 = vmax.f32 %v293_v48, 0.0 }
 0x103   :  { %v303_v54 = vmax.f32 %v291_v50, 0.0 }
 0x104   :  { %v437_v55 = vpack.c.bf16 %v305_v52, %v304_v51 }
 0x105   :  { %v432_v56 = vpack.c.bf16 %v303_v54, %v302_v53 }
 0x106   :  { %443 = vst [vmem:[%s602_s3 + $0x28] sm:$0xff] %v437_v55  }
 0x107   :  { %442 = vst [vmem:[%s602_s3 + $0x20] sm:$0xff] %v432_v56  }

// kernel: _lambda_.14
= control target key start
LH: loop header
LB: loop body
LE: loop exit
PB: predicated region body
PF: predicated region fallthrough
CT: control target
= control target key end

     0   :  { %v596_v1 = vmov 0   ;;  %v381_v23 = vlaneseq  ;;  %s736_s1 = inlined_call_operand.vmem [shape: bf16[128,256], index: 1, kind: input, shape index: {}]   ;;  %s737_s0 = inlined_call_operand.vmem [shape: bf16[96,128], index: 0, kind: input, shape index: {}]   ;;  %s738_s2 = inlined_call_operand.vmem [shape: f32[1,256], index: 2, kind: input, shape index: {}]   ;;  %s739_s3 = inlined_call_operand.vmem [shape: bf16[96,256], index: 3, kind: output, shape index: {}]  }
   0x1   :  { %v566_v0 = vld [vmem:[%s736_s1 + $0x4] ss:$8 sps:$4 sm:$0xff]   ;;  %243 = vmatprep.mubr.bf16.mxu0 %v596_v1  ;;  %273 = vmatprep.mubr.bf16.mxu1 %v596_v1  ;;  %v568_v2 = vld [vmem:[%s736_s1] ss:$8 sps:$4 sm:$0xff]   ;;  %v569_v3 = vld [vmem:[%s736_s1 + $0x14] ss:$8 sps:$4 sm:$0xff]  }
   0x2   :  { %211 = vmatprep.subr.bf16.mxu0 %v566_v0  ;;  %549 = vmatprep.subr.bf16.mxu1 %v566_v0  ;;  %v571_v4 = vld [vmem:[%s736_s1 + $0x10] ss:$8 sps:$4 sm:$0xff]   ;;  %v572_v5 = vld [vmem:[%s736_s1 + $0x24] ss:$8 sps:$4 sm:$0xff]   ;;  %v574_v6 = vld [vmem:[%s736_s1 + $0x20] ss:$8 sps:$4 sm:$0xff]  }
   0x3   :  { %212 = vmatpush1.bf16.msra.mxu0 %v568_v2  ;;  %557 = vmatpush1.bf16.msra.mxu1 %v568_v2  ;;  %v575_v7 = vld [vmem:[%s736_s1 + $0x34] ss:$8 sps:$4 sm:$0xff]   ;;  %v577_v8 = vld [vmem:[%s736_s1 + $0x30] ss:$8 sps:$4 sm:$0xff]   ;;  %v578_v9 = vld [vmem:[%s736_s1 + $0x44] ss:$8 sps:$4 sm:$0xff]  }
   0x4   :  { %213 = vmatprep.subr.bf16.mxu0 %v569_v3  ;;  %550 = vmatprep.subr.bf16.mxu1 %v569_v3  ;;  %v580_v10 = vld [vmem:[%s736_s1 + $0x40] ss:$8 sps:$4 sm:$0xff]   ;;  %v581_v11 = vld [vmem:[%s736_s1 + $0x54] ss:$8 sps:$4 sm:$0xff]   ;;  %v583_v12 = vld [vmem:[%s736_s1 + $0x50] ss:$8 sps:$4 sm:$0xff]  }
   0x5   :  { %v584_v13 = vld [vmem:[%s736_s1 + $0x64] ss:$8 sps:$4 sm:$0xff]   ;;  %v586_v14 = vld [vmem:[%s736_s1 + $0x60] ss:$8 sps:$4 sm:$0xff]   ;;  %v587_v15 = vld [vmem:[%s736_s1 + $0x74] ss:$8 sps:$4 sm:$0xff]  }
   0x6   :  { %v589_v16 = vld [vmem:[%s736_s1 + $0x70] ss:$8 sps:$4 sm:$0xff]   ;;  %v590_v17 = vld [vmem:[%s737_s0] sm:$0xff]   ;;  %v592_v19 = vld [vmem:[%s737_s0 + $0x8] sm:$0xff]   ;;  %v382_v24 = vshrl.u32 %v381_v23, 7 }
   0x7   :  { %214 = vmatpush1.bf16.msra.mxu0 %v571_v4  ;;  %558 = vmatpush1.bf16.msra.mxu1 %v571_v4  ;;  %v591_v18 = vld [vmem:[%s737_s0 + $0x18] sm:$0xff]   ;;  %v593_v20 = vld [vmem:[%s737_s0 + $0x20] sm:$0xff]   ;;  %v594_v21 = vld [vmem:[%s737_s0 + $0x10] sm:$0xff]  }
   0x8   :  { %215 = vmatprep.subr.bf16.mxu0 %v572_v5  ;;  %551 = vmatprep.subr.bf16.mxu1 %v572_v5  ;;  %v595_v22 = vld [vmem:[%s737_s0 + $0x28] sm:$0xff]   ;;  %v383_v25 = vsub.s32 0, %v382_v24  ;;  %v379_v26 = vld [vmem:[%s738_s2] sm:$0x3]  ;;  %v387_v27 = vsub.s32 1, %v382_v24 }
   0xa   :  { %v384_v28 = vrot.slane %v379_v26, %v383_v25  ;;  %v686_v29 = vrot.slane %v379_v26, %v387_v27 }
   0xb   :  { %216 = vmatpush1.bf16.msra.mxu0 %v574_v6  ;;  %559 = vmatpush1.bf16.msra.mxu1 %v574_v6 }
   0xc   :  { %217 = vmatprep.subr.bf16.mxu0 %v575_v7  ;;  %552 = vmatprep.subr.bf16.mxu1 %v575_v7 }
   0xf   :  { %218 = vmatpush1.bf16.msra.mxu0 %v577_v8  ;;  %560 = vmatpush1.bf16.msra.mxu1 %v577_v8 }
  0x10   :  { %219 = vmatprep.subr.bf16.mxu0 %v578_v9  ;;  %553 = vmatprep.subr.bf16.mxu1 %v578_v9 }
  0x13   :  { %220 = vmatpush1.bf16.msra.mxu0 %v580_v10  ;;  %561 = vmatpush1.bf16.msra.mxu1 %v580_v10 }
  0x14   :  { %221 = vmatprep.subr.bf16.mxu0 %v581_v11  ;;  %554 = vmatprep.subr.bf16.mxu1 %v581_v11 }
  0x17   :  { %222 = vmatpush1.bf16.msra.mxu0 %v583_v12  ;;  %562 = vmatpush1.bf16.msra.mxu1 %v583_v12 }
  0x18   :  { %223 = vmatprep.subr.bf16.mxu0 %v584_v13  ;;  %555 = vmatprep.subr.bf16.mxu1 %v584_v13 }
  0x1b   :  { %224 = vmatpush1.bf16.msra.mxu0 %v586_v14  ;;  %563 = vmatpush1.bf16.msra.mxu1 %v586_v14 }
  0x1c   :  { %225 = vmatprep.subr.bf16.mxu0 %v587_v15  ;;  %556 = vmatprep.subr.bf16.mxu1 %v587_v15 }
  0x1f   :  { %226 = vmatpush1.bf16.msra.mxu0 %v589_v16  ;;  %564 = vmatpush1.bf16.msra.mxu1 %v589_v16 }
  0x22   :  { %244 = vmatmul.mubr.bf16.vlgmr.msra.gmra.mrb[0].mxu0 %v590_v17  ;;  %274 = vmatmul.mubr.bf16.vlgmr.msra.gmra.mrb[0].mxu1 %v591_v18 }
  0x23   :  { %253 = vmatprep.mubr.bf16.mxu0 %v596_v1  ;;  %283 = vmatprep.mubr.bf16.mxu1 %v596_v1 }
  0x2a   :  { %254 = vmatmul.mubr.bf16.gmra.mrb[4].mxu0 %v592_v19  ;;  %284 = vmatmul.mubr.bf16.gmra.mrb[4].mxu1 %v593_v20 }
  0x2b   :  { %263 = vmatprep.mubr.bf16.mxu0 %v596_v1  ;;  %293 = vmatprep.mubr.bf16.mxu1 %v596_v1 }
  0x32   :  { %264 = vmatmul.mubr.bf16.gmra.mrb[8].mxu0 %v594_v21  ;;  %294 = vmatmul.mubr.bf16.gmra.mrb[8].mxu1 %v595_v22 }
  0xf5   :  { %v245_v30 = vpop.f32.mrb[0].mxu0  ;;  %v275_v31 = vpop.f32.mrb[0].mxu1 }
  0xf6   :  { %v391_v32 = vadd.f32 %v384_v28, %v245_v30  ;;  %v403_v33 = vadd.f32 %v384_v28, %v275_v31  ;;  %v247_v34 = vpop.f32.mrb[1].mxu0  ;;  %v277_v35 = vpop.f32.mrb[1].mxu1 }
  0xf7   :  { %v392_v36 = vadd.f32 %v686_v29, %v247_v34  ;;  %v404_v37 = vadd.f32 %v686_v29, %v277_v35  ;;  %v249_v38 = vpop.f32.mrb[2].mxu0  ;;  %v279_v39 = vpop.f32.mrb[2].mxu1 }
  0xf8   :  { %v393_v40 = vadd.f32 %v384_v28, %v249_v38  ;;  %v405_v41 = vadd.f32 %v384_v28, %v279_v39  ;;  %v251_v42 = vpop.f32.mrb[3].mxu0  ;;  %v281_v43 = vpop.f32.mrb[3].mxu1 }
  0xf9   :  { %v537_v44 = vpack.c.bf16 %v392_v36, %v391_v32  ;;  %v543_v45 = vpack.c.bf16 %v404_v37, %v403_v33  ;;  %v394_v46 = vadd.f32 %v686_v29, %v251_v42  ;;  %v406_v47 = vadd.f32 %v686_v29, %v281_v43 }
  0xfb   :  { %487 = vst [vmem:[%s739_s3] sm:$0xff] %v537_v44  ;;  %493 = vst [vmem:[%s739_s3 + $0x30] sm:$0xff] %v543_v45  ;;  %v538_v48 = vpack.c.bf16 %v394_v46, %v393_v40  ;;  %v544_v49 = vpack.c.bf16 %v406_v47, %v405_v41 }
  0xfd   :  { %488 = vst [vmem:[%s739_s3 + $0x8] sm:$0xff] %v538_v48  ;;  %494 = vst [vmem:[%s739_s3 + $0x38] sm:$0xff] %v544_v49  ;;  %v255_v50 = vpop.f32.mrb[4].mxu0  ;;  %v285_v51 = vpop.f32.mrb[4].mxu1 }
  0xfe   :  { %v395_v52 = vadd.f32 %v384_v28, %v255_v50  ;;  %v407_v53 = vadd.f32 %v384_v28, %v285_v51  ;;  %v257_v54 = vpop.f32.mrb[5].mxu0  ;;  %v287_v55 = vpop.f32.mrb[5].mxu1 }
  0xff   :  { %v396_v56 = vadd.f32 %v686_v29, %v257_v54  ;;  %v408_v57 = vadd.f32 %v686_v29, %v287_v55  ;;  %v259_v58 = vpop.f32.mrb[6].mxu0  ;;  %v289_v59 = vpop.f32.mrb[6].mxu1 }
 0x100   :  { %v397_v60 = vadd.f32 %v384_v28, %v259_v58  ;;  %v409_v61 = vadd.f32 %v384_v28, %v289_v59  ;;  %v261_v62 = vpop.f32.mrb[7].mxu0  ;;  %v291_v63 = vpop.f32.mrb[7].mxu1 }
 0x101   :  { %v539_v0 = vpack.c.bf16 %v396_v56, %v395_v52  ;;  %v545_v1 = vpack.c.bf16 %v408_v57, %v407_v53  ;;  %v398_v2 = vadd.f32 %v686_v29, %v261_v62  ;;  %v410_v3 = vadd.f32 %v686_v29, %v291_v63 }
 0x103   :  { %489 = vst [vmem:[%s739_s3 + $0x10] sm:$0xff] %v539_v0  ;;  %495 = vst [vmem:[%s739_s3 + $0x40] sm:$0xff] %v545_v1  ;;  %v540_v4 = vpack.c.bf16 %v398_v2, %v397_v60  ;;  %v546_v5 = vpack.c.bf16 %v410_v3, %v409_v61 }
 0x105   :  { %490 = vst [vmem:[%s739_s3 + $0x18] sm:$0xff] %v540_v4  ;;  %496 = vst [vmem:[%s739_s3 + $0x48] sm:$0xff] %v546_v5  ;;  %v265_v6 = vpop.f32.mrb[8].mxu0  ;;  %v295_v7 = vpop.f32.mrb[8].mxu1 }
 0x106   :  { %v399_v8 = vadd.f32 %v384_v28, %v265_v6  ;;  %v411_v9 = vadd.f32 %v384_v28, %v295_v7  ;;  %v267_v10 = vpop.f32.mrb[9].mxu0  ;;  %v297_v11 = vpop.f32.mrb[9].mxu1 }
 0x107   :  { %v400_v12 = vadd.f32 %v686_v29, %v267_v10  ;;  %v412_v13 = vadd.f32 %v686_v29, %v297_v11  ;;  %v269_v14 = vpop.f32.mrb[10].mxu0  ;;  %v299_v15 = vpop.f32.mrb[10].mxu1 }
 0x108   :  { %v401_v16 = vadd.f32 %v384_v28, %v269_v14  ;;  %v413_v17 = vadd.f32 %v384_v28, %v299_v15  ;;  %v271_v18 = vpop.f32.mrb[11].mxu0  ;;  %v301_v19 = vpop.f32.mrb[11].mxu1 }
 0x109   :  { %v541_v20 = vpack.c.bf16 %v400_v12, %v399_v8  ;;  %v547_v21 = vpack.c.bf16 %v412_v13, %v411_v9  ;;  %v402_v22 = vadd.f32 %v686_v29, %v271_v18  ;;  %v414_v23 = vadd.f32 %v686_v29, %v301_v19 }
 0x10b   :  { %491 = vst [vmem:[%s739_s3 + $0x20] sm:$0xff] %v541_v20  ;;  %497 = vst [vmem:[%s739_s3 + $0x50] sm:$0xff] %v547_v21  ;;  %v542_v24 = vpack.c.bf16 %v402_v22, %v401_v16  ;;  %v548_v25 = vpack.c.bf16 %v414_v23, %v413_v17 }
 0x10d   :  { %492 = vst [vmem:[%s739_s3 + $0x28] sm:$0xff] %v542_v24  ;;  %498 = vst [vmem:[%s739_s3 + $0x58] sm:$0xff] %v548_v25 }

// kernel: _lambda_.17
= control target key start
LH: loop header
LB: loop body
LE: loop exit
PB: predicated region body
PF: predicated region fallthrough
CT: control target
= control target key end

     0   :  { %v683_v1 = vmov 0   ;;  %v384_v23 = vlaneseq  ;;  %s922_s1 = inlined_call_operand.vmem [shape: bf16[128,256], index: 1, kind: input, shape index: {}]   ;;  %s923_s0 = inlined_call_operand.vmem [shape: bf16[96,128], index: 0, kind: input, shape index: {}]   ;;  %s924_s2 = inlined_call_operand.vmem [shape: f32[1,256], index: 2, kind: input, shape index: {}]   ;;  %s925_s3 = inlined_call_operand.vmem [shape: bf16[96,256], index: 3, kind: input, shape index: {}]   ;;  %s926_s4 = inlined_call_operand.vmem [shape: bf16[96,256], index: 4, kind: output, shape index: {}]  }
   0x1   :  { %v653_v0 = vld [vmem:[%s922_s1 + $0x4] ss:$8 sps:$4 sm:$0xff]   ;;  %246 = vmatprep.mubr.bf16.mxu0 %v683_v1  ;;  %276 = vmatprep.mubr.bf16.mxu1 %v683_v1  ;;  %v655_v2 = vld [vmem:[%s922_s1] ss:$8 sps:$4 sm:$0xff]   ;;  %v656_v3 = vld [vmem:[%s922_s1 + $0x14] ss:$8 sps:$4 sm:$0xff]  }
   0x2   :  { %214 = vmatprep.subr.bf16.mxu0 %v653_v0  ;;  %636 = vmatprep.subr.bf16.mxu1 %v653_v0  ;;  %v658_v4 = vld [vmem:[%s922_s1 + $0x10] ss:$8 sps:$4 sm:$0xff]   ;;  %v659_v5 = vld [vmem:[%s922_s1 + $0x24] ss:$8 sps:$4 sm:$0xff]   ;;  %v661_v6 = vld [vmem:[%s922_s1 + $0x20] ss:$8 sps:$4 sm:$0xff]  }
   0x3   :  { %215 = vmatpush1.bf16.msra.mxu0 %v655_v2  ;;  %644 = vmatpush1.bf16.msra.mxu1 %v655_v2  ;;  %v662_v7 = vld [vmem:[%s922_s1 + $0x34] ss:$8 sps:$4 sm:$0xff]   ;;  %v664_v8 = vld [vmem:[%s922_s1 + $0x30] ss:$8 sps:$4 sm:$0xff]   ;;  %v665_v9 = vld [vmem:[%s922_s1 + $0x44] ss:$8 sps:$4 sm:$0xff]  }
   0x4   :  { %216 = vmatprep.subr.bf16.mxu0 %v656_v3  ;;  %637 = vmatprep.subr.bf16.mxu1 %v656_v3  ;;  %v667_v10 = vld [vmem:[%s922_s1 + $0x40] ss:$8 sps:$4 sm:$0xff]   ;;  %v668_v11 = vld [vmem:[%s922_s1 + $0x54] ss:$8 sps:$4 sm:$0xff]   ;;  %v670_v12 = vld [vmem:[%s922_s1 + $0x50] ss:$8 sps:$4 sm:$0xff]  }
   0x5   :  { %v671_v13 = vld [vmem:[%s922_s1 + $0x64] ss:$8 sps:$4 sm:$0xff]   ;;  %v673_v14 = vld [vmem:[%s922_s1 + $0x60] ss:$8 sps:$4 sm:$0xff]   ;;  %v674_v15 = vld [vmem:[%s922_s1 + $0x74] ss:$8 sps:$4 sm:$0xff]  }
   0x6   :  { %v676_v16 = vld [vmem:[%s922_s1 + $0x70] ss:$8 sps:$4 sm:$0xff]   ;;  %v677_v17 = vld [vmem:[%s923_s0] sm:$0xff]   ;;  %v679_v19 = vld [vmem:[%s923_s0 + $0x8] sm:$0xff]   ;;  %v385_v24 = vshrl.u32 %v384_v23, 7 }
   0x7   :  { %217 = vmatpush1.bf16.msra.mxu0 %v658_v4  ;;  %645 = vmatpush1.bf16.msra.mxu1 %v658_v4  ;;  %v678_v18 = vld [vmem:[%s923_s0 + $0x18] sm:$0xff]   ;;  %v680_v20 = vld [vmem:[%s923_s0 + $0x20] sm:$0xff]   ;;  %v681_v21 = vld [vmem:[%s923_s0 + $0x10] sm:$0xff]  }
   0x8   :  { %218 = vmatprep.subr.bf16.mxu0 %v659_v5  ;;  %638 = vmatprep.subr.bf16.mxu1 %v659_v5  ;;  %v682_v22 = vld [vmem:[%s923_s0 + $0x28] sm:$0xff]   ;;  %v386_v25 = vsub.s32 0, %v385_v24  ;;  %v390_v26 = vsub.s32 1, %v385_v24  ;;  %v382_v27 = vld [vmem:[%s924_s2] sm:$0x3]  ;;  %v424_v29 = vld [vmem:[%s925_s3 + $0x30] sm:$0xff] }
   0x9   :  { %v418_v28 = vld [vmem:[%s925_s3] sm:$0xff]  ;;  %v419_v30 = vld [vmem:[%s925_s3 + $0x8] sm:$0xff]  ;;  %v425_v31 = vld [vmem:[%s925_s3 + $0x38] sm:$0xff]  ;;  %v442_v37 = vunpack.c.l.bf16 %v424_v29  ;;  %v443_v39 = vunpack.c.h.bf16 %v424_v29 }
   0xa   :  { %v790_v32 = vrot.slane %v382_v27, %v386_v25  ;;  %v792_v33 = vrot.slane %v382_v27, %v390_v26  ;;  %v797_v34 = vld [vmem:[%s925_s3 + $0x10] sm:$0xff]  ;;  %v802_v35 = vld [vmem:[%s925_s3 + $0x40] sm:$0xff]  ;;  %v430_v36 = vunpack.c.l.bf16 %v418_v28  ;;  %v431_v38 = vunpack.c.h.bf16 %v418_v28  ;;  %v807_v40 = vld [vmem:[%s925_s3 + $0x18] sm:$0xff] }
   0xb   :  { %219 = vmatpush1.bf16.msra.mxu0 %v661_v6  ;;  %646 = vmatpush1.bf16.msra.mxu1 %v661_v6  ;;  %v812_v41 = vld [vmem:[%s925_s3 + $0x48] sm:$0xff]  ;;  %v432_v42 = vunpack.c.l.bf16 %v419_v30  ;;  %v444_v43 = vunpack.c.l.bf16 %v425_v31  ;;  %v433_v44 = vunpack.c.h.bf16 %v419_v30  ;;  %v445_v45 = vunpack.c.h.bf16 %v425_v31 }
   0xc   :  { %220 = vmatprep.subr.bf16.mxu0 %v662_v7  ;;  %639 = vmatprep.subr.bf16.mxu1 %v662_v7  ;;  %v434_v48 = vunpack.c.l.bf16 %v797_v34  ;;  %v446_v49 = vunpack.c.l.bf16 %v802_v35  ;;  %v435_v50 = vunpack.c.h.bf16 %v797_v34  ;;  %v447_v51 = vunpack.c.h.bf16 %v802_v35 }
   0xd   :  { %v436_v56 = vunpack.c.l.bf16 %v807_v40  ;;  %v448_v57 = vunpack.c.l.bf16 %v812_v41  ;;  %v437_v62 = vunpack.c.h.bf16 %v807_v40  ;;  %v449_v63 = vunpack.c.h.bf16 %v812_v41 }
   0xf   :  { %221 = vmatpush1.bf16.msra.mxu0 %v664_v8  ;;  %647 = vmatpush1.bf16.msra.mxu1 %v664_v8 }
  0x10   :  { %222 = vmatprep.subr.bf16.mxu0 %v665_v9  ;;  %640 = vmatprep.subr.bf16.mxu1 %v665_v9 }
  0x13   :  { %223 = vmatpush1.bf16.msra.mxu0 %v667_v10  ;;  %648 = vmatpush1.bf16.msra.mxu1 %v667_v10  ;;  %v833_v10 = vld [vmem:[%s925_s3 + $0x20] sm:$0xff] }
  0x14   :  { %224 = vmatprep.subr.bf16.mxu0 %v668_v11  ;;  %641 = vmatprep.subr.bf16.mxu1 %v668_v11  ;;  %v838_v11 = vld [vmem:[%s925_s3 + $0x50] sm:$0xff] }
  0x15   :  { %v450_v23 = vunpack.c.l.bf16 %v838_v11 }
  0x17   :  { %225 = vmatpush1.bf16.msra.mxu0 %v670_v12  ;;  %649 = vmatpush1.bf16.msra.mxu1 %v670_v12 }
  0x18   :  { %226 = vmatprep.subr.bf16.mxu0 %v671_v13  ;;  %642 = vmatprep.subr.bf16.mxu1 %v671_v13 }
  0x1b   :  { %227 = vmatpush1.bf16.msra.mxu0 %v673_v14  ;;  %650 = vmatpush1.bf16.msra.mxu1 %v673_v14 }
  0x1c   :  { %228 = vmatprep.subr.bf16.mxu0 %v674_v15  ;;  %643 = vmatprep.subr.bf16.mxu1 %v674_v15 }
  0x1f   :  { %229 = vmatpush1.bf16.msra.mxu0 %v676_v16  ;;  %651 = vmatpush1.bf16.msra.mxu1 %v676_v16 }
  0x22   :  { %247 = vmatmul.mubr.bf16.vlgmr.msra.gmra.mrb[0].mxu0 %v677_v17  ;;  %277 = vmatmul.mubr.bf16.vlgmr.msra.gmra.mrb[0].mxu1 %v678_v18 }
  0x23   :  { %256 = vmatprep.mubr.bf16.mxu0 %v683_v1  ;;  %286 = vmatprep.mubr.bf16.mxu1 %v683_v1 }
  0x2a   :  { %257 = vmatmul.mubr.bf16.gmra.mrb[4].mxu0 %v679_v19  ;;  %287 = vmatmul.mubr.bf16.gmra.mrb[4].mxu1 %v680_v20 }
  0x2b   :  { %266 = vmatprep.mubr.bf16.mxu0 %v683_v1  ;;  %296 = vmatprep.mubr.bf16.mxu1 %v683_v1 }
  0x32   :  { %267 = vmatmul.mubr.bf16.gmra.mrb[8].mxu0 %v681_v21  ;;  %297 = vmatmul.mubr.bf16.gmra.mrb[8].mxu1 %v682_v22  ;;  %v438_v22 = vunpack.c.l.bf16 %v833_v10 }
  0xf5   :  { %v248_v46 = vpop.f32.mrb[0].mxu0  ;;  %v278_v47 = vpop.f32.mrb[0].mxu1 }
  0xf6   :  { %v394_v52 = vadd.f32 %v790_v32, %v248_v46  ;;  %v406_v53 = vadd.f32 %v790_v32, %v278_v47  ;;  %v250_v54 = vpop.f32.mrb[1].mxu0  ;;  %v280_v55 = vpop.f32.mrb[1].mxu1 }
  0xf7   :  { %v395_v58 = vadd.f32 %v792_v33, %v250_v54  ;;  %v407_v59 = vadd.f32 %v792_v33, %v280_v55  ;;  %v252_v60 = vpop.f32.mrb[2].mxu0  ;;  %v282_v61 = vpop.f32.mrb[2].mxu1 }
  0xf8   :  { %v454_v0 = vadd.f32 %v430_v36, %v394_v52  ;;  %v466_v1 = vadd.f32 %v442_v37, %v406_v53  ;;  %v396_v2 = vadd.f32 %v790_v32, %v252_v60  ;;  %v408_v3 = vadd.f32 %v790_v32, %v282_v61  ;;  %v254_v4 = vpop.f32.mrb[3].mxu0  ;;  %v284_v5 = vpop.f32.mrb[3].mxu1 }
  0xf9   :  { %v455_v6 = vadd.f32 %v431_v38, %v395_v58  ;;  %v467_v7 = vadd.f32 %v443_v39, %v407_v59  ;;  %v397_v8 = vadd.f32 %v792_v33, %v254_v4  ;;  %v409_v9 = vadd.f32 %v792_v33, %v284_v5 }
  0xfa   :  { %v478_v12 = vmax.f32 %v454_v0, 0.0  ;;  %v490_v13 = vmax.f32 %v466_v1, 0.0  ;;  %v456_v14 = vadd.f32 %v432_v42, %v396_v2  ;;  %v468_v15 = vadd.f32 %v444_v43, %v408_v3  ;;  %v423_v0 = vld [vmem:[%s925_s3 + $0x28] sm:$0xff]  ;;  %v429_v1 = vld [vmem:[%s925_s3 + $0x58] sm:$0xff] }
  0xfb   :  { %v479_v16 = vmax.f32 %v455_v6, 0.0  ;;  %v491_v17 = vmax.f32 %v467_v7, 0.0  ;;  %v457_v18 = vadd.f32 %v433_v44, %v397_v8  ;;  %v469_v19 = vadd.f32 %v445_v45, %v409_v9 }
  0xfc   :  { %v480_v20 = vmax.f32 %v456_v14, 0.0  ;;  %v492_v21 = vmax.f32 %v468_v15, 0.0  ;;  %v439_v38 = vunpack.c.h.bf16 %v833_v10  ;;  %v451_v39 = vunpack.c.h.bf16 %v838_v11 }
  0xfd   :  { %v624_v24 = vpack.c.bf16 %v479_v16, %v478_v12  ;;  %v630_v25 = vpack.c.bf16 %v491_v17, %v490_v13  ;;  %v481_v26 = vmax.f32 %v457_v18, 0.0  ;;  %v493_v27 = vmax.f32 %v469_v19, 0.0  ;;  %v258_v28 = vpop.f32.mrb[4].mxu0  ;;  %v288_v29 = vpop.f32.mrb[4].mxu1 }
  0xfe   :  { %v398_v30 = vadd.f32 %v790_v32, %v258_v28  ;;  %v410_v31 = vadd.f32 %v790_v32, %v288_v29  ;;  %v260_v36 = vpop.f32.mrb[5].mxu0  ;;  %v290_v37 = vpop.f32.mrb[5].mxu1  ;;  %v440_v8 = vunpack.c.l.bf16 %v423_v0  ;;  %v452_v9 = vunpack.c.l.bf16 %v429_v1 }
  0xff   :  { %574 = vst [vmem:[%s926_s4] sm:$0xff] %v624_v24  ;;  %580 = vst [vmem:[%s926_s4 + $0x30] sm:$0xff] %v630_v25  ;;  %v625_v42 = vpack.c.bf16 %v481_v26, %v480_v20  ;;  %v631_v43 = vpack.c.bf16 %v493_v27, %v492_v21  ;;  %v399_v44 = vadd.f32 %v792_v33, %v260_v36  ;;  %v262_v46 = vpop.f32.mrb[6].mxu0  ;;  %v292_v47 = vpop.f32.mrb[6].mxu1  ;;  %v453_v19 = vunpack.c.h.bf16 %v429_v1 }
 0x100   :  { %v411_v45 = vadd.f32 %v792_v33, %v290_v37  ;;  %v458_v52 = vadd.f32 %v434_v48, %v398_v30  ;;  %v470_v53 = vadd.f32 %v446_v49, %v410_v31  ;;  %v400_v54 = vadd.f32 %v790_v32, %v262_v46  ;;  %v264_v58 = vpop.f32.mrb[7].mxu0  ;;  %v294_v59 = vpop.f32.mrb[7].mxu1 }
 0x101   :  { %v412_v55 = vadd.f32 %v790_v32, %v292_v47  ;;  %575 = vst [vmem:[%s926_s4 + $0x8] sm:$0xff] %v625_v42  ;;  %581 = vst [vmem:[%s926_s4 + $0x38] sm:$0xff] %v631_v43  ;;  %v459_v60 = vadd.f32 %v435_v50, %v399_v44  ;;  %v401_v49 = vadd.f32 %v792_v33, %v264_v58 }
 0x102   :  { %v471_v48 = vadd.f32 %v447_v51, %v411_v45  ;;  %v413_v61 = vadd.f32 %v792_v33, %v294_v59  ;;  %v482_v2 = vmax.f32 %v458_v52, 0.0  ;;  %v494_v3 = vmax.f32 %v470_v53, 0.0 }
 0x103   :  { %v460_v34 = vadd.f32 %v436_v56, %v400_v54  ;;  %v472_v35 = vadd.f32 %v448_v57, %v412_v55  ;;  %v483_v50 = vmax.f32 %v459_v60, 0.0  ;;  %v461_v4 = vadd.f32 %v437_v62, %v401_v49 }
 0x104   :  { %v495_v51 = vmax.f32 %v471_v48, 0.0  ;;  %v473_v5 = vadd.f32 %v449_v63, %v413_v61  ;;  %v441_v62 = vunpack.c.h.bf16 %v423_v0 }
 0x105   :  { %v484_v6 = vmax.f32 %v460_v34, 0.0  ;;  %v496_v7 = vmax.f32 %v472_v35, 0.0  ;;  %v626_v12 = vpack.c.bf16 %v483_v50, %v482_v2  ;;  %v485_v14 = vmax.f32 %v461_v4, 0.0  ;;  %v268_v56 = vpop.f32.mrb[8].mxu0  ;;  %v298_v16 = vpop.f32.mrb[8].mxu1 }
 0x106   :  { %v632_v13 = vpack.c.bf16 %v495_v51, %v494_v3  ;;  %v497_v15 = vmax.f32 %v473_v5, 0.0  ;;  %v402_v57 = vadd.f32 %v790_v32, %v268_v56  ;;  %v414_v17 = vadd.f32 %v790_v32, %v298_v16  ;;  %v270_v18 = vpop.f32.mrb[9].mxu0  ;;  %v300_v40 = vpop.f32.mrb[9].mxu1 }
 0x107   :  { %576 = vst [vmem:[%s926_s4 + $0x10] sm:$0xff] %v626_v12  ;;  %v627_v41 = vpack.c.bf16 %v485_v14, %v484_v6  ;;  %v403_v20 = vadd.f32 %v792_v33, %v270_v18  ;;  %v415_v21 = vadd.f32 %v792_v33, %v300_v40  ;;  %v272_v24 = vpop.f32.mrb[10].mxu0  ;;  %v302_v25 = vpop.f32.mrb[10].mxu1 }
 0x108   :  { %582 = vst [vmem:[%s926_s4 + $0x40] sm:$0xff] %v632_v13  ;;  %v633_v63 = vpack.c.bf16 %v497_v15, %v496_v7  ;;  %v462_v26 = vadd.f32 %v438_v22, %v402_v57  ;;  %v474_v27 = vadd.f32 %v450_v23, %v414_v17  ;;  %v404_v28 = vadd.f32 %v790_v32, %v272_v24  ;;  %v274_v30 = vpop.f32.mrb[11].mxu0  ;;  %v304_v31 = vpop.f32.mrb[11].mxu1 }
 0x109   :  { %v416_v29 = vadd.f32 %v790_v32, %v302_v25  ;;  %577 = vst [vmem:[%s926_s4 + $0x18] sm:$0xff] %v627_v41  ;;  %v463_v22 = vadd.f32 %v439_v38, %v403_v20  ;;  %v475_v23 = vadd.f32 %v451_v39, %v415_v21  ;;  %v405_v36 = vadd.f32 %v792_v33, %v274_v30 }
 0x10a   :  { %583 = vst [vmem:[%s926_s4 + $0x48] sm:$0xff] %v633_v63  ;;  %v417_v32 = vadd.f32 %v792_v33, %v304_v31  ;;  %v486_v37 = vmax.f32 %v462_v26, 0.0  ;;  %v498_v42 = vmax.f32 %v474_v27, 0.0  ;;  %v464_v43 = vadd.f32 %v440_v8, %v404_v28 }
 0x10b   :  { %v476_v44 = vadd.f32 %v452_v9, %v416_v29  ;;  %v487_v45 = vmax.f32 %v463_v22, 0.0  ;;  %v499_v46 = vmax.f32 %v475_v23, 0.0  ;;  %v465_v47 = vadd.f32 %v441_v62, %v405_v36 }
 0x10c   :  { %v477_v52 = vadd.f32 %v453_v19, %v417_v32  ;;  %v488_v53 = vmax.f32 %v464_v43, 0.0 }
 0x10d   :  { %v500_v54 = vmax.f32 %v476_v44, 0.0  ;;  %v628_v55 = vpack.c.bf16 %v487_v45, %v486_v37  ;;  %v634_v10 = vpack.c.bf16 %v499_v46, %v498_v42  ;;  %v489_v38 = vmax.f32 %v465_v47, 0.0 }
 0x10e   :  { %v501_v58 = vmax.f32 %v477_v52, 0.0 }
 0x10f   :  { %578 = vst [vmem:[%s926_s4 + $0x20] sm:$0xff] %v628_v55  ;;  %584 = vst [vmem:[%s926_s4 + $0x50] sm:$0xff] %v634_v10  ;;  %v629_v33 = vpack.c.bf16 %v489_v38, %v488_v53 }
 0x110   :  { %v635_v11 = vpack.c.bf16 %v501_v58, %v500_v54 }
 0x111   :  { %579 = vst [vmem:[%s926_s4 + $0x28] sm:$0xff] %v629_v33 }
 0x112   :  { %585 = vst [vmem:[%s926_s4 + $0x58] sm:$0xff] %v635_v11 }

// kernel: _lambda_.18
= control target key start
LH: loop header
LB: loop body
LE: loop exit
PB: predicated region body
PF: predicated region fallthrough
CT: control target
= control target key end

     0   :  { %s773_s1 = inlined_call_operand.vmem [shape: bf16[256,128], index: 1, kind: input, shape index: {}]   ;;  %s774_s0 = inlined_call_operand.vmem [shape: bf16[96,256], index: 0, kind: input, shape index: {}]   ;;  %s775_s2 = inlined_call_operand.vmem [shape: f32[1,128], index: 2, kind: input, shape index: {}]   ;;  %s776_s3 = inlined_call_operand.vmem [shape: bf16[96,128], index: 3, kind: output, shape index: {}]  }
   0x1   :  { %v614_v0 = vld [vmem:[%s773_s1 + $0x40] sm:$0xff]   ;;  %v616_v2 = vld [vmem:[%s773_s1 + $0x48] sm:$0xff]   ;;  %v618_v4 = vld [vmem:[%s773_s1 + $0x50] sm:$0xff]  }
   0x2   :  { %v615_v1 = vld [vmem:[%s773_s1] sm:$0xff]   ;;  %546 = vmatprep.subr.bf16.mxu0 %v614_v0  ;;  %598 = vmatprep.subr.bf16.mxu1 %v614_v0  ;;  %v617_v3 = vld [vmem:[%s773_s1 + $0x8] sm:$0xff]   ;;  %v619_v5 = vld [vmem:[%s773_s1 + $0x10] sm:$0xff]  }
   0x3   :  { %547 = vmatpush3.bf16.msra.mxu0 %v615_v1  ;;  %606 = vmatpush3.bf16.msra.mxu1 %v615_v1  ;;  %v620_v6 = vld [vmem:[%s773_s1 + $0x58] sm:$0xff]   ;;  %v622_v8 = vld [vmem:[%s773_s1 + $0x60] sm:$0xff]   ;;  %v624_v10 = vld [vmem:[%s773_s1 + $0x68] sm:$0xff]  }
   0x4   :  { %548 = vmatprep.subr.bf16.mxu0 %v616_v2  ;;  %599 = vmatprep.subr.bf16.mxu1 %v616_v2  ;;  %v621_v7 = vld [vmem:[%s773_s1 + $0x18] sm:$0xff]   ;;  %v623_v9 = vld [vmem:[%s773_s1 + $0x20] sm:$0xff]   ;;  %v625_v13 = vld [vmem:[%s773_s1 + $0x28] sm:$0xff]  }
   0x5   :  { %v632_v11 = vld [vmem:[%s774_s0 + $0x4] ss:$8 sps:$4 sm:$0xff]   ;;  %v635_v12 = vld [vmem:[%s774_s0 + $0x34] ss:$8 sps:$4 sm:$0xff]   ;;  %v630_v18 = vld [vmem:[%s774_s0] ss:$8 sps:$4 sm:$0xff]  }
   0x6   :  { %v626_v14 = vld [vmem:[%s773_s1 + $0x70] sm:$0xff]   ;;  %275 = vmatprep.mubr.bf16.mxu0 %v632_v11  ;;  %299 = vmatprep.mubr.bf16.mxu1 %v635_v12  ;;  %v628_v16 = vld [vmem:[%s773_s1 + $0x78] sm:$0xff]   ;;  %v638_v21 = vld [vmem:[%s774_s0 + $0x44] ss:$8 sps:$4 sm:$0xff]  }
   0x7   :  { %549 = vmatpush3.bf16.msra.mxu0 %v617_v3  ;;  %607 = vmatpush3.bf16.msra.mxu1 %v617_v3  ;;  %v627_v15 = vld [vmem:[%s773_s1 + $0x30] sm:$0xff]   ;;  %v629_v17 = vld [vmem:[%s773_s1 + $0x38] sm:$0xff]   ;;  %v641_v23 = vld [vmem:[%s774_s0 + $0x40] ss:$8 sps:$4 sm:$0xff]  }
   0x8   :  { %550 = vmatprep.subr.bf16.mxu0 %v618_v4  ;;  %600 = vmatprep.subr.bf16.mxu1 %v618_v4  ;;  %v633_v19 = vld [vmem:[%s774_s0 + $0x30] ss:$8 sps:$4 sm:$0xff]   ;;  %v636_v20 = vld [vmem:[%s774_s0 + $0x14] ss:$8 sps:$4 sm:$0xff]   ;;  %v642_v24 = vld [vmem:[%s774_s0 + $0x24] ss:$8 sps:$4 sm:$0xff]  }
   0x9   :  { %v640_v22 = vld [vmem:[%s774_s0 + $0x10] ss:$8 sps:$4 sm:$0xff]   ;;  %v644_v25 = vld [vmem:[%s774_s0 + $0x54] ss:$8 sps:$4 sm:$0xff]   ;;  %v646_v26 = vld [vmem:[%s774_s0 + $0x20] ss:$8 sps:$4 sm:$0xff]  }
   0xa   :  { %v647_v27 = vld [vmem:[%s774_s0 + $0x50] ss:$8 sps:$4 sm:$0xff]   ;;  %v486_v31 = vld [vmem:[%s775_s2] ss:$0 sm:$0xff] }
   0xb   :  { %551 = vmatpush3.bf16.msra.mxu0 %v619_v5  ;;  %608 = vmatpush3.bf16.msra.mxu1 %v619_v5 }
   0xc   :  { %552 = vmatprep.subr.bf16.mxu0 %v620_v6  ;;  %601 = vmatprep.subr.bf16.mxu1 %v620_v6 }
   0xf   :  { %553 = vmatpush3.bf16.msra.mxu0 %v621_v7  ;;  %609 = vmatpush3.bf16.msra.mxu1 %v621_v7 }
  0x10   :  { %554 = vmatprep.subr.bf16.mxu0 %v622_v8  ;;  %602 = vmatprep.subr.bf16.mxu1 %v622_v8 }
  0x13   :  { %555 = vmatpush3.bf16.msra.mxu0 %v623_v9  ;;  %610 = vmatpush3.bf16.msra.mxu1 %v623_v9 }
  0x14   :  { %556 = vmatprep.subr.bf16.mxu0 %v624_v10  ;;  %603 = vmatprep.subr.bf16.mxu1 %v624_v10 }
  0x17   :  { %557 = vmatpush3.bf16.msra.mxu0 %v625_v13  ;;  %611 = vmatpush3.bf16.msra.mxu1 %v625_v13 }
  0x18   :  { %558 = vmatprep.subr.bf16.mxu0 %v626_v14  ;;  %604 = vmatprep.subr.bf16.mxu1 %v626_v14 }
  0x1b   :  { %559 = vmatpush3.bf16.msra.mxu0 %v627_v15  ;;  %612 = vmatpush3.bf16.msra.mxu1 %v627_v15 }
  0x1c   :  { %560 = vmatprep.subr.bf16.mxu0 %v628_v16  ;;  %605 = vmatprep.subr.bf16.mxu1 %v628_v16 }
  0x1f   :  { %561 = vmatpush3.bf16.msra.mxu0 %v629_v17  ;;  %613 = vmatpush3.bf16.msra.mxu1 %v629_v17 }
  0x22   :  { %276 = vmatmul.mubr.bf16.vlgmr.msra.gmra.mrb[0].mxu0 %v630_v18  ;;  %300 = vmatmul.mubr.bf16.vlgmr.msra.gmra.mrb[0].mxu1 %v633_v19 }
  0x23   :  { %283 = vmatprep.mubr.bf16.mxu0 %v636_v20  ;;  %307 = vmatprep.mubr.bf16.mxu1 %v638_v21 }
  0x2a   :  { %284 = vmatmul.mubr.bf16.gmra.mrb[4].mxu0 %v640_v22  ;;  %308 = vmatmul.mubr.bf16.gmra.mrb[4].mxu1 %v641_v23 }
  0x2b   :  { %291 = vmatprep.mubr.bf16.mxu0 %v642_v24  ;;  %315 = vmatprep.mubr.bf16.mxu1 %v644_v25 }
  0x32   :  { %292 = vmatmul.mubr.bf16.gmra.mrb[8].mxu0 %v646_v26  ;;  %316 = vmatmul.mubr.bf16.gmra.mrb[8].mxu1 %v647_v27 }
  0xf5   :  { %v562_v28 = vpop.f32.mrb[0].mxu0  ;;  %v580_v29 = vpop.f32.mrb[0].mxu1 }
  0xf6   :  { %v563_v30 = vpop.f32.mrb[1].mxu0  ;;  %v581_v32 = vpop.f32.mrb[1].mxu1 }
  0xf7   :  { %v564_v33 = vadd.f32 %v563_v30, %v562_v28  ;;  %v582_v34 = vadd.f32 %v581_v32, %v580_v29  ;;  %v565_v35 = vpop.f32.mrb[2].mxu0  ;;  %v583_v36 = vpop.f32.mrb[2].mxu1 }
  0xf8   :  { %v566_v37 = vpop.f32.mrb[3].mxu0  ;;  %v584_v38 = vpop.f32.mrb[3].mxu1 }
  0xf9   :  { %v370_v39 = vadd.f32 %v564_v33, %v486_v31  ;;  %v376_v40 = vadd.f32 %v582_v34, %v486_v31  ;;  %v567_v41 = vadd.f32 %v566_v37, %v565_v35  ;;  %v585_v42 = vadd.f32 %v584_v38, %v583_v36 }
  0xfb   :  { %v371_v43 = vadd.f32 %v567_v41, %v486_v31  ;;  %v377_v44 = vadd.f32 %v585_v42, %v486_v31  ;;  %v382_v45 = vmax.f32 %v370_v39, 0.0  ;;  %v388_v46 = vmax.f32 %v376_v40, 0.0 }
  0xfd   :  { %v383_v47 = vmax.f32 %v371_v43, 0.0  ;;  %v389_v48 = vmax.f32 %v377_v44, 0.0  ;;  %v568_v49 = vpop.f32.mrb[4].mxu0  ;;  %v586_v50 = vpop.f32.mrb[4].mxu1 }
  0xfe   :  { %v569_v51 = vpop.f32.mrb[5].mxu0  ;;  %v587_v52 = vpop.f32.mrb[5].mxu1 }
  0xff   :  { %v514_v53 = vpack.c.bf16 %v383_v47, %v382_v45  ;;  %v529_v54 = vpack.c.bf16 %v389_v48, %v388_v46  ;;  %v570_v55 = vadd.f32 %v569_v51, %v568_v49  ;;  %v588_v56 = vadd.f32 %v587_v52, %v586_v50  ;;  %v571_v57 = vpop.f32.mrb[6].mxu0  ;;  %v589_v58 = vpop.f32.mrb[6].mxu1 }
 0x100   :  { %v572_v59 = vpop.f32.mrb[7].mxu0  ;;  %v590_v60 = vpop.f32.mrb[7].mxu1 }
 0x101   :  { %515 = vst [vmem:[%s776_s3] sm:$0xff] %v514_v53   ;;  %543 = vst [vmem:[%s776_s3 + $0x18] sm:$0xff] %v529_v54   ;;  %v372_v61 = vadd.f32 %v570_v55, %v486_v31  ;;  %v378_v62 = vadd.f32 %v588_v56, %v486_v31  ;;  %v573_v63 = vadd.f32 %v572_v59, %v571_v57 }
 0x102   :  { %v591_v0 = vadd.f32 %v590_v60, %v589_v58 }
 0x103   :  { %v373_v1 = vadd.f32 %v573_v63, %v486_v31  ;;  %v384_v3 = vmax.f32 %v372_v61, 0.0  ;;  %v390_v4 = vmax.f32 %v378_v62, 0.0 }
 0x104   :  { %v379_v2 = vadd.f32 %v591_v0, %v486_v31 }
 0x105   :  { %v385_v5 = vmax.f32 %v373_v1, 0.0  ;;  %v574_v7 = vpop.f32.mrb[8].mxu0  ;;  %v592_v8 = vpop.f32.mrb[8].mxu1 }
 0x106   :  { %v391_v6 = vmax.f32 %v379_v2, 0.0  ;;  %v575_v9 = vpop.f32.mrb[9].mxu0  ;;  %v593_v10 = vpop.f32.mrb[9].mxu1 }
 0x107   :  { %v519_v11 = vpack.c.bf16 %v385_v5, %v384_v3  ;;  %v576_v13 = vadd.f32 %v575_v9, %v574_v7  ;;  %v594_v14 = vadd.f32 %v593_v10, %v592_v8  ;;  %v577_v15 = vpop.f32.mrb[10].mxu0  ;;  %v595_v16 = vpop.f32.mrb[10].mxu1 }
 0x108   :  { %v534_v12 = vpack.c.bf16 %v391_v6, %v390_v4  ;;  %v578_v17 = vpop.f32.mrb[11].mxu0  ;;  %v596_v18 = vpop.f32.mrb[11].mxu1 }
 0x109   :  { %541 = vst [vmem:[%s776_s3 + $0x8] sm:$0xff] %v519_v11   ;;  %v374_v19 = vadd.f32 %v576_v13, %v486_v31  ;;  %v380_v20 = vadd.f32 %v594_v14, %v486_v31  ;;  %v579_v21 = vadd.f32 %v578_v17, %v577_v15  ;;  %v597_v22 = vadd.f32 %v596_v18, %v595_v16 }
 0x10a   :  { %544 = vst [vmem:[%s776_s3 + $0x20] sm:$0xff] %v534_v12  }
 0x10b   :  { %v375_v23 = vadd.f32 %v579_v21, %v486_v31  ;;  %v381_v24 = vadd.f32 %v597_v22, %v486_v31  ;;  %v386_v25 = vmax.f32 %v374_v19, 0.0  ;;  %v392_v26 = vmax.f32 %v380_v20, 0.0 }
 0x10d   :  { %v387_v27 = vmax.f32 %v375_v23, 0.0  ;;  %v393_v28 = vmax.f32 %v381_v24, 0.0 }
 0x10f   :  { %v524_v29 = vpack.c.bf16 %v387_v27, %v386_v25  ;;  %v539_v30 = vpack.c.bf16 %v393_v28, %v392_v26 }
 0x111   :  { %542 = vst [vmem:[%s776_s3 + $0x10] sm:$0xff] %v524_v29   ;;  %545 = vst [vmem:[%s776_s3 + $0x28] sm:$0xff] %v539_v30  }

// kernel: _lambda_.16
= control target key start
LH: loop header
LB: loop body
LE: loop exit
PB: predicated region body
PF: predicated region fallthrough
CT: control target
= control target key end

     0   :  { %v3983_v0 = vmov 0   ;;  %v3984_v37 = vmov 839922192   ;;  %v40_v39 = vlaneseq  ;;  %vm129_vm0 = vsmask.f32 256  ;;  %s5402_s2 = inlined_call_operand.vmem [shape: bf16[9,16,1], index: 2, kind: input, shape index: {}]   ;;  %s5403_s1 = inlined_call_operand.vmem [shape: bf16[3,3,128,128], index: 1, kind: input, shape index: {}]   ;;  %s5404_s0 = inlined_call_operand.vmem [shape: bf16[6,26,128], index: 0, kind: input, shape index: {}]   ;;  %s5405_s3 = inlined_call_operand.vmem [shape: f32[1,128], index: 3, kind: input, shape index: {}]   ;;  %s5406_s4 = inlined_call_operand.vmem [shape: bf16[96,128], index: 4, kind: output, shape index: {}]  }
   0x1   :  { %3898 = vset.pattern.permute.xlu1 %v3983_v0  ;;  %3897 = vset.pattern.permute.xlu0 %v3983_v0  ;;  %v3173_v1 = vld [vmem:[%s5402_s2 + $0x20] sm:$0xf]  ;;  %v3051_v2 = vld [vmem:[%s5402_s2 + $0x8] sm:$0xf]  ;;  %v3174_v3 = vld [vmem:[%s5402_s2 + $0x24] sm:$0xf]  ;;  %v38_v38 = vunpack.c.l.s4 %v3984_v37 }
   0x2   :  { %1284 = vperm.xlu1 %3898, %v3173_v1   ;;  %107 = vperm.xlu0 %3897, %v3051_v2   ;;  %v3052_v4 = vld [vmem:[%s5402_s2 + $0xc] sm:$0xf]  ;;  %v3205_v5 = vld [vmem:[%s5402_s2 + $0x28] sm:$0xf]  ;;  %v30_v6 = vld [vmem:[%s5402_s2] sm:$0xf] }
   0x3   :  { %v3899_v7 = vld [vmem:[%s5403_s1 + $0x40] sm:$0xff]   ;;  %v3901_v10 = vld [vmem:[%s5403_s1 + $0x48] sm:$0xff]   ;;  %v3903_v13 = vld [vmem:[%s5403_s1 + $0x50] sm:$0xff]   ;;  %v39_v40 = vunpack.c.0.s8 %v38_v38  ;;  %v41_v41 = vshrl.u32 %v40_v39, 7  ;;  %vm130_vm1 = vsmask.f32 4368 }
   0x4   :  { %v3900_v8 = vld [vmem:[%s5403_s1 + $0x100] sm:$0xff]   ;;  %3531 = vmatprep.subr.bf16.mxu1 %v3899_v7  ;;  %v3902_v11 = vld [vmem:[%s5403_s1 + $0x108] sm:$0xff]   ;;  %v3904_v14 = vld [vmem:[%s5403_s1 + $0x110] sm:$0xff]   ;;  %vm1306_vm2 = vsmask.f32 2304  ;;  %vm734_vm6 = vcmask 1042432  }
   0x5   :  { %v31_v9 = vld [vmem:[%s5402_s2 + $0x4] sm:$0xf]  ;;  %v3206_v12 = vld [vmem:[%s5402_s2 + $0x2c] sm:$0xf]  ;;  %3643 = vmatprep.subr.bf16.mxu0 %v3900_v8  ;;  %3532 = vmatpush3.bf16.msra.mxu1 %v3899_v7  ;;  %v3097_v15 = vld [vmem:[%s5402_s2 + $0x10] sm:$0xf]  ;;  %v4124_v42 = vsub.s32 %v39_v40, %v41_v41 }
   0x6   :  { %1296 = vperm.xlu1 %3898, %v3174_v3   ;;  %119 = vperm.xlu0 %3897, %v3052_v4   ;;  %v3098_v16 = vld [vmem:[%s5402_s2 + $0x14] sm:$0xf]  ;;  %v3905_v17 = vld [vmem:[%s5403_s1 + $0x58] sm:$0xff]   ;;  %v3243_v19 = vld [vmem:[%s5402_s2 + $0x30] sm:$0xf]  ;;  %vm735_vm7 = vcmask 1046532  }
   0x7   :  { %3644 = vmatpush3.bf16.msra.mxu0 %v3900_v8  ;;  %3533 = vmatprep.subr.bf16.mxu1 %v3901_v10  ;;  %v3906_v18 = vld [vmem:[%s5403_s1 + $0x118] sm:$0xff]   ;;  %v3244_v20 = vld [vmem:[%s5402_s2 + $0x34] sm:$0xf]  ;;  %v3907_v21 = vld [vmem:[%s5403_s1 + $0x60] sm:$0xff]   ;;  %vm1307_vm3 = vsmask.f32 6416 }
   0x8   :  { %3645 = vmatprep.subr.bf16.mxu0 %v3902_v11  ;;  %v3908_v22 = vld [vmem:[%s5403_s1 + $0x120] sm:$0xff]   ;;  %v3135_v23 = vld [vmem:[%s5402_s2 + $0x18] sm:$0xf]  ;;  %v3136_v24 = vld [vmem:[%s5402_s2 + $0x1c] sm:$0xf]  ;;  %vm687_vm14 = vcmask 1040384  }
   0x9   :  { %3534 = vmatpush3.bf16.msra.mxu1 %v3901_v10  ;;  %v3909_v25 = vld [vmem:[%s5403_s1 + $0x68] sm:$0xff]   ;;  %v3275_v27 = vld [vmem:[%s5402_s2 + $0x38] sm:$0xf]  ;;  %v3276_v28 = vld [vmem:[%s5402_s2 + $0x3c] sm:$0xf]  ;;  %vm688_vm15 = vcmask 1044484  }
   0xa   :  { %1713 = vperm.xlu0 %3897, %v3205_v5   ;;  %34 = vperm.xlu1 %3898, %v30_v6   ;;  %v3910_v26 = vld [vmem:[%s5403_s1 + $0x128] sm:$0xff]   ;;  %v3911_v29 = vld [vmem:[%s5403_s1 + $0x70] sm:$0xff]   ;;  %v3307_v30 = vld [vmem:[%s5402_s2 + $0x40] sm:$0xf]  ;;  %vm170_vm8 = vsmask.f32 3328 }
   0xb   :  { %3646 = vmatpush3.bf16.msra.mxu0 %v3902_v11  ;;  %3535 = vmatprep.subr.bf16.mxu1 %v3903_v13  ;;  %v3912_v31 = vld [vmem:[%s5403_s1 + $0x130] sm:$0xff]   ;;  %v3308_v32 = vld [vmem:[%s5402_s2 + $0x44] sm:$0xf]  ;;  %v3913_v33 = vld [vmem:[%s5403_s1 + $0x78] sm:$0xff]   ;;  %vm171_vm9 = vsmask.f32 7440 }
   0xc   :  { %3647 = vmatprep.subr.bf16.mxu0 %v3904_v14  ;;  %v3914_v34 = vld [vmem:[%s5403_s1 + $0x138] sm:$0xff]   ;;  %v4115_v35 = vld [vmem:[%s5403_s1] sm:$0xff]   ;;  %vm4139_vm4 = vmor %vm129_vm0, %vm130_vm1  ;;  %vm1349_vm10 = vsmask.f32 1280  ;;  %vm1350_vm11 = vsmask.f32 5392 }
   0xd   :  { %3536 = vmatpush3.bf16.msra.mxu1 %v3903_v13  ;;  %v4120_v36 = vld [vmem:[%s5403_s1 + $0x140] sm:$0xff]   ;;  %vm1308_vm5 = vmor %vm1306_vm2, %vm1307_vm3  ;;  %vm1002_vm2 = vcmask 1041408   ;;  %vm1003_vm3 = vcmask 1045508  }
   0xe   :  { %46 = vperm.xlu0 %3897, %v31_v9   ;;  %1725 = vperm.xlu1 %3898, %v3206_v12   ;;  %v84_v61 = vld [vmem:[%s5404_s0] sm:$0xf]  ;;  %vm4213_vm12 = vmor %vm170_vm8, %vm171_vm9 }
   0xf   :  { %3648 = vmatpush3.bf16.msra.mxu0 %v3904_v14  ;;  %3537 = vmatprep.subr.bf16.mxu1 %v3905_v17  ;;  %v961_v10 = vld [vmem:[%s5404_s0] sm:$0xc]  ;;  %vm4221_vm13 = vmor %vm734_vm6, %vm735_vm7 }
  0x10   :  { %3649 = vmatprep.subr.bf16.mxu0 %v3906_v18  ;;  %vm4262_vm0 = vmor %vm1349_vm10, %vm1350_vm11 }
  0x11   :  { %3538 = vmatpush3.bf16.msra.mxu1 %v3905_v17  ;;  %vm4302_vm1 = vmor %vm687_vm14, %vm688_vm15 }
  0x12   :  { %663 = vperm.xlu0 %3897, %v3097_v15   ;;  %675 = vperm.xlu1 %3898, %v3098_v16   ;;  %v4153_v16 = vld [vmem:[%s5404_s0 + $0x4] sm:$0xf] }
  0x13   :  { %3650 = vmatpush3.bf16.msra.mxu0 %v3906_v18  ;;  %3539 = vmatprep.subr.bf16.mxu1 %v3907_v21  ;;  %v4160_v18 = vld [vmem:[%s5404_s0 + $0x8] sm:$0x1] }
  0x14   :  { %3651 = vmatprep.subr.bf16.mxu0 %v3908_v22 }
  0x15   :  { %3540 = vmatpush3.bf16.msra.mxu1 %v3907_v21 }
  0x16   :  { %2016 = vperm.xlu0 %3897, %v3243_v19   ;;  %2028 = vperm.xlu1 %3898, %v3244_v20  }
  0x17   :  { %3652 = vmatpush3.bf16.msra.mxu0 %v3908_v22  ;;  %3541 = vmatprep.subr.bf16.mxu1 %v3909_v25 }
  0x18   :  { %3653 = vmatprep.subr.bf16.mxu0 %v3910_v26 }
  0x19   :  { %3542 = vmatpush3.bf16.msra.mxu1 %v3909_v25 }
  0x1a   :  { %978 = vperm.xlu0 %3897, %v3135_v23   ;;  %990 = vperm.xlu1 %3898, %v3136_v24  }
  0x1b   :  { %3654 = vmatpush3.bf16.msra.mxu0 %v3910_v26  ;;  %3543 = vmatprep.subr.bf16.mxu1 %v3911_v29 }
  0x1c   :  { %3655 = vmatprep.subr.bf16.mxu0 %v3912_v31 }
  0x1d   :  { %3544 = vmatpush3.bf16.msra.mxu1 %v3911_v29 }
  0x1e   :  { %2267 = vperm.xlu0 %3897, %v3275_v27   ;;  %2279 = vperm.xlu1 %3898, %v3276_v28  }
  0x1f   :  { %3656 = vmatpush3.bf16.msra.mxu0 %v3912_v31  ;;  %3545 = vmatprep.subr.bf16.mxu1 %v3913_v33 }
  0x20   :  { %3657 = vmatprep.subr.bf16.mxu0 %v3914_v34 }
  0x21   :  { %3546 = vmatpush3.bf16.msra.mxu1 %v3913_v33 }
  0x22   :  { %2664 = vperm.xlu0 %3897, %v3307_v30   ;;  %2676 = vperm.xlu1 %3898, %v3308_v32   ;;  %v4182_v32 = vld [vmem:[%s5404_s0 + $0x8] sm:$0x7] }
  0x23   :  { %3658 = vmatpush3.bf16.msra.mxu0 %v3914_v34  ;;  %3559 = vmatprep.subr.bf16.mxu1 %v4115_v35 }
  0x24   :  { %3671 = vmatprep.subr.bf16.mxu0 %v4120_v36 }
  0x81   :  { %v1285_v43 = vpop.permute.xlu1 %1284  ;;  %v108_v44 = vpop.permute.xlu0 %107 }
  0x82   :  { %v1293_v45 = vrot.slane %v1285_v43, %v4124_v42  ;;  %v116_v46 = vrot.slane %v108_v44, %v4124_v42 }
  0x84   :  { %v1310_v47 = vshrl.u32 %v1293_v45, 16  ;;  %v1313_v48 = vshll.u32 %v1293_v45, 16  ;;  %v133_v49 = vshrl.u32 %v116_v46, 16  ;;  %v136_v50 = vshll.u32 %v116_v46, 16 }
  0x85   :  { %v1297_v51 = vpop.permute.xlu1 %1296  ;;  %v120_v52 = vpop.permute.xlu0 %119 }
  0x86   :  { %v1312_v53 = vrot.slane %v1310_v47, 5  ;;  %v1315_v54 = vrot.slane %v1313_v48, 6  ;;  %v135_v55 = vrot.slane %v133_v49, 7  ;;  %v1305_v56 = vrot.slane %v1297_v51, %v4124_v42 }
  0x87   :  { %v128_v57 = vrot.slane %v120_v52, %v4124_v42  ;;  %v87_v52 = vld [vmem:[%s5404_s0 + $0x10] sm:$0xf] }
  0x88   :  { %v4130_v58 = vor.u32 %v1315_v54, %v1312_v53  ;;  %v4132_v59 = vor.u32 %v136_v50, %v135_v55  ;;  %v1319_v60 = vshrl.u32 %v1305_v56, 16  ;;  %v1322_v62 = vshll.u32 %v1305_v56, 16 }
  0x89   :  { %v141_v63 = vshrl.u32 %v128_v57, 16  ;;  %v1714_v0 = vpop.permute.xlu0 %1713  ;;  %v35_v1 = vpop.permute.xlu1 %34  ;;  %v144_v5 = vshll.u32 %v128_v57, 16  ;;  %v139_v7 = vrot.slane %v135_v55, 4  ;;  %v4209_v57 = vld [vmem:[%s5404_s0 + $0x10] sm:$0xc] }
  0x8a   :  { %v1321_v2 = vrot.slane %v1319_v60, 5  ;;  %v1324_v3 = vrot.slane %v1322_v62, 6  ;;  %v152_v6 = vmul.bf16 %v4132_v59, %v84_v61  ;;  %v1317_v8 = vrot.slane %v4130_v58, 4 }
  0x8b   :  { %v143_v4 = vrot.slane %v141_v63, 7  ;;  %v1331_v21 = vmul.bf16 %v4130_v58, %v961_v10  ;;  %v1722_v30 = vrot.slane %v1714_v0, %v4124_v42  ;;  %v4198_v50 = vrot.slane %v35_v1, %v4124_v42 }
  0x8c   :  { %v1325_v11 = vor.u32 %v1324_v3, %v1321_v2  ;;  %v174_v17 = vshrl.u32 %v152_v6, 16  ;;  %v177_v19 = vshll.u32 %v152_v6, 16 }
  0x8d   :  { %v146_v12 = vor.u32 %v144_v5, %v143_v4  ;;  %v4146_v13 = vrot.slane %v143_v4, 4  ;;  %v4148_v14 = vpop.permute.xlu0 %46  ;;  %v1726_v15 = vpop.permute.xlu1 %1725  ;;  %v1353_v38 = vshrl.u32 %v1331_v21, 16  ;;  %v4195_v49 = vrot.slane %v1722_v30, 5 }
  0x8e   :  { %v176_v23 = vrot.slane %v174_v17, 4  ;;  %v179_v24 = vrot.slane %v177_v19, 5  ;;  %v4169_v25 = vsel %vm1308_vm5, %v1317_v8, %v1325_v11  ;;  %v4171_v26 = vrot.slane %v1325_v11, 4  ;;  %v90_v8 = vld [vmem:[%s5404_s0 + $0x20] sm:$0xf] }
  0x8f   :  { %v4164_v20 = vsel %vm4139_vm4, %v139_v7, %v146_v12  ;;  %v154_v29 = vmul.bf16 %v4146_v13, %v4160_v18  ;;  %v1734_v39 = vrot.slane %v1726_v15, %v4124_v42  ;;  %v1332_v41 = vmul.bf16 %v4169_v25, %v4153_v16 }
  0x90   :  { %v153_v22 = vmul.bf16 %v4164_v20, %v4153_v16  ;;  %v180_v33 = vor.u32 %v179_v24, %v176_v23  ;;  %v1333_v48 = vmul.bf16 %v4171_v26, %v4182_v32  ;;  %v1355_v55 = vrot.slane %v1353_v38, 6  ;;  %v4243_v23 = vld [vmem:[%s5404_s0 + $0x14] sm:$0xf] }
  0x91   :  { %v4173_v27 = vpop.permute.xlu0 %663  ;;  %v676_v28 = vpop.permute.xlu1 %675  ;;  %v193_v47 = vshll.u32 %v154_v29, 16  ;;  %v1356_v56 = vshll.u32 %v1331_v21, 16  ;;  %v1739_v60 = vrot.slane %v1734_v39, 5  ;;  %v1362_v63 = vshrl.u32 %v1332_v41, 16 }
  0x92   :  { %v684_v31 = vrot.slane %v676_v28, %v4124_v42  ;;  %v183_v34 = vshll.u32 %v153_v22, 16  ;;  %v187_v37 = vshrl.u32 %v153_v22, 16  ;;  %v181_v53 = vrot.slane %v180_v33, 4 }
  0x93   :  { %v1365_v0 = vshll.u32 %v1332_v41, 16  ;;  %v195_v5 = vrot.slane %v193_v47, 5  ;;  %v1358_v6 = vrot.slane %v1356_v56, 7  ;;  %v1372_v7 = vshrl.u32 %v1333_v48, 16 }
  0x94   :  { %v4185_v40 = vrot.slane %v684_v31, 7  ;;  %v185_v45 = vrot.slane %v183_v34, 5  ;;  %v189_v46 = vrot.slane %v187_v37, 4  ;;  %v1738_v10 = vrot.slane %v4195_v49, 4 }
  0x95   :  { %v4189_v43 = vpop.permute.xlu0 %2016  ;;  %v4191_v44 = vpop.permute.xlu1 %2028  ;;  %v1364_v11 = vrot.slane %v1362_v63, 6  ;;  %v155_v12 = vmul.bf16 %v4132_v59, %v87_v52  ;;  %v4234_v15 = vmul.bf16 %v4130_v58, %v4209_v57  ;;  %v1359_v21 = vor.u32 %v1358_v6, %v1355_v55 }
  0x96   :  { %v4201_v51 = vrot.slane %v4185_v40, 4  ;;  %v190_v54 = vor.u32 %v189_v46, %v185_v45  ;;  %v186_v17 = vsel %vm4213_vm12, %v181_v53, %v185_v45  ;;  %v1367_v22 = vrot.slane %v1365_v0, 7 }
  0x97   :  { %v4247_v24 = vsel %vm4221_vm13, %v1738_v10, %v1739_v60  ;;  %v672_v28 = vrot.slane %v4173_v27, %v4124_v42  ;;  %v4252_v30 = vmul.bf16 %v4132_v59, %v90_v8  ;;  %v1360_v31 = vrot.slane %v1359_v21, 4 }
  0x98   :  { %v191_v4 = vrot.slane %v190_v54, 4  ;;  %v1368_v33 = vor.u32 %v1367_v22, %v1364_v11  ;;  %v1374_v34 = vrot.slane %v1372_v7, 6  ;;  %v1375_v37 = vshll.u32 %v1333_v48, 16  ;;  %v4273_v48 = vld [vmem:[%s5404_s0 + $0x18] sm:$0x1] }
  0x99   :  { %v979_v2 = vpop.permute.xlu0 %978  ;;  %v4225_v3 = vpop.permute.xlu1 %990  ;;  %v4256_v41 = vrot.slane %v4148_v14, %v4124_v42  ;;  %v4258_v45 = vrot.slane %v1739_v60, 4  ;;  %v156_v54 = vmul.bf16 %v4164_v20, %v4243_v23  ;;  %v1749_v55 = vmul.bf16 %v4247_v24, %v4243_v23 }
  0x9a   :  { %v196_v19 = vsel %vm4213_vm12, %v191_v4, %v195_v5  ;;  %v987_v14 = vrot.slane %v979_v2, %v4124_v42  ;;  %v1370_v52 = vrot.slane %v1368_v33, 4  ;;  %v1377_v53 = vrot.slane %v1375_v37, 7 }
  0x9b   :  { %v3069_v29 = vcombine.low %v186_v17, %v196_v19  ;;  %v4280_v56 = vrot.slane %v672_v28, 7  ;;  %v1369_v0 = vsel %vm4262_vm0, %v1360_v31, %v1368_v33  ;;  %v157_v2 = vmul.bf16 %v4146_v13, %v4273_v48 }
  0x9c   :  { %v1378_v4 = vor.u32 %v1377_v53, %v1374_v34  ;;  %v198_v8 = vshrl.u32 %v155_v12, 16  ;;  %v201_v10 = vshll.u32 %v155_v12, 16  ;;  %v4291_v11 = vrot.slane %v987_v14, 6 }
  0x9d   :  { %v2268_v38 = vpop.permute.xlu0 %2267  ;;  %v2280_v39 = vpop.permute.xlu1 %2279  ;;  %3547 = vmatprep.mubr.bf16.mxu1 %v3069_v29  ;;  %v207_v19 = vshll.u32 %v156_v54, 16  ;;  %v211_v21 = vshrl.u32 %v156_v54, 16  ;;  %v691_v22 = vrot.slane %v4280_v56, 4  ;;  %v4298_v33 = vrot.slane %v1749_v55, 7 }
  0x9e   :  { %v4267_v46 = vrot.slane %v2268_v38, %v4124_v42  ;;  %v2288_v47 = vrot.slane %v2280_v39, %v4124_v42  ;;  %v1379_v17 = vsel %vm4262_vm0, %v1370_v52, %v1378_v4  ;;  %v4308_v34 = vrot.slane %v4189_v43, %v4124_v42  ;;  %v4313_v39 = vld [vmem:[%s5404_s0 + $0x18] sm:$0x7] }
  0x9f   :  { %v3191_v28 = vcombine.low %v1369_v0, %v1379_v17  ;;  %v200_v37 = vrot.slane %v198_v8, 4  ;;  %v203_v38 = vrot.slane %v201_v10, 5  ;;  %v209_v14 = vrot.slane %v207_v19, 5 }
  0xa0   :  { %v2290_v60 = vshrl.u32 %v4267_v46, 16  ;;  %v2298_v63 = vshrl.u32 %v2288_v47, 16  ;;  %v2301_v5 = vshll.u32 %v2288_v47, 16  ;;  %v213_v52 = vrot.slane %v211_v21, 4 }
  0xa1   :  { %3659 = vmatprep.mubr.bf16.mxu0 %v3191_v28  ;;  %v217_v53 = vshll.u32 %v157_v2, 16  ;;  %v204_v54 = vor.u32 %v203_v38, %v200_v37  ;;  %v1336_v0 = vmul.bf16 %v4171_v26, %v4313_v39  ;;  %v1381_v4 = vshrl.u32 %v4234_v15, 16 }
  0xa2   :  { %v4287_v6 = vrot.slane %v2290_v60, 7  ;;  %v4289_v7 = vrot.slane %v2298_v63, 7  ;;  %v1335_v60 = vmul.bf16 %v4169_v25, %v4243_v23  ;;  %v4328_v63 = vsel %vm4302_vm1, %v691_v22, %v4185_v40  ;;  %v4339_v22 = vld [vmem:[%s5404_s0 + $0x28] sm:$0x1] }
  0xa3   :  { %v214_v9 = vor.u32 %v213_v52, %v209_v14  ;;  %v205_v2 = vrot.slane %v204_v54, 4  ;;  %v219_v8 = vrot.slane %v217_v53, 5  ;;  %v1384_v10 = vshll.u32 %v4234_v15, 16  ;;  %5427 = vst [vmem:[#allocation2_spill] sm:$0xff] %v4339_v22 }
  0xa4   :  { %v2296_v29 = vrot.slane %v4287_v6, 4  ;;  %v2303_v31 = vor.u32 %v2301_v5, %v4289_v7  ;;  %v999_v5 = vrot.slane %v4225_v3, %v4124_v42  ;;  %v1383_v19 = vrot.slane %v1381_v4, 6  ;;  %v4346_v3 = vld [vmem:[%s5404_s0 + $0x24] sm:$0xf] }
  0xa5   :  { %v215_v17 = vrot.slane %v214_v9, 4  ;;  %v1390_v21 = vshrl.u32 %v1335_v60, 16  ;;  %v1393_v40 = vshll.u32 %v1335_v60, 16  ;;  %v1403_v37 = vshll.u32 %v1336_v0, 16 }
  0xa6   :  { %v4317_v47 = vsel %vm4139_vm4, %v2296_v29, %v2303_v31  ;;  %v1386_v29 = vrot.slane %v1384_v10, 7  ;;  %v1400_v31 = vshrl.u32 %v1336_v0, 16  ;;  %v210_v15 = vsel %vm4213_vm12, %v205_v2, %v209_v14  ;;  %v3917_v0 = vld [vmem:[%s5403_s1 + $0x8] sm:$0xff]   ;;  %v965_v2 = vld [vmem:[%s5404_s0 + $0x20] sm:$0xc]  ;;  %vm4390_vm4 = vmor %vm1002_vm2, %vm1003_vm3 }
  0xa7   :  { %v220_v38 = vsel %vm4213_vm12, %v215_v17, %v219_v8  ;;  %v1392_v52 = vrot.slane %v1390_v21, 6  ;;  %v1395_v53 = vrot.slane %v1393_v40, 7  ;;  %v1405_v4 = vrot.slane %v1403_v37, 7  ;;  %v4370_v37 = vld [vmem:[%s5404_s0 + $0x28] sm:$0x7] }
  0xa8   :  { %v3070_v54 = vcombine.low %v210_v15, %v220_v38  ;;  %v1387_v60 = vor.u32 %v1386_v29, %v1383_v19  ;;  %v1402_v9 = vrot.slane %v1400_v31, 6  ;;  %v4355_v10 = vrot.slane %v999_v5, 6 }
  0xa9   :  { %v1396_v55 = vor.u32 %v1395_v53, %v1392_v52  ;;  %v159_v43 = vmul.bf16 %v4164_v20, %v4346_v3  ;;  %v160_v14 = vmul.bf16 %v4146_v13, %v4339_v22  ;;  %v222_v19 = vshrl.u32 %v4252_v30, 16 }
  0xaa   :  { %3548 = vmatmul.mubr.bf16.vlgmr.msra.gmra.mrb[0].mxu1 %v3070_v54  ;;  %v1388_v8 = vrot.slane %v1387_v60, 4  ;;  %v1406_v17 = vor.u32 %v1405_v4, %v1402_v9  ;;  %v225_v21 = vshll.u32 %v4252_v30, 16  ;;  %v1337_v53 = vmul.bf16 %v4130_v58, %v965_v2  ;;  %v3918_v2 = vld [vmem:[%s5403_s1 + $0x148] sm:$0xff]  }
  0xab   :  { %3560 = vmatpush3.bf16.msra.mxu1 %v4115_v35  ;;  %v1398_v5 = vrot.slane %v1396_v55, 4  ;;  %v231_v40 = vshll.u32 %v159_v43, 16  ;;  %v235_v29 = vshrl.u32 %v159_v43, 16  ;;  %v241_v31 = vshll.u32 %v160_v14, 16  ;;  %v3919_v35 = vld [vmem:[%s5403_s1 + $0x10] sm:$0xff]  }
  0xac   :  { %v1397_v15 = vsel %vm4262_vm0, %v1388_v8, %v1396_v55  ;;  %v224_v38 = vrot.slane %v222_v19, 4  ;;  %v227_v52 = vrot.slane %v225_v21, 5  ;;  %3561 = vmatprep.subr.bf16.mxu1 %v3917_v0  ;;  %v1006_v30 = vrot.slane %v4291_v11, 4 }
  0xad   :  { %v1407_v43 = vsel %vm4262_vm0, %v1398_v5, %v1406_v17  ;;  %v233_v54 = vrot.slane %v231_v40, 5  ;;  %v237_v60 = vrot.slane %v235_v29, 4  ;;  %v1338_v55 = vmul.bf16 %v4169_v25, %v4346_v3 }
  0xae   :  { %v3192_v9 = vcombine.low %v1397_v15, %v1407_v43  ;;  %v228_v4 = vor.u32 %v227_v52, %v224_v38  ;;  %v1339_v14 = vmul.bf16 %v4171_v26, %v4370_v37  ;;  %v5428_v8 = vmov 0  ;;  %v3921_v52 = vld [vmem:[%s5403_s1 + $0x18] sm:$0xff]  }
  0xaf   :  { %v5429_v8 = vsel %vm4390_vm4, 4294967295, %v5428_v8  ;;  %v238_v17 = vor.u32 %v237_v60, %v233_v54  ;;  %v243_v19 = vrot.slane %v241_v31, 5  ;;  %v1409_v21 = vshrl.u32 %v1337_v53, 16  ;;  %3562 = vmatpush3.bf16.msra.mxu1 %v3917_v0 }
  0xb0   :  { %5430 = vst [vmem:[#allocation3_spill] sm:$0xff] %v5429_v8  ;;  %v1412_v5 = vshll.u32 %v1337_v53, 16  ;;  %3660 = vmatmul.mubr.bf16.vlgmr.msra.gmra.mrb[0].mxu0 %v3192_v9  ;;  %v229_v40 = vrot.slane %v228_v4, 4  ;;  %v1418_v29 = vshrl.u32 %v1338_v55, 16  ;;  %v1421_v15 = vshll.u32 %v1338_v55, 16  ;;  %3563 = vmatprep.subr.bf16.mxu1 %v3919_v35  ;;  %v3920_v4 = vld [vmem:[%s5403_s1 + $0x150] sm:$0xff]  }
  0xb1   :  { %v1428_v38 = vshrl.u32 %v1339_v14, 16  ;;  %3672 = vmatpush3.bf16.msra.mxu0 %v4120_v36  ;;  %v239_v43 = vrot.slane %v238_v17, 4  ;;  %v1411_v62 = vrot.slane %v1409_v21, 6  ;;  %v1431_v60 = vshll.u32 %v1339_v14, 16  ;;  %v93_v36 = vld [vmem:[%s5404_s0 + $0x30] sm:$0xf] }
  0xb2   :  { %v1414_v28 = vrot.slane %v1412_v5, 7  ;;  %v4401_v0 = vsel %vm4390_vm4, %v1006_v30, %v4355_v10  ;;  %v1420_v31 = vrot.slane %v1418_v29, 6  ;;  %v1423_v53 = vrot.slane %v1421_v15, 7  ;;  %3673 = vmatprep.subr.bf16.mxu0 %v3918_v2  ;;  %v4416_v21 = vld [vmem:[%s5404_s0 + $0x34] sm:$0xf] }
  0xb3   :  { %5431 = vst [vmem:[#allocation4_spill] sm:$0xff] %v4401_v0  ;;  %v1430_v9 = vrot.slane %v1428_v38, 6  ;;  %v234_v55 = vsel %vm4213_vm12, %v229_v40, %v233_v54  ;;  %v244_v14 = vsel %vm4213_vm12, %v239_v43, %v243_v19  ;;  %v1433_v17 = vrot.slane %v1431_v60, 7  ;;  %3564 = vmatpush3.bf16.msra.mxu1 %v3919_v35  ;;  %v3924_v35 = vld [vmem:[%s5403_s1 + $0x160] sm:$0xff]  }
  0xb4   :  { %v1415_v30 = vor.u32 %v1414_v28, %v1411_v62  ;;  %v5432_v5 = vmul.bf16 %v4328_v63, %v4243_v23  ;;  %v4425_v15 = vrot.slane %v4191_v44, %v4124_v42  ;;  %v3071_v54 = vcombine.low %v234_v55, %v244_v14  ;;  %v4430_v62 = vld [vmem:[%s5404_s0 + $0x38] sm:$0x1]  ;;  %3565 = vmatprep.subr.bf16.mxu1 %v3921_v52  ;;  %v3923_v28 = vld [vmem:[%s5403_s1 + $0x20] sm:$0xff]  }
  0xb5   :  { %v1424_v40 = vor.u32 %v1423_v53, %v1420_v31  ;;  %5434 = vst [vmem:[#allocation6_spill] sm:$0xff] %v4430_v62  ;;  %v1434_v38 = vor.u32 %v1433_v17, %v1430_v9  ;;  %3674 = vmatpush3.bf16.msra.mxu0 %v3918_v2  ;;  %v161_v44 = vmul.bf16 %v4132_v59, %v93_v36  ;;  %v2293_v60 = vshll.u32 %v4267_v46, 16  ;;  %v3922_v55 = vld [vmem:[%s5403_s1 + $0x158] sm:$0xff]   ;;  %v967_v46 = vld [vmem:[%s5404_s0 + $0x30] sm:$0xc] }
  0xb6   :  { %v4421_v29 = vrot.slane %v5432_v5, 5  ;;  %5433 = vst [vmem:[#allocation5_spill] sm:$0xff] %v4425_v15  ;;  %v1416_v19 = vrot.slane %v1415_v30, 4  ;;  %v1017_v43 = vmul.bf16 %v4401_v0, %v4243_v23  ;;  %3551 = vmatprep.mubr.bf16.mxu1 %v3071_v54  ;;  %3675 = vmatprep.subr.bf16.mxu0 %v3920_v4  ;;  %v162_v53 = vmul.bf16 %v4164_v20, %v4416_v21 }
  0xb7   :  { %v1426_v31 = vrot.slane %v1424_v40, 4  ;;  %v163_v9 = vmul.bf16 %v4146_v13, %v4430_v62  ;;  %v246_v36 = vshrl.u32 %v161_v44, 16  ;;  %v249_v23 = vshll.u32 %v161_v44, 16  ;;  %3566 = vmatpush3.bf16.msra.mxu1 %v3921_v52  ;;  %v3925_v52 = vld [vmem:[%s5403_s1 + $0x28] sm:$0xff]   ;;  %v3929_v62 = vld [vmem:[%s5403_s1 + $0x38] sm:$0xff]  }
  0xb8   :  { %v1425_v2 = vsel %vm4262_vm0, %v1416_v19, %v1424_v40  ;;  %v4454_v30 = vrot.slane %v4355_v10, 4  ;;  %v5436_v17 = vmul.bf16 %v4201_v51, %v4160_v18  ;;  %v4466_v40 = vld [vmem:[%s5404_s0 + $0x38] sm:$0x7]  ;;  %3567 = vmatprep.subr.bf16.mxu1 %v3923_v28  ;;  %v4472_v10 = vor.u32 %v2293_v60, %v4287_v6  ;;  %v4500_v60 = vld [vmem:[%s5404_s0 + $0x44] sm:$0xf] }
  0xb9   :  { %v1435_v54 = vsel %vm4262_vm0, %v1426_v31, %v1434_v38  ;;  %v248_v18 = vrot.slane %v246_v36, 4  ;;  %v251_v44 = vrot.slane %v249_v23, 5  ;;  %3676 = vmatpush3.bf16.msra.mxu0 %v3920_v4  ;;  %v259_v14 = vshrl.u32 %v162_v53, 16  ;;  %v3927_v36 = vld [vmem:[%s5403_s1 + $0x30] sm:$0xff]  }
  0xba   :  { %5435 = vst [vmem:[#allocation7_spill] sm:$0xff] %v4454_v30  ;;  %v4459_v5 = vrot.slane %v5436_v17, 5  ;;  %5438 = vst [vmem:[#allocation9_spill] sm:$0xff] %v4472_v10  ;;  %v3193_v19 = vcombine.low %v1425_v2, %v1435_v54  ;;  %v255_v17 = vshll.u32 %v162_v53, 16  ;;  %v265_v38 = vshll.u32 %v163_v9, 16  ;;  %3677 = vmatprep.subr.bf16.mxu0 %v3922_v55 }
  0xbb   :  { %v1340_v31 = vmul.bf16 %v4130_v58, %v967_v46  ;;  %v4478_v8 = vrot.slane %v1017_v43, 6  ;;  %v252_v30 = vor.u32 %v251_v44, %v248_v18  ;;  %v1341_v6 = vmul.bf16 %v4169_v25, %v4416_v21  ;;  %3568 = vmatpush3.bf16.msra.mxu1 %v3923_v28  ;;  %v96_v43 = vld [vmem:[%s5404_s0 + $0x40] sm:$0xf]  ;;  %v4495_v28 = vld [vmem:[%s5404_s0 + $0x48] sm:$0x1] }
  0xbc   :  { %5437 = vst [vmem:[#allocation8_spill] sm:$0xff] %v4459_v5  ;;  %3663 = vmatprep.mubr.bf16.mxu0 %v3193_v19  ;;  %v1342_v4 = vmul.bf16 %v4171_v26, %v4466_v40  ;;  %v257_v53 = vrot.slane %v255_v17, 5  ;;  %v261_v2 = vrot.slane %v259_v14, 4  ;;  %3569 = vmatprep.subr.bf16.mxu1 %v3925_v52  ;;  %v267_v46 = vrot.slane %v265_v38, 5  ;;  %5439 = vst [vmem:[#allocation10_spill] sm:$0xff] %v4495_v28 }
  0xbd   :  { %v1437_v9 = vshrl.u32 %v1340_v31, 16  ;;  %v253_v23 = vrot.slane %v252_v30, 4  ;;  %v1440_v54 = vshll.u32 %v1340_v31, 16  ;;  %v1446_v19 = vshrl.u32 %v1341_v6, 16  ;;  %3678 = vmatpush3.bf16.msra.mxu0 %v3922_v55  ;;  %v3926_v30 = vld [vmem:[%s5403_s1 + $0x168] sm:$0xff]  }
  0xbe   :  { %v262_v14 = vor.u32 %v261_v2, %v257_v53  ;;  %v1449_v44 = vshll.u32 %v1341_v6, 16  ;;  %v1456_v17 = vshrl.u32 %v1342_v4, 16  ;;  %3679 = vmatprep.subr.bf16.mxu0 %v3924_v35  ;;  %v1459_v55 = vshll.u32 %v1342_v4, 16 }
  0xbf   :  { %v1439_v18 = vrot.slane %v1437_v9, 6  ;;  %v258_v38 = vsel %vm4213_vm12, %v253_v23, %v257_v53  ;;  %v1442_v31 = vrot.slane %v1440_v54, 7  ;;  %v1448_v0 = vrot.slane %v1446_v19, 6  ;;  %3570 = vmatpush3.bf16.msra.mxu1 %v3925_v52  ;;  %v969_v54 = vld [vmem:[%s5404_s0 + $0x40] sm:$0xc]  ;;  %v3928_v19 = vld [vmem:[%s5403_s1 + $0x170] sm:$0xff]  }
  0xc0   :  { %v263_v2 = vrot.slane %v262_v14, 4  ;;  %v1451_v6 = vrot.slane %v1449_v44, 7  ;;  %v1458_v9 = vrot.slane %v1456_v17, 6  ;;  %v164_v10 = vmul.bf16 %v4132_v59, %v96_v43  ;;  %3571 = vmatprep.subr.bf16.mxu1 %v3927_v36 }
  0xc1   :  { %v1443_v22 = vor.u32 %v1442_v31, %v1439_v18  ;;  %v1461_v5 = vrot.slane %v1459_v55, 7  ;;  %v165_v15 = vmul.bf16 %v4164_v20, %v4500_v60  ;;  %v166_v53 = vmul.bf16 %v4146_v13, %v4495_v28  ;;  %3680 = vmatpush3.bf16.msra.mxu0 %v3924_v35  ;;  %v4526_v35 = vld [vmem:[%s5404_s0 + $0x48] sm:$0x7]  ;;  %v4531_v55 = vld [vmem:[%s5403_s1 + $0x80] sm:$0xff]  }
  0xc2   :  { %v268_v52 = vsel %vm4213_vm12, %v263_v2, %v267_v46  ;;  %v1452_v4 = vor.u32 %v1451_v6, %v1448_v0  ;;  %v270_v23 = vshrl.u32 %v164_v10, 16  ;;  %v273_v43 = vshll.u32 %v164_v10, 16  ;;  %3681 = vmatprep.subr.bf16.mxu0 %v3926_v30 }
  0xc3   :  { %v3072_v14 = vcombine.low %v258_v38, %v268_v52  ;;  %v1444_v18 = vrot.slane %v1443_v22, 4  ;;  %v1462_v44 = vor.u32 %v1461_v5, %v1458_v9  ;;  %v279_v17 = vshll.u32 %v165_v15, 16  ;;  %3572 = vmatpush3.bf16.msra.mxu1 %v3927_v36 }
  0xc4   :  { %v1454_v0 = vrot.slane %v1452_v4, 4  ;;  %v272_v10 = vrot.slane %v270_v23, 4  ;;  %v275_v46 = vrot.slane %v273_v43, 5  ;;  %v283_v31 = vshrl.u32 %v165_v15, 16  ;;  %3573 = vmatprep.subr.bf16.mxu1 %v3929_v62 }
  0xc5   :  { %3552 = vmatmul.mubr.bf16.gmra.mrb[4].mxu1 %v3072_v14  ;;  %v1453_v22 = vsel %vm4262_vm0, %v1444_v18, %v1452_v4  ;;  %v281_v5 = vrot.slane %v279_v17, 5  ;;  %v289_v38 = vshll.u32 %v166_v53, 16  ;;  %v1343_v2 = vmul.bf16 %v4130_v58, %v969_v54  ;;  %3682 = vmatpush3.bf16.msra.mxu0 %v3926_v30  ;;  %v99_v53 = vld [vmem:[%s5404_s0 + $0x50] sm:$0xf]  ;;  %v3930_v30 = vld [vmem:[%s5403_s1 + $0x178] sm:$0xff]  }
  0xc6   :  { %v1463_v36 = vsel %vm4262_vm0, %v1454_v0, %v1462_v44  ;;  %v276_v6 = vor.u32 %v275_v46, %v272_v10  ;;  %v285_v15 = vrot.slane %v283_v31, 4  ;;  %v1344_v9 = vmul.bf16 %v4169_v25, %v4500_v60  ;;  %3683 = vmatprep.subr.bf16.mxu0 %v3928_v19  ;;  %v4551_v17 = vld [vmem:[%s5404_s0 + $0x58] sm:$0x1] }
  0xc7   :  { %v3194_v52 = vcombine.low %v1453_v22, %v1463_v36  ;;  %v291_v23 = vrot.slane %v289_v38, 5  ;;  %v1345_v43 = vmul.bf16 %v4171_v26, %v4526_v35  ;;  %v1465_v4 = vshrl.u32 %v1343_v2, 16  ;;  %3574 = vmatpush3.bf16.msra.mxu1 %v3929_v62  ;;  %v4557_v62 = vld [vmem:[%s5404_s0 + $0x54] sm:$0xf] }
  0xc8   :  { %v277_v54 = vrot.slane %v276_v6, 4  ;;  %v286_v14 = vor.u32 %v285_v15, %v281_v5  ;;  %v1468_v18 = vshll.u32 %v1343_v2, 16  ;;  %v1474_v44 = vshrl.u32 %v1344_v9, 16  ;;  %3587 = vmatprep.subr.bf16.mxu1 %v4531_v55 }
  0xc9   :  { %3664 = vmatmul.mubr.bf16.gmra.mrb[4].mxu0 %v3194_v52  ;;  %v1467_v0 = vrot.slane %v1465_v4, 6  ;;  %v1477_v10 = vshll.u32 %v1344_v9, 16  ;;  %v1484_v46 = vshrl.u32 %v1345_v43, 16  ;;  %v1487_v31 = vshll.u32 %v1345_v43, 16  ;;  %v4565_v9 = vld [vmem:[%s5403_s1 + $0x180] sm:$0xff]  }
  0xca   :  { %v282_v22 = vsel %vm4213_vm12, %v277_v54, %v281_v5  ;;  %v287_v38 = vrot.slane %v286_v14, 4  ;;  %v1470_v2 = vrot.slane %v1468_v18, 7  ;;  %v1476_v36 = vrot.slane %v1474_v44, 6  ;;  %3684 = vmatpush3.bf16.msra.mxu0 %v3928_v19 }
  0xcb   :  { %v1479_v6 = vrot.slane %v1477_v10, 7  ;;  %v1486_v15 = vrot.slane %v1484_v46, 6  ;;  %v1489_v28 = vrot.slane %v1487_v31, 7  ;;  %v167_v52 = vmul.bf16 %v4132_v59, %v99_v53  ;;  %3685 = vmatprep.subr.bf16.mxu0 %v3930_v30  ;;  %v971_v59 = vld [vmem:[%s5404_s0 + $0x50] sm:$0xc] }
  0xcc   :  { %v292_v43 = vsel %vm4213_vm12, %v287_v38, %v291_v23  ;;  %v1471_v4 = vor.u32 %v1470_v2, %v1467_v0  ;;  %v168_v5 = vmul.bf16 %v4164_v20, %v4557_v62  ;;  %v169_v19 = vmul.bf16 %v4146_v13, %v4551_v17  ;;  %v4579_v23 = vld [vmem:[%s5404_s0 + $0x58] sm:$0x7] }
  0xcd   :  { %v3073_v53 = vcombine.low %v282_v22, %v292_v43  ;;  %v1480_v54 = vor.u32 %v1479_v6, %v1476_v36  ;;  %v1490_v14 = vor.u32 %v1489_v28, %v1486_v15  ;;  %v294_v18 = vshrl.u32 %v167_v52, 16 }
  0xce   :  { %v1472_v44 = vrot.slane %v1471_v4, 4  ;;  %v297_v10 = vshll.u32 %v167_v52, 16  ;;  %v303_v46 = vshll.u32 %v168_v5, 16  ;;  %v307_v31 = vshrl.u32 %v168_v5, 16  ;;  %3686 = vmatpush3.bf16.msra.mxu0 %v3930_v30 }
  0xcf   :  { %3555 = vmatprep.mubr.bf16.mxu1 %v3073_v53  ;;  %v1482_v13 = vrot.slane %v1480_v54, 4  ;;  %v296_v20 = vrot.slane %v294_v18, 4  ;;  %v313_v0 = vshll.u32 %v169_v19, 16  ;;  %v1346_v38 = vmul.bf16 %v4130_v58, %v971_v59  ;;  %3699 = vmatprep.subr.bf16.mxu0 %v4565_v9  ;;  %v18_v18 = vld [vmem:[%s5404_s0] sm:$0xf] }
  0xd0   :  { %v1481_v28 = vsel %vm4262_vm0, %v1472_v44, %v1480_v54  ;;  %v299_v22 = vrot.slane %v297_v10, 5  ;;  %v305_v2 = vrot.slane %v303_v46, 5  ;;  %v309_v36 = vrot.slane %v307_v31, 4 }
  0xd1   :  { %v1491_v6 = vsel %vm4262_vm0, %v1482_v13, %v1490_v14  ;;  %v315_v15 = vrot.slane %v313_v0, 5  ;;  %v1347_v30 = vmul.bf16 %v4169_v25, %v4557_v62  ;;  %v1348_v52 = vmul.bf16 %v4171_v26, %v4579_v23  ;;  %v19_v26 = vld [vmem:[%s5404_s0 + $0x4] sm:$0xf]  ;;  %v1702_v0 = vld [vmem:[%s5404_s0] sm:$0x8] }
  0xd2   :  { %v3195_v43 = vcombine.low %v1481_v28, %v1491_v6  ;;  %v300_v58 = vor.u32 %v299_v22, %v296_v20  ;;  %v310_v4 = vor.u32 %v309_v36, %v305_v2  ;;  %v1493_v5 = vshrl.u32 %v1346_v38, 16 }
  0xd3   :  { %v1496_v19 = vshll.u32 %v1346_v38, 16  ;;  %v1502_v59 = vshrl.u32 %v1347_v30, 16  ;;  %v1505_v53 = vshll.u32 %v1347_v30, 16  ;;  %v1512_v54 = vshrl.u32 %v1348_v52, 16 }
  0xd4   :  { %3667 = vmatprep.mubr.bf16.mxu0 %v3195_v43  ;;  %v301_v14 = vrot.slane %v300_v58, 4  ;;  %v311_v44 = vrot.slane %v310_v4, 4  ;;  %v1495_v10 = vrot.slane %v1493_v5, 6  ;;  %v1515_v25 = vshll.u32 %v1348_v52, 16 }
  0xd5   :  { %v1498_v46 = vrot.slane %v1496_v19, 7  ;;  %v1504_v31 = vrot.slane %v1502_v59, 6  ;;  %v1507_v13 = vrot.slane %v1505_v53, 7  ;;  %v1514_v20 = vrot.slane %v1512_v54, 6  ;;  %v21_v19 = vld [vmem:[%s5404_s0 + $0x14] sm:$0xf] }
  0xd6   :  { %v306_v38 = vsel %vm4213_vm12, %v301_v14, %v305_v2  ;;  %v316_v28 = vsel %vm4213_vm12, %v311_v44, %v315_v15  ;;  %v1517_v22 = vrot.slane %v1515_v25, 7  ;;  %v56_v36 = vmul.bf16 %v4198_v50, %v18_v18  ;;  %v20_v15 = vld [vmem:[%s5404_s0 + $0x10] sm:$0xf] }
  0xd7   :  { %v3074_v6 = vcombine.low %v306_v38, %v316_v28  ;;  %v1499_v30 = vor.u32 %v1498_v46, %v1495_v10  ;;  %v1508_v52 = vor.u32 %v1507_v13, %v1504_v31  ;;  %v57_v43 = vmul.bf16 %v4256_v41, %v19_v26  ;;  %v1703_v59 = vld [vmem:[%s5404_s0 + $0x10] sm:$0x8]  ;;  %v1704_v46 = vld [vmem:[%s5404_s0 + $0x20] sm:$0x8] }
  0xd8   :  { %v1518_v58 = vor.u32 %v1517_v22, %v1514_v20  ;;  %v1745_v4 = vmul.bf16 %v4195_v49, %v1702_v0  ;;  %v1746_v5 = vmul.bf16 %v4247_v24, %v4153_v16  ;;  %v1747_v2 = vmul.bf16 %v4258_v45, %v4182_v32  ;;  %v23_v32 = vld [vmem:[%s5404_s0 + $0x24] sm:$0xf] }
  0xd9   :  { %v1060_v53 = vrot.slane %v4478_v8, 4  ;;  %3556 = vmatmul.mubr.bf16.gmra.mrb[8].mxu1 %v3074_v6  ;;  %v1500_v54 = vrot.slane %v1499_v30, 4  ;;  %v1510_v16 = vrot.slane %v1508_v52, 4  ;;  %v3083_v18 = vcombine.low %v56_v36, %v57_v43  ;;  %v2248_v43 = vld [vmem:[%s5404_s0 + $0x18] sm:$0xf] }
  0xda   :  { %v4625_v14 = vrot.slane %v4289_v7, 4  ;;  %v5440_v44 = vmul.bf16 %v4258_v45, %v4313_v39  ;;  %v1783_v25 = vrot.slane %v1746_v5, 7  ;;  %v1786_v26 = vrot.slane %v1747_v2, 7  ;;  %v22_v39 = vld [vmem:[%s5404_s0 + $0x20] sm:$0xf] }
  0xdb   :  { %v1509_v31 = vsel %vm4262_vm0, %v1500_v54, %v1508_v52  ;;  %v1519_v13 = vsel %vm4262_vm0, %v1510_v16, %v1518_v58  ;;  %3575 = vmatprep.mubr.bf16.mxu1 %v3083_v18  ;;  %v3207_v20 = vrot.slane %v1745_v4, 11  ;;  %v59_v7 = vmul.bf16 %v4256_v41, %v21_v19  ;;  %v3933_v18 = vld [vmem:[%s5403_s1 + $0x88] sm:$0xff]  }
  0xdc   :  { %v1793_v10 = vrot.slane %v5440_v44, 7  ;;  %v5441_v0 = vmul.bf16 %v4201_v51, %v4273_v48  ;;  %v3196_v28 = vcombine.low %v1509_v31, %v1519_v13  ;;  %v1785_v22 = vrot.slane %v1783_v25, 4 }
  0xdd   :  { %v1748_v36 = vmul.bf16 %v4195_v49, %v1703_v59  ;;  %v1784_v27 = vsel %vm4302_vm1, %v3207_v20, %v1783_v25  ;;  %v58_v6 = vmul.bf16 %v4198_v50, %v20_v15  ;;  %v61_v30 = vmul.bf16 %v4256_v41, %v23_v32 }
  0xde   :  { %v4644_v38 = vrot.slane %v5441_v0, 5  ;;  %v1751_v52 = vmul.bf16 %v4195_v49, %v1704_v46  ;;  %3668 = vmatmul.mubr.bf16.gmra.mrb[8].mxu0 %v3196_v28  ;;  %v1787_v48 = vsel %vm4302_vm1, %v1785_v22, %v1786_v26  ;;  %v60_v58 = vmul.bf16 %v4198_v50, %v22_v39 }
  0xdf   :  { %v1752_v4 = vmul.bf16 %v4247_v24, %v4346_v3  ;;  %v1753_v5 = vmul.bf16 %v4258_v45, %v4370_v37  ;;  %v5442_v2 = vmul.bf16 %v4291_v11, %v4209_v57  ;;  %v3229_v19 = vcombine.low %v1784_v27, %v1787_v48  ;;  %v24_v37 = vld [vmem:[%s5404_s0 + $0x30] sm:$0xf]  ;;  %v3934_v48 = vld [vmem:[%s5403_s1 + $0x188] sm:$0xff]  }
  0xe0   :  { %v3084_v59 = vcombine.low %v58_v6, %v59_v7  ;;  %v5443_v54 = vrot.slane %v4298_v33, 4  ;;  %v1705_v57 = vld [vmem:[%s5404_s0 + $0x30] sm:$0x8]  ;;  %v3208_v32 = vrot.slane %v1748_v36, 11  ;;  %v3085_v44 = vcombine.low %v60_v58, %v61_v30  ;;  %v27_v7 = vld [vmem:[%s5404_s0 + $0x44] sm:$0xf]  ;;  %v2665_v30 = vpop.permute.xlu0 %2664 }
  0xe1   :  { %v4665_v15 = vrot.slane %v5442_v2, 10  ;;  %v1797_v25 = vrot.slane %v1752_v4, 7  ;;  %v1800_v26 = vrot.slane %v1753_v5, 7  ;;  %v4684_v46 = vmul.bf16 %v4317_v47, %v2248_v43  ;;  %3687 = vmatprep.mubr.bf16.mxu0 %v3229_v19  ;;  %v3935_v58 = vld [vmem:[%s5403_s1 + $0x90] sm:$0xff]  }
  0xe2   :  { %v1794_v16 = vsel %vm4302_vm1, %v5443_v54, %v1793_v10  ;;  %v25_v10 = vld [vmem:[%s5404_s0 + $0x34] sm:$0xf]  ;;  %3576 = vmatmul.mubr.bf16.vlgmr.msra.gmra.mrb[0].mxu1 %v3084_v59  ;;  %v3209_v31 = vrot.slane %v1751_v52, 11  ;;  %v1755_v13 = vmul.bf16 %v4247_v24, %v4416_v21  ;;  %v1756_v20 = vmul.bf16 %v4258_v45, %v4466_v40  ;;  %v1706_v40 = vld [vmem:[%s5404_s0 + $0x40] sm:$0x8]  ;;  %v4708_v52 = vpop.permute.xlu1 %2676 }
  0xe3   :  { %v1791_v39 = vsel %vm4302_vm1, %v3208_v32, %v4298_v33  ;;  %3579 = vmatprep.mubr.bf16.mxu1 %v3085_v44  ;;  %3588 = vmatpush3.bf16.msra.mxu1 %v4531_v55  ;;  %v1799_v0 = vrot.slane %v1797_v25, 4  ;;  %v62_v28 = vmul.bf16 %v4198_v50, %v24_v37  ;;  %v1754_v22 = vmul.bf16 %v4195_v49, %v1705_v57  ;;  %v26_v55 = vld [vmem:[%s5404_s0 + $0x40] sm:$0xf] }
  0xe4   :  { %v3230_v36 = vcombine.low %v1791_v39, %v1794_v16  ;;  %v1798_v27 = vsel %vm4302_vm1, %v3209_v31, %v1797_v25  ;;  %3589 = vmatprep.subr.bf16.mxu1 %v3933_v18  ;;  %v63_v6 = vmul.bf16 %v4256_v41, %v25_v10  ;;  %v1804_v33 = vrot.slane %v1755_v13, 7  ;;  %v652_v25 = vld [vmem:[%s5404_s0] sm:$0xe]  ;;  %v3937_v31 = vld [vmem:[%s5403_s1 + $0x98] sm:$0xff]   ;;  %v29_v13 = vld [vmem:[%s5404_s0 + $0x54] sm:$0xf] }
  0xe5   :  { %v1801_v43 = vsel %vm4302_vm1, %v1799_v0, %v1800_v26  ;;  %v65_v4 = vmul.bf16 %v4256_v41, %v27_v7  ;;  %v1758_v5 = vmul.bf16 %v4247_v24, %v4500_v60  ;;  %v1759_v2 = vmul.bf16 %v4258_v45, %v4526_v35  ;;  %v3936_v7 = vld [vmem:[%s5403_s1 + $0x190] sm:$0xff]  }
  0xe6   :  { %v3231_v19 = vcombine.low %v1798_v27, %v1801_v43  ;;  %v1806_v59 = vrot.slane %v1804_v33, 4  ;;  %v1807_v54 = vrot.slane %v1756_v20, 7  ;;  %v1757_v16 = vmul.bf16 %v4195_v49, %v1706_v40  ;;  %3688 = vmatmul.mubr.bf16.vlgmr.msra.gmra.mrb[0].mxu0 %v3230_v36  ;;  %v28_v0 = vld [vmem:[%s5404_s0 + $0x50] sm:$0xf]  ;;  %v4766_v43 = vld [vmem:[%s5404_s0 + $0x4] sm:$0xf] }
  0xe7   :  { %3590 = vmatpush3.bf16.msra.mxu1 %v3933_v18  ;;  %v3210_v37 = vrot.slane %v1754_v22, 11  ;;  %v64_v57 = vmul.bf16 %v4198_v50, %v26_v55  ;;  %v1811_v32 = vrot.slane %v1758_v5, 7  ;;  %v1814_v44 = vrot.slane %v1759_v2, 7  ;;  %3700 = vmatpush3.bf16.msra.mxu0 %v4565_v9 }
  0xe8   :  { %v2673_v26 = vrot.slane %v2665_v30, %v4124_v42  ;;  %v2365_v35 = vshrl.u32 %v4684_v46, 16  ;;  %v2685_v10 = vrot.slane %v4708_v52, %v4124_v42  ;;  %3691 = vmatprep.mubr.bf16.mxu0 %v3231_v19  ;;  %v3086_v18 = vcombine.low %v62_v28, %v63_v6  ;;  %3701 = vmatprep.subr.bf16.mxu0 %v3934_v48  ;;  %v1707_v28 = vld [vmem:[%s5404_s0 + $0x50] sm:$0x8]  ;;  %v3938_v19 = vld [vmem:[%s5403_s1 + $0x198] sm:$0xff]   ;;  %v3978_v42 = vld [vmem:[%s5404_s0 + $0x44] sm:$0xf] }
  0xe9   :  { %3591 = vmatprep.subr.bf16.mxu1 %v3935_v58  ;;  %v1805_v20 = vsel %vm4302_vm1, %v3210_v37, %v1804_v33  ;;  %v3087_v39 = vcombine.low %v64_v57, %v65_v4  ;;  %v1813_v9 = vrot.slane %v1811_v32, 4  ;;  %v1761_v22 = vmul.bf16 %v4247_v24, %v4557_v62  ;;  %v653_v33 = vld [vmem:[%s5404_s0 + $0x10] sm:$0xe] }
  0xea   :  { %3580 = vmatmul.mubr.bf16.gmra.mrb[4].mxu1 %v3086_v18  ;;  %v1808_v40 = vsel %vm4302_vm1, %v1806_v59, %v1807_v54  ;;  %v3211_v36 = vrot.slane %v1757_v16, 11  ;;  %v1762_v27 = vmul.bf16 %v4258_v45, %v4579_v23  ;;  %v698_v6 = vmul.bf16 %v4280_v56, %v652_v25  ;;  %v3939_v59 = vld [vmem:[%s5403_s1 + $0xa0] sm:$0xff]   ;;  %v2005_v54 = vld [vmem:[%s5404_s0 + $0x8] sm:$0xf] }
  0xeb   :  { %3583 = vmatprep.mubr.bf16.mxu1 %v3087_v39  ;;  %3592 = vmatpush3.bf16.msra.mxu1 %v3935_v58  ;;  %v1815_v55 = vsel %vm4302_vm1, %v1813_v9, %v1814_v44  ;;  %v67_v24 = vmul.bf16 %v4256_v41, %v29_v13  ;;  %v1818_v30 = vrot.slane %v1761_v22, 7  ;;  %v699_v45 = vmul.bf16 %v4766_v43, %v4328_v63  ;;  %v654_v13 = vld [vmem:[%s5404_s0 + $0x20] sm:$0xe] }
  0xec   :  { %v4770_v23 = vrot.slane %v2673_v26, 7  ;;  %3702 = vmatpush3.bf16.msra.mxu0 %v3934_v48  ;;  %v1812_v58 = vsel %vm4302_vm1, %v3211_v36, %v1811_v32  ;;  %3593 = vmatprep.subr.bf16.mxu1 %v3937_v31  ;;  %v66_v4 = vmul.bf16 %v4198_v50, %v28_v0  ;;  %v1760_v41 = vmul.bf16 %v4195_v49, %v1707_v28  ;;  %v5446_v28 = vld [vmem:[#allocation8_spill] sm:$0xff] }
  0xed   :  { %v3232_v5 = vcombine.low %v1805_v20, %v1808_v40  ;;  %3703 = vmatprep.subr.bf16.mxu0 %v3936_v7  ;;  %v3233_v2 = vcombine.low %v1812_v58, %v1815_v55  ;;  %v739_v48 = vrot.slane %v699_v45, 5  ;;  %v701_v50 = vmul.bf16 %v4280_v56, %v653_v33  ;;  %v3941_v40 = vld [vmem:[%s5403_s1 + $0xa8] sm:$0xff]   ;;  %v4826_v55 = vld [vmem:[%s5404_s0 + $0x18] sm:$0xf]  ;;  %v5447_v45 = vld [vmem:[#allocation2_spill] sm:$0xff] }
  0xee   :  { %v1820_v16 = vrot.slane %v1818_v30, 4  ;;  %v1821_v49 = vrot.slane %v1762_v27, 7  ;;  %v3099_v37 = vrot.slane %v698_v6, 9  ;;  %v5444_v57 = vrot.slane %v4421_v29, 4 }
  0xef   :  { %v4791_v44 = vrot.slane %v2365_v35, 4  ;;  %3692 = vmatmul.mubr.bf16.gmra.mrb[4].mxu0 %v3232_v5  ;;  %3594 = vmatpush3.bf16.msra.mxu1 %v3937_v31  ;;  %v3088_v25 = vcombine.low %v66_v4, %v67_v24  ;;  %v741_v26 = vrot.slane %v739_v48, 4  ;;  %v3100_v18 = vrot.slane %v701_v50, 9  ;;  %v655_v31 = vld [vmem:[%s5404_s0 + $0x30] sm:$0xe] }
  0xf0   :  { %v750_v32 = vsel %vm4221_vm13, %v5444_v57, %v4644_v38  ;;  %3695 = vmatprep.mubr.bf16.mxu0 %v3233_v2  ;;  %3704 = vmatpush3.bf16.msra.mxu0 %v3936_v7  ;;  %v740_v20 = vsel %vm4221_vm13, %v3099_v37, %v739_v48  ;;  %v2038_v39 = vmul.bf16 %v4766_v43, %v4308_v34  ;;  %v5445_v38 = vld [vmem:[#allocation5_spill] sm:$0xff]  ;;  %v2361_v9 = vshll.u32 %v4684_v46, 16  ;;  %v3940_v7 = vld [vmem:[%s5403_s1 + $0x1a0] sm:$0xff]  }
  0xf1   :  { %v2039_v35 = vmul.bf16 %v5445_v38, %v2005_v54  ;;  %3705 = vmatprep.subr.bf16.mxu0 %v3938_v19  ;;  %3595 = vmatprep.subr.bf16.mxu1 %v3939_v59  ;;  %v3212_v0 = vrot.slane %v1760_v41, 11  ;;  %v743_v22 = vsel %vm4221_vm13, %v741_v26, %v5446_v28  ;;  %v747_v36 = vsel %vm4221_vm13, %v3100_v18, %v4421_v29  ;;  %v4838_v41 = vld [vmem:[%s5404_s0 + $0x28] sm:$0xf]  ;;  %v3945_v28 = vld [vmem:[%s5403_s1 + $0xb8] sm:$0xff]  }
  0xf2   :  { %v705_v46 = vmul.bf16 %v4328_v63, %v4346_v3  ;;  %3584 = vmatmul.mubr.bf16.gmra.mrb[8].mxu1 %v3088_v25  ;;  %v1822_v27 = vsel %vm4302_vm1, %v1820_v16, %v1821_v49  ;;  %v3121_v6 = vcombine.low %v740_v20, %v743_v22  ;;  %v4821_v33 = vcombine.low %v747_v36, %v750_v32  ;;  %v3942_v16 = vld [vmem:[%s5403_s1 + $0x1a8] sm:$0xff]   ;;  %v3972_v49 = vld [vmem:[%s5404_s0 + $0x14] sm:$0xf]  ;;  %v656_v25 = vld [vmem:[%s5404_s0 + $0x40] sm:$0xe] }
  0xf3   :  { %v704_v24 = vmul.bf16 %v4280_v56, %v654_v13  ;;  %v1819_v29 = vsel %vm4302_vm1, %v3212_v0, %v1818_v30  ;;  %3596 = vmatpush3.bf16.msra.mxu1 %v3939_v59  ;;  %v706_v58 = vmul.bf16 %v4201_v51, %v5447_v45  ;;  %v707_v5 = vmul.bf16 %v4280_v56, %v655_v31  ;;  %v5448_v30 = vld [vmem:[#allocation6_spill] sm:$0xff] }
  0xf4   :  { %v4833_v4 = vrot.slane %v705_v46, 5  ;;  %3706 = vmatpush3.bf16.msra.mxu0 %v3938_v19  ;;  %3603 = vmatprep.mubr.bf16.mxu1 %v3121_v6  ;;  %v3261_v2 = vcombine.low %v2038_v39, %v2039_v35  ;;  %v708_v48 = vmul.bf16 %v4328_v63, %v4416_v21  ;;  %v709_v59 = vmul.bf16 %v4201_v51, %v5448_v30  ;;  %v3943_v19 = vld [vmem:[%s5403_s1 + $0xb0] sm:$0xff]   ;;  %v2008_v39 = vld [vmem:[%s5404_s0 + $0x38] sm:$0xf]  ;;  %v5449_v46 = vld [vmem:[#allocation10_spill] sm:$0xff] }
  0xf5   :  { %v4845_v54 = vrot.slane %v2361_v9, 5  ;;  %v3234_v50 = vcombine.low %v1819_v29, %v1822_v27  ;;  %3707 = vmatprep.subr.bf16.mxu0 %v3940_v7  ;;  %3597 = vmatprep.subr.bf16.mxu1 %v3941_v40  ;;  %v2040_v37 = vmul.bf16 %v3972_v49, %v4308_v34  ;;  %v2041_v57 = vmul.bf16 %v5445_v38, %v4826_v55  ;;  %v657_v27 = vld [vmem:[%s5404_s0 + $0x50] sm:$0xe] }
  0xf6   :  { %v755_v32 = vrot.slane %v4833_v4, 4  ;;  %v3101_v26 = vrot.slane %v704_v24, 9  ;;  %v2042_v18 = vmul.bf16 %v4308_v34, %v4346_v3  ;;  %v2043_v13 = vmul.bf16 %v5445_v38, %v4838_v41  ;;  %v2009_v3 = vld [vmem:[%s5404_s0 + $0x48] sm:$0xf] }
  0xf7   :  { %v760_v20 = vrot.slane %v708_v48, 5  ;;  %3696 = vmatmul.mubr.bf16.gmra.mrb[8].mxu0 %v3234_v50  ;;  %3598 = vmatpush3.bf16.msra.mxu1 %v3941_v40  ;;  %v756_v35 = vrot.slane %v706_v58, 5  ;;  %v3102_v31 = vrot.slane %v707_v5, 9  ;;  %v2044_v9 = vmul.bf16 %v4308_v34, %v4416_v21  ;;  %v4910_v50 = vld [vmem:[%s5404_s0 + $0x58] sm:$0xf] }
  0xf8   :  { %v711_v0 = vmul.bf16 %v4328_v63, %v4500_v60  ;;  %3708 = vmatpush3.bf16.msra.mxu0 %v3940_v7  ;;  %3715 = vmatprep.mubr.bf16.mxu0 %v3261_v2  ;;  %v763_v40 = vrot.slane %v709_v59, 5  ;;  %v710_v36 = vmul.bf16 %v4280_v56, %v656_v25  ;;  %v712_v21 = vmul.bf16 %v4201_v51, %v5449_v46  ;;  %v3944_v7 = vld [vmem:[%s5403_s1 + $0x1b0] sm:$0xff]  }
  0xf9   :  { %v762_v22 = vrot.slane %v760_v20, 4  ;;  %3709 = vmatprep.subr.bf16.mxu0 %v3942_v16  ;;  %3599 = vmatprep.subr.bf16.mxu1 %v3943_v19  ;;  %v757_v6 = vsel %vm4221_vm13, %v755_v32, %v756_v35  ;;  %v761_v55 = vsel %vm4221_vm13, %v3102_v31, %v760_v20  ;;  %v2045_v24 = vmul.bf16 %v5445_v38, %v2008_v39 }
  0xfa   :  { %v767_v29 = vrot.slane %v711_v0, 5  ;;  %v2046_v58 = vmul.bf16 %v4308_v34, %v4500_v60  ;;  %v2047_v41 = vmul.bf16 %v5445_v38, %v2009_v3  ;;  %v714_v5 = vmul.bf16 %v4328_v63, %v4557_v62  ;;  %v3947_v63 = vld [vmem:[%s5403_s1 + $0xc0] sm:$0xff]   ;;  %v3949_v3 = vld [vmem:[%s5403_s1 + $0xc8] sm:$0xff]  }
  0xfb   :  { %v764_v45 = vsel %vm4221_vm13, %v762_v22, %v763_v40  ;;  %3600 = vmatpush3.bf16.msra.mxu1 %v3943_v19  ;;  %v754_v2 = vsel %vm4221_vm13, %v3101_v26, %v4833_v4  ;;  %v713_v59 = vmul.bf16 %v4280_v56, %v657_v27  ;;  %v3103_v60 = vrot.slane %v710_v36, 9  ;;  %v2244_v56 = vld [vmem:[%s5404_s0 + $0x4] sm:$0xf] }
  0xfc   :  { %v4904_v48 = vcombine.low %v761_v55, %v764_v45  ;;  %v769_v30 = vrot.slane %v767_v29, 4  ;;  %3710 = vmatpush3.bf16.msra.mxu0 %v3942_v16  ;;  %3601 = vmatprep.subr.bf16.mxu1 %v3945_v28  ;;  %v770_v19 = vrot.slane %v712_v21, 5  ;;  %v715_v4 = vmul.bf16 %v4201_v51, %v4551_v17  ;;  %v3946_v16 = vld [vmem:[%s5403_s1 + $0x1b8] sm:$0xff]   ;;  %v4930_v51 = vld [vmem:[%s5404_s0 + $0x8] sm:$0xf]  ;;  %v3948_v27 = vld [vmem:[%s5403_s1 + $0x1c0] sm:$0xff]  }
  0xfd   :  { %v774_v49 = vrot.slane %v714_v5, 5  ;;  %3711 = vmatprep.subr.bf16.mxu0 %v3944_v7  ;;  %v3262_v32 = vcombine.low %v2040_v37, %v2041_v57  ;;  %v3123_v25 = vcombine.low %v754_v2, %v757_v6  ;;  %v4923_v26 = vcombine.low %v2042_v18, %v2043_v13  ;;  %v4935_v17 = vld [vmem:[%s5404_s0 + $0xc] sm:$0x1]  ;;  %v964_v21 = vld [vmem:[%s5404_s0 + $0x18] sm:$0x3]  ;;  %v5451_v55 = vld [vmem:[#allocation4_spill] sm:$0xff] }
  0xfe   :  { %v4925_v20 = vcombine.low %v2044_v9, %v2045_v24  ;;  %v768_v39 = vsel %vm4221_vm13, %v3103_v60, %v767_v29  ;;  %v771_v37 = vsel %vm4221_vm13, %v769_v30, %v770_v19  ;;  %v4941_v57 = vcombine.low %v2046_v58, %v2047_v41  ;;  %v5450_v9 = vld [vmem:[#allocation9_spill] sm:$0xff]  ;;  %v962_v6 = vld [vmem:[%s5404_s0 + $0x8] sm:$0x3]  ;;  %v2247_v30 = vld [vmem:[%s5404_s0 + $0x14] sm:$0xf] }
  0xff   :  { %v776_v18 = vrot.slane %v774_v49, 4  ;;  %3602 = vmatpush3.bf16.msra.mxu1 %v3945_v28  ;;  %v3104_v13 = vrot.slane %v713_v59, 9  ;;  %v2048_v35 = vmul.bf16 %v4308_v34, %v4557_v62  ;;  %v2049_v31 = vmul.bf16 %v5445_v38, %v4910_v50  ;;  %v4954_v28 = vld [vmem:[%s5404_s0] sm:$0xc]  ;;  %v5452_v19 = vld [vmem:[#allocation7_spill] sm:$0xff] }
 0x100   :  { %v2309_v0 = vmul.bf16 %v5450_v9, %v2244_v56  ;;  %3712 = vmatpush3.bf16.msra.mxu0 %v3944_v7  ;;  %3615 = vmatprep.subr.bf16.mxu1 %v3947_v63  ;;  %v777_v22 = vrot.slane %v715_v4, 5  ;;  %v1013_v40 = vmul.bf16 %v4954_v28, %v4291_v11  ;;  %v2310_v36 = vmul.bf16 %v4317_v47, %v4930_v51  ;;  %v968_v38 = vld [vmem:[%s5404_s0 + $0x38] sm:$0x3] }
 0x101   :  { %v2311_v46 = vmul.bf16 %v4625_v14, %v4935_v17  ;;  %3713 = vmatprep.subr.bf16.mxu0 %v3946_v16  ;;  %v4968_v7 = vcombine.low %v768_v39, %v771_v37  ;;  %v1014_v24 = vmul.bf16 %v4766_v43, %v5451_v55  ;;  %v775_v58 = vsel %vm4221_vm13, %v3104_v13, %v774_v49  ;;  %v3950_v37 = vld [vmem:[%s5403_s1 + $0x1c8] sm:$0xff]  }
 0x102   :  { %v2328_v29 = vshrl.u32 %v2309_v0, 16  ;;  %v2331_v45 = vshll.u32 %v2309_v0, 16  ;;  %3604 = vmatmul.mubr.bf16.vlgmr.msra.gmra.mrb[0].mxu1 %v4821_v33  ;;  %v778_v41 = vsel %vm4221_vm13, %v776_v18, %v777_v22  ;;  %v2337_v5 = vshll.u32 %v2310_v36, 16  ;;  %v4987_v33 = vld [vmem:[%s5404_s0 + $0x1c] sm:$0x1]  ;;  %v3951_v18 = vld [vmem:[%s5403_s1 + $0xd0] sm:$0xff]  }
 0x103   :  { %v2341_v2 = vshrl.u32 %v2310_v36, 16  ;;  %3607 = vmatprep.mubr.bf16.mxu1 %v3123_v25  ;;  %3616 = vmatpush3.bf16.msra.mxu1 %v3947_v63  ;;  %v2347_v60 = vshll.u32 %v2311_v46, 16  ;;  %v1018_v4 = vmul.bf16 %v5452_v19, %v964_v21  ;;  %v1015_v49 = vmul.bf16 %v5452_v19, %v962_v6 }
 0x104   :  { %v2330_v59 = vrot.slane %v2328_v29, 4  ;;  %v2333_v43 = vrot.slane %v2331_v45, 5  ;;  %3714 = vmatpush3.bf16.msra.mxu0 %v3946_v16  ;;  %3617 = vmatprep.subr.bf16.mxu1 %v3949_v3  ;;  %v2339_v56 = vrot.slane %v2337_v5, 5  ;;  %v1059_v63 = vsel %vm4390_vm4, %v4665_v15, %v4478_v8  ;;  %v966_v45 = vld [vmem:[%s5404_s0 + $0x28] sm:$0x3]  ;;  %v3953_v8 = vld [vmem:[%s5403_s1 + $0xd8] sm:$0xff]  }
 0x105   :  { %v2343_v39 = vrot.slane %v2341_v2, 4  ;;  %3727 = vmatprep.subr.bf16.mxu0 %v3948_v27  ;;  %v5000_v16 = vcombine.low %v775_v58, %v778_v41  ;;  %v5002_v13 = vrot.slane %v1014_v24, 6  ;;  %v1061_v22 = vrot.slane %v1018_v4, 6  ;;  %v3974_v58 = vld [vmem:[%s5404_s0 + $0x24] sm:$0xf] }
 0x106   :  { %v2334_v0 = vor.u32 %v2333_v43, %v2330_v59  ;;  %v2312_v46 = vmul.bf16 %v5450_v9, %v2247_v30  ;;  %v2314_v15 = vmul.bf16 %v4625_v14, %v4987_v33  ;;  %v2368_v21 = vor.u32 %v4791_v44, %v4845_v54  ;;  %v2250_v5 = vld [vmem:[%s5404_s0 + $0x24] sm:$0xf]  ;;  %v5038_v43 = vld [vmem:[%s5404_s0 + $0x28] sm:$0xf] }
 0x107   :  { %v2344_v36 = vor.u32 %v2343_v39, %v2339_v56  ;;  %3716 = vmatmul.mubr.bf16.vlgmr.msra.gmra.mrb[0].mxu0 %v3262_v32  ;;  %3618 = vmatpush3.bf16.msra.mxu1 %v3949_v3  ;;  %v2349_v29 = vrot.slane %v2347_v60, 5  ;;  %v1062_v24 = vsel %vm4390_vm4, %v1060_v53, %v1061_v22  ;;  %v1020_v41 = vmul.bf16 %v3974_v58, %v5451_v55 }
 0x108   :  { %v2335_v6 = vrot.slane %v2334_v0, 4  ;;  %3719 = vmatprep.mubr.bf16.mxu0 %v4923_v26  ;;  %3728 = vmatpush3.bf16.msra.mxu0 %v3948_v27  ;;  %v5024_v32 = vcombine.low %v1059_v63, %v1062_v24  ;;  %v2352_v53 = vshrl.u32 %v2312_v46, 16  ;;  %v2355_v3 = vshll.u32 %v2312_v46, 16  ;;  %v3952_v26 = vld [vmem:[%s5403_s1 + $0x1d0] sm:$0xff]   ;;  %v5046_v0 = vld [vmem:[%s5404_s0 + $0x2c] sm:$0x1] }
 0x109   :  { %v2345_v44 = vrot.slane %v2344_v36, 4  ;;  %3729 = vmatprep.subr.bf16.mxu0 %v3950_v37  ;;  %3619 = vmatprep.subr.bf16.mxu1 %v3951_v18  ;;  %v1053_v27 = vrot.slane %v5002_v13, 4  ;;  %v2369_v30 = vrot.slane %v2368_v21, 4  ;;  %v2371_v59 = vshll.u32 %v2314_v15, 16 }
 0x10a   :  { %v2340_v2 = vsel %vm4213_vm12, %v2335_v6, %v2339_v56  ;;  %3608 = vmatmul.mubr.bf16.gmra.mrb[4].mxu1 %v4904_v48  ;;  %v1054_v60 = vrot.slane %v1015_v49, 6  ;;  %v2354_v39 = vrot.slane %v2352_v53, 4  ;;  %v2357_v63 = vrot.slane %v2355_v3, 5 }
 0x10b   :  { %v2350_v4 = vsel %vm4213_vm12, %v2345_v44, %v2349_v29  ;;  %3611 = vmatprep.mubr.bf16.mxu1 %v4968_v7  ;;  %3620 = vmatpush3.bf16.msra.mxu1 %v3951_v18  ;;  %v2373_v22 = vrot.slane %v2371_v59, 5  ;;  %v1021_v36 = vmul.bf16 %v5452_v19, %v966_v45  ;;  %v5052_v48 = vrot.slane %v1020_v41, 6  ;;  %v3954_v18 = vld [vmem:[%s5403_s1 + $0x1d8] sm:$0xff]   ;;  %v3975_v44 = vld [vmem:[%s5404_s0 + $0x20] sm:$0xc] }
 0x10c   :  { %v5049_v56 = vcombine.low %v2340_v2, %v2350_v4  ;;  %3730 = vmatpush3.bf16.msra.mxu0 %v3950_v37  ;;  %3621 = vmatprep.subr.bf16.mxu1 %v3953_v8  ;;  %v3137_v49 = vrot.slane %v1013_v40, 10  ;;  %v2358_v46 = vor.u32 %v2357_v63, %v2354_v39  ;;  %v2315_v15 = vmul.bf16 %v5450_v9, %v2250_v5  ;;  %v3955_v37 = vld [vmem:[%s5403_s1 + $0xe0] sm:$0xff]   ;;  %v5094_v59 = vld [vmem:[%s5404_s0 + $0x38] sm:$0xf] }
 0x10d   :  { %v2316_v7 = vmul.bf16 %v4317_v47, %v5038_v43  ;;  %3731 = vmatprep.subr.bf16.mxu0 %v3952_v26  ;;  %v1055_v21 = vsel %vm4390_vm4, %v1053_v27, %v1054_v60  ;;  %v2374_v28 = vsel %vm4213_vm12, %v2369_v30, %v2373_v22  ;;  %v1067_v40 = vrot.slane %v5052_v48, 4  ;;  %v2253_v27 = vld [vmem:[%s5404_s0 + $0x34] sm:$0xf] }
 0x10e   :  { %v2317_v6 = vmul.bf16 %v4625_v14, %v5046_v0  ;;  %v2359_v29 = vrot.slane %v2358_v46, 4  ;;  %v2376_v24 = vshrl.u32 %v2315_v15, 16  ;;  %v2379_v45 = vshll.u32 %v2315_v15, 16 }
 0x10f   :  { %v2385_v58 = vshll.u32 %v2316_v7, 16  ;;  %3720 = vmatmul.mubr.bf16.gmra.mrb[4].mxu0 %v4925_v20  ;;  %3622 = vmatpush3.bf16.msra.mxu1 %v3953_v8  ;;  %v1052_v41 = vsel %vm4390_vm4, %v3137_v49, %v5002_v13  ;;  %v1019_v53 = vmul.bf16 %v3975_v44, %v4291_v11  ;;  %v1068_v3 = vrot.slane %v1021_v36, 6  ;;  %v3957_v20 = vld [vmem:[%s5403_s1 + $0xe8] sm:$0xff]   ;;  %v3976_v49 = vld [vmem:[%s5404_s0 + $0x34] sm:$0xf] }
 0x110   :  { %v2389_v5 = vshrl.u32 %v2316_v7, 16  ;;  %3723 = vmatprep.mubr.bf16.mxu0 %v4941_v57  ;;  %3732 = vmatpush3.bf16.msra.mxu0 %v3952_v26  ;;  %v2364_v13 = vsel %vm4213_vm12, %v2359_v29, %v4845_v54  ;;  %v2378_v8 = vrot.slane %v2376_v24, 4  ;;  %v2381_v2 = vrot.slane %v2379_v45, 5  ;;  %v3956_v57 = vld [vmem:[%s5403_s1 + $0x1e0] sm:$0xff]   ;;  %v5104_v54 = vld [vmem:[%s5404_s0 + $0x3c] sm:$0x1] }
 0x111   :  { %v2395_v30 = vshll.u32 %v2317_v6, 16  ;;  %3733 = vmatprep.subr.bf16.mxu0 %v3954_v18  ;;  %3623 = vmatprep.subr.bf16.mxu1 %v3955_v37  ;;  %v3159_v26 = vcombine.low %v1052_v41, %v1055_v21  ;;  %v5099_v60 = vcombine.low %v2364_v13, %v2374_v28  ;;  %v2387_v4 = vrot.slane %v2385_v58, 5  ;;  %v3958_v21 = vld [vmem:[%s5403_s1 + $0x1e8] sm:$0xff]  }
 0x112   :  { %v2391_v39 = vrot.slane %v2389_v5, 4  ;;  %3612 = vmatmul.mubr.bf16.gmra.mrb[8].mxu1 %v5000_v16  ;;  %v3266_v63 = vcombine.low %v2048_v35, %v2049_v31  ;;  %v1069_v22 = vsel %vm4390_vm4, %v1067_v40, %v1068_v3  ;;  %v2382_v36 = vor.u32 %v2381_v2, %v2378_v8  ;;  %v3977_v31 = vld [vmem:[%s5404_s0 + $0x30] sm:$0xc] }
 0x113   :  { %v1023_v46 = vmul.bf16 %v3976_v49, %v5451_v55  ;;  %3624 = vmatpush3.bf16.msra.mxu1 %v3955_v37  ;;  %3631 = vmatprep.mubr.bf16.mxu1 %v3159_v26  ;;  %v3139_v16 = vrot.slane %v1019_v53, 10  ;;  %v2318_v34 = vmul.bf16 %v5450_v9, %v2253_v27  ;;  %v2319_v62 = vmul.bf16 %v4317_v47, %v5094_v59  ;;  %v3961_v27 = vld [vmem:[%s5403_s1 + $0xf8] sm:$0xff]   ;;  %v2256_v26 = vld [vmem:[%s5404_s0 + $0x44] sm:$0xf]  ;;  %v970_v49 = vld [vmem:[%s5404_s0 + $0x48] sm:$0x3] }
 0x114   :  { %v2392_v15 = vor.u32 %v2391_v39, %v2387_v4  ;;  %3734 = vmatpush3.bf16.msra.mxu0 %v3954_v18  ;;  %3625 = vmatprep.subr.bf16.mxu1 %v3957_v20  ;;  %v2383_v50 = vrot.slane %v2382_v36, 4  ;;  %v2397_v35 = vrot.slane %v2395_v30, 5  ;;  %v1022_v7 = vmul.bf16 %v3977_v31, %v4291_v11  ;;  %v3959_v18 = vld [vmem:[%s5403_s1 + $0xf0] sm:$0xff]   ;;  %v3962_v31 = vld [vmem:[%s5403_s1 + $0x1f8] sm:$0xff]  }
 0x115   :  { %v2320_v37 = vmul.bf16 %v4625_v14, %v5104_v54  ;;  %3735 = vmatprep.subr.bf16.mxu0 %v3956_v57  ;;  %v2400_v40 = vshrl.u32 %v2318_v34, 16  ;;  %v2403_v6 = vshll.u32 %v2318_v34, 16  ;;  %v2409_v29 = vshll.u32 %v2319_v62, 16 }
 0x116   :  { %v2393_v28 = vrot.slane %v2392_v15, 4  ;;  %v2388_v24 = vsel %vm4213_vm12, %v2383_v50, %v2387_v4  ;;  %v1024_v45 = vmul.bf16 %v5452_v19, %v968_v38  ;;  %v5140_v58 = vrot.slane %v1023_v46, 6 }
 0x117   :  { %v2413_v41 = vshrl.u32 %v2319_v62, 16  ;;  %3724 = vmatmul.mubr.bf16.gmra.mrb[8].mxu0 %v3266_v63  ;;  %3626 = vmatpush3.bf16.msra.mxu1 %v3957_v20  ;;  %v2402_v53 = vrot.slane %v2400_v40, 4  ;;  %v2405_v3 = vrot.slane %v2403_v6, 5  ;;  %v2411_v5 = vrot.slane %v2409_v29, 5  ;;  %v3960_v20 = vld [vmem:[%s5403_s1 + $0x1f0] sm:$0xff]  }
 0x118   :  { %v2398_v44 = vsel %vm4213_vm12, %v2393_v28, %v2397_v35  ;;  %3736 = vmatpush3.bf16.msra.mxu0 %v3956_v57  ;;  %3743 = vmatprep.mubr.bf16.mxu0 %v5049_v56  ;;  %v2419_v2 = vshll.u32 %v2320_v37, 16  ;;  %v2689_v30 = vrot.slane %v4770_v23, 4  ;;  %v1066_v56 = vsel %vm4390_vm4, %v3139_v16, %v5052_v48  ;;  %v5169_v48 = vld [vmem:[%s5404_s0 + $0x48] sm:$0xf]  ;;  %v3979_v62 = vld [vmem:[%s5404_s0 + $0x40] sm:$0xc] }
 0x119   :  { %v5148_v13 = vcombine.low %v2388_v24, %v2398_v44  ;;  %v2415_v8 = vrot.slane %v2413_v41, 4  ;;  %3737 = vmatprep.subr.bf16.mxu0 %v3958_v21  ;;  %3627 = vmatprep.subr.bf16.mxu1 %v3959_v18  ;;  %v2406_v57 = vor.u32 %v2405_v3, %v2402_v53  ;;  %v2690_v4 = vrot.slane %v2685_v10, 7  ;;  %v5179_v10 = vld [vmem:[%s5404_s0 + $0x4c] sm:$0x1] }
 0x11a   :  { %v3161_v39 = vcombine.low %v1066_v56, %v1069_v22  ;;  %v3140_v63 = vrot.slane %v1022_v7, 10  ;;  %v1074_v46 = vrot.slane %v5140_v58, 4  ;;  %v1075_v16 = vrot.slane %v1024_v45, 6  ;;  %v5184_v22 = vld [vmem:[%s5403_s1 + $0x200] sm:$0xff]   ;;  %v5209_v24 = vld [vmem:[%s5403_s1 + $0x208] sm:$0xff]  }
 0x11b   :  { %v2416_v36 = vor.u32 %v2415_v8, %v2411_v5  ;;  %3628 = vmatpush3.bf16.msra.mxu1 %v3959_v18  ;;  %v2407_v15 = vrot.slane %v2406_v57, 4  ;;  %v1026_v52 = vmul.bf16 %v3978_v42, %v5451_v55  ;;  %v2421_v34 = vrot.slane %v2419_v2, 5 }
 0x11c   :  { %3738 = vmatpush3.bf16.msra.mxu0 %v3958_v21  ;;  %3629 = vmatprep.subr.bf16.mxu1 %v3961_v27  ;;  %v1025_v50 = vmul.bf16 %v3979_v62, %v4291_v11  ;;  %v2321_v35 = vmul.bf16 %v5450_v9, %v2256_v26  ;;  %v1073_v7 = vsel %vm4390_vm4, %v3140_v63, %v5140_v58  ;;  %v3980_v26 = vld [vmem:[%s5404_s0 + $0x54] sm:$0xf]  ;;  %v5226_v63 = vld [vmem:[%s5404_s0 + $0x58] sm:$0xf]  ;;  %v5236_v42 = vrot.slane %v2690_v4, 4 }
 0x11d   :  { %v2417_v38 = vrot.slane %v2416_v36, 4  ;;  %3739 = vmatprep.subr.bf16.mxu0 %v3960_v20  ;;  %v2412_v37 = vsel %vm4213_vm12, %v2407_v15, %v2411_v5  ;;  %v1027_v21 = vmul.bf16 %v5452_v19, %v970_v49  ;;  %v1079_v18 = vrot.slane %v1026_v52, 6  ;;  %v972_v15 = vld [vmem:[%s5404_s0 + $0x58] sm:$0x3] }
 0x11e   :  { %v2322_v40 = vmul.bf16 %v4317_v47, %v5169_v48  ;;  %v2323_v6 = vmul.bf16 %v4625_v14, %v5179_v10  ;;  %v2424_v29 = vshrl.u32 %v2321_v35, 16  ;;  %v1076_v45 = vsel %vm4390_vm4, %v1074_v46, %v1075_v16 }
 0x11f   :  { %v2422_v28 = vsel %vm4213_vm12, %v2417_v38, %v2421_v34  ;;  %3630 = vmatpush3.bf16.msra.mxu1 %v3961_v27  ;;  %v1081_v41 = vrot.slane %v1079_v18, 4  ;;  %v2427_v44 = vshll.u32 %v2321_v35, 16  ;;  %v3141_v53 = vrot.slane %v1025_v50, 10  ;;  %v2259_v27 = vld [vmem:[%s5404_s0 + $0x54] sm:$0xf] }
 0x120   :  { %v5213_v58 = vcombine.low %v2412_v37, %v2422_v28  ;;  %3740 = vmatpush3.bf16.msra.mxu0 %v3960_v20  ;;  %3783 = vmatprep.subr.bf16.mxu1 %v5184_v22  ;;  %v2426_v3 = vrot.slane %v2424_v29, 4  ;;  %v2433_v5 = vshll.u32 %v2322_v40, 16  ;;  %v2437_v8 = vshrl.u32 %v2322_v40, 16  ;;  %v5258_v34 = vld [vmem:[%s5403_s1 + $0x210] sm:$0xff]  }
 0x121   :  { %3741 = vmatprep.subr.bf16.mxu0 %v3962_v31  ;;  %v1082_v2 = vrot.slane %v1027_v21, 6  ;;  %v2429_v56 = vrot.slane %v2427_v44, 5  ;;  %v2443_v57 = vshll.u32 %v2323_v6, 16  ;;  %v1029_v20 = vmul.bf16 %v3980_v26, %v5451_v55  ;;  %v3981_v35 = vld [vmem:[%s5404_s0 + $0x50] sm:$0xc] }
 0x122   :  { %v5230_v36 = vsel %vm4302_vm1, %v2689_v30, %v2690_v4  ;;  %3632 = vmatmul.mubr.bf16.vlgmr.msra.gmra.mrb[0].mxu1 %v5024_v32  ;;  %v3162_v49 = vcombine.low %v1073_v7, %v1076_v45  ;;  %v2435_v46 = vrot.slane %v2433_v5, 5  ;;  %v2439_v16 = vrot.slane %v2437_v8, 4  ;;  %v5246_v32 = vld [vmem:[%s5404_s0 + $0x5c] sm:$0x1]  ;;  %v2655_v45 = vld [vmem:[%s5404_s0 + $0x24] sm:$0xe] }
 0x123   :  { %3635 = vmatprep.mubr.bf16.mxu1 %v3161_v39  ;;  %3791 = vmatpush3.bf16.msra.mxu1 %v5184_v22  ;;  %v1080_v55 = vsel %vm4390_vm4, %v3141_v53, %v1079_v18  ;;  %v1083_v12 = vsel %vm4390_vm4, %v1081_v41, %v1082_v2  ;;  %v2430_v30 = vor.u32 %v2429_v56, %v2426_v3  ;;  %v5249_v52 = vrot.slane %v1029_v20, 6  ;;  %v2653_v2 = vld [vmem:[%s5404_s0 + $0x4] sm:$0xe] }
 0x124   :  { %3742 = vmatpush3.bf16.msra.mxu0 %v3962_v31  ;;  %3784 = vmatprep.subr.bf16.mxu1 %v5209_v24  ;;  %v2440_v4 = vor.u32 %v2439_v16, %v2435_v46  ;;  %v2324_v39 = vmul.bf16 %v5450_v9, %v2259_v27  ;;  %v2325_v38 = vmul.bf16 %v4317_v47, %v5226_v63  ;;  %v2445_v50 = vrot.slane %v2443_v57, 5 }
 0x125   :  { %3755 = vmatprep.subr.bf16.mxu0 %v5184_v22  ;;  %v2431_v62 = vrot.slane %v2430_v30, 4  ;;  %v1028_v31 = vmul.bf16 %v3981_v35, %v4291_v11  ;;  %v1030_v9 = vmul.bf16 %v5452_v19, %v972_v15  ;;  %v2326_v47 = vmul.bf16 %v4625_v14, %v5246_v32  ;;  %v3966_v14 = vld [vmem:[%s5403_s1 + $0x218] sm:$0xff]   ;;  %v3967_v15 = vld [vmem:[%s5403_s1 + $0x220] sm:$0xff]   ;;  %v3968_v35 = vld [vmem:[%s5403_s1 + $0x228] sm:$0xff]  }
 0x126   :  { %v2441_v7 = vrot.slane %v2440_v4, 4  ;;  %v2448_v37 = vshrl.u32 %v2324_v39, 16  ;;  %v2451_v21 = vshll.u32 %v2324_v39, 16  ;;  %v3163_v18 = vcombine.low %v1080_v55, %v1083_v12 }
 0x127   :  { %3744 = vmatmul.mubr.bf16.vlgmr.msra.gmra.mrb[0].mxu0 %v5099_v60  ;;  %3792 = vmatpush3.bf16.msra.mxu1 %v5209_v24  ;;  %v2436_v28 = vsel %vm4213_vm12, %v2431_v62, %v2435_v46  ;;  %v2457_v40 = vshll.u32 %v2325_v38, 16  ;;  %v2461_v6 = vshrl.u32 %v2325_v38, 16  ;;  %v1088_v19 = vrot.slane %v5249_v52, 4 }
 0x128   :  { %3747 = vmatprep.mubr.bf16.mxu0 %v5148_v13  ;;  %3756 = vmatpush3.bf16.msra.mxu0 %v5184_v22  ;;  %v2446_v11 = vsel %vm4213_vm12, %v2441_v7, %v2445_v50  ;;  %v2450_v60 = vrot.slane %v2448_v37, 4  ;;  %v2453_v29 = vrot.slane %v2451_v21, 5  ;;  %v2467_v44 = vshll.u32 %v2326_v47, 16  ;;  %v3969_v37 = vld [vmem:[%s5403_s1 + $0x230] sm:$0xff]   ;;  %v3982_v21 = vld [vmem:[%s5404_s0 + $0x18] sm:$0xf] }
 0x129   :  { %3757 = vmatprep.subr.bf16.mxu0 %v5209_v24  ;;  %3785 = vmatprep.subr.bf16.mxu1 %v5258_v34  ;;  %v3297_v13 = vcombine.low %v2436_v28, %v2446_v11  ;;  %v2459_v22 = vrot.slane %v2457_v40, 5  ;;  %v2463_v41 = vrot.slane %v2461_v6, 4  ;;  %v1089_v53 = vrot.slane %v1030_v9, 6  ;;  %v2657_v11 = vld [vmem:[%s5404_s0 + $0x44] sm:$0xe] }
 0x12a   :  { %3636 = vmatmul.mubr.bf16.gmra.mrb[4].mxu1 %v3162_v49  ;;  %v2454_v3 = vor.u32 %v2453_v29, %v2450_v60  ;;  %v2697_v5 = vmul.bf16 %v5230_v36, %v4930_v51  ;;  %v3142_v8 = vrot.slane %v1028_v31, 10  ;;  %v2702_v56 = vmul.bf16 %v4770_v23, %v2655_v45 }
 0x12b   :  { %3639 = vmatprep.mubr.bf16.mxu1 %v3163_v18  ;;  %3793 = vmatpush3.bf16.msra.mxu1 %v5258_v34  ;;  %v2464_v27 = vor.u32 %v2463_v41, %v2459_v22  ;;  %v2703_v57 = vmul.bf16 %v5230_v36, %v5038_v43  ;;  %v1090_v51 = vsel %vm4390_vm4, %v1088_v19, %v1089_v53  ;;  %v2469_v16 = vrot.slane %v2467_v44, 5  ;;  %v2654_v44 = vld [vmem:[%s5404_s0 + $0x14] sm:$0xe] }
 0x12c   :  { %3758 = vmatpush3.bf16.msra.mxu0 %v5209_v24  ;;  %3786 = vmatprep.subr.bf16.mxu1 %v3966_v14  ;;  %v2455_v26 = vrot.slane %v2454_v3, 4  ;;  %v2698_v20 = vmul.bf16 %v5236_v42, %v4935_v17  ;;  %v2734_v49 = vrot.slane %v2697_v5, 5  ;;  %v2704_v43 = vmul.bf16 %v5236_v42, %v5046_v0 }
 0x12d   :  { %3759 = vmatprep.subr.bf16.mxu0 %v5258_v34  ;;  %v2465_v46 = vrot.slane %v2464_v27, 4  ;;  %v2748_v24 = vrot.slane %v2703_v57, 5  ;;  %v1087_v55 = vsel %vm4390_vm4, %v3142_v8, %v5249_v52  ;;  %v2696_v12 = vmul.bf16 %v4770_v23, %v2653_v2 }
 0x12e   :  { %v2460_v17 = vsel %vm4213_vm12, %v2455_v26, %v2459_v22  ;;  %v3311_v30 = vrot.slane %v2702_v56, 9  ;;  %v2736_v39 = vrot.slane %v2734_v49, 4  ;;  %v2751_v0 = vrot.slane %v2704_v43, 5  ;;  %v2658_v56 = vld [vmem:[%s5404_s0 + $0x54] sm:$0xe] }
 0x12f   :  { %3748 = vmatmul.mubr.bf16.gmra.mrb[4].mxu0 %v5213_v58  ;;  %3794 = vmatpush3.bf16.msra.mxu1 %v3966_v14  ;;  %v2470_v4 = vsel %vm4213_vm12, %v2465_v46, %v2469_v16  ;;  %v2750_v38 = vrot.slane %v2748_v24, 4  ;;  %v3164_v25 = vcombine.low %v1087_v55, %v1090_v51  ;;  %v2706_v62 = vmul.bf16 %v5230_v36, %v5094_v59 }
 0x130   :  { %3751 = vmatprep.mubr.bf16.mxu0 %v3297_v13  ;;  %3760 = vmatpush3.bf16.msra.mxu0 %v5258_v34  ;;  %v3298_v52 = vcombine.low %v2460_v17, %v2470_v4  ;;  %v2737_v50 = vrot.slane %v2698_v20, 5  ;;  %v2749_v58 = vsel %vm4221_vm13, %v3311_v30, %v2748_v24  ;;  %v3309_v31 = vrot.slane %v2696_v12, 9 }
 0x131   :  { %3761 = vmatprep.subr.bf16.mxu0 %v3966_v14  ;;  %3787 = vmatprep.subr.bf16.mxu1 %v3967_v15  ;;  %v2752_v61 = vsel %vm4221_vm13, %v2750_v38, %v2751_v0  ;;  %v2709_v9 = vmul.bf16 %v5230_v36, %v5169_v48  ;;  %v2755_v7 = vrot.slane %v2706_v62, 5  ;;  %v2700_v18 = vmul.bf16 %v3982_v21, %v5230_v36  ;;  %v2656_v48 = vld [vmem:[%s5404_s0 + $0x34] sm:$0xe] }
 0x132   :  { %3640 = vmatmul.mubr.bf16.gmra.mrb[8].mxu1 %v3164_v25  ;;  %v3333_v34 = vcombine.low %v2749_v58, %v2752_v61  ;;  %v2738_v59 = vsel %vm4221_vm13, %v2736_v39, %v2737_v50  ;;  %v2735_v47 = vsel %vm4221_vm13, %v3309_v31, %v2734_v49  ;;  %v2707_v6 = vmul.bf16 %v5236_v42, %v5104_v54 }
 0x133   :  { %3795 = vmatpush3.bf16.msra.mxu1 %v3967_v15  ;;  %v3331_v28 = vcombine.low %v2735_v47, %v2738_v59  ;;  %v2762_v40 = vrot.slane %v2709_v9, 5  ;;  %v2710_v19 = vmul.bf16 %v5236_v42, %v5179_v10  ;;  %v2757_v60 = vrot.slane %v2755_v7, 4 }
 0x134   :  { %3762 = vmatpush3.bf16.msra.mxu0 %v3966_v14  ;;  %3775 = vmatprep.mubr.bf16.mxu1 %v3333_v34  ;;  %v3970_v14 = vld [vmem:[%s5403_s1 + $0x238] sm:$0xff]   ;;  %v2705_v54 = vmul.bf16 %v4770_v23, %v2656_v48  ;;  %v2712_v29 = vmul.bf16 %v5230_v36, %v5226_v63  ;;  %v2741_v45 = vrot.slane %v2700_v18, 5  ;;  %v2708_v13 = vmul.bf16 %v4770_v23, %v2657_v11 }
 0x135   :  { %3763 = vmatprep.subr.bf16.mxu0 %v3967_v15  ;;  %3788 = vmatprep.subr.bf16.mxu1 %v3968_v35  ;;  %v2764_v22 = vrot.slane %v2762_v40, 4  ;;  %v2758_v41 = vrot.slane %v2707_v6, 5  ;;  %v2701_v10 = vmul.bf16 %v5236_v42, %v4987_v33  ;;  %v2765_v53 = vrot.slane %v2710_v19, 5  ;;  %v3345_v19 = vld [vmem:[%s5405_s3] ss:$0 sm:$0xff] }
 0x136   :  { %v3312_v3 = vrot.slane %v2705_v54, 9  ;;  %v2769_v36 = vrot.slane %v2712_v29, 5  ;;  %v2743_v5 = vrot.slane %v2741_v45, 4  ;;  %v2699_v8 = vmul.bf16 %v4770_v23, %v2654_v44 }
 0x137   :  { %3752 = vmatmul.mubr.bf16.gmra.mrb[8].mxu0 %v3298_v52  ;;  %3796 = vmatpush3.bf16.msra.mxu1 %v3968_v35  ;;  %v2759_v63 = vsel %vm4221_vm13, %v2757_v60, %v2758_v41  ;;  %v3313_v27 = vrot.slane %v2708_v13, 9  ;;  %v2766_v2 = vsel %vm4221_vm13, %v2764_v22, %v2765_v53  ;;  %v2713_v57 = vmul.bf16 %v5236_v42, %v5246_v32 }
 0x138   :  { %3764 = vmatpush3.bf16.msra.mxu0 %v3967_v15  ;;  %3771 = vmatprep.mubr.bf16.mxu0 %v3331_v28  ;;  %v2756_v33 = vsel %vm4221_vm13, %v3312_v3, %v2755_v7  ;;  %v2744_v51 = vrot.slane %v2701_v10, 5  ;;  %v2711_v46 = vmul.bf16 %v4770_v23, %v2658_v56  ;;  %v2771_v16 = vrot.slane %v2769_v36, 4 }
 0x139   :  { %3765 = vmatprep.subr.bf16.mxu0 %v3968_v35  ;;  %3789 = vmatprep.subr.bf16.mxu1 %v3969_v37  ;;  %v3334_v26 = vcombine.low %v2756_v33, %v2759_v63  ;;  %v2763_v20 = vsel %vm4221_vm13, %v3313_v27, %v2762_v40  ;;  %v3310_v15 = vrot.slane %v2699_v8, 9  ;;  %v2772_v24 = vrot.slane %v2713_v57, 5 }
 0x13a   :  { %v3335_v49 = vcombine.low %v2763_v20, %v2766_v2  ;;  %v2745_v43 = vsel %vm4221_vm13, %v2743_v5, %v2744_v51  ;;  %v3314_v55 = vrot.slane %v2711_v46, 9 }
 0x13b   :  { %3797 = vmatpush3.bf16.msra.mxu1 %v3969_v37  ;;  %v2742_v42 = vsel %vm4221_vm13, %v3310_v15, %v2741_v45  ;;  %v2773_v17 = vsel %vm4221_vm13, %v2771_v16, %v2772_v24 }
 0x13c   :  { %3766 = vmatpush3.bf16.msra.mxu0 %v3968_v35  ;;  %3790 = vmatprep.subr.bf16.mxu1 %v3970_v14  ;;  %v3332_v32 = vcombine.low %v2742_v42, %v2745_v43  ;;  %v2770_v23 = vsel %vm4221_vm13, %v3314_v55, %v2769_v36 }
 0x13d   :  { %3767 = vmatprep.subr.bf16.mxu0 %v3969_v37  ;;  %v3336_v12 = vcombine.low %v2770_v23, %v2773_v17 }
 0x13f   :  { %3798 = vmatpush3.bf16.msra.mxu1 %v3970_v14 }
 0x140   :  { %3768 = vmatpush3.bf16.msra.mxu0 %v3969_v37 }
 0x141   :  { %3769 = vmatprep.subr.bf16.mxu0 %v3970_v14 }
 0x142   :  { %3776 = vmatmul.mubr.bf16.vlgmr.msra.gmra.mrb[12].mxu1 %v3334_v26 }
 0x143   :  { %3779 = vmatprep.mubr.bf16.mxu1 %v3335_v49 }
 0x144   :  { %3770 = vmatpush3.bf16.msra.mxu0 %v3970_v14 }
 0x147   :  { %3772 = vmatmul.mubr.bf16.vlgmr.msra.gmra.mrb[0].mxu0 %v3332_v32 }
 0x14a   :  { %3780 = vmatmul.mubr.bf16.gmra.mrb[16].mxu1 %v3336_v12 }
 0x1f5   :  { %v3633_v30 = vpop.f32.mrb[0].mxu1 }
 0x1f6   :  { %v1214_v4 = vpop.f32.mrb[1].mxu1 }
 0x1f7   :  { %v3634_v39 = vpop.f32.mrb[2].mxu1 }
 0x1f8   :  { %v1217_v38 = vpop.f32.mrb[3].mxu1 }
 0x1fd   :  { %v3637_v0 = vpop.f32.mrb[4].mxu1 }
 0x1fe   :  { %v1230_v25 = vpop.f32.mrb[5].mxu1 }
 0x1ff   :  { %v3638_v52 = vpop.f32.mrb[6].mxu1 }
 0x200   :  { %v1233_v62 = vpop.f32.mrb[7].mxu1 }
 0x202   :  { %v3749_v50 = vpop.f32.mrb[4].mxu0 }
 0x203   :  { %v3803_v58 = vadd.f32 %v3749_v50, %v3637_v0  ;;  %v2610_v61 = vpop.f32.mrb[5].mxu0 }
 0x204   :  { %v3805_v35 = vadd.f32 %v2610_v61, %v1230_v25  ;;  %v3750_v34 = vpop.f32.mrb[6].mxu0 }
 0x205   :  { %v3807_v31 = vadd.f32 %v3750_v34, %v3638_v52  ;;  %v2613_v59 = vpop.f32.mrb[7].mxu0  ;;  %v3641_v9 = vpop.f32.mrb[8].mxu1 }
 0x206   :  { %v3809_v1 = vadd.f32 %v2613_v59, %v1233_v62  ;;  %v1246_v7 = vpop.f32.mrb[9].mxu1 }
 0x207   :  { %v3642_v47 = vpop.f32.mrb[10].mxu1 }
 0x208   :  { %v1249_v37 = vpop.f32.mrb[11].mxu1 }
 0x20a   :  { %v3753_v21 = vpop.f32.mrb[8].mxu0 }
 0x20b   :  { %v3811_v18 = vadd.f32 %v3753_v21, %v3641_v9  ;;  %v2626_v28 = vpop.f32.mrb[9].mxu0 }
 0x20c   :  { %v3813_v48 = vadd.f32 %v2626_v28, %v1246_v7  ;;  %v3754_v40 = vpop.f32.mrb[10].mxu0 }
 0x20d   :  { %v3815_v6 = vadd.f32 %v3754_v40, %v3642_v47  ;;  %v2629_v11 = vpop.f32.mrb[11].mxu0 }
 0x20e   :  { %v3817_v14 = vadd.f32 %v2629_v11, %v1249_v37 }
 0x215   :  { %v3777_v60 = vpop.f32.mrb[12].mxu1 }
 0x216   :  { %v3804_v54 = vadd.f32 %v3803_v58, %v3777_v60  ;;  %v2913_v29 = vpop.f32.mrb[13].mxu1 }
 0x217   :  { %v3806_v45 = vadd.f32 %v3805_v35, %v2913_v29  ;;  %v3778_v13 = vpop.f32.mrb[14].mxu1 }
 0x218   :  { %v2969_v22 = vadd.f32 %v3804_v54, %v3345_v19  ;;  %v3808_v41 = vadd.f32 %v3807_v31, %v3778_v13  ;;  %v2916_v44 = vpop.f32.mrb[15].mxu1 }
 0x219   :  { %v2967_v10 = vadd.f32 %v3806_v45, %v3345_v19  ;;  %v3810_v53 = vadd.f32 %v3809_v1, %v2916_v44 }
 0x21a   :  { %v3773_v3 = vpop.f32.mrb[0].mxu0  ;;  %v2970_v63 = vadd.f32 %v3808_v41, %v3345_v19  ;;  %v2981_v27 = vmax.f32 %v2969_v22, 0.0 }
 0x21b   :  { %v3799_v36 = vadd.f32 %v3773_v3, %v3633_v30  ;;  %v2897_v5 = vpop.f32.mrb[1].mxu0  ;;  %v2968_v8 = vadd.f32 %v3810_v53, %v3345_v19  ;;  %v2979_v51 = vmax.f32 %v2967_v10, 0.0 }
 0x21c   :  { %v3800_v2 = vadd.f32 %v2897_v5, %v1214_v4  ;;  %v3774_v56 = vpop.f32.mrb[2].mxu0  ;;  %v2982_v33 = vmax.f32 %v2970_v63, 0.0 }
 0x21d   :  { %v2965_v57 = vadd.f32 %v3799_v36, %v3345_v19  ;;  %v3801_v26 = vadd.f32 %v3774_v56, %v3634_v39  ;;  %v2900_v20 = vpop.f32.mrb[3].mxu0  ;;  %v2980_v49 = vmax.f32 %v2968_v8, 0.0  ;;  %v3781_v46 = vpop.f32.mrb[16].mxu1 }
 0x21e   :  { %v2963_v16 = vadd.f32 %v3800_v2, %v3345_v19  ;;  %v3388_v15 = vpack.c.bf16 %v2982_v33, %v2981_v27  ;;  %v3802_v43 = vadd.f32 %v2900_v20, %v1217_v38  ;;  %v3812_v24 = vadd.f32 %v3811_v18, %v3781_v46  ;;  %v2929_v42 = vpop.f32.mrb[17].mxu1 }
 0x21f   :  { %v2966_v32 = vadd.f32 %v3801_v26, %v3345_v19  ;;  %v3383_v55 = vpack.c.bf16 %v2980_v49, %v2979_v51  ;;  %v3814_v17 = vadd.f32 %v3813_v48, %v2929_v42  ;;  %v3782_v23 = vpop.f32.mrb[18].mxu1  ;;  %v2977_v0 = vmax.f32 %v2965_v57, 0.0 }
 0x220   :  { %3402 = vst [vmem:[%s5406_s4 + $0x18] sm:$0xff] %v3388_v15   ;;  %v2964_v12 = vadd.f32 %v3802_v43, %v3345_v19  ;;  %v2973_v30 = vadd.f32 %v3812_v24, %v3345_v19  ;;  %v3816_v4 = vadd.f32 %v3815_v6, %v3782_v23  ;;  %v2932_v39 = vpop.f32.mrb[19].mxu1  ;;  %v2975_v62 = vmax.f32 %v2963_v16, 0.0 }
 0x221   :  { %v2978_v25 = vmax.f32 %v2966_v32, 0.0  ;;  %3401 = vst [vmem:[%s5406_s4 + $0x10] sm:$0xff] %v3383_v55   ;;  %v2971_v38 = vadd.f32 %v3814_v17, %v3345_v19  ;;  %v3818_v52 = vadd.f32 %v3817_v14, %v2932_v39 }
 0x222   :  { %v2976_v50 = vmax.f32 %v2964_v12, 0.0  ;;  %v2974_v58 = vadd.f32 %v3816_v4, %v3345_v19  ;;  %v2985_v31 = vmax.f32 %v2973_v30, 0.0 }
 0x223   :  { %v3378_v61 = vpack.c.bf16 %v2978_v25, %v2977_v0  ;;  %v2972_v35 = vadd.f32 %v3818_v52, %v3345_v19  ;;  %v2983_v9 = vmax.f32 %v2971_v38, 0.0 }
 0x224   :  { %v3373_v34 = vpack.c.bf16 %v2976_v50, %v2975_v62  ;;  %v2986_v59 = vmax.f32 %v2974_v58, 0.0 }
 0x225   :  { %3400 = vst [vmem:[%s5406_s4 + $0x8] sm:$0xff] %v3378_v61   ;;  %v2984_v1 = vmax.f32 %v2972_v35, 0.0 }
 0x226   :  { %3374 = vst [vmem:[%s5406_s4] sm:$0xff] %v3373_v34   ;;  %v3398_v7 = vpack.c.bf16 %v2986_v59, %v2985_v31 }
 0x227   :  { %v3393_v47 = vpack.c.bf16 %v2984_v1, %v2983_v9 }
 0x228   :  { %3404 = vst [vmem:[%s5406_s4 + $0x28] sm:$0xff] %v3398_v7  }
 0x229   :  { %3403 = vst [vmem:[%s5406_s4 + $0x20] sm:$0xff] %v3393_v47  }

// kernel: _lambda_.13
= control target key start
LH: loop header
LB: loop body
LE: loop exit
PB: predicated region body
PF: predicated region fallthrough
CT: control target
= control target key end

     0   :  { %v10700_v0 = vmov 0   ;;  %vm393_vm0 = vsmask.f32 256  ;;  %vm394_vm1 = vsmask.f32 4368  ;;  %vm1959_vm6 = vcmask 1040384   ;;  %s14979_s2 = inlined_call_operand.vmem [shape: bf16[9,64,1], index: 2, kind: input, shape index: {}]   ;;  %s14980_s1 = inlined_call_operand.vmem [shape: bf16[3,3,128,128], index: 1, kind: input, shape index: {}]   ;;  %s14981_s0 = inlined_call_operand.vmem [shape: bf16[6,82,128], index: 0, kind: input, shape index: {}]   ;;  %s14982_s3 = inlined_call_operand.vmem [shape: f32[1,128], index: 3, kind: input, shape index: {}]   ;;  %s14983_s4 = inlined_call_operand.vmem [shape: bf16[384,128], index: 4, kind: output, shape index: {}]  }
   0x1   :  { %10423 = vset.pattern.permute.xlu1 %v10700_v0  ;;  %10422 = vset.pattern.permute.xlu0 %v10700_v0  ;;  %v8624_v1 = vld [vmem:[%s14979_s2 + $0x80] sm:$0xf]  ;;  %v8625_v3 = vld [vmem:[%s14979_s2 + $0x84] sm:$0xf]  ;;  %v8421_v5 = vld [vmem:[%s14979_s2 + $0x2c] sm:$0xf] }
   0x2   :  { %v8418_v2 = vld [vmem:[%s14979_s2 + $0x20] sm:$0xf]  ;;  %3395 = vperm.xlu1 %10423, %v8624_v1   ;;  %v8419_v4 = vld [vmem:[%s14979_s2 + $0x24] sm:$0xf]  ;;  %v8420_v6 = vld [vmem:[%s14979_s2 + $0x28] sm:$0xf] }
   0x3   :  { %299 = vperm.xlu0 %10422, %v8418_v2   ;;  %v8627_v7 = vld [vmem:[%s14979_s2 + $0x8c] sm:$0xf]  ;;  %v8626_v8 = vld [vmem:[%s14979_s2 + $0x88] sm:$0xf]  ;;  %v8628_v9 = vld [vmem:[%s14979_s2 + $0x90] sm:$0xf] }
   0x4   :  { %v8422_v10 = vld [vmem:[%s14979_s2 + $0x30] sm:$0xf]  ;;  %v8629_v11 = vld [vmem:[%s14979_s2 + $0x94] sm:$0xf]  ;;  %v8425_v13 = vld [vmem:[%s14979_s2 + $0x3c] sm:$0xf] }
   0x5   :  { %v8423_v12 = vld [vmem:[%s14979_s2 + $0x34] sm:$0xf]  ;;  %v10424_v14 = vld [vmem:[%s14980_s1 + $0x40] sm:$0xff]   ;;  %v8424_v15 = vld [vmem:[%s14979_s2 + $0x38] sm:$0xf]  ;;  %vm1960_vm7 = vcmask 1044484  }
   0x6   :  { %3407 = vperm.xlu1 %10423, %v8625_v3   ;;  %9444 = vmatprep.subr.bf16.mxu1 %v10424_v14  ;;  %v10425_v16 = vld [vmem:[%s14980_s1 + $0x100] sm:$0xff]   ;;  %v8631_v17 = vld [vmem:[%s14979_s2 + $0x9c] sm:$0xf]  ;;  %v8630_v18 = vld [vmem:[%s14979_s2 + $0x98] sm:$0xf]  ;;  %vm2102_vm9 = vcmask 1042432  }
   0x7   :  { %311 = vperm.xlu0 %10422, %v8419_v4   ;;  %9445 = vmatpush3.bf16.msra.mxu1 %v10424_v14  ;;  %v10426_v19 = vld [vmem:[%s14980_s1 + $0x48] sm:$0xff]   ;;  %v10428_v21 = vld [vmem:[%s14980_s1 + $0x50] sm:$0xff]   ;;  %v8681_v22 = vld [vmem:[%s14979_s2 + $0xa4] sm:$0xf]  ;;  %vm530_vm3 = vsmask.f32 3328 }
   0x8   :  { %9700 = vmatprep.subr.bf16.mxu0 %v10425_v16  ;;  %v10427_v20 = vld [vmem:[%s14980_s1 + $0x108] sm:$0xff]   ;;  %9446 = vmatprep.subr.bf16.mxu1 %v10426_v19  ;;  %v8680_v23 = vld [vmem:[%s14979_s2 + $0xa0] sm:$0xf]  ;;  %v10429_v24 = vld [vmem:[%s14980_s1 + $0x110] sm:$0xff]   ;;  %vm531_vm4 = vsmask.f32 7440 }
   0x9   :  { %9701 = vmatpush3.bf16.msra.mxu0 %v10425_v16  ;;  %v10430_v25 = vld [vmem:[%s14980_s1 + $0x58] sm:$0xff]   ;;  %v8683_v27 = vld [vmem:[%s14979_s2 + $0xac] sm:$0xf]  ;;  %v8682_v28 = vld [vmem:[%s14979_s2 + $0xa8] sm:$0xf]  ;;  %vm2103_vm10 = vcmask 1046532  }
   0xa   :  { %335 = vperm.xlu1 %10423, %v8421_v5   ;;  %9702 = vmatprep.subr.bf16.mxu0 %v10427_v20  ;;  %v10431_v26 = vld [vmem:[%s14980_s1 + $0x118] sm:$0xff]   ;;  %v10432_v29 = vld [vmem:[%s14980_s1 + $0x60] sm:$0xff]   ;;  %v8685_v31 = vld [vmem:[%s14979_s2 + $0xb4] sm:$0xf] }
   0xb   :  { %323 = vperm.xlu0 %10422, %v8420_v6   ;;  %9447 = vmatpush3.bf16.msra.mxu1 %v10426_v19  ;;  %v10433_v30 = vld [vmem:[%s14980_s1 + $0x120] sm:$0xff]   ;;  %v8684_v32 = vld [vmem:[%s14979_s2 + $0xb0] sm:$0xf]  ;;  %v10434_v33 = vld [vmem:[%s14980_s1 + $0x68] sm:$0xff]  }
   0xc   :  { %9448 = vmatprep.subr.bf16.mxu1 %v10428_v21  ;;  %v10435_v34 = vld [vmem:[%s14980_s1 + $0x128] sm:$0xff]   ;;  %v8687_v35 = vld [vmem:[%s14979_s2 + $0xbc] sm:$0xf]  ;;  %v8686_v36 = vld [vmem:[%s14979_s2 + $0xb8] sm:$0xf] }
   0xd   :  { %9703 = vmatpush3.bf16.msra.mxu0 %v10427_v20  ;;  %v10436_v37 = vld [vmem:[%s14980_s1 + $0x70] sm:$0xff]   ;;  %v67_v39 = vld [vmem:[%s14979_s2 + $0x4] sm:$0xf]  ;;  %v66_v40 = vld [vmem:[%s14979_s2] sm:$0xf] }
   0xe   :  { %3431 = vperm.xlu1 %10423, %v8627_v7   ;;  %9704 = vmatprep.subr.bf16.mxu0 %v10429_v24  ;;  %v10437_v38 = vld [vmem:[%s14980_s1 + $0x130] sm:$0xff]   ;;  %v10438_v41 = vld [vmem:[%s14980_s1 + $0x78] sm:$0xff]   ;;  %v69_v43 = vld [vmem:[%s14979_s2 + $0xc] sm:$0xf] }
   0xf   :  { %3419 = vperm.xlu0 %10422, %v8626_v8   ;;  %9449 = vmatpush3.bf16.msra.mxu1 %v10428_v21  ;;  %v10439_v42 = vld [vmem:[%s14980_s1 + $0x138] sm:$0xff]   ;;  %v68_v44 = vld [vmem:[%s14979_s2 + $0x8] sm:$0xf]  ;;  %v71_v45 = vld [vmem:[%s14979_s2 + $0x14] sm:$0xf] }
  0x10   :  { %9450 = vmatprep.subr.bf16.mxu1 %v10430_v25  ;;  %v70_v46 = vld [vmem:[%s14979_s2 + $0x10] sm:$0xf]  ;;  %v73_v47 = vld [vmem:[%s14979_s2 + $0x1c] sm:$0xf]  ;;  %v72_v48 = vld [vmem:[%s14979_s2 + $0x18] sm:$0xf] }
  0x11   :  { %9705 = vmatpush3.bf16.msra.mxu0 %v10429_v24  ;;  %v10874_v49 = vld [vmem:[%s14980_s1] sm:$0xff]   ;;  %v8745_v53 = vld [vmem:[%s14979_s2 + $0xcc] sm:$0xf]  ;;  %v8744_v54 = vld [vmem:[%s14979_s2 + $0xc8] sm:$0xf] }
  0x12   :  { %3443 = vperm.xlu1 %10423, %v8628_v9   ;;  %9706 = vmatprep.subr.bf16.mxu0 %v10431_v26  ;;  %v10879_v50 = vld [vmem:[%s14980_s1 + $0x140] sm:$0xff]   ;;  %v8747_v55 = vld [vmem:[%s14979_s2 + $0xd4] sm:$0xf]  ;;  %v8746_v56 = vld [vmem:[%s14979_s2 + $0xd0] sm:$0xf] }
  0x13   :  { %347 = vperm.xlu0 %10422, %v8422_v10   ;;  %9451 = vmatpush3.bf16.msra.mxu1 %v10430_v25  ;;  %v8743_v51 = vld [vmem:[%s14979_s2 + $0xc4] sm:$0xf]  ;;  %v8742_v52 = vld [vmem:[%s14979_s2 + $0xc0] sm:$0xf]  ;;  %v8749_v57 = vld [vmem:[%s14979_s2 + $0xdc] sm:$0xf] }
  0x14   :  { %9452 = vmatprep.subr.bf16.mxu1 %v10432_v29  ;;  %v8748_v58 = vld [vmem:[%s14979_s2 + $0xd8] sm:$0xf]  ;;  %v8507_v59 = vld [vmem:[%s14979_s2 + $0x44] sm:$0xf]  ;;  %v8506_v60 = vld [vmem:[%s14979_s2 + $0x40] sm:$0xf] }
  0x15   :  { %9707 = vmatpush3.bf16.msra.mxu0 %v10431_v26  ;;  %v8509_v61 = vld [vmem:[%s14979_s2 + $0x4c] sm:$0xf]  ;;  %v8508_v62 = vld [vmem:[%s14979_s2 + $0x48] sm:$0xf]  ;;  %v8511_v63 = vld [vmem:[%s14979_s2 + $0x54] sm:$0xf] }
  0x16   :  { %3455 = vperm.xlu1 %10423, %v8629_v11   ;;  %9708 = vmatprep.subr.bf16.mxu0 %v10433_v30  ;;  %v8510_v0 = vld [vmem:[%s14979_s2 + $0x50] sm:$0xf]  ;;  %v8513_v1 = vld [vmem:[%s14979_s2 + $0x5c] sm:$0xf]  ;;  %v8512_v2 = vld [vmem:[%s14979_s2 + $0x58] sm:$0xf] }
  0x17   :  { %359 = vperm.xlu0 %10422, %v8423_v12   ;;  %9453 = vmatpush3.bf16.msra.mxu1 %v10432_v29  ;;  %v8799_v3 = vld [vmem:[%s14979_s2 + $0xe4] sm:$0xf]  ;;  %v8798_v4 = vld [vmem:[%s14979_s2 + $0xe0] sm:$0xf]  ;;  %v8801_v5 = vld [vmem:[%s14979_s2 + $0xec] sm:$0xf] }
  0x18   :  { %9454 = vmatprep.subr.bf16.mxu1 %v10434_v33  ;;  %v8800_v6 = vld [vmem:[%s14979_s2 + $0xe8] sm:$0xf]  ;;  %v8803_v7 = vld [vmem:[%s14979_s2 + $0xf4] sm:$0xf]  ;;  %v8802_v8 = vld [vmem:[%s14979_s2 + $0xf0] sm:$0xf] }
  0x19   :  { %9709 = vmatpush3.bf16.msra.mxu0 %v10433_v30  ;;  %v8805_v9 = vld [vmem:[%s14979_s2 + $0xfc] sm:$0xf]  ;;  %v8804_v10 = vld [vmem:[%s14979_s2 + $0xf8] sm:$0xf]  ;;  %v8569_v11 = vld [vmem:[%s14979_s2 + $0x64] sm:$0xf] }
  0x1a   :  { %383 = vperm.xlu1 %10423, %v8425_v13   ;;  %9710 = vmatprep.subr.bf16.mxu0 %v10435_v34  ;;  %v8568_v12 = vld [vmem:[%s14979_s2 + $0x60] sm:$0xf]  ;;  %v8571_v13 = vld [vmem:[%s14979_s2 + $0x6c] sm:$0xf]  ;;  %v8570_v14 = vld [vmem:[%s14979_s2 + $0x68] sm:$0xf] }
  0x1b   :  { %371 = vperm.xlu0 %10422, %v8424_v15   ;;  %9455 = vmatpush3.bf16.msra.mxu1 %v10434_v33  ;;  %v10701_v15 = vmov 839922192   ;;  %v8572_v19 = vld [vmem:[%s14979_s2 + $0x70] sm:$0xf]  ;;  %v8855_v25 = vld [vmem:[%s14979_s2 + $0x104] sm:$0xf]  ;;  %vm11037_vm2 = vmor %vm393_vm0, %vm394_vm1 }
  0x1c   :  { %9456 = vmatprep.subr.bf16.mxu1 %v10436_v37  ;;  %v80_v16 = vunpack.c.l.s4 %v10701_v15  ;;  %v8854_v26 = vld [vmem:[%s14979_s2 + $0x100] sm:$0xf]  ;;  %vm11108_vm5 = vmor %vm530_vm3, %vm531_vm4 }
  0x1d   :  { %9711 = vmatpush3.bf16.msra.mxu0 %v10435_v34  ;;  %vm11215_vm8 = vmor %vm1959_vm6, %vm1960_vm7 }
  0x1e   :  { %3479 = vperm.xlu1 %10423, %v8631_v17   ;;  %9712 = vmatprep.subr.bf16.mxu0 %v10437_v38  ;;  %v82_v17 = vlaneseq  ;;  %v81_v20 = vunpack.c.0.s8 %v80_v16  ;;  %vm11767_vm11 = vmor %vm2102_vm9, %vm2103_vm10 }
  0x1f   :  { %3467 = vperm.xlu0 %10422, %v8630_v18   ;;  %9457 = vmatpush3.bf16.msra.mxu1 %v10436_v37  ;;  %v8573_v18 = vld [vmem:[%s14979_s2 + $0x74] sm:$0xf] }
  0x20   :  { %9458 = vmatprep.subr.bf16.mxu1 %v10438_v41  ;;  %v83_v21 = vshrl.u32 %v82_v17, 7 }
  0x21   :  { %9713 = vmatpush3.bf16.msra.mxu0 %v10437_v38 }
  0x22   :  { %4590 = vperm.xlu1 %10423, %v8681_v22   ;;  %9714 = vmatprep.subr.bf16.mxu0 %v10439_v42  ;;  %v8575_v22 = vld [vmem:[%s14979_s2 + $0x7c] sm:$0xf]  ;;  %v10979_v24 = vsub.s32 %v81_v20, %v83_v21 }
  0x23   :  { %4578 = vperm.xlu0 %10422, %v8680_v23   ;;  %9459 = vmatpush3.bf16.msra.mxu1 %v10438_v41  ;;  %v8574_v23 = vld [vmem:[%s14979_s2 + $0x78] sm:$0xf] }
  0x24   :  { %9508 = vmatprep.subr.bf16.mxu1 %v10874_v49 }
  0x25   :  { %9715 = vmatpush3.bf16.msra.mxu0 %v10439_v42 }
  0x26   :  { %4614 = vperm.xlu1 %10423, %v8683_v27   ;;  %9764 = vmatprep.subr.bf16.mxu0 %v10879_v50 }
  0x27   :  { %4602 = vperm.xlu0 %10422, %v8682_v28  }
  0x2a   :  { %4638 = vperm.xlu1 %10423, %v8685_v31   ;;  %v8857_v31 = vld [vmem:[%s14979_s2 + $0x10c] sm:$0xf] }
  0x2b   :  { %4626 = vperm.xlu0 %10422, %v8684_v32   ;;  %v8856_v32 = vld [vmem:[%s14979_s2 + $0x108] sm:$0xf] }
  0x2e   :  { %4662 = vperm.xlu1 %10423, %v8687_v35  }
  0x2f   :  { %4650 = vperm.xlu0 %10422, %v8686_v36  }
  0x32   :  { %88 = vperm.xlu1 %10423, %v67_v39  }
  0x33   :  { %76 = vperm.xlu0 %10422, %v66_v40  }
  0x36   :  { %112 = vperm.xlu1 %10423, %v69_v43   ;;  %v8859_v43 = vld [vmem:[%s14979_s2 + $0x114] sm:$0xf] }
  0x37   :  { %100 = vperm.xlu0 %10422, %v68_v44   ;;  %v8858_v44 = vld [vmem:[%s14979_s2 + $0x110] sm:$0xf] }
  0x3a   :  { %136 = vperm.xlu1 %10423, %v71_v45   ;;  %v234_v45 = vld [vmem:[%s14981_s0] sm:$0xf] }
  0x3b   :  { %124 = vperm.xlu0 %10422, %v70_v46  }
  0x3e   :  { %160 = vperm.xlu1 %10423, %v73_v47  }
  0x3f   :  { %148 = vperm.xlu0 %10422, %v72_v48  }
  0x42   :  { %5433 = vperm.xlu1 %10423, %v8743_v51   ;;  %v3330_v51 = vld [vmem:[%s14981_s0 + $0x4] sm:$0xf] }
  0x43   :  { %5421 = vperm.xlu0 %10422, %v8742_v52   ;;  %v243_v52 = vld [vmem:[%s14981_s0 + $0x2c] sm:$0xf] }
  0x46   :  { %5457 = vperm.xlu1 %10423, %v8745_v53  }
  0x47   :  { %5445 = vperm.xlu0 %10422, %v8744_v54  }
  0x4a   :  { %5481 = vperm.xlu1 %10423, %v8747_v55  }
  0x4b   :  { %5469 = vperm.xlu0 %10422, %v8746_v56  }
  0x4e   :  { %5505 = vperm.xlu1 %10423, %v8749_v57  }
  0x4f   :  { %5493 = vperm.xlu0 %10422, %v8748_v58  }
  0x52   :  { %1869 = vperm.xlu1 %10423, %v8507_v59  }
  0x53   :  { %1857 = vperm.xlu0 %10422, %v8506_v60  }
  0x56   :  { %1893 = vperm.xlu1 %10423, %v8509_v61  }
  0x57   :  { %1881 = vperm.xlu0 %10422, %v8508_v62  }
  0x5a   :  { %1917 = vperm.xlu1 %10423, %v8511_v63  }
  0x5b   :  { %1905 = vperm.xlu0 %10422, %v8510_v0  }
  0x5e   :  { %1941 = vperm.xlu1 %10423, %v8513_v1   ;;  %v8861_v1 = vld [vmem:[%s14979_s2 + $0x11c] sm:$0xf] }
  0x5f   :  { %1929 = vperm.xlu0 %10422, %v8512_v2   ;;  %v8860_v2 = vld [vmem:[%s14979_s2 + $0x118] sm:$0xf] }
  0x62   :  { %6122 = vperm.xlu1 %10423, %v8799_v3  }
  0x63   :  { %6110 = vperm.xlu0 %10422, %v8798_v4  }
  0x66   :  { %6146 = vperm.xlu1 %10423, %v8801_v5  }
  0x67   :  { %6134 = vperm.xlu0 %10422, %v8800_v6  }
  0x6a   :  { %6170 = vperm.xlu1 %10423, %v8803_v7  }
  0x6b   :  { %6158 = vperm.xlu0 %10422, %v8802_v8  }
  0x6e   :  { %6194 = vperm.xlu1 %10423, %v8805_v9  }
  0x6f   :  { %6182 = vperm.xlu0 %10422, %v8804_v10  }
  0x72   :  { %2718 = vperm.xlu1 %10423, %v8569_v11  }
  0x73   :  { %2706 = vperm.xlu0 %10422, %v8568_v12  }
  0x76   :  { %2742 = vperm.xlu1 %10423, %v8571_v13  }
  0x77   :  { %2730 = vperm.xlu0 %10422, %v8570_v14  }
  0x7a   :  { %2766 = vperm.xlu1 %10423, %v8573_v18  }
  0x7b   :  { %2754 = vperm.xlu0 %10422, %v8572_v19  }
  0x7e   :  { %2790 = vperm.xlu1 %10423, %v8575_v22  }
  0x7f   :  { %2778 = vperm.xlu0 %10422, %v8574_v23  }
  0x81   :  { %v3396_v27 = vpop.permute.xlu1 %3395 }
  0x82   :  { %v300_v28 = vpop.permute.xlu0 %299  ;;  %v3404_v29 = vrot.slane %v3396_v27, %v10979_v24  ;;  %7305 = vperm.xlu1 %10423, %v8855_v25  }
  0x83   :  { %v308_v30 = vrot.slane %v300_v28, %v10979_v24  ;;  %7293 = vperm.xlu0 %10422, %v8854_v26  }
  0x84   :  { %v3490_v33 = vshrl.u32 %v3404_v29, 16  ;;  %v3493_v35 = vshll.u32 %v3404_v29, 16  ;;  %v235_v29 = vld [vmem:[%s14981_s0 + $0x4] sm:$0xf] }
  0x85   :  { %v397_v34 = vshrl.u32 %v308_v30, 16  ;;  %v400_v36 = vshll.u32 %v308_v30, 16  ;;  %v3408_v37 = vpop.permute.xlu1 %3407  ;;  %v236_v30 = vld [vmem:[%s14981_s0 + $0x8] sm:$0xf] }
  0x86   :  { %v312_v38 = vpop.permute.xlu0 %311  ;;  %v3492_v39 = vrot.slane %v3490_v33, 7  ;;  %v3416_v41 = vrot.slane %v3408_v37, %v10979_v24  ;;  %7329 = vperm.xlu1 %10423, %v8857_v31  }
  0x87   :  { %v399_v40 = vrot.slane %v397_v34, 7  ;;  %v320_v42 = vrot.slane %v312_v38, %v10979_v24  ;;  %7317 = vperm.xlu0 %10422, %v8856_v32  }
  0x88   :  { %v11006_v46 = vor.u32 %v3493_v35, %v3492_v39  ;;  %v3496_v47 = vrot.slane %v3492_v39, 4  ;;  %v3498_v54 = vshrl.u32 %v3416_v41, 16  ;;  %v3501_v55 = vshll.u32 %v3416_v41, 16 }
  0x89   :  { %v11008_v48 = vor.u32 %v400_v36, %v399_v40  ;;  %v403_v53 = vrot.slane %v399_v40, 4  ;;  %v405_v56 = vshrl.u32 %v320_v42, 16  ;;  %v336_v57 = vpop.permute.xlu1 %335  ;;  %v408_v59 = vshll.u32 %v320_v42, 16 }
  0x8a   :  { %15083 = vst [vmem:[#allocation2_spill] sm:$0xff] %v11006_v46  ;;  %v324_v58 = vpop.permute.xlu0 %323  ;;  %v344_v60 = vrot.slane %v336_v57, %v10979_v24  ;;  %7353 = vperm.xlu1 %10423, %v8859_v43   ;;  %v11021_v63 = vrot.slane %v3498_v54, 7  ;;  %v11030_v3 = vmul.bf16 %v11006_v46, %v3330_v51 }
  0x8b   :  { %v332_v61 = vrot.slane %v324_v58, %v10979_v24  ;;  %7341 = vperm.xlu0 %10422, %v8858_v44   ;;  %v11019_v62 = vmul.bf16 %v11008_v48, %v234_v45  ;;  %v407_v0 = vrot.slane %v405_v56, 7  ;;  %v11033_v4 = vmul.bf16 %v11008_v48, %v243_v52 }
  0x8c   :  { %v423_v6 = vshrl.u32 %v344_v60, 16  ;;  %v426_v7 = vshll.u32 %v344_v60, 16  ;;  %v3503_v10 = vor.u32 %v3501_v55, %v11021_v63  ;;  %v3505_v11 = vrot.slane %v11021_v63, 4 }
  0x8d   :  { %v414_v8 = vshrl.u32 %v332_v61, 16  ;;  %v417_v9 = vshll.u32 %v332_v61, 16  ;;  %v410_v12 = vor.u32 %v408_v59, %v407_v0  ;;  %v412_v13 = vrot.slane %v407_v0, 4  ;;  %v3432_v14 = vpop.permute.xlu1 %3431 }
  0x8e   :  { %v3420_v15 = vpop.permute.xlu0 %3419  ;;  %v11043_v16 = vrot.slane %v423_v6, 7  ;;  %v3440_v18 = vrot.slane %v3432_v14, %v10979_v24  ;;  %7377 = vperm.xlu1 %10423, %v8861_v1   ;;  %v11049_v20 = vsel %vm11037_vm2, %v3496_v47, %v3503_v10  ;;  %v534_v22 = vshrl.u32 %v11019_v62, 16 }
  0x8f   :  { %v416_v17 = vrot.slane %v414_v8, 7  ;;  %v3428_v19 = vrot.slane %v3420_v15, %v10979_v24  ;;  %7365 = vperm.xlu0 %10422, %v8860_v2   ;;  %15086 = vst [vmem:[#allocation3_spill] sm:$0xff] %v11049_v20  ;;  %v11053_v21 = vsel %vm11037_vm2, %v403_v53, %v410_v12  ;;  %v537_v23 = vshll.u32 %v11019_v62, 16 }
  0x90   :  { %v428_v25 = vor.u32 %v426_v7, %v11043_v16  ;;  %v430_v26 = vrot.slane %v11043_v16, 4  ;;  %v3516_v31 = vshrl.u32 %v3440_v18, 16  ;;  %v3519_v32 = vshll.u32 %v3440_v18, 16 }
  0x91   :  { %v419_v27 = vor.u32 %v417_v9, %v416_v17  ;;  %v421_v28 = vrot.slane %v416_v17, 4  ;;  %v3507_v33 = vshrl.u32 %v3428_v19, 16  ;;  %v3510_v34 = vshll.u32 %v3428_v19, 16  ;;  %v3444_v35 = vpop.permute.xlu1 %3443 }
  0x92   :  { %v348_v36 = vpop.permute.xlu0 %347  ;;  %v3452_v39 = vrot.slane %v3444_v35, %v10979_v24  ;;  %v3518_v41 = vrot.slane %v3516_v31, 7  ;;  %v11076_v43 = vmul.bf16 %v11053_v21, %v235_v29  ;;  %v536_v1 = vrot.slane %v534_v22, 4 }
  0x93   :  { %v11067_v37 = vsel %vm11037_vm2, %v412_v13, %v419_v27  ;;  %v11071_v38 = vsel %vm11037_vm2, %v421_v28, %v428_v25  ;;  %v356_v40 = vrot.slane %v348_v36, %v10979_v24  ;;  %v3509_v42 = vrot.slane %v3507_v33, 7 }
  0x94   :  { %v11079_v44 = vmul.bf16 %v11067_v37, %v236_v30  ;;  %v3525_v45 = vshrl.u32 %v3452_v39, 16  ;;  %v3528_v47 = vshll.u32 %v3452_v39, 16  ;;  %v3521_v53 = vor.u32 %v3519_v32, %v3518_v41 }
  0x95   :  { %v432_v51 = vshrl.u32 %v356_v40, 16  ;;  %v435_v52 = vshll.u32 %v356_v40, 16  ;;  %v3523_v54 = vrot.slane %v3518_v41, 4  ;;  %v3512_v55 = vor.u32 %v3510_v34, %v3509_v42  ;;  %v3456_v57 = vpop.permute.xlu1 %3455 }
  0x96   :  { %v3514_v56 = vrot.slane %v3509_v42, 4  ;;  %v360_v58 = vpop.permute.xlu0 %359  ;;  %v3527_v59 = vrot.slane %v3525_v45, 7  ;;  %v3464_v61 = vrot.slane %v3456_v57, %v10979_v24  ;;  %v539_v2 = vrot.slane %v537_v23, 5 }
  0x97   :  { %v434_v60 = vrot.slane %v432_v51, 7  ;;  %v368_v62 = vrot.slane %v360_v58, %v10979_v24  ;;  %v11085_v63 = vsel %vm11037_vm2, %v3505_v11, %v3512_v55  ;;  %v543_v27 = vshll.u32 %v11076_v43, 16  ;;  %v3331_v58 = vld [vmem:[%s14981_s0 + $0x8] sm:$0xf] }
  0x98   :  { %15087 = vst [vmem:[#allocation4_spill] sm:$0xff] %v11085_v63  ;;  %v11089_v0 = vsel %vm11037_vm2, %v3514_v56, %v3521_v53  ;;  %v3530_v6 = vor.u32 %v3528_v47, %v3527_v59  ;;  %v3532_v7 = vrot.slane %v3527_v59, 4  ;;  %v3534_v10 = vshrl.u32 %v3464_v61, 16  ;;  %v3332_v59 = vld [vmem:[%s14981_s0 + $0xc] sm:$0xf] }
  0x99   :  { %15088 = vst [vmem:[#allocation5_spill] sm:$0xff] %v11089_v0  ;;  %v437_v8 = vor.u32 %v435_v52, %v434_v60  ;;  %v439_v9 = vrot.slane %v434_v60, 4  ;;  %v3537_v12 = vshll.u32 %v3464_v61, 16  ;;  %v441_v13 = vshrl.u32 %v368_v62, 16  ;;  %v384_v15 = vpop.permute.xlu1 %383 }
  0x9a   :  { %v444_v14 = vshll.u32 %v368_v62, 16  ;;  %v372_v16 = vpop.permute.xlu0 %371  ;;  %v11093_v11 = vsel %vm11037_vm2, %v3523_v54, %v3530_v6  ;;  %v392_v18 = vrot.slane %v384_v15, %v10979_v24  ;;  %v11101_v22 = vrot.slane %v3534_v10, 7 }
  0x9b   :  { %15089 = vst [vmem:[#allocation6_spill] sm:$0xff] %v11093_v11  ;;  %v11097_v17 = vsel %vm11037_vm2, %v430_v26, %v437_v8  ;;  %v380_v19 = vrot.slane %v372_v16, %v10979_v24  ;;  %v443_v23 = vrot.slane %v441_v13, 7  ;;  %v540_v25 = vor.u32 %v539_v2, %v536_v1 }
  0x9c   :  { %v459_v28 = vshrl.u32 %v392_v18, 16  ;;  %v462_v29 = vshll.u32 %v392_v18, 16  ;;  %v3539_v32 = vor.u32 %v3537_v12, %v11101_v22  ;;  %v3541_v33 = vrot.slane %v11101_v22, 4 }
  0x9d   :  { %v450_v30 = vshrl.u32 %v380_v19, 16  ;;  %v453_v31 = vshll.u32 %v380_v19, 16  ;;  %v446_v26 = vor.u32 %v444_v14, %v443_v23  ;;  %v448_v34 = vrot.slane %v443_v23, 4  ;;  %v3480_v42 = vpop.permute.xlu1 %3479 }
  0x9e   :  { %v461_v35 = vrot.slane %v459_v28, 7  ;;  %v15090_v39 = vmov 0  ;;  %v541_v40 = vrot.slane %v540_v25, 4  ;;  %v545_v41 = vrot.slane %v543_v27, 5  ;;  %v3468_v53 = vpop.permute.xlu0 %3467 }
  0x9f   :  { %v452_v36 = vrot.slane %v450_v30, 7  ;;  %v15091_v39 = vsel %vm11108_vm5, 4294967295, %v15090_v39  ;;  %v11114_v45 = vsel %vm11037_vm2, %v3532_v7, %v3539_v32  ;;  %v11118_v47 = vsel %vm11037_vm2, %v439_v9, %v446_v26 }
  0xa0   :  { %15092 = vst [vmem:[#allocation7_spill] sm:$0xff] %v15091_v39  ;;  %15093 = vst [vmem:[#allocation8_spill] sm:$0xff] %v11114_v45  ;;  %v547_v51 = vshrl.u32 %v11076_v43, 16  ;;  %v553_v52 = vshll.u32 %v11079_v44, 16  ;;  %v464_v54 = vor.u32 %v462_v29, %v461_v35  ;;  %v11122_v55 = vrot.slane %v461_v35, 4 }
  0xa1   :  { %v455_v56 = vor.u32 %v453_v31, %v452_v36  ;;  %v457_v57 = vrot.slane %v452_v36, 4  ;;  %v546_v60 = vsel %vm11108_vm5, %v541_v40, %v545_v41  ;;  %v557_v62 = vshrl.u32 %v11079_v44, 16  ;;  %v4591_v16 = vpop.permute.xlu1 %4590  ;;  %v33_v39 = vld [vmem:[%s14981_s0 + $0x48] sm:$0xf] }
  0xa2   :  { %v549_v43 = vrot.slane %v547_v51, 4  ;;  %v555_v61 = vrot.slane %v553_v52, 5  ;;  %v3488_v6 = vrot.slane %v3480_v42, %v10979_v24  ;;  %v3476_v7 = vrot.slane %v3468_v53, %v10979_v24  ;;  %v4579_v25 = vpop.permute.xlu0 %4578  ;;  %v237_v53 = vld [vmem:[%s14981_s0 + $0xc] sm:$0xf] }
  0xa3   :  { %v11135_v1 = vsel %vm11037_vm2, %v448_v34, %v455_v56  ;;  %v11139_v2 = vsel %vm11037_vm2, %v457_v57, %v464_v54  ;;  %v559_v9 = vrot.slane %v557_v62, 4  ;;  %v3570_v10 = vmul.bf16 %v11049_v20, %v3331_v58 }
  0xa4   :  { %v550_v8 = vor.u32 %v549_v43, %v545_v41  ;;  %v3571_v12 = vmul.bf16 %v11085_v63, %v3332_v59  ;;  %v3552_v13 = vshrl.u32 %v3488_v6, 16  ;;  %v3555_v44 = vshll.u32 %v3488_v6, 16  ;;  %v238_v59 = vld [vmem:[%s14981_s0 + $0x10] sm:$0xf] }
  0xa5   :  { %v3543_v14 = vshrl.u32 %v3476_v7, 16  ;;  %v3546_v15 = vshll.u32 %v3476_v7, 16  ;;  %v560_v19 = vor.u32 %v559_v9, %v555_v61  ;;  %v3624_v22 = vshrl.u32 %v11030_v3, 16  ;;  %v11172_v6 = vld [vmem:[%s14981_s0 + $0x10] sm:$0xf] }
  0xa6   :  { %v551_v18 = vrot.slane %v550_v8, 4  ;;  %v3627_v23 = vshll.u32 %v11030_v3, 16  ;;  %v3554_v27 = vrot.slane %v3552_v13, 7  ;;  %v3633_v29 = vshll.u32 %v3570_v10, 16  ;;  %v4603_v7 = vpop.permute.xlu0 %4602  ;;  %v11180_v13 = vld [vmem:[%s14981_s0 + $0x14] sm:$0xf] }
  0xa7   :  { %v3545_v28 = vrot.slane %v3543_v14, 7  ;;  %v3637_v30 = vshrl.u32 %v3570_v10, 16  ;;  %v11149_v32 = vrot.slane %v560_v19, 4  ;;  %v3626_v26 = vrot.slane %v3624_v22, 4 }
  0xa8   :  { %v556_v31 = vsel %vm11108_vm5, %v551_v18, %v555_v61  ;;  %v3629_v34 = vrot.slane %v3627_v23, 5  ;;  %v3557_v36 = vor.u32 %v3555_v44, %v3554_v27  ;;  %v11151_v40 = vrot.slane %v3554_v27, 4 }
  0xa9   :  { %v8442_v35 = vcombine.low %v546_v60, %v556_v31  ;;  %v3548_v41 = vor.u32 %v3546_v15, %v3545_v28  ;;  %v3550_v42 = vrot.slane %v3545_v28, 4  ;;  %v3635_v3 = vrot.slane %v3633_v29, 5  ;;  %v4615_v60 = vpop.permute.xlu1 %4614 }
  0xaa   :  { %15094 = vst [vmem:[#allocation9_spill] sm:$0xff] %v11151_v40  ;;  %v3630_v51 = vor.u32 %v3629_v34, %v3626_v26  ;;  %v3639_v52 = vrot.slane %v3637_v30, 4  ;;  %v3643_v56 = vshll.u32 %v3571_v12, 16  ;;  %v3647_v57 = vshrl.u32 %v3571_v12, 16 }
  0xab   :  { %9460 = vmatprep.mubr.bf16.mxu1 %v8442_v35  ;;  %v11158_v54 = vsel %vm11037_vm2, %v3541_v33, %v3548_v41  ;;  %v4599_v58 = vrot.slane %v4591_v16, %v10979_v24  ;;  %v11166_v43 = vsel %vm11037_vm2, %v3550_v42, %v3557_v36  ;;  %v4587_v33 = vrot.slane %v4579_v25, %v10979_v24 }
  0xac   :  { %15095 = vst [vmem:[#allocation10_spill] sm:$0xff] %v11158_v54  ;;  %15096 = vst [vmem:[#allocation11_spill] sm:$0xff] %v11166_v43  ;;  %v3631_v61 = vrot.slane %v3630_v51, 4  ;;  %v3640_v62 = vor.u32 %v3639_v52, %v3635_v3  ;;  %v3645_v8 = vrot.slane %v3643_v56, 5  ;;  %v3649_v9 = vrot.slane %v3647_v57, 4 }
  0xad   :  { %v11174_v10 = vrot.slane %v4599_v58, 7  ;;  %v479_v12 = vmul.bf16 %v11071_v38, %v237_v53  ;;  %v11184_v15 = vrot.slane %v4587_v33, 7  ;;  %v480_v16 = vmul.bf16 %v11097_v17, %v238_v59  ;;  %v4639_v35 = vpop.permute.xlu1 %4638  ;;  %v239_v58 = vld [vmem:[%s14981_s0 + $0x14] sm:$0xf] }
  0xae   :  { %v3636_v44 = vsel %vm11108_vm5, %v3631_v61, %v3635_v3  ;;  %v3641_v14 = vrot.slane %v3640_v62, 4  ;;  %v3650_v18 = vor.u32 %v3649_v9, %v3645_v8  ;;  %v3572_v28 = vmul.bf16 %v11089_v0, %v11172_v6  ;;  %v4627_v3 = vpop.permute.xlu0 %4626 }
  0xaf   :  { %v4684_v19 = vrot.slane %v11174_v10, 4  ;;  %v563_v22 = vshll.u32 %v479_v12, 16  ;;  %v567_v23 = vshrl.u32 %v479_v12, 16  ;;  %v573_v27 = vshll.u32 %v480_v16, 16 }
  0xb0   :  { %v3646_v25 = vsel %vm11108_vm5, %v3641_v14, %v3645_v8  ;;  %v11194_v29 = vmul.bf16 %v11093_v11, %v11180_v13  ;;  %v3651_v30 = vrot.slane %v3650_v18, 4  ;;  %v3653_v41 = vshll.u32 %v3572_v28, 16  ;;  %v240_v18 = vld [vmem:[%s14981_s0 + $0x18] sm:$0xf] }
  0xb1   :  { %v8648_v31 = vcombine.low %v3636_v44, %v3646_v25  ;;  %v565_v26 = vrot.slane %v563_v22, 5  ;;  %v569_v34 = vrot.slane %v567_v23, 4  ;;  %v11196_v36 = vrot.slane %v573_v27, 5 }
  0xb2   :  { %v3657_v42 = vshrl.u32 %v3572_v28, 16  ;;  %v3663_v51 = vshll.u32 %v11194_v29, 16  ;;  %v4623_v56 = vrot.slane %v4615_v60, %v10979_v24  ;;  %v4611_v57 = vrot.slane %v4603_v7, %v10979_v24 }
  0xb3   :  { %9716 = vmatprep.mubr.bf16.mxu0 %v8648_v31  ;;  %v566_v52 = vsel %vm11108_vm5, %v11149_v32, %v565_v26  ;;  %v570_v53 = vor.u32 %v569_v34, %v565_v26  ;;  %v3655_v59 = vrot.slane %v3653_v41, 5  ;;  %v4647_v33 = vrot.slane %v4639_v35, %v10979_v24  ;;  %v10443_v35 = vld [vmem:[%s14980_s1 + $0x8] sm:$0xff]  }
  0xb4   :  { %v3659_v61 = vrot.slane %v3657_v42, 4  ;;  %v11207_v62 = vrot.slane %v3663_v51, 5  ;;  %v4688_v9 = vrot.slane %v4623_v56, 7  ;;  %v4685_v12 = vrot.slane %v4611_v57, 7  ;;  %v4663_v57 = vpop.permute.xlu1 %4662 }
  0xb5   :  { %v571_v8 = vrot.slane %v570_v53, 4  ;;  %v4635_v32 = vrot.slane %v4627_v3, %v10979_v24  ;;  %v3656_v60 = vsel %vm11108_vm5, %v3651_v30, %v3655_v59  ;;  %v15097_v7 = vmov 0 }
  0xb6   :  { %v3660_v44 = vor.u32 %v3659_v61, %v3655_v59  ;;  %v15098_v7 = vsel %vm11215_vm8, 4294967295, %v15097_v7  ;;  %v11219_v14 = vrot.slane %v4647_v33, 7  ;;  %v481_v22 = vmul.bf16 %v11118_v47, %v239_v58  ;;  %v4651_v58 = vpop.permute.xlu0 %4650 }
  0xb7   :  { %15099 = vst [vmem:[#allocation12_spill] sm:$0xff] %v15098_v7  ;;  %v576_v23 = vsel %vm11108_vm5, %v571_v8, %v11196_v36  ;;  %v4690_v25 = vrot.slane %v4688_v9, 4  ;;  %v11230_v27 = vsel %vm11215_vm8, %v4684_v19, %v4685_v12  ;;  %v4687_v28 = vrot.slane %v4685_v12, 4  ;;  %v1842_v7 = vld [vmem:[%s14981_s0 + $0x58] sm:$0xe] }
  0xb8   :  { %v8443_v30 = vcombine.low %v566_v52, %v576_v23  ;;  %v3661_v31 = vrot.slane %v3660_v44, 4  ;;  %v4696_v26 = vrot.slane %v11219_v14, 4  ;;  %v4691_v34 = vrot.slane %v4635_v32, 7 }
  0xb9   :  { %v11238_v41 = vsel %vm11215_vm8, %v4687_v28, %v4688_v9  ;;  %v482_v42 = vmul.bf16 %v11135_v1, %v240_v18  ;;  %v577_v51 = vshrl.u32 %v480_v16, 16  ;;  %v583_v3 = vshll.u32 %v481_v22, 16  ;;  %v242_v16 = vld [vmem:[%s14981_s0 + $0x20] sm:$0x1]  ;;  %v10442_v9 = vld [vmem:[%s14980_s1 + $0x148] sm:$0xff]  }
  0xba   :  { %9461 = vmatmul.mubr.bf16.vlgmr.msra.gmra.mrb[0].mxu1 %v8443_v30  ;;  %v3666_v19 = vsel %vm11108_vm5, %v3661_v31, %v11207_v62  ;;  %v4715_v52 = vmul.bf16 %v11238_v41, %v11172_v6  ;;  %v11248_v53 = vsel %vm11215_vm8, %v4690_v25, %v4691_v34  ;;  %v4693_v56 = vrot.slane %v4691_v34, 4  ;;  %v241_v6 = vld [vmem:[%s14981_s0 + $0x1c] sm:$0xf]  ;;  %v3335_v31 = vld [vmem:[%s14981_s0 + $0x18] sm:$0xf] }
  0xbb   :  { %v8649_v59 = vcombine.low %v3656_v60, %v3666_v19  ;;  %v4716_v61 = vmul.bf16 %v11248_v53, %v11180_v13  ;;  %v579_v33 = vrot.slane %v577_v51, 4  ;;  %v585_v8 = vrot.slane %v583_v3, 5  ;;  %9509 = vmatpush3.bf16.msra.mxu1 %v10874_v49  ;;  %v10446_v49 = vld [vmem:[%s14980_s1 + $0x10] sm:$0xff]  }
  0xbc   :  { %v11262_v12 = vrot.slane %v4715_v52, 5  ;;  %v11267_v32 = vsel %vm11215_vm8, %v4693_v56, %v11219_v14  ;;  %v587_v13 = vshrl.u32 %v481_v22, 16  ;;  %v593_v60 = vshll.u32 %v482_v42, 16  ;;  %9510 = vmatprep.subr.bf16.mxu1 %v10443_v35  ;;  %v10444_v19 = vld [vmem:[%s14980_s1 + $0x150] sm:$0xff]  }
  0xbd   :  { %9717 = vmatmul.mubr.bf16.vlgmr.msra.gmra.mrb[0].mxu0 %v8649_v59  ;;  %v11272_v44 = vrot.slane %v4716_v61, 5  ;;  %v580_v18 = vor.u32 %v579_v33, %v11196_v36  ;;  %v4671_v23 = vrot.slane %v4663_v57, %v10979_v24  ;;  %v4659_v25 = vrot.slane %v4651_v58, %v10979_v24  ;;  %v3336_v58 = vld [vmem:[%s14981_s0 + $0x1c] sm:$0xf] }
  0xbe   :  { %v589_v28 = vrot.slane %v587_v13, 4  ;;  %v595_v30 = vrot.slane %v593_v60, 5  ;;  %9765 = vmatpush3.bf16.msra.mxu0 %v10879_v50  ;;  %v483_v14 = vmul.bf16 %v11139_v2, %v241_v6  ;;  %v484_v22 = vmul.bf16 %v11122_v55, %v242_v16  ;;  %v10449_v16 = vld [vmem:[%s14980_s1 + $0x18] sm:$0xff]  }
  0xbf   :  { %v581_v34 = vrot.slane %v580_v18, 4  ;;  %v4700_v51 = vrot.slane %v4671_v23, 7  ;;  %v4697_v3 = vrot.slane %v4659_v25, 7  ;;  %v597_v36 = vshrl.u32 %v482_v42, 16  ;;  %9766 = vmatprep.subr.bf16.mxu0 %v10442_v9  ;;  %9511 = vmatpush3.bf16.msra.mxu1 %v10443_v35 }
  0xc0   :  { %v590_v52 = vor.u32 %v589_v28, %v585_v8  ;;  %v603_v50 = vshll.u32 %v483_v14, 16  ;;  %v607_v56 = vshrl.u32 %v483_v14, 16  ;;  %v613_v57 = vshll.u32 %v484_v22, 16  ;;  %9512 = vmatprep.subr.bf16.mxu1 %v10446_v49  ;;  %v89_v28 = vpop.permute.xlu1 %88 }
  0xc1   :  { %v586_v42 = vsel %vm11108_vm5, %v581_v34, %v585_v8  ;;  %v11294_v59 = vrot.slane %v4700_v51, 4  ;;  %v11298_v35 = vsel %vm11215_vm8, %v4696_v26, %v4697_v3  ;;  %v4699_v61 = vrot.slane %v4697_v3, 4  ;;  %v10445_v26 = vld [vmem:[%s14980_s1 + $0x158] sm:$0xff]  }
  0xc2   :  { %v591_v33 = vrot.slane %v590_v52, 4  ;;  %v599_v6 = vrot.slane %v597_v36, 4  ;;  %v605_v13 = vrot.slane %v603_v50, 5  ;;  %v609_v60 = vrot.slane %v607_v56, 4  ;;  %9767 = vmatpush3.bf16.msra.mxu0 %v10442_v9  ;;  %v244_v50 = vld [vmem:[%s14981_s0 + $0x30] sm:$0xf] }
  0xc3   :  { %v11302_v18 = vsel %vm11215_vm8, %v4699_v61, %v4700_v51  ;;  %v615_v23 = vrot.slane %v613_v57, 5  ;;  %v3574_v25 = vmul.bf16 %v11114_v45, %v3335_v31  ;;  %v11306_v8 = vmul.bf16 %v11158_v54, %v3336_v58  ;;  %9768 = vmatprep.subr.bf16.mxu0 %v10444_v19  ;;  %9513 = vmatpush3.bf16.msra.mxu1 %v10446_v49  ;;  %v77_v51 = vpop.permute.xlu0 %76  ;;  %v10452_v49 = vld [vmem:[%s14980_s1 + $0x20] sm:$0xff]   ;;  %v245_v58 = vld [vmem:[%s14981_s0 + $0x34] sm:$0xf] }
  0xc4   :  { %v596_v9 = vsel %vm11108_vm5, %v591_v33, %v595_v30  ;;  %v600_v14 = vor.u32 %v599_v6, %v595_v30  ;;  %v610_v22 = vor.u32 %v609_v60, %v605_v13  ;;  %v3667_v34 = vshrl.u32 %v11194_v29, 16  ;;  %9514 = vmatprep.subr.bf16.mxu1 %v10449_v16  ;;  %v10447_v60 = vld [vmem:[%s14980_s1 + $0x160] sm:$0xff]  }
  0xc5   :  { %v8444_v31 = vcombine.low %v586_v42, %v596_v9  ;;  %v3673_v3 = vshll.u32 %v3574_v25, 16  ;;  %v3677_v36 = vshrl.u32 %v3574_v25, 16  ;;  %v3683_v52 = vshll.u32 %v11306_v8, 16 }
  0xc6   :  { %v601_v56 = vrot.slane %v600_v14, 4  ;;  %v611_v30 = vrot.slane %v610_v22, 4  ;;  %v3669_v57 = vrot.slane %v3667_v34, 4  ;;  %v11322_v29 = vrot.slane %v89_v28, %v10979_v24  ;;  %9769 = vmatpush3.bf16.msra.mxu0 %v10444_v19  ;;  %v3337_v14 = vld [vmem:[%s14981_s0 + $0x20] sm:$0xf] }
  0xc7   :  { %9464 = vmatprep.mubr.bf16.mxu1 %v8444_v31  ;;  %v3675_v42 = vrot.slane %v3673_v3, 5  ;;  %v3679_v61 = vrot.slane %v3677_v36, 4  ;;  %v11327_v33 = vrot.slane %v3683_v52, 5  ;;  %v11330_v6 = vrot.slane %v77_v51, %v10979_v24  ;;  %9770 = vmatprep.subr.bf16.mxu0 %v10445_v26  ;;  %v3338_v36 = vld [vmem:[%s14981_s0 + $0x24] sm:$0x1] }
  0xc8   :  { %v606_v25 = vsel %vm11108_vm5, %v601_v56, %v605_v13  ;;  %v616_v28 = vsel %vm11108_vm5, %v611_v30, %v615_v23  ;;  %v3670_v19 = vor.u32 %v3669_v57, %v11207_v62  ;;  %v486_v9 = vmul.bf16 %v11053_v21, %v244_v50  ;;  %9515 = vmatpush3.bf16.msra.mxu1 %v10449_v16  ;;  %v10448_v30 = vld [vmem:[%s14980_s1 + $0x168] sm:$0xff]  }
  0xc9   :  { %v8445_v22 = vcombine.low %v606_v25, %v616_v28  ;;  %v3680_v34 = vor.u32 %v3679_v61, %v3675_v42  ;;  %v11345_v51 = vmul.bf16 %v11067_v37, %v245_v58  ;;  %v618_v31 = vshrl.u32 %v11033_v4, 16  ;;  %9516 = vmatprep.subr.bf16.mxu1 %v10452_v49  ;;  %v113_v25 = vpop.permute.xlu1 %112 }
  0xca   :  { %v3671_v13 = vrot.slane %v3670_v19, 4  ;;  %v621_v23 = vshll.u32 %v11033_v4, 16  ;;  %v627_v3 = vshll.u32 %v486_v9, 16  ;;  %v631_v62 = vshrl.u32 %v486_v9, 16  ;;  %9771 = vmatpush3.bf16.msra.mxu0 %v10445_v26 }
  0xcb   :  { %9465 = vmatmul.mubr.bf16.gmra.mrb[4].mxu1 %v8445_v22  ;;  %v3681_v16 = vrot.slane %v3680_v34, 4  ;;  %v620_v52 = vrot.slane %v618_v31, 4  ;;  %v637_v50 = vshll.u32 %v11345_v51, 16  ;;  %v3576_v56 = vmul.bf16 %v11166_v43, %v3337_v14  ;;  %9772 = vmatprep.subr.bf16.mxu0 %v10447_v60  ;;  %v101_v14 = vpop.permute.xlu0 %100 }
  0xcc   :  { %v3676_v4 = vsel %vm11108_vm5, %v3671_v13, %v3675_v42  ;;  %v623_v57 = vrot.slane %v621_v23, 5  ;;  %v629_v58 = vrot.slane %v627_v3, 5  ;;  %v633_v61 = vrot.slane %v631_v62, 4  ;;  %9517 = vmatpush3.bf16.msra.mxu1 %v10452_v49  ;;  %v3339_v42 = vld [vmem:[%s14981_s0 + $0x30] sm:$0xf] }
  0xcd   :  { %v3686_v26 = vsel %vm11108_vm5, %v3681_v16, %v11327_v33  ;;  %v11362_v28 = vrot.slane %v637_v50, 5  ;;  %v3577_v19 = vmul.bf16 %v11151_v40, %v3338_v36  ;;  %v3687_v9 = vshrl.u32 %v11306_v8, 16  ;;  %v3340_v49 = vld [vmem:[%s14981_s0 + $0x34] sm:$0xf]  ;;  %v3341_v23 = vld [vmem:[%s14981_s0 + $0x38] sm:$0xf] }
  0xce   :  { %v8650_v22 = vcombine.low %v3676_v4, %v3686_v26  ;;  %v624_v34 = vor.u32 %v623_v57, %v620_v52  ;;  %v634_v31 = vor.u32 %v633_v61, %v629_v58  ;;  %v3693_v13 = vshll.u32 %v3576_v56, 16  ;;  %9773 = vmatpush3.bf16.msra.mxu0 %v10447_v60  ;;  %v10450_v16 = vld [vmem:[%s14980_s1 + $0x170] sm:$0xff]   ;;  %v10454_v52 = vld [vmem:[%s14980_s1 + $0x28] sm:$0xff]  }
  0xcf   :  { %v3689_v3 = vrot.slane %v3687_v9, 4  ;;  %v3697_v8 = vshrl.u32 %v3576_v56, 16  ;;  %v3703_v62 = vshll.u32 %v3577_v19, 16  ;;  %v11376_v36 = vrot.slane %v113_v25, %v10979_v24  ;;  %9774 = vmatprep.subr.bf16.mxu0 %v10448_v30  ;;  %9518 = vmatprep.subr.bf16.mxu1 %v10454_v52 }
  0xd0   :  { %9720 = vmatprep.mubr.bf16.mxu0 %v8650_v22  ;;  %v625_v50 = vrot.slane %v624_v34, 4  ;;  %v635_v4 = vrot.slane %v634_v31, 4  ;;  %v3695_v57 = vrot.slane %v3693_v13, 5  ;;  %v11385_v60 = vrot.slane %v101_v14, %v10979_v24  ;;  %9519 = vmatpush3.bf16.msra.mxu1 %v10454_v52 }
  0xd1   :  { %15100 = vst [vmem:[#allocation13_spill] sm:$0xff] %v11376_v36  ;;  %v3690_v56 = vor.u32 %v3689_v3, %v11327_v33  ;;  %v3699_v61 = vrot.slane %v3697_v8, 4  ;;  %v3705_v25 = vrot.slane %v3703_v62, 5  ;;  %v3578_v26 = vmul.bf16 %v11006_v46, %v3339_v42  ;;  %v246_v33 = vld [vmem:[%s14981_s0 + $0x38] sm:$0xf] }
  0xd2   :  { %15101 = vst [vmem:[#allocation14_spill] sm:$0xff] %v11385_v60  ;;  %v630_v19 = vsel %vm11108_vm5, %v625_v50, %v629_v58  ;;  %v640_v9 = vsel %vm11108_vm5, %v635_v4, %v11362_v28  ;;  %v3579_v22 = vmul.bf16 %v11049_v20, %v3340_v49  ;;  %v11396_v34 = vmul.bf16 %v11085_v63, %v3341_v23  ;;  %v10451_v58 = vld [vmem:[%s14980_s1 + $0x178] sm:$0xff]  }
  0xd3   :  { %9775 = vmatpush3.bf16.msra.mxu0 %v10448_v30  ;;  %v8446_v14 = vcombine.low %v630_v19, %v640_v9  ;;  %v3691_v42 = vrot.slane %v3690_v56, 4  ;;  %v3700_v31 = vor.u32 %v3699_v61, %v3695_v57  ;;  %v3708_v13 = vshrl.u32 %v3578_v26, 16  ;;  %v247_v62 = vld [vmem:[%s14981_s0 + $0x3c] sm:$0xf]  ;;  %v137_v9 = vpop.permute.xlu1 %136 }
  0xd4   :  { %9776 = vmatprep.subr.bf16.mxu0 %v10450_v16  ;;  %v3711_v3 = vshll.u32 %v3578_v26, 16  ;;  %v3717_v49 = vshll.u32 %v3579_v22, 16  ;;  %v3721_v8 = vshrl.u32 %v3579_v22, 16  ;;  %v3727_v23 = vshll.u32 %v11396_v34, 16 }
  0xd5   :  { %9468 = vmatprep.mubr.bf16.mxu1 %v8446_v14  ;;  %v3696_v30 = vsel %vm11108_vm5, %v3691_v42, %v3695_v57  ;;  %v3701_v50 = vrot.slane %v3700_v31, 4  ;;  %v3710_v4 = vrot.slane %v3708_v13, 4  ;;  %v488_v56 = vmul.bf16 %v11071_v38, %v246_v33  ;;  %v125_v57 = vpop.permute.xlu0 %124 }
  0xd6   :  { %v3713_v61 = vrot.slane %v3711_v3, 5  ;;  %v3719_v19 = vrot.slane %v3717_v49, 5  ;;  %v3723_v52 = vrot.slane %v3721_v8, 4  ;;  %v11411_v26 = vrot.slane %v3727_v23, 5  ;;  %v248_v3 = vld [vmem:[%s14981_s0 + $0x40] sm:$0xf] }
  0xd7   :  { %9777 = vmatpush3.bf16.msra.mxu0 %v10450_v16  ;;  %v3706_v22 = vsel %vm11108_vm5, %v3701_v50, %v3705_v25  ;;  %v489_v36 = vmul.bf16 %v11097_v17, %v247_v62  ;;  %v641_v14 = vshrl.u32 %v11345_v51, 16  ;;  %v647_v60 = vshll.u32 %v488_v56, 16  ;;  %v249_v16 = vld [vmem:[%s14981_s0 + $0x44] sm:$0xf] }
  0xd8   :  { %9778 = vmatprep.subr.bf16.mxu0 %v10451_v58  ;;  %v8651_v42 = vcombine.low %v3696_v30, %v3706_v22  ;;  %v3714_v31 = vor.u32 %v3713_v61, %v3710_v4  ;;  %v3724_v33 = vor.u32 %v3723_v52, %v3719_v19  ;;  %v651_v13 = vshrl.u32 %v488_v56, 16  ;;  %v11426_v25 = vld [vmem:[%s14980_s1 + $0x180] sm:$0xff]  }
  0xd9   :  { %v643_v51 = vrot.slane %v641_v14, 4  ;;  %v649_v49 = vrot.slane %v647_v60, 5  ;;  %v657_v8 = vshll.u32 %v489_v36, 16  ;;  %v11429_v23 = vrot.slane %v137_v9, %v10979_v24  ;;  %v3342_v60 = vld [vmem:[%s14981_s0 + $0x3c] sm:$0xf] }
  0xda   :  { %9721 = vmatmul.mubr.bf16.gmra.mrb[4].mxu0 %v8651_v42  ;;  %v3715_v62 = vrot.slane %v3714_v31, 4  ;;  %v3725_v30 = vrot.slane %v3724_v33, 4  ;;  %v653_v50 = vrot.slane %v651_v13, 4  ;;  %v11432_v4 = vrot.slane %v125_v57, %v10979_v24  ;;  %v3343_v42 = vld [vmem:[%s14981_s0 + $0x40] sm:$0xf] }
  0xdb   :  { %15102 = vst [vmem:[#allocation15_spill] sm:$0xff] %v11429_v23  ;;  %v644_v56 = vor.u32 %v643_v51, %v11362_v28  ;;  %v659_v61 = vrot.slane %v657_v8, 5  ;;  %v490_v52 = vmul.bf16 %v11118_v47, %v248_v3  ;;  %v11437_v22 = vmul.bf16 %v11135_v1, %v249_v16  ;;  %9779 = vmatpush3.bf16.msra.mxu0 %v10451_v58 }
  0xdc   :  { %15103 = vst [vmem:[#allocation16_spill] sm:$0xff] %v11432_v4  ;;  %v3720_v9 = vsel %vm11108_vm5, %v3715_v62, %v3719_v19  ;;  %v3730_v14 = vsel %vm11108_vm5, %v3725_v30, %v11411_v26  ;;  %v654_v57 = vor.u32 %v653_v50, %v649_v49  ;;  %v661_v28 = vshrl.u32 %v489_v36, 16  ;;  %9828 = vmatprep.subr.bf16.mxu0 %v11426_v25  ;;  %v161_v50 = vpop.permute.xlu1 %160 }
  0xdd   :  { %v8652_v31 = vcombine.low %v3720_v9, %v3730_v14  ;;  %v645_v33 = vrot.slane %v644_v56, 4  ;;  %v667_v13 = vshll.u32 %v490_v52, 16  ;;  %v671_v3 = vshrl.u32 %v490_v52, 16 }
  0xde   :  { %v655_v58 = vrot.slane %v654_v57, 4  ;;  %v663_v16 = vrot.slane %v661_v28, 4  ;;  %v677_v19 = vshll.u32 %v11437_v22, 16  ;;  %v3581_v51 = vmul.bf16 %v11089_v0, %v3342_v60  ;;  %v149_v57 = vpop.permute.xlu0 %148 }
  0xdf   :  { %9724 = vmatprep.mubr.bf16.mxu0 %v8652_v31  ;;  %v650_v36 = vsel %vm11108_vm5, %v645_v33, %v649_v49  ;;  %v669_v8 = vrot.slane %v667_v13, 5  ;;  %v673_v62 = vrot.slane %v671_v3, 4  ;;  %v3582_v30 = vmul.bf16 %v11093_v11, %v3343_v42  ;;  %v3344_v49 = vld [vmem:[%s14981_s0 + $0x44] sm:$0xf] }
  0xe0   :  { %v660_v56 = vsel %vm11108_vm5, %v655_v58, %v659_v61  ;;  %v664_v9 = vor.u32 %v663_v16, %v659_v61  ;;  %v11458_v52 = vrot.slane %v677_v19, 5  ;;  %v3731_v14 = vshrl.u32 %v11396_v34, 16  ;;  %v3345_v61 = vld [vmem:[%s14981_s0 + $0x48] sm:$0xf] }
  0xe1   :  { %v8447_v28 = vcombine.low %v650_v36, %v660_v56  ;;  %v674_v60 = vor.u32 %v673_v62, %v669_v8  ;;  %v3737_v31 = vshll.u32 %v3581_v51, 16  ;;  %v3741_v23 = vshrl.u32 %v3581_v51, 16  ;;  %v250_v56 = vld [vmem:[%s14981_s0 + $0x48] sm:$0xf] }
  0xe2   :  { %v665_v33 = vrot.slane %v664_v9, 4  ;;  %v3733_v42 = vrot.slane %v3731_v14, 4  ;;  %v3747_v13 = vshll.u32 %v3582_v30, 16  ;;  %v11465_v3 = vrot.slane %v161_v50, %v10979_v24 }
  0xe3   :  { %9469 = vmatmul.mubr.bf16.gmra.mrb[8].mxu1 %v8447_v28  ;;  %v675_v34 = vrot.slane %v674_v60, 4  ;;  %v3739_v58 = vrot.slane %v3737_v31, 5  ;;  %v3743_v16 = vrot.slane %v3741_v23, 4  ;;  %v11471_v19 = vrot.slane %v149_v57, %v10979_v24 }
  0xe4   :  { %15104 = vst [vmem:[#allocation17_spill] sm:$0xff] %v11465_v3  ;;  %v670_v51 = vsel %vm11108_vm5, %v665_v33, %v669_v8  ;;  %v3734_v36 = vor.u32 %v3733_v42, %v11411_v26  ;;  %v3749_v62 = vrot.slane %v3747_v13, 5  ;;  %v3583_v50 = vmul.bf16 %v11114_v45, %v3344_v49  ;;  %v251_v26 = vld [vmem:[%s14981_s0 + $0x4c] sm:$0x1]  ;;  %v5434_v3 = vpop.permute.xlu1 %5433 }
  0xe5   :  { %15105 = vst [vmem:[#allocation18_spill] sm:$0xff] %v11471_v19  ;;  %v680_v9 = vsel %vm11108_vm5, %v675_v34, %v11458_v52  ;;  %v3744_v23 = vor.u32 %v3743_v16, %v3739_v58  ;;  %v11484_v14 = vmul.bf16 %v11158_v54, %v3345_v61  ;;  %v3751_v57 = vshrl.u32 %v3582_v30, 16 }
  0xe6   :  { %v8448_v8 = vcombine.low %v670_v51, %v680_v9  ;;  %v3735_v28 = vrot.slane %v3734_v36, 4  ;;  %v3757_v60 = vshll.u32 %v3583_v50, 16  ;;  %v3761_v31 = vshrl.u32 %v3583_v50, 16 }
  0xe7   :  { %v3745_v49 = vrot.slane %v3744_v23, 4  ;;  %v3753_v33 = vrot.slane %v3751_v57, 4  ;;  %v3767_v42 = vshll.u32 %v11484_v14, 16  ;;  %v492_v13 = vmul.bf16 %v11139_v2, %v250_v56  ;;  %v5422_v23 = vpop.permute.xlu0 %5421 }
  0xe8   :  { %9472 = vmatprep.mubr.bf16.mxu1 %v8448_v8  ;;  %v3740_v61 = vsel %vm11108_vm5, %v3735_v28, %v3739_v58  ;;  %v3759_v34 = vrot.slane %v3757_v60, 5  ;;  %v3763_v30 = vrot.slane %v3761_v31, 4  ;;  %v493_v16 = vmul.bf16 %v11122_v55, %v251_v26  ;;  %v252_v58 = vld [vmem:[%s14981_s0 + $0x58] sm:$0xf]  ;;  %v253_v26 = vld [vmem:[%s14981_s0 + $0x5c] sm:$0xf] }
  0xe9   :  { %v3750_v51 = vsel %vm11108_vm5, %v3745_v49, %v3749_v62  ;;  %v3754_v36 = vor.u32 %v3753_v33, %v3749_v62  ;;  %v11496_v50 = vrot.slane %v3767_v42, 5  ;;  %v681_v9 = vshrl.u32 %v11437_v22, 16  ;;  %v254_v22 = vld [vmem:[%s14981_s0 + $0x60] sm:$0xf] }
  0xea   :  { %v8653_v57 = vcombine.low %v3740_v61, %v3750_v51  ;;  %v3764_v56 = vor.u32 %v3763_v30, %v3759_v34  ;;  %v687_v8 = vshll.u32 %v492_v13, 16  ;;  %v691_v19 = vshrl.u32 %v492_v13, 16 }
  0xeb   :  { %v3755_v28 = vrot.slane %v3754_v36, 4  ;;  %v683_v60 = vrot.slane %v681_v9, 4  ;;  %v697_v62 = vshll.u32 %v493_v16, 16  ;;  %v11506_v31 = vrot.slane %v5434_v3, %v10979_v24 }
  0xec   :  { %9725 = vmatmul.mubr.bf16.gmra.mrb[8].mxu0 %v8653_v57  ;;  %v3765_v49 = vrot.slane %v3764_v56, 4  ;;  %v689_v33 = vrot.slane %v687_v8, 5  ;;  %v693_v42 = vrot.slane %v691_v19, 4  ;;  %v11512_v13 = vrot.slane %v5422_v23, %v10979_v24  ;;  %v3346_v23 = vld [vmem:[%s14981_s0 + $0x4c] sm:$0xf] }
  0xed   :  { %15106 = vst [vmem:[#allocation19_spill] sm:$0xff] %v11506_v31  ;;  %v3760_v61 = vsel %vm11108_vm5, %v3755_v28, %v3759_v34  ;;  %v684_v30 = vor.u32 %v683_v60, %v11458_v52  ;;  %v699_v16 = vrot.slane %v697_v62, 5  ;;  %v494_v3 = vmul.bf16 %v11008_v48, %v252_v58  ;;  %v10456_v52 = vld [vmem:[%s14980_s1 + $0x30] sm:$0xff]   ;;  %v5446_v31 = vpop.permute.xlu0 %5445 }
  0xee   :  { %15107 = vst [vmem:[#allocation20_spill] sm:$0xff] %v11512_v13  ;;  %v3770_v51 = vsel %vm11108_vm5, %v3765_v49, %v11496_v50  ;;  %v694_v36 = vor.u32 %v693_v42, %v689_v33  ;;  %v495_v9 = vmul.bf16 %v11053_v21, %v253_v26  ;;  %v11523_v19 = vmul.bf16 %v11067_v37, %v254_v22  ;;  %v3347_v62 = vld [vmem:[%s14981_s0 + $0x50] sm:$0x1] }
  0xef   :  { %v8654_v34 = vcombine.low %v3760_v61, %v3770_v51  ;;  %v685_v57 = vrot.slane %v684_v30, 4  ;;  %v702_v56 = vshrl.u32 %v494_v3, 16  ;;  %v705_v8 = vshll.u32 %v494_v3, 16  ;;  %9520 = vmatprep.subr.bf16.mxu1 %v10456_v52  ;;  %v5458_v30 = vpop.permute.xlu1 %5457 }
  0xf0   :  { %v695_v58 = vrot.slane %v694_v36, 4  ;;  %v711_v28 = vshll.u32 %v495_v9, 16  ;;  %v715_v60 = vshrl.u32 %v495_v9, 16  ;;  %v721_v26 = vshll.u32 %v11523_v19, 16  ;;  %9521 = vmatpush3.bf16.msra.mxu1 %v10456_v52 }
  0xf1   :  { %9728 = vmatprep.mubr.bf16.mxu0 %v8654_v34  ;;  %v690_v22 = vsel %vm11108_vm5, %v685_v57, %v689_v33  ;;  %v704_v49 = vrot.slane %v702_v56, 4  ;;  %v707_v42 = vrot.slane %v705_v8, 5  ;;  %v3585_v61 = vmul.bf16 %v11166_v43, %v3346_v23  ;;  %v3348_v23 = vld [vmem:[%s14981_s0 + $0x5c] sm:$0xf]  ;;  %v3349_v8 = vld [vmem:[%s14981_s0 + $0x60] sm:$0xf] }
  0xf2   :  { %v700_v3 = vsel %vm11108_vm5, %v695_v58, %v699_v16  ;;  %v713_v51 = vrot.slane %v711_v28, 5  ;;  %v717_v36 = vrot.slane %v715_v60, 4  ;;  %v11540_v9 = vrot.slane %v721_v26, 5  ;;  %v3350_v26 = vld [vmem:[%s14981_s0 + $0x64] sm:$0xf] }
  0xf3   :  { %v8449_v13 = vcombine.low %v690_v22, %v700_v3  ;;  %v708_v4 = vor.u32 %v707_v42, %v704_v49  ;;  %v3586_v34 = vmul.bf16 %v11151_v40, %v3347_v62  ;;  %v3771_v33 = vshrl.u32 %v11484_v14, 16 }
  0xf4   :  { %v718_v57 = vor.u32 %v717_v36, %v713_v51  ;;  %v3777_v52 = vshll.u32 %v3585_v61, 16  ;;  %v3781_v56 = vshrl.u32 %v3585_v61, 16  ;;  %v11548_v16 = vrot.slane %v5458_v30, %v10979_v24 }
  0xf5   :  { %9473 = vmatmul.mubr.bf16.gmra.mrb[12].mxu1 %v8449_v13  ;;  %v709_v58 = vrot.slane %v708_v4, 4  ;;  %v3773_v28 = vrot.slane %v3771_v33, 4  ;;  %v3787_v60 = vshll.u32 %v3586_v34, 16  ;;  %v11554_v14 = vrot.slane %v5446_v31, %v10979_v24  ;;  %v255_v33 = vld [vmem:[%s14981_s0 + $0x64] sm:$0xf] }
  0xf6   :  { %v719_v62 = vrot.slane %v718_v57, 4  ;;  %v3779_v22 = vrot.slane %v3777_v52, 5  ;;  %v3783_v49 = vrot.slane %v3781_v56, 4  ;;  %v3587_v42 = vmul.bf16 %v11006_v46, %v3348_v23  ;;  %v256_v52 = vld [vmem:[%s14981_s0 + $0x68] sm:$0xf] }
  0xf7   :  { %v714_v61 = vsel %vm11108_vm5, %v709_v58, %v713_v51  ;;  %v3774_v13 = vor.u32 %v3773_v28, %v11496_v50  ;;  %v3789_v4 = vrot.slane %v3787_v60, 5  ;;  %v3588_v30 = vmul.bf16 %v11049_v20, %v3349_v8 }
  0xf8   :  { %v724_v31 = vsel %vm11108_vm5, %v719_v62, %v11540_v9  ;;  %v3784_v3 = vor.u32 %v3783_v49, %v3779_v22  ;;  %v11568_v36 = vmul.bf16 %v11085_v63, %v3350_v26  ;;  %v3792_v34 = vshrl.u32 %v3587_v42, 16 }
  0xf9   :  { %v8450_v23 = vcombine.low %v714_v61, %v724_v31  ;;  %v3775_v51 = vrot.slane %v3774_v13, 4  ;;  %v3795_v57 = vshll.u32 %v3587_v42, 16  ;;  %v3801_v50 = vshll.u32 %v3588_v30, 16  ;;  %v5482_v61 = vpop.permute.xlu1 %5481 }
  0xfa   :  { %v3785_v56 = vrot.slane %v3784_v3, 4  ;;  %v3794_v8 = vrot.slane %v3792_v34, 4  ;;  %v3805_v58 = vshrl.u32 %v3588_v30, 16  ;;  %v3811_v28 = vshll.u32 %v11568_v36, 16  ;;  %v5470_v30 = vpop.permute.xlu0 %5469 }
  0xfb   :  { %9476 = vmatprep.mubr.bf16.mxu1 %v8450_v23  ;;  %v3780_v60 = vsel %vm11108_vm5, %v3775_v51, %v3779_v22  ;;  %v3797_v26 = vrot.slane %v3795_v57, 5  ;;  %v3803_v62 = vrot.slane %v3801_v50, 5  ;;  %v497_v49 = vmul.bf16 %v11071_v38, %v255_v33  ;;  %v257_v22 = vld [vmem:[%s14981_s0 + $0x6c] sm:$0xf]  ;;  %v258_v50 = vld [vmem:[%s14981_s0 + $0x70] sm:$0xf] }
  0xfc   :  { %v3790_v42 = vsel %vm11108_vm5, %v3785_v56, %v3789_v4  ;;  %v3807_v13 = vrot.slane %v3805_v58, 4  ;;  %v11582_v31 = vrot.slane %v3811_v28, 5  ;;  %v498_v3 = vmul.bf16 %v11097_v17, %v256_v52 }
  0xfd   :  { %v8655_v34 = vcombine.low %v3780_v60, %v3790_v42  ;;  %v3798_v63 = vor.u32 %v3797_v26, %v3794_v8  ;;  %v725_v23 = vshrl.u32 %v11523_v19, 16  ;;  %v731_v20 = vshll.u32 %v497_v49, 16 }
  0xfe   :  { %v3808_v33 = vor.u32 %v3807_v13, %v3803_v62  ;;  %v735_v51 = vshrl.u32 %v497_v49, 16  ;;  %v741_v57 = vshll.u32 %v498_v3, 16  ;;  %v11590_v4 = vrot.slane %v5482_v61, %v10979_v24  ;;  %v10458_v49 = vld [vmem:[%s14980_s1 + $0x38] sm:$0xff]   ;;  %v3351_v13 = vld [vmem:[%s14981_s0 + $0x68] sm:$0xf] }
  0xff   :  { %9729 = vmatmul.mubr.bf16.gmra.mrb[12].mxu0 %v8655_v34  ;;  %v3799_v52 = vrot.slane %v3798_v63, 4  ;;  %v727_v56 = vrot.slane %v725_v23, 4  ;;  %v733_v8 = vrot.slane %v731_v20, 5  ;;  %v11596_v19 = vrot.slane %v5470_v30, %v10979_v24  ;;  %9522 = vmatprep.subr.bf16.mxu1 %v10458_v49 }
 0x100   :  { %15108 = vst [vmem:[#allocation21_spill] sm:$0xff] %v11590_v4  ;;  %v3809_v58 = vrot.slane %v3808_v33, 4  ;;  %v737_v28 = vrot.slane %v735_v51, 4  ;;  %v743_v60 = vrot.slane %v741_v57, 5  ;;  %v499_v26 = vmul.bf16 %v11118_v47, %v257_v22  ;;  %9523 = vmatpush3.bf16.msra.mxu1 %v10458_v49 }
 0x101   :  { %v3804_v61 = vsel %vm11108_vm5, %v3799_v52, %v3803_v62  ;;  %v728_v42 = vor.u32 %v727_v56, %v11540_v9  ;;  %v11606_v63 = vmul.bf16 %v11135_v1, %v258_v50  ;;  %v745_v20 = vshrl.u32 %v498_v3, 16  ;;  %v3352_v62 = vld [vmem:[%s14981_s0 + $0x6c] sm:$0xf] }
 0x102   :  { %v3814_v30 = vsel %vm11108_vm5, %v3809_v58, %v11582_v31  ;;  %v738_v34 = vor.u32 %v737_v28, %v733_v8  ;;  %v751_v23 = vshll.u32 %v499_v26, 16  ;;  %v755_v22 = vshrl.u32 %v499_v26, 16 }
 0x103   :  { %v8656_v9 = vcombine.low %v3804_v61, %v3814_v30  ;;  %v729_v33 = vrot.slane %v728_v42, 4  ;;  %v747_v51 = vrot.slane %v745_v20, 4  ;;  %v761_v3 = vshll.u32 %v11606_v63, 16  ;;  %v5506_v61 = vpop.permute.xlu1 %5505 }
 0x104   :  { %v739_v57 = vrot.slane %v738_v34, 4  ;;  %v753_v50 = vrot.slane %v751_v23, 5  ;;  %v757_v52 = vrot.slane %v755_v22, 4  ;;  %v3590_v56 = vmul.bf16 %v11089_v0, %v3351_v13  ;;  %v5494_v34 = vpop.permute.xlu0 %5493  ;;  %v3353_v13 = vld [vmem:[%s14981_s0 + $0x70] sm:$0xf] }
 0x105   :  { %9732 = vmatprep.mubr.bf16.mxu0 %v8656_v9  ;;  %v734_v58 = vsel %vm11108_vm5, %v729_v33, %v733_v8  ;;  %v748_v28 = vor.u32 %v747_v51, %v743_v60  ;;  %v11621_v26 = vrot.slane %v761_v3, 5  ;;  %v3591_v46 = vmul.bf16 %v11093_v11, %v3352_v62  ;;  %v3354_v62 = vld [vmem:[%s14981_s0 + $0x74] sm:$0xf] }
 0x106   :  { %v744_v42 = vsel %vm11108_vm5, %v739_v57, %v743_v60  ;;  %v758_v20 = vor.u32 %v757_v52, %v753_v50  ;;  %v3815_v49 = vshrl.u32 %v11568_v36, 16  ;;  %v3821_v30 = vshll.u32 %v3590_v56, 16  ;;  %v259_v36 = vld [vmem:[%s14981_s0 + $0x74] sm:$0xf] }
 0x107   :  { %v8451_v23 = vcombine.low %v734_v58, %v744_v42  ;;  %v749_v8 = vrot.slane %v748_v28, 4  ;;  %v3825_v22 = vshrl.u32 %v3590_v56, 16  ;;  %v3831_v9 = vshll.u32 %v3591_v46, 16 }
 0x108   :  { %v759_v33 = vrot.slane %v758_v20, 4  ;;  %v3817_v51 = vrot.slane %v3815_v49, 4  ;;  %v3823_v60 = vrot.slane %v3821_v30, 5  ;;  %v11634_v3 = vrot.slane %v5506_v61, %v10979_v24 }
 0x109   :  { %9477 = vmatmul.mubr.bf16.gmra.mrb[16].mxu1 %v8451_v23  ;;  %v754_v57 = vsel %vm11108_vm5, %v749_v8, %v753_v50  ;;  %v3827_v52 = vrot.slane %v3825_v22, 4  ;;  %v3833_v56 = vrot.slane %v3831_v9, 5  ;;  %v11642_v58 = vrot.slane %v5494_v34, %v10979_v24  ;;  %v260_v50 = vld [vmem:[%s14981_s0 + $0x78] sm:$0x1] }
 0x10a   :  { %15109 = vst [vmem:[#allocation22_spill] sm:$0xff] %v11634_v3  ;;  %v764_v28 = vsel %vm11108_vm5, %v759_v33, %v11621_v26  ;;  %v3818_v61 = vor.u32 %v3817_v51, %v11582_v31  ;;  %v3592_v42 = vmul.bf16 %v11114_v45, %v3353_v13  ;;  %v11650_v20 = vmul.bf16 %v11158_v54, %v3354_v62 }
 0x10b   :  { %15110 = vst [vmem:[#allocation23_spill] sm:$0xff] %v11642_v58  ;;  %v8452_v49 = vcombine.low %v754_v57, %v764_v28  ;;  %v3828_v30 = vor.u32 %v3827_v52, %v3823_v60  ;;  %v3835_v23 = vshrl.u32 %v3591_v46, 16  ;;  %v501_v34 = vmul.bf16 %v11139_v2, %v259_v36  ;;  %v1870_v36 = vpop.permute.xlu1 %1869 }
 0x10c   :  { %v3819_v8 = vrot.slane %v3818_v61, 4  ;;  %v3841_v22 = vshll.u32 %v3592_v42, 16  ;;  %v3845_v9 = vshrl.u32 %v3592_v42, 16  ;;  %v3851_v33 = vshll.u32 %v11650_v20, 16 }
 0x10d   :  { %9480 = vmatprep.mubr.bf16.mxu1 %v8452_v49  ;;  %v3829_v31 = vrot.slane %v3828_v30, 4  ;;  %v3837_v13 = vrot.slane %v3835_v23, 4  ;;  %v502_v62 = vmul.bf16 %v11122_v55, %v260_v50  ;;  %v765_v51 = vshrl.u32 %v11606_v63, 16  ;;  %v1858_v30 = vpop.permute.xlu0 %1857  ;;  %v261_v63 = vld [vmem:[%s14981_s0 + $0x84] sm:$0xf] }
 0x10e   :  { %v3824_v54 = vsel %vm11108_vm5, %v3819_v8, %v3823_v60  ;;  %v3843_v57 = vrot.slane %v3841_v22, 5  ;;  %v3847_v52 = vrot.slane %v3845_v9, 4  ;;  %v11661_v46 = vrot.slane %v3851_v33, 5 }
 0x10f   :  { %v3834_v28 = vsel %vm11108_vm5, %v3829_v31, %v3833_v56  ;;  %v3838_v61 = vor.u32 %v3837_v13, %v3833_v56  ;;  %v767_v42 = vrot.slane %v765_v51, 4  ;;  %v771_v49 = vshll.u32 %v501_v34, 16  ;;  %v262_v56 = vld [vmem:[%s14981_s0 + $0x88] sm:$0xf] }
 0x110   :  { %v8657_v23 = vcombine.low %v3824_v54, %v3834_v28  ;;  %v3848_v45 = vor.u32 %v3847_v52, %v3843_v57  ;;  %v775_v50 = vshrl.u32 %v501_v34, 16  ;;  %v781_v3 = vshll.u32 %v502_v62, 16  ;;  %v10460_v54 = vld [vmem:[%s14980_s1 + $0x80] sm:$0xff]  }
 0x111   :  { %v3839_v60 = vrot.slane %v3838_v61, 4  ;;  %v768_v8 = vor.u32 %v767_v42, %v11621_v26  ;;  %v773_v22 = vrot.slane %v771_v49, 5  ;;  %v1878_v9 = vrot.slane %v1870_v36, %v10979_v24  ;;  %v263_v26 = vld [vmem:[%s14981_s0 + $0x8c] sm:$0xf]  ;;  %9572 = vmatprep.subr.bf16.mxu1 %v10460_v54  ;;  %v3355_v42 = vld [vmem:[%s14981_s0 + $0x78] sm:$0xf] }
 0x112   :  { %9733 = vmatmul.mubr.bf16.gmra.mrb[16].mxu0 %v8657_v23  ;;  %v3849_v34 = vrot.slane %v3848_v45, 4  ;;  %v777_v33 = vrot.slane %v775_v50, 4  ;;  %v783_v31 = vrot.slane %v781_v3, 5  ;;  %v1866_v13 = vrot.slane %v1858_v30, %v10979_v24 }
 0x113   :  { %v3844_v62 = vsel %vm11108_vm5, %v3839_v60, %v3843_v57  ;;  %v769_v51 = vrot.slane %v768_v8, 4  ;;  %v11682_v52 = vrot.slane %v1878_v9, 7  ;;  %v503_v36 = vmul.bf16 %v11008_v48, %v261_v63  ;;  %v3356_v57 = vld [vmem:[%s14981_s0 + $0x7c] sm:$0x1] }
 0x114   :  { %v3854_v45 = vsel %vm11108_vm5, %v3849_v34, %v11661_v46  ;;  %v778_v3 = vor.u32 %v777_v33, %v773_v22  ;;  %v11688_v28 = vrot.slane %v1866_v13, 7  ;;  %v504_v61 = vmul.bf16 %v11053_v21, %v262_v56 }
 0x115   :  { %15111 = vst [vmem:[#allocation24_spill] sm:$0xff] %v11682_v52  ;;  %v8658_v49 = vcombine.low %v3844_v62, %v3854_v45  ;;  %v774_v30 = vsel %vm11108_vm5, %v769_v51, %v773_v22  ;;  %v1966_v23 = vrot.slane %v11682_v52, 4  ;;  %v11701_v50 = vmul.bf16 %v11067_v37, %v263_v26  ;;  %v1894_v26 = vpop.permute.xlu1 %1893  ;;  %v1882_v45 = vpop.permute.xlu0 %1881 }
 0x116   :  { %v779_v63 = vrot.slane %v778_v3, 4  ;;  %v786_v60 = vshrl.u32 %v503_v36, 16  ;;  %v789_v8 = vshll.u32 %v503_v36, 16  ;;  %v795_v9 = vshll.u32 %v504_v61, 16 }
 0x117   :  { %9736 = vmatprep.mubr.bf16.mxu0 %v8658_v49  ;;  %v799_v56 = vshrl.u32 %v504_v61, 16  ;;  %v805_v54 = vshll.u32 %v11701_v50, 16  ;;  %v3594_v34 = vmul.bf16 %v11166_v43, %v3355_v42  ;;  %v3595_v33 = vmul.bf16 %v11151_v40, %v3356_v57 }
 0x118   :  { %v784_v22 = vsel %vm11108_vm5, %v779_v63, %v783_v31  ;;  %v788_v13 = vrot.slane %v786_v60, 4  ;;  %v791_v62 = vrot.slane %v789_v8, 5  ;;  %v797_v51 = vrot.slane %v795_v9, 5 }
 0x119   :  { %v8453_v3 = vcombine.low %v774_v30, %v784_v22  ;;  %v801_v52 = vrot.slane %v799_v56, 4  ;;  %v11708_v36 = vrot.slane %v805_v54, 5  ;;  %v3855_v61 = vshrl.u32 %v11650_v20, 16 }
 0x11a   :  { %v792_v49 = vor.u32 %v791_v62, %v788_v13  ;;  %v3861_v58 = vshll.u32 %v3594_v34, 16  ;;  %v3865_v4 = vshrl.u32 %v3594_v34, 16  ;;  %v3871_v42 = vshll.u32 %v3595_v33, 16  ;;  %v265_v62 = vld [vmem:[%s14981_s0 + $0x94] sm:$0xf] }
 0x11b   :  { %9481 = vmatmul.mubr.bf16.gmra.mrb[20].mxu1 %v8453_v3  ;;  %v802_v57 = vor.u32 %v801_v52, %v797_v51  ;;  %v3857_v40 = vrot.slane %v3855_v61, 4  ;;  %v1902_v31 = vrot.slane %v1894_v26, %v10979_v24  ;;  %v1890_v63 = vrot.slane %v1882_v45, %v10979_v24  ;;  %v4561_v52 = vld [vmem:[%s14981_s0 + $0x4] sm:$0xe] }
 0x11c   :  { %v793_v60 = vrot.slane %v792_v49, 4  ;;  %v3863_v8 = vrot.slane %v3861_v58, 5  ;;  %v3867_v9 = vrot.slane %v3865_v4, 4  ;;  %v3873_v30 = vrot.slane %v3871_v42, 5  ;;  %v264_v4 = vld [vmem:[%s14981_s0 + $0x90] sm:$0xf] }
 0x11d   :  { %v803_v56 = vrot.slane %v802_v57, 4  ;;  %v3858_v54 = vor.u32 %v3857_v40, %v11661_v46  ;;  %v11714_v22 = vrot.slane %v1902_v31, 7  ;;  %v1967_v20 = vrot.slane %v1890_v63, 7  ;;  %v10496_v42 = vld [vmem:[%s14981_s0 + $0xc] sm:$0xf] }
 0x11e   :  { %v798_v34 = vsel %vm11108_vm5, %v793_v60, %v797_v51  ;;  %v3868_v33 = vor.u32 %v3867_v9, %v3863_v8  ;;  %v4681_v3 = vrot.slane %v11184_v15, 4  ;;  %v4712_v49 = vmul.bf16 %v11184_v15, %v4561_v52  ;;  %v1918_v9 = vpop.permute.xlu1 %1917 }
 0x11f   :  { %v808_v40 = vsel %vm11108_vm5, %v803_v56, %v11708_v36  ;;  %v3859_v58 = vrot.slane %v3858_v54, 4  ;;  %v11730_v13 = vsel %vm11215_vm8, %v1966_v23, %v1967_v20  ;;  %v1969_v45 = vrot.slane %v1967_v20, 4  ;;  %v10497_v54 = vld [vmem:[%s14981_s0 + $0xc] sm:$0xf]  ;;  %v10498_v20 = vld [vmem:[%s14981_s0 + $0x8] sm:$0xf] }
 0x120   :  { %15112 = vst [vmem:[#allocation25_spill] sm:$0xff] %v11730_v13  ;;  %v8454_v51 = vcombine.low %v798_v34, %v808_v40  ;;  %v3869_v26 = vrot.slane %v3868_v33, 4  ;;  %v4714_v23 = vmul.bf16 %v10496_v42, %v11230_v27  ;;  %v506_v57 = vmul.bf16 %v11071_v38, %v264_v4 }
 0x121   :  { %v3864_v61 = vsel %vm11108_vm5, %v3859_v58, %v3863_v8  ;;  %v11749_v63 = vsel %vm11215_vm8, %v1969_v45, %v11714_v22  ;;  %v11754_v60 = vsel %vm11215_vm8, %v4681_v3, %v11174_v10  ;;  %v507_v8 = vmul.bf16 %v11097_v17, %v265_v62  ;;  %v1906_v3 = vpop.permute.xlu0 %1905 }
 0x122   :  { %9484 = vmatprep.mubr.bf16.mxu1 %v8454_v51  ;;  %v3874_v31 = vsel %vm11108_vm5, %v3869_v26, %v3873_v30  ;;  %15113 = vst [vmem:[#allocation26_spill] sm:$0xff] %v11749_v63  ;;  %v1997_v30 = vmul.bf16 %v10497_v54, %v11749_v63  ;;  %v4713_v34 = vmul.bf16 %v10498_v20, %v11754_v60  ;;  %v8688_v33 = vrot.slane %v4712_v49, 9 }
 0x123   :  { %v8659_v56 = vcombine.low %v3864_v61, %v3874_v31  ;;  %v4825_v52 = vrot.slane %v4714_v23, 5  ;;  %v809_v4 = vshrl.u32 %v11701_v50, 16  ;;  %v815_v40 = vshll.u32 %v506_v57, 16  ;;  %v266_v61 = vld [vmem:[%s14981_s0 + $0x98] sm:$0xf] }
 0x124   :  { %v819_v58 = vshrl.u32 %v506_v57, 16  ;;  %v11772_v62 = vrot.slane %v1997_v30, 5  ;;  %v4822_v51 = vrot.slane %v4713_v34, 5  ;;  %v825_v26 = vshll.u32 %v507_v8, 16  ;;  %v267_v50 = vld [vmem:[%s14981_s0 + $0x9c] sm:$0xf] }
 0x125   :  { %9737 = vmatmul.mubr.bf16.gmra.mrb[20].mxu0 %v8659_v56  ;;  %v1926_v45 = vrot.slane %v1918_v9, %v10979_v24  ;;  %v4827_v49 = vrot.slane %v4825_v52, 4  ;;  %v811_v42 = vrot.slane %v809_v4, 4  ;;  %v817_v31 = vrot.slane %v815_v40, 5 }
 0x126   :  { %v821_v23 = vrot.slane %v819_v58, 4  ;;  %v4823_v57 = vsel %vm11767_vm11, %v8688_v33, %v4822_v51  ;;  %v4824_v56 = vrot.slane %v4822_v51, 4  ;;  %v827_v54 = vrot.slane %v825_v26, 5 }
 0x127   :  { %v11783_v30 = vrot.slane %v1926_v45, 7  ;;  %v812_v9 = vor.u32 %v811_v42, %v11708_v36  ;;  %v1914_v34 = vrot.slane %v1906_v3, %v10979_v24  ;;  %v508_v4 = vmul.bf16 %v11118_v47, %v266_v61 }
 0x128   :  { %v822_v20 = vor.u32 %v821_v23, %v817_v31  ;;  %v4826_v40 = vsel %vm11767_vm11, %v4824_v56, %v4825_v52  ;;  %v11792_v46 = vmul.bf16 %v11135_v1, %v267_v50  ;;  %v829_v33 = vshrl.u32 %v507_v8, 16 }
 0x129   :  { %v1978_v58 = vrot.slane %v11783_v30, 4  ;;  %v8710_v51 = vcombine.low %v4823_v57, %v4826_v40  ;;  %v813_v26 = vrot.slane %v812_v9, 4  ;;  %v1973_v43 = vrot.slane %v1914_v34, 7  ;;  %v1942_v57 = vpop.permute.xlu1 %1941  ;;  %v10499_v9 = vld [vmem:[%s14981_s0 + $0x10] sm:$0xf] }
 0x12a   :  { %v823_v45 = vrot.slane %v822_v20, 4  ;;  %v831_v63 = vrot.slane %v829_v33, 4  ;;  %v835_v36 = vshll.u32 %v508_v4, 16  ;;  %v839_v42 = vshrl.u32 %v508_v4, 16  ;;  %v1930_v4 = vpop.permute.xlu0 %1929 }
 0x12b   :  { %v845_v3 = vshll.u32 %v11792_v46, 16  ;;  %9780 = vmatprep.mubr.bf16.mxu0 %v8710_v51  ;;  %v818_v61 = vsel %vm11108_vm5, %v813_v26, %v817_v31  ;;  %v15116_v23 = vrot.slane %v11714_v22, 4  ;;  %v1975_v50 = vrot.slane %v1973_v43, 4 }
 0x12c   :  { %v828_v52 = vsel %vm11108_vm5, %v823_v45, %v827_v54  ;;  %v832_v34 = vor.u32 %v831_v63, %v827_v54  ;;  %v837_v31 = vrot.slane %v835_v36, 5  ;;  %v841_v40 = vrot.slane %v839_v42, 4 }
 0x12d   :  { %v11803_v8 = vsel %vm11215_vm8, %v15116_v23, %v1973_v43  ;;  %v8455_v56 = vcombine.low %v818_v61, %v828_v52  ;;  %v11812_v22 = vsel %vm11215_vm8, %v1975_v50, %v11783_v30  ;;  %v11814_v33 = vrot.slane %v845_v3, 5  ;;  %v10500_v30 = vld [vmem:[%s14981_s0 + $0x18] sm:$0xf]  ;;  %v269_v61 = vld [vmem:[%s14981_s0 + $0xa4] sm:$0x1] }
 0x12e   :  { %15117 = vst [vmem:[#allocation27_spill] sm:$0xff] %v11803_v8  ;;  %v1998_v20 = vmul.bf16 %v10499_v9, %v11803_v8  ;;  %15118 = vst [vmem:[#allocation28_spill] sm:$0xff] %v11812_v22  ;;  %v4829_v43 = vsel %vm11767_vm11, %v4827_v49, %v11262_v12  ;;  %v833_v26 = vrot.slane %v832_v34, 4  ;;  %v4830_v63 = vrot.slane %v11262_v12, 4  ;;  %v10501_v49 = vld [vmem:[%s14981_s0 + $0x1c] sm:$0xf] }
 0x12f   :  { %9485 = vmatmul.mubr.bf16.gmra.mrb[24].mxu1 %v8455_v56  ;;  %v1950_v54 = vrot.slane %v1942_v57, %v10979_v24  ;;  %v842_v45 = vor.u32 %v841_v40, %v837_v31  ;;  %v1938_v36 = vrot.slane %v1930_v4, %v10979_v24  ;;  %v4717_v42 = vmul.bf16 %v10500_v30, %v11267_v32  ;;  %v268_v12 = vld [vmem:[%s14981_s0 + $0xa0] sm:$0xf]  ;;  %v10455_v4 = vld [vmem:[%s14980_s1 + $0x188] sm:$0xff]  }
 0x130   :  { %v11819_v51 = vrot.slane %v1998_v20, 5  ;;  %v4718_v3 = vmul.bf16 %v10501_v49, %v11298_v35  ;;  %v838_v52 = vsel %vm11108_vm5, %v833_v26, %v837_v31  ;;  %v4832_v23 = vsel %vm11767_vm11, %v4830_v63, %v11272_v44  ;;  %v6123_v63 = vpop.permute.xlu1 %6122 }
 0x131   :  { %v1982_v50 = vrot.slane %v1950_v54, 7  ;;  %v4833_v57 = vrot.slane %v11272_v44, 4  ;;  %v843_v56 = vrot.slane %v842_v45, 4  ;;  %v8711_v9 = vcombine.low %v4829_v43, %v4832_v23 }
 0x132   :  { %v1979_v20 = vrot.slane %v1938_v36, 7  ;;  %v4834_v34 = vrot.slane %v4717_v42, 5  ;;  %v11849_v30 = vrot.slane %v4718_v3, 5  ;;  %v510_v31 = vmul.bf16 %v11139_v2, %v268_v12  ;;  %v6111_v36 = vpop.permute.xlu0 %6110 }
 0x133   :  { %v11847_v40 = vrot.slane %v1982_v50, 4  ;;  %v511_v26 = vmul.bf16 %v11122_v55, %v269_v61  ;;  %v848_v44 = vsel %vm11108_vm5, %v843_v56, %v11814_v33  ;;  %9781 = vmatmul.mubr.bf16.vlgmr.msra.gmra.mrb[0].mxu0 %v8711_v9  ;;  %v849_v3 = vshrl.u32 %v11792_v46, 16 }
 0x134   :  { %v11858_v43 = vsel %vm11215_vm8, %v1978_v58, %v1979_v20  ;;  %v1981_v54 = vrot.slane %v1979_v20, 4  ;;  %v4835_v45 = vsel %vm11767_vm11, %v4833_v57, %v4834_v34  ;;  %v8456_v42 = vcombine.low %v838_v52, %v848_v44  ;;  %9829 = vmatpush3.bf16.msra.mxu0 %v11426_v25  ;;  %v10457_v57 = vld [vmem:[%s14980_s1 + $0x190] sm:$0xff]   ;;  %v272_v44 = vld [vmem:[%s14981_s0 + $0xb8] sm:$0xf] }
 0x135   :  { %15119 = vst [vmem:[#allocation29_spill] sm:$0xff] %v11847_v40  ;;  %15120 = vst [vmem:[#allocation30_spill] sm:$0xff] %v11858_v43  ;;  %v4836_v49 = vrot.slane %v4834_v34, 4  ;;  %v855_v12 = vshll.u32 %v510_v31, 16  ;;  %v859_v23 = vshrl.u32 %v510_v31, 16  ;;  %v865_v56 = vshll.u32 %v511_v26, 16  ;;  %9830 = vmatprep.subr.bf16.mxu0 %v10455_v4 }
 0x136   :  { %v11866_v61 = vsel %vm11215_vm8, %v1981_v54, %v1982_v50  ;;  %v6131_v58 = vrot.slane %v6123_v63, %v10979_v24  ;;  %9488 = vmatprep.mubr.bf16.mxu1 %v8456_v42  ;;  %v851_v46 = vrot.slane %v849_v3, 4  ;;  %v6119_v9 = vrot.slane %v6111_v36, %v10979_v24  ;;  %v270_v50 = vld [vmem:[%s14981_s0 + $0xb0] sm:$0xf]  ;;  %v271_v20 = vld [vmem:[%s14981_s0 + $0xb4] sm:$0xf] }
 0x137   :  { %15121 = vst [vmem:[#allocation31_spill] sm:$0xff] %v11866_v61  ;;  %v4838_v25 = vsel %vm11767_vm11, %v4836_v49, %v11849_v30  ;;  %v857_v52 = vrot.slane %v855_v12, 5  ;;  %v861_v31 = vrot.slane %v859_v23, 4  ;;  %v867_v26 = vrot.slane %v865_v56, 5  ;;  %v10459_v23 = vld [vmem:[%s14980_s1 + $0x198] sm:$0xff]  }
 0x138   :  { %v8712_v34 = vcombine.low %v4835_v45, %v4838_v25  ;;  %v6213_v63 = vshrl.u32 %v6131_v58, 16  ;;  %v852_v54 = vor.u32 %v851_v46, %v11814_v33  ;;  %v6216_v42 = vshll.u32 %v6131_v58, 16  ;;  %9831 = vmatpush3.bf16.msra.mxu0 %v10455_v4  ;;  %v10502_v4 = vld [vmem:[%s14981_s0 + $0x20] sm:$0xf] }
 0x139   :  { %v6205_v36 = vshrl.u32 %v6119_v9, 16  ;;  %v6208_v49 = vshll.u32 %v6119_v9, 16  ;;  %v862_v3 = vor.u32 %v861_v31, %v857_v52  ;;  %v512_v8 = vmul.bf16 %v11008_v48, %v270_v50  ;;  %9832 = vmatprep.subr.bf16.mxu0 %v10457_v57 }
 0x13a   :  { %9784 = vmatprep.mubr.bf16.mxu0 %v8712_v34  ;;  %v11886_v12 = vrot.slane %v6213_v63, 7  ;;  %v513_v45 = vmul.bf16 %v11053_v21, %v271_v20  ;;  %v853_v56 = vrot.slane %v852_v54, 4  ;;  %v11894_v33 = vmul.bf16 %v11067_v37, %v272_v44 }
 0x13b   :  { %v6207_v25 = vrot.slane %v6205_v36, 7  ;;  %v4719_v58 = vmul.bf16 %v10502_v4, %v11302_v18  ;;  %v863_v46 = vrot.slane %v862_v3, 4  ;;  %v870_v20 = vshrl.u32 %v512_v8, 16  ;;  %v6147_v3 = vpop.permute.xlu1 %6146 }
 0x13c   :  { %v6218_v9 = vor.u32 %v6216_v42, %v11886_v12  ;;  %v858_v34 = vsel %vm11108_vm5, %v853_v56, %v857_v52  ;;  %v873_v44 = vshll.u32 %v512_v8, 16  ;;  %9833 = vmatpush3.bf16.msra.mxu0 %v10457_v57  ;;  %v879_v40 = vshll.u32 %v513_v45, 16  ;;  %v10461_v42 = vld [vmem:[%s14980_s1 + $0x1a0] sm:$0xff]   ;;  %v6135_v57 = vpop.permute.xlu0 %6134 }
 0x13d   :  { %v11904_v31 = vor.u32 %v6208_v49, %v6207_v25  ;;  %v6211_v63 = vrot.slane %v6207_v25, 4  ;;  %v868_v54 = vsel %vm11108_vm5, %v863_v46, %v867_v26  ;;  %v872_v36 = vrot.slane %v870_v20, 4  ;;  %9834 = vmatprep.subr.bf16.mxu0 %v10459_v23  ;;  %v4562_v26 = vld [vmem:[%s14981_s0 + $0x30] sm:$0xe]  ;;  %v10503_v25 = vld [vmem:[%s14981_s0 + $0x24] sm:$0x1] }
 0x13e   :  { %v883_v4 = vshrl.u32 %v513_v45, 16  ;;  %v8457_v50 = vcombine.low %v858_v34, %v868_v54  ;;  %v875_v49 = vrot.slane %v873_v44, 5  ;;  %v889_v8 = vshll.u32 %v11894_v33, 16 }
 0x13f   :  { %15122 = vst [vmem:[#allocation32_spill] sm:$0xff] %v11904_v31  ;;  %v11913_v52 = vsel %vm11037_vm2, %v6211_v63, %v6218_v9  ;;  %v881_v45 = vrot.slane %v879_v40, 5  ;;  %v4720_v46 = vmul.bf16 %v10503_v25, %v11294_v59  ;;  %v4839_v20 = vrot.slane %v11849_v30, 4  ;;  %v10463_v25 = vld [vmem:[%s14980_s1 + $0x1a8] sm:$0xff]  }
 0x140   :  { %15123 = vst [vmem:[#allocation33_spill] sm:$0xff] %v11913_v52  ;;  %v885_v56 = vrot.slane %v883_v4, 4  ;;  %9489 = vmatmul.mubr.bf16.gmra.mrb[28].mxu1 %v8457_v50  ;;  %v876_v9 = vor.u32 %v875_v49, %v872_v36  ;;  %v11924_v34 = vrot.slane %v889_v8, 5  ;;  %v4840_v63 = vrot.slane %v4719_v58, 5  ;;  %9835 = vmatpush3.bf16.msra.mxu0 %v10459_v23 }
 0x141   :  { %v6155_v44 = vrot.slane %v6147_v3, %v10979_v24  ;;  %v4843_v52 = vrot.slane %v4720_v46, 5  ;;  %v6143_v40 = vrot.slane %v6135_v57, %v10979_v24  ;;  %v4721_v4 = vmul.bf16 %v11184_v15, %v4562_v26  ;;  %9836 = vmatprep.subr.bf16.mxu0 %v10461_v42  ;;  %v10504_v46 = vld [vmem:[%s14981_s0 + $0x34] sm:$0xf] }
 0x142   :  { %v886_v54 = vor.u32 %v885_v56, %v881_v45  ;;  %v877_v30 = vrot.slane %v876_v9, 4  ;;  %v4841_v50 = vsel %vm11767_vm11, %v4839_v20, %v4840_v63  ;;  %v4842_v36 = vrot.slane %v4840_v63, 4 }
 0x143   :  { %v6231_v58 = vshrl.u32 %v6155_v44, 16  ;;  %v6234_v3 = vshll.u32 %v6155_v44, 16  ;;  %v6222_v23 = vshrl.u32 %v6143_v40, 16  ;;  %v6225_v8 = vshll.u32 %v6143_v40, 16  ;;  %v6171_v40 = vpop.permute.xlu1 %6170 }
 0x144   :  { %v887_v49 = vrot.slane %v886_v54, 4  ;;  %v882_v57 = vsel %vm11108_vm5, %v877_v30, %v881_v45  ;;  %v4844_v26 = vsel %vm11767_vm11, %v4842_v36, %v4843_v52  ;;  %v4722_v20 = vmul.bf16 %v10504_v46, %v11754_v60  ;;  %9837 = vmatpush3.bf16.msra.mxu0 %v10461_v42  ;;  %v10505_v45 = vld [vmem:[%s14981_s0 + $0x38] sm:$0xf]  ;;  %v273_v54 = vld [vmem:[%s14981_s0 + $0xbc] sm:$0xf]  ;;  %v10465_v30 = vld [vmem:[%s14980_s1 + $0x1b0] sm:$0xff]  }
 0x145   :  { %v11938_v56 = vrot.slane %v6231_v58, 7  ;;  %v8713_v63 = vcombine.low %v4841_v50, %v4844_v26  ;;  %v6224_v44 = vrot.slane %v6222_v23, 7  ;;  %v4723_v52 = vmul.bf16 %v10505_v45, %v11230_v27  ;;  %v274_v42 = vld [vmem:[%s14981_s0 + $0xc0] sm:$0xf]  ;;  %9838 = vmatprep.subr.bf16.mxu0 %v10463_v25 }
 0x146   :  { %v892_v9 = vsel %vm11108_vm5, %v887_v49, %v11924_v34  ;;  %v8689_v49 = vrot.slane %v4721_v4, 9  ;;  %v4847_v46 = vrot.slane %v4722_v20, 5  ;;  %v515_v31 = vmul.bf16 %v11071_v38, %v273_v54 }
 0x147   :  { %v8458_v50 = vcombine.low %v882_v57, %v892_v9  ;;  %v6236_v36 = vor.u32 %v6234_v3, %v11938_v56  ;;  %9785 = vmatmul.mubr.bf16.gmra.mrb[4].mxu0 %v8713_v63  ;;  %v6227_v23 = vor.u32 %v6225_v8, %v6224_v44  ;;  %v6229_v26 = vrot.slane %v6224_v44, 4  ;;  %v6159_v9 = vpop.permute.xlu0 %6158 }
 0x148   :  { %v11962_v45 = vrot.slane %v4723_v52, 5  ;;  %v516_v61 = vmul.bf16 %v11097_v17, %v274_v42  ;;  %v893_v43 = vshrl.u32 %v11894_v33, 16  ;;  %v6179_v57 = vrot.slane %v6171_v40, %v10979_v24  ;;  %9839 = vmatpush3.bf16.msra.mxu0 %v10463_v25  ;;  %v10467_v33 = vld [vmem:[%s14980_s1 + $0x1b8] sm:$0xff]  }
 0x149   :  { %9492 = vmatprep.mubr.bf16.mxu1 %v8458_v50  ;;  %v15124_v3 = vrot.slane %v11886_v12, 4  ;;  %v11976_v8 = vsel %vm11037_vm2, %v6229_v26, %v6236_v36  ;;  %v4848_v20 = vsel %vm11767_vm11, %v8689_v49, %v4847_v46  ;;  %v4849_v63 = vrot.slane %v4847_v46, 4  ;;  %9840 = vmatprep.subr.bf16.mxu0 %v10465_v30  ;;  %v275_v36 = vld [vmem:[%s14981_s0 + $0xc4] sm:$0xf]  ;;  %v276_v49 = vld [vmem:[%s14981_s0 + $0xc8] sm:$0xf] }
 0x14a   :  { %15126 = vst [vmem:[#allocation35_spill] sm:$0xff] %v11976_v8  ;;  %v895_v25 = vrot.slane %v893_v43, 4  ;;  %v899_v44 = vshll.u32 %v515_v31, 16  ;;  %v903_v12 = vshrl.u32 %v515_v31, 16  ;;  %v909_v52 = vshll.u32 %v516_v61, 16 }
 0x14b   :  { %v11972_v4 = vsel %vm11037_vm2, %v15124_v3, %v6227_v23  ;;  %v4851_v54 = vsel %vm11767_vm11, %v4849_v63, %v11962_v45  ;;  %v6249_v42 = vshrl.u32 %v6179_v57, 16  ;;  %v6252_v40 = vshll.u32 %v6179_v57, 16 }
 0x14c   :  { %15125 = vst [vmem:[#allocation34_spill] sm:$0xff] %v11972_v4  ;;  %v6167_v50 = vrot.slane %v6159_v9, %v10979_v24  ;;  %v8714_v43 = vcombine.low %v4848_v20, %v4851_v54  ;;  %v896_v31 = vor.u32 %v895_v25, %v11924_v34  ;;  %v901_v23 = vrot.slane %v899_v44, 5  ;;  %9841 = vmatpush3.bf16.msra.mxu0 %v10465_v30  ;;  %v10469_v9 = vld [vmem:[%s14980_s1 + $0x1c0] sm:$0xff]  }
 0x14d   :  { %v905_v26 = vrot.slane %v903_v12, 4  ;;  %v911_v46 = vrot.slane %v909_v52, 5  ;;  %v11994_v3 = vrot.slane %v6249_v42, 7  ;;  %9842 = vmatprep.subr.bf16.mxu0 %v10467_v33  ;;  %v517_v20 = vmul.bf16 %v11118_v47, %v275_v36 }
 0x14e   :  { %v6240_v57 = vshrl.u32 %v6167_v50, 16  ;;  %v6243_v63 = vshll.u32 %v6167_v50, 16  ;;  %9788 = vmatprep.mubr.bf16.mxu0 %v8714_v43  ;;  %v897_v58 = vrot.slane %v896_v31, 4  ;;  %v12001_v34 = vmul.bf16 %v11135_v1, %v276_v49 }
 0x14f   :  { %v906_v4 = vor.u32 %v905_v26, %v901_v23  ;;  %v6254_v30 = vor.u32 %v6252_v40, %v11994_v3  ;;  %v913_v12 = vshrl.u32 %v516_v61, 16  ;;  %v919_v42 = vshll.u32 %v517_v20, 16  ;;  %v10506_v61 = vld [vmem:[%s14981_s0 + $0x3c] sm:$0xf] }
 0x150   :  { %v6242_v44 = vrot.slane %v6240_v57, 7  ;;  %v902_v52 = vsel %vm11108_vm5, %v897_v58, %v901_v23  ;;  %v923_v50 = vshrl.u32 %v517_v20, 16  ;;  %9843 = vmatpush3.bf16.msra.mxu0 %v10467_v33  ;;  %v929_v36 = vshll.u32 %v12001_v34, 16  ;;  %v6183_v23 = vpop.permute.xlu0 %6182 }
 0x151   :  { %v907_v54 = vrot.slane %v906_v4, 4  ;;  %v915_v26 = vrot.slane %v913_v12, 4  ;;  %9892 = vmatprep.subr.bf16.mxu0 %v10469_v9  ;;  %v921_v49 = vrot.slane %v919_v42, 5  ;;  %v4724_v58 = vmul.bf16 %v10506_v61, %v11238_v41  ;;  %v6195_v4 = vpop.permute.xlu1 %6194 }
 0x152   :  { %v6245_v43 = vor.u32 %v6243_v63, %v6242_v44  ;;  %v6247_v31 = vrot.slane %v6242_v44, 4  ;;  %v925_v25 = vrot.slane %v923_v50, 4  ;;  %v15127_v57 = vrot.slane %v11938_v56, 4 }
 0x153   :  { %v912_v40 = vsel %vm11108_vm5, %v907_v54, %v911_v46  ;;  %v916_v20 = vor.u32 %v915_v26, %v911_v46  ;;  %v12024_v12 = vrot.slane %v929_v36, 5  ;;  %v10507_v54 = vld [vmem:[%s14981_s0 + $0x40] sm:$0xf]  ;;  %v4852_v56 = vrot.slane %v11962_v45, 4  ;;  %v10509_v36 = vld [vmem:[%s14981_s0 + $0x48] sm:$0xf] }
 0x154   :  { %v8459_v33 = vcombine.low %v902_v52, %v912_v40  ;;  %v12018_v63 = vsel %vm11037_vm2, %v15127_v57, %v6245_v43  ;;  %v12022_v9 = vsel %vm11037_vm2, %v6247_v31, %v6254_v30  ;;  %v926_v44 = vor.u32 %v925_v25, %v921_v49  ;;  %v10508_v25 = vld [vmem:[%s14981_s0 + $0x44] sm:$0xf] }
 0x155   :  { %15128 = vst [vmem:[#allocation36_spill] sm:$0xff] %v12018_v63  ;;  %15129 = vst [vmem:[#allocation37_spill] sm:$0xff] %v12022_v9  ;;  %v4725_v52 = vmul.bf16 %v10507_v54, %v11248_v53  ;;  %v917_v42 = vrot.slane %v916_v20, 4  ;;  %v4853_v50 = vrot.slane %v4724_v58, 5  ;;  %v6203_v43 = vrot.slane %v6195_v4, %v10979_v24  ;;  %v2719_v13 = vpop.permute.xlu1 %2718 }
 0x156   :  { %9493 = vmatmul.mubr.bf16.gmra.mrb[32].mxu1 %v8459_v33  ;;  %v6191_v30 = vrot.slane %v6183_v23, %v10979_v24  ;;  %v927_v31 = vrot.slane %v926_v44, 4  ;;  %v4726_v26 = vmul.bf16 %v10508_v25, %v11267_v32  ;;  %v4727_v45 = vmul.bf16 %v10509_v36, %v11298_v35  ;;  %v278_v23 = vld [vmem:[%s14981_s0 + $0xd0] sm:$0x1] }
 0x157   :  { %v4856_v46 = vrot.slane %v4725_v52, 5  ;;  %v922_v40 = vsel %vm11108_vm5, %v917_v42, %v921_v49  ;;  %v4854_v61 = vsel %vm11767_vm11, %v4852_v56, %v4853_v50  ;;  %v4855_v58 = vrot.slane %v4853_v50, 4  ;;  %v277_v49 = vld [vmem:[%s14981_s0 + $0xcc] sm:$0xf] }
 0x158   :  { %v6267_v4 = vshrl.u32 %v6203_v43, 16  ;;  %v932_v33 = vsel %vm11108_vm5, %v927_v31, %v12024_v12  ;;  %v6270_v57 = vshll.u32 %v6203_v43, 16  ;;  %v6258_v20 = vshrl.u32 %v6191_v30, 16 }
 0x159   :  { %v6261_v44 = vshll.u32 %v6191_v30, 16  ;;  %v8460_v54 = vcombine.low %v922_v40, %v932_v33  ;;  %v4857_v52 = vsel %vm11767_vm11, %v4855_v58, %v4856_v46  ;;  %v4858_v42 = vrot.slane %v4856_v46, 4 }
 0x15a   :  { %v6269_v56 = vrot.slane %v6267_v4, 7  ;;  %v8715_v50 = vcombine.low %v4854_v61, %v4857_v52  ;;  %v6260_v25 = vrot.slane %v6258_v20, 7  ;;  %v4859_v36 = vrot.slane %v4726_v26, 5  ;;  %v279_v26 = vld [vmem:[%s14981_s0 + $0xdc] sm:$0xf]  ;;  %v2707_v20 = vpop.permute.xlu0 %2706 }
 0x15b   :  { %v12056_v9 = vrot.slane %v4727_v45, 5  ;;  %9496 = vmatprep.mubr.bf16.mxu1 %v8460_v54  ;;  %v519_v30 = vmul.bf16 %v11139_v2, %v277_v49  ;;  %v520_v22 = vmul.bf16 %v11122_v55, %v278_v23  ;;  %v933_v45 = vshrl.u32 %v12001_v34, 16  ;;  %v280_v23 = vld [vmem:[%s14981_s0 + $0xe0] sm:$0xf]  ;;  %v281_v52 = vld [vmem:[%s14981_s0 + $0xe4] sm:$0xf] }
 0x15c   :  { %v6272_v31 = vor.u32 %v6270_v57, %v6269_v56  ;;  %v12058_v43 = vrot.slane %v6269_v56, 4  ;;  %9789 = vmatmul.mubr.bf16.gmra.mrb[8].mxu0 %v8715_v50  ;;  %v6263_v40 = vor.u32 %v6261_v44, %v6260_v25  ;;  %v6265_v33 = vrot.slane %v6260_v25, 4 }
 0x15d   :  { %v4860_v46 = vsel %vm11767_vm11, %v4858_v42, %v4859_v36  ;;  %v4861_v61 = vrot.slane %v4859_v36, 4  ;;  %v939_v58 = vshll.u32 %v519_v30, 16  ;;  %v943_v4 = vshrl.u32 %v519_v30, 16 }
 0x15e   :  { %15130 = vst [vmem:[#allocation38_spill] sm:$0xff] %v12058_v43  ;;  %v949_v57 = vshll.u32 %v520_v22, 16  ;;  %v15131_v44 = vrot.slane %v11994_v3, 4  ;;  %v12079_v54 = vsel %vm11037_vm2, %v6265_v33, %v6272_v31  ;;  %v12085_v22 = vrot.slane %v2719_v13, %v10979_v24  ;;  %v10510_v33 = vld [vmem:[%s14981_s0 + $0x4c] sm:$0xf] }
 0x15f   :  { %15133 = vst [vmem:[#allocation40_spill] sm:$0xff] %v12079_v54  ;;  %v4863_v34 = vsel %vm11767_vm11, %v4861_v61, %v12056_v9  ;;  %v935_v56 = vrot.slane %v933_v45, 4  ;;  %v941_v42 = vrot.slane %v939_v58, 5  ;;  %v945_v50 = vrot.slane %v943_v4, 4 }
 0x160   :  { %v12075_v49 = vsel %vm11037_vm2, %v15131_v44, %v6263_v40  ;;  %15134 = vst [vmem:[#allocation41_spill] sm:$0xff] %v12085_v22  ;;  %v8716_v3 = vcombine.low %v4860_v46, %v4863_v34  ;;  %v951_v25 = vrot.slane %v949_v57, 5  ;;  %v12091_v5 = vrot.slane %v2707_v20, %v10979_v24  ;;  %v2743_v34 = vpop.permute.xlu1 %2742 }
 0x161   :  { %15132 = vst [vmem:[#allocation39_spill] sm:$0xff] %v12075_v49  ;;  %v521_v36 = vmul.bf16 %v11008_v48, %v279_v26  ;;  %v522_v31 = vmul.bf16 %v11053_v21, %v280_v23  ;;  %v936_v13 = vor.u32 %v935_v56, %v12024_v12  ;;  %v946_v30 = vor.u32 %v945_v50, %v941_v42  ;;  %v10511_v12 = vld [vmem:[%s14981_s0 + $0x50] sm:$0x1] }
 0x162   :  { %15135 = vst [vmem:[#allocation42_spill] sm:$0xff] %v12091_v5  ;;  %9792 = vmatprep.mubr.bf16.mxu0 %v8716_v3  ;;  %v12097_v40 = vmul.bf16 %v11067_v37, %v281_v52  ;;  %v4728_v46 = vmul.bf16 %v10510_v33, %v11302_v18  ;;  %v4729_v37 = vmul.bf16 %v10511_v12, %v11294_v59  ;;  %v2731_v52 = vpop.permute.xlu0 %2730  ;;  %v4563_v3 = vld [vmem:[%s14981_s0 + $0x5c] sm:$0xe]  ;;  %v12136_v12 = vld [vmem:[%s14981_s0 + $0x60] sm:$0xf] }
 0x163   :  { %v954_v61 = vshrl.u32 %v521_v36, 16  ;;  %v957_v45 = vshll.u32 %v521_v36, 16  ;;  %v963_v58 = vshll.u32 %v522_v31, 16  ;;  %v967_v4 = vshrl.u32 %v522_v31, 16 }
 0x164   :  { %v937_v48 = vrot.slane %v936_v13, 4  ;;  %v947_v26 = vrot.slane %v946_v30, 4  ;;  %v973_v21 = vshll.u32 %v12097_v40, 16  ;;  %v4864_v31 = vrot.slane %v12056_v9, 4  ;;  %v283_v9 = vld [vmem:[%s14981_s0 + $0xec] sm:$0xf] }
 0x165   :  { %v956_v57 = vrot.slane %v954_v61, 4  ;;  %v959_v20 = vrot.slane %v957_v45, 5  ;;  %v965_v23 = vrot.slane %v963_v58, 5  ;;  %v969_v44 = vrot.slane %v967_v4, 4  ;;  %v282_v45 = vld [vmem:[%s14981_s0 + $0xe8] sm:$0xf] }
 0x166   :  { %v942_v56 = vsel %vm11108_vm5, %v937_v48, %v941_v42  ;;  %v952_v50 = vsel %vm11108_vm5, %v947_v26, %v951_v25  ;;  %v12115_v36 = vrot.slane %v973_v21, 5  ;;  %v4865_v61 = vrot.slane %v4728_v46, 5 }
 0x167   :  { %v8461_v13 = vcombine.low %v942_v56, %v952_v50  ;;  %v960_v30 = vor.u32 %v959_v20, %v956_v57  ;;  %v970_v33 = vor.u32 %v969_v44, %v965_v23  ;;  %v4868_v58 = vrot.slane %v4729_v37, 5  ;;  %v12143_v57 = vld [vmem:[%s14981_s0 + $0x64] sm:$0xf] }
 0x168   :  { %v12122_v4 = vrot.slane %v2743_v34, %v10979_v24  ;;  %v12125_v42 = vrot.slane %v2731_v52, %v10979_v24  ;;  %v4730_v25 = vmul.bf16 %v11184_v15, %v4563_v3  ;;  %v4866_v26 = vsel %vm11767_vm11, %v4864_v31, %v4865_v61  ;;  %v2767_v31 = vpop.permute.xlu1 %2766 }
 0x169   :  { %9497 = vmatmul.mubr.bf16.gmra.mrb[36].mxu1 %v8461_v13  ;;  %v961_v48 = vrot.slane %v960_v30, 4  ;;  %v971_v46 = vrot.slane %v970_v33, 4  ;;  %v4867_v21 = vrot.slane %v4865_v61, 4  ;;  %v4731_v37 = vmul.bf16 %v12136_v12, %v11754_v60  ;;  %v2755_v13 = vpop.permute.xlu0 %2754 }
 0x16a   :  { %15136 = vst [vmem:[#allocation43_spill] sm:$0xff] %v12122_v4  ;;  %15137 = vst [vmem:[#allocation44_spill] sm:$0xff] %v12125_v42  ;;  %v4732_v20 = vmul.bf16 %v12143_v57, %v11230_v27  ;;  %v8690_v44 = vrot.slane %v4730_v25, 9  ;;  %v524_v34 = vmul.bf16 %v11071_v38, %v282_v45  ;;  %v525_v50 = vmul.bf16 %v11097_v17, %v283_v9  ;;  %v284_v38 = vld [vmem:[%s14981_s0 + $0xf0] sm:$0xf] }
 0x16b   :  { %v966_v52 = vsel %vm11108_vm5, %v961_v48, %v965_v23  ;;  %v976_v3 = vsel %vm11108_vm5, %v971_v46, %v12115_v36  ;;  %v4869_v56 = vsel %vm11767_vm11, %v4867_v21, %v4868_v58  ;;  %v4872_v61 = vrot.slane %v4731_v37, 5  ;;  %v285_v58 = vld [vmem:[%s14981_s0 + $0xf4] sm:$0xf] }
 0x16c   :  { %v8462_v30 = vcombine.low %v966_v52, %v976_v3  ;;  %v8717_v33 = vcombine.low %v4866_v26, %v4869_v56  ;;  %v4875_v25 = vrot.slane %v4732_v20, 5  ;;  %v977_v23 = vshrl.u32 %v12097_v40, 16 }
 0x16d   :  { %v983_v45 = vshll.u32 %v524_v34, 16  ;;  %v987_v48 = vshrl.u32 %v524_v34, 16  ;;  %v993_v46 = vshll.u32 %v525_v50, 16  ;;  %v4873_v17 = vsel %vm11767_vm11, %v8690_v44, %v4872_v61 }
 0x16e   :  { %9500 = vmatprep.mubr.bf16.mxu1 %v8462_v30  ;;  %9793 = vmatmul.mubr.bf16.gmra.mrb[12].mxu0 %v8717_v33  ;;  %v4874_v9 = vrot.slane %v4872_v61, 4  ;;  %v12166_v26 = vrot.slane %v2767_v31, %v10979_v24  ;;  %v12169_v21 = vrot.slane %v2755_v13, %v10979_v24  ;;  %v979_v40 = vrot.slane %v977_v23, 4  ;;  %v12179_v13 = vld [vmem:[%s14981_s0 + $0x68] sm:$0xf] }
 0x16f   :  { %v985_v37 = vrot.slane %v983_v45, 5  ;;  %v989_v20 = vrot.slane %v987_v48, 4  ;;  %v995_v34 = vrot.slane %v993_v46, 5  ;;  %v526_v3 = vmul.bf16 %v11118_v47, %v284_v38  ;;  %v2791_v47 = vpop.permute.xlu1 %2790 }
 0x170   :  { %15138 = vst [vmem:[#allocation45_spill] sm:$0xff] %v12166_v26  ;;  %15139 = vst [vmem:[#allocation46_spill] sm:$0xff] %v12169_v21  ;;  %v4876_v52 = vsel %vm11767_vm11, %v4874_v9, %v4875_v25  ;;  %v527_v56 = vmul.bf16 %v11135_v1, %v285_v58  ;;  %v997_v30 = vshrl.u32 %v525_v50, 16  ;;  %v980_v33 = vor.u32 %v979_v40, %v12115_v36  ;;  %v12186_v36 = vld [vmem:[%s14981_s0 + $0x6c] sm:$0xf] }
 0x171   :  { %v8718_v44 = vcombine.low %v4873_v17, %v4876_v52  ;;  %v990_v31 = vor.u32 %v989_v20, %v985_v37  ;;  %v4733_v61 = vmul.bf16 %v12179_v13, %v11238_v41  ;;  %v1003_v45 = vshll.u32 %v526_v3, 16  ;;  %v2779_v52 = vpop.permute.xlu0 %2778 }
 0x172   :  { %v999_v23 = vrot.slane %v997_v30, 4  ;;  %v1007_v48 = vshrl.u32 %v526_v3, 16  ;;  %v1013_v46 = vshll.u32 %v527_v56, 16  ;;  %v981_v1 = vrot.slane %v980_v33, 4 }
 0x173   :  { %9796 = vmatprep.mubr.bf16.mxu0 %v8718_v44  ;;  %v991_v50 = vrot.slane %v990_v31, 4  ;;  %v4734_v38 = vmul.bf16 %v12186_v36, %v11248_v53  ;;  %v4877_v58 = vrot.slane %v4875_v25, 4  ;;  %v1005_v9 = vrot.slane %v1003_v45, 5  ;;  %v286_v25 = vld [vmem:[%s14981_s0 + $0xf8] sm:$0xf] }
 0x174   :  { %v1000_v17 = vor.u32 %v999_v23, %v995_v34  ;;  %v1009_v40 = vrot.slane %v1007_v48, 4  ;;  %v1015_v20 = vrot.slane %v1013_v46, 5  ;;  %v986_v3 = vsel %vm11108_vm5, %v981_v1, %v985_v37  ;;  %v287_v23 = vld [vmem:[%s14981_s0 + $0xfc] sm:$0x1]  ;;  %v12211_v45 = vld [vmem:[%s14981_s0 + $0x70] sm:$0xf] }
 0x175   :  { %v996_v30 = vsel %vm11108_vm5, %v991_v50, %v995_v34  ;;  %v4878_v44 = vrot.slane %v4733_v61, 5  ;;  %v4881_v33 = vrot.slane %v4734_v38, 5  ;;  %v12195_v4 = vrot.slane %v2791_v47, %v10979_v24  ;;  %v12220_v1 = vld [vmem:[%s14981_s0 + $0x74] sm:$0xf] }
 0x176   :  { %v8463_v31 = vcombine.low %v986_v3, %v996_v30  ;;  %v1001_v26 = vrot.slane %v1000_v17, 4  ;;  %v1010_v21 = vor.u32 %v1009_v40, %v1005_v9  ;;  %v12206_v61 = vrot.slane %v2779_v52, %v10979_v24 }
 0x177   :  { %15140 = vst [vmem:[#allocation47_spill] sm:$0xff] %v12195_v4  ;;  %v4879_v37 = vsel %vm11767_vm11, %v4877_v58, %v4878_v44  ;;  %v4880_v34 = vrot.slane %v4878_v44, 4  ;;  %v4735_v48 = vmul.bf16 %v12211_v45, %v11267_v32  ;;  %v4736_v50 = vmul.bf16 %v12220_v1, %v11298_v35  ;;  %v7306_v58 = vpop.permute.xlu1 %7305  ;;  %v7294_v44 = vpop.permute.xlu0 %7293 }
 0x178   :  { %15141 = vst [vmem:[#allocation48_spill] sm:$0xff] %v12206_v61  ;;  %9501 = vmatmul.mubr.bf16.gmra.mrb[40].mxu1 %v8463_v31  ;;  %v1006_v46 = vsel %vm11108_vm5, %v1001_v26, %v1005_v9  ;;  %v1011_v47 = vrot.slane %v1010_v21, 4  ;;  %v4883_v38 = vrot.slane %v4881_v33, 4  ;;  %v528_v52 = vmul.bf16 %v11139_v2, %v286_v25  ;;  %v18_v31 = vld [vmem:[%s14981_s0] sm:$0xf] }
 0x179   :  { %v4882_v17 = vsel %vm11767_vm11, %v4880_v34, %v4881_v33  ;;  %v4884_v40 = vrot.slane %v4735_v48, 5  ;;  %v529_v3 = vmul.bf16 %v11122_v55, %v287_v23  ;;  %v4887_v9 = vrot.slane %v4736_v50, 5 }
 0x17a   :  { %v1016_v26 = vsel %vm11108_vm5, %v1011_v47, %v1015_v20  ;;  %v8719_v21 = vcombine.low %v4879_v37, %v4882_v17  ;;  %v1017_v30 = vshrl.u32 %v527_v56, 16  ;;  %v1023_v48 = vshll.u32 %v528_v52, 16  ;;  %v19_v56 = vld [vmem:[%s14981_s0 + $0x4] sm:$0xf] }
 0x17b   :  { %v8464_v4 = vcombine.low %v1006_v46, %v1016_v26  ;;  %v4885_v33 = vsel %vm11767_vm11, %v4883_v38, %v4884_v40  ;;  %v4886_v34 = vrot.slane %v4884_v40, 4  ;;  %v1027_v55 = vshrl.u32 %v528_v52, 16 }
 0x17c   :  { %9797 = vmatmul.mubr.bf16.gmra.mrb[16].mxu0 %v8719_v21  ;;  %v1019_v2 = vrot.slane %v1017_v30, 4  ;;  %v1033_v25 = vshll.u32 %v529_v3, 16  ;;  %v7314_v23 = vrot.slane %v7306_v58, %v10979_v24  ;;  %v1025_v46 = vrot.slane %v1023_v48, 5  ;;  %v7330_v3 = vpop.permute.xlu1 %7329 }
 0x17d   :  { %9504 = vmatprep.mubr.bf16.mxu1 %v8464_v4  ;;  %v4888_v37 = vsel %vm11767_vm11, %v4886_v34, %v4887_v9  ;;  %v7302_v47 = vrot.slane %v7294_v44, %v10979_v24  ;;  %v170_v50 = vmul.bf16 %v11330_v6, %v18_v31  ;;  %v1029_v40 = vrot.slane %v1027_v55, 4  ;;  %v12251_v4 = vld [vmem:[%s14981_s0 + $0x78] sm:$0xf] }
 0x17e   :  { %v8720_v38 = vcombine.low %v4885_v33, %v4888_v37  ;;  %v1020_v17 = vor.u32 %v1019_v2, %v1015_v20  ;;  %v1035_v52 = vrot.slane %v1033_v25, 5  ;;  %v12243_v26 = vrot.slane %v7314_v23, 7  ;;  %v12258_v20 = vld [vmem:[%s14981_s0 + $0x14] sm:$0xf]  ;;  %v10519_v33 = vld [vmem:[%s14981_s0 + $0x7c] sm:$0x1]  ;;  %v7318_v2 = vpop.permute.xlu0 %7317 }
 0x17f   :  { %v12245_v58 = vrot.slane %v7302_v47, 7  ;;  %v171_v21 = vmul.bf16 %v11322_v29, %v19_v56  ;;  %v4737_v30 = vmul.bf16 %v12251_v4, %v11302_v18  ;;  %v1030_v31 = vor.u32 %v1029_v40, %v1025_v46  ;;  %v4564_v37 = vld [vmem:[%s14981_s0 + $0x88] sm:$0xe] }
 0x180   :  { %15142 = vst [vmem:[#allocation49_spill] sm:$0xff] %v12243_v26  ;;  %9800 = vmatprep.mubr.bf16.mxu0 %v8720_v38  ;;  %v1021_v44 = vrot.slane %v1020_v17, 4  ;;  %v4738_v34 = vmul.bf16 %v10519_v33, %v11294_v59  ;;  %v4889_v48 = vrot.slane %v4887_v9, 4  ;;  %v7399_v55 = vrot.slane %v12243_v26, 4  ;;  %v6049_v26 = vld [vmem:[%s14981_s0 + $0x18] sm:$0xf] }
 0x181   :  { %15143 = vst [vmem:[#allocation50_spill] sm:$0xff] %v12245_v58  ;;  %v8474_v25 = vcombine.low %v170_v50, %v171_v21  ;;  %v4890_v23 = vrot.slane %v4737_v30, 5  ;;  %v7338_v56 = vrot.slane %v7330_v3, %v10979_v24  ;;  %v1031_v38 = vrot.slane %v1030_v31, 4  ;;  %v12281_v30 = vld [vmem:[%s14981_s0 + $0x8c] sm:$0xf] }
 0x182   :  { %v1026_v47 = vsel %vm11108_vm5, %v1021_v44, %v1025_v46  ;;  %v4893_v17 = vrot.slane %v4738_v34, 5  ;;  %v12273_v40 = vmul.bf16 %v11976_v8, %v12258_v20  ;;  %v7326_v3 = vrot.slane %v7318_v2, %v10979_v24  ;;  %v12286_v46 = vld [vmem:[%s14981_s0 + $0x90] sm:$0xf]  ;;  %v21_v2 = vld [vmem:[%s14981_s0 + $0xc] sm:$0xf]  ;;  %v7342_v5 = vpop.permute.xlu0 %7341 }
 0x183   :  { %v4891_v9 = vsel %vm11767_vm11, %v4889_v48, %v4890_v23  ;;  %v4892_v50 = vrot.slane %v4890_v23, 4  ;;  %v7403_v21 = vrot.slane %v7338_v56, 7  ;;  %v1036_v44 = vsel %vm11108_vm5, %v1031_v38, %v1035_v52  ;;  %v20_v48 = vld [vmem:[%s14981_s0 + $0x8] sm:$0xf]  ;;  %v7354_v38 = vpop.permute.xlu1 %7353  ;;  %v22_v8 = vld [vmem:[%s14981_s0 + $0x10] sm:$0xf] }
 0x184   :  { %15144 = vst [vmem:[#allocation51_spill] sm:$0xff] %v12273_v40  ;;  %v4739_v31 = vmul.bf16 %v11184_v15, %v4564_v37  ;;  %v4740_v33 = vmul.bf16 %v11754_v60, %v12281_v30  ;;  %v4741_v34 = vmul.bf16 %v11230_v27, %v12286_v46  ;;  %v8465_v23 = vcombine.low %v1026_v47, %v1036_v44  ;;  %v15147_v44 = vld [vmem:[#allocation13_spill] sm:$0xff] }
 0x185   :  { %v4894_v52 = vsel %vm11767_vm11, %v4892_v50, %v4893_v17  ;;  %v7405_v56 = vrot.slane %v7403_v21, 4  ;;  %v7400_v37 = vrot.slane %v7326_v3, 7  ;;  %v15146_v50 = vld [vmem:[#allocation14_spill] sm:$0xff]  ;;  %v173_v43 = vmul.bf16 %v15147_v44, %v21_v2  ;;  %v12332_v2 = vld [vmem:[%s14981_s0 + $0x98] sm:$0xf] }
 0x186   :  { %v8721_v58 = vcombine.low %v4891_v9, %v4894_v52  ;;  %v8691_v61 = vrot.slane %v4739_v31, 9  ;;  %v4897_v42 = vrot.slane %v4740_v33, 5  ;;  %v4900_v22 = vrot.slane %v4741_v34, 5  ;;  %9505 = vmatmul.mubr.bf16.gmra.mrb[44].mxu1 %v8465_v23  ;;  %v23_v9 = vld [vmem:[%s14981_s0 + $0x14] sm:$0xf] }
 0x187   :  { %v12311_v47 = vsel %vm11215_vm8, %v7399_v55, %v7400_v37  ;;  %v7402_v17 = vrot.slane %v7400_v37, 4  ;;  %v172_v3 = vmul.bf16 %v15146_v50, %v20_v48  ;;  %9524 = vmatprep.mubr.bf16.mxu1 %v8474_v25  ;;  %v7362_v34 = vrot.slane %v7354_v38, %v10979_v24  ;;  %v12327_v48 = vld [vmem:[%s14981_s0 + $0x94] sm:$0xf] }
 0x188   :  { %15145 = vst [vmem:[#allocation52_spill] sm:$0xff] %v12311_v47  ;;  %9801 = vmatmul.mubr.bf16.gmra.mrb[20].mxu0 %v8721_v58  ;;  %v4898_v31 = vsel %vm11767_vm11, %v8691_v61, %v4897_v42  ;;  %v4899_v33 = vrot.slane %v4897_v42, 4  ;;  %v12322_v55 = vmul.bf16 %v12018_v63, %v6049_v26  ;;  %v7350_v61 = vrot.slane %v7342_v5, %v10979_v24  ;;  %v15150_v25 = vld [vmem:[#allocation16_spill] sm:$0xff]  ;;  %v15151_v47 = vld [vmem:[#allocation15_spill] sm:$0xff] }
 0x189   :  { %v12336_v58 = vsel %vm11215_vm8, %v7402_v17, %v7403_v21  ;;  %v8475_v42 = vcombine.low %v172_v3, %v173_v43  ;;  %v174_v23 = vmul.bf16 %v15150_v25, %v22_v8  ;;  %v7409_v38 = vrot.slane %v7362_v34, 7  ;;  %v7378_v34 = vpop.permute.xlu1 %7377 }
 0x18a   :  { %15148 = vst [vmem:[#allocation14_spill] sm:$0xff] %v12322_v55  ;;  %15149 = vst [vmem:[#allocation13_spill] sm:$0xff] %v12336_v58  ;;  %v7430_v52 = vmul.bf16 %v12336_v58, %v12258_v20  ;;  %v4901_v37 = vsel %vm11767_vm11, %v4899_v33, %v4900_v22  ;;  %v175_v63 = vmul.bf16 %v15151_v47, %v23_v9  ;;  %v7406_v49 = vrot.slane %v7350_v61, 7  ;;  %v10462_v61 = vld [vmem:[%s14980_s1 + $0x88] sm:$0xff]  }
 0x18b   :  { %v8722_v54 = vcombine.low %v4898_v31, %v4901_v37  ;;  %v3599_v21 = vmul.bf16 %v11089_v0, %v12327_v48  ;;  %v12349_v43 = vmul.bf16 %v11093_v11, %v12332_v2  ;;  %v7411_v8 = vrot.slane %v7409_v38, 4  ;;  %v7366_v37 = vpop.permute.xlu0 %7365 }
 0x18c   :  { %v12351_v5 = vrot.slane %v7430_v52, 5  ;;  %v8476_v17 = vcombine.low %v174_v23, %v175_v63  ;;  %v4742_v20 = vmul.bf16 %v11238_v41, %v12327_v48  ;;  %v12357_v3 = vsel %vm11215_vm8, %v7405_v56, %v7406_v49 }
 0x18d   :  { %15152 = vst [vmem:[#allocation16_spill] sm:$0xff] %v12349_v43  ;;  %9804 = vmatprep.mubr.bf16.mxu0 %v8722_v54  ;;  %15154 = vst [vmem:[#allocation53_spill] sm:$0xff] %v12357_v3  ;;  %v7408_v9 = vrot.slane %v7406_v49, 4  ;;  %v3905_v31 = vshll.u32 %v3599_v21, 16  ;;  %v3909_v33 = vshrl.u32 %v3599_v21, 16  ;;  %v7431_v52 = vmul.bf16 %v12357_v3, %v6049_v26  ;;  %v15161_v3 = vld [vmem:[#allocation17_spill] sm:$0xff] }
 0x18e   :  { %15153 = vst [vmem:[#allocation15_spill] sm:$0xff] %v12351_v5  ;;  %v3915_v63 = vshll.u32 %v12349_v43, 16  ;;  %v4743_v23 = vmul.bf16 %v11248_v53, %v12332_v2  ;;  %v4902_v54 = vrot.slane %v4900_v22, 4  ;;  %v12369_v49 = vld [vmem:[%s14981_s0 + $0x9c] sm:$0xf]  ;;  %9525 = vmatmul.mubr.bf16.vlgmr.msra.gmra.mrb[0].mxu1 %v8475_v42  ;;  %v4903_v11 = vrot.slane %v4742_v20, 5 }
 0x18f   :  { %v12373_v56 = vsel %vm11215_vm8, %v7408_v9, %v7409_v38  ;;  %v12375_v21 = vrot.slane %v3905_v31, 5  ;;  %v12377_v26 = vrot.slane %v3909_v33, 4  ;;  %v24_v22 = vld [vmem:[%s14981_s0 + $0x18] sm:$0xf]  ;;  %v12382_v0 = vrot.slane %v7431_v52, 5  ;;  %9528 = vmatprep.mubr.bf16.mxu1 %v8476_v17  ;;  %v10520_v42 = vld [vmem:[%s14980_s1 + $0x80] sm:$0xff]  }
 0x190   :  { %15155 = vst [vmem:[#allocation54_spill] sm:$0xff] %v12373_v56  ;;  %9573 = vmatpush3.bf16.msra.mxu1 %v10520_v42  ;;  %v12387_v43 = vrot.slane %v3915_v63, 5  ;;  %v4906_v38 = vrot.slane %v4743_v23, 5  ;;  %v7386_v9 = vrot.slane %v7378_v34, %v10979_v24  ;;  %v25_v20 = vld [vmem:[%s14981_s0 + $0x1c] sm:$0xf]  ;;  %v4904_v31 = vsel %vm11767_vm11, %v4902_v54, %v4903_v11  ;;  %v10464_v23 = vld [vmem:[%s14980_s1 + $0x90] sm:$0xff]  }
 0x191   :  { %15156 = vst [vmem:[#allocation55_spill] sm:$0xff] %v12375_v21  ;;  %15157 = vst [vmem:[#allocation56_spill] sm:$0xff] %v12377_v26  ;;  %v4905_v33 = vrot.slane %v4903_v11, 4  ;;  %v7374_v17 = vrot.slane %v7366_v37, %v10979_v24  ;;  %v12399_v52 = vld [vmem:[%s14981_s0 + $0xa0] sm:$0xf]  ;;  %v4744_v63 = vmul.bf16 %v11267_v32, %v12369_v49  ;;  %9574 = vmatprep.subr.bf16.mxu1 %v10462_v61 }
 0x192   :  { %15158 = vst [vmem:[#allocation57_spill] sm:$0xff] %v12382_v0  ;;  %15159 = vst [vmem:[#allocation58_spill] sm:$0xff] %v12387_v43  ;;  %v26_v34 = vld [vmem:[%s14981_s0 + $0x2c] sm:$0xf]  ;;  %v7415_v11 = vrot.slane %v7386_v9, 7  ;;  %v4745_v24 = vmul.bf16 %v11298_v35, %v12399_v52  ;;  %v4908_v54 = vrot.slane %v4906_v38, 4  ;;  %v177_v58 = vmul.bf16 %v15161_v3, %v25_v20 }
 0x193   :  { %v15160_v37 = vld [vmem:[#allocation18_spill] sm:$0xff]  ;;  %v4907_v43 = vsel %vm11767_vm11, %v4905_v33, %v4906_v38  ;;  %v7412_v26 = vrot.slane %v7374_v17, 7  ;;  %v4909_v21 = vrot.slane %v4744_v63, 5  ;;  %v27_v0 = vld [vmem:[%s14981_s0 + $0x30] sm:$0xf]  ;;  %v178_v55 = vmul.bf16 %v11330_v6, %v26_v34 }
 0x194   :  { %v176_v42 = vmul.bf16 %v15160_v37, %v24_v22  ;;  %v8723_v56 = vcombine.low %v4904_v31, %v4907_v43  ;;  %v12418_v5 = vrot.slane %v7415_v11, 4  ;;  %v4912_v9 = vrot.slane %v4745_v24, 5  ;;  %v4565_v22 = vld [vmem:[%s14981_s0 + $0xb4] sm:$0xe]  ;;  %9575 = vmatpush3.bf16.msra.mxu1 %v10462_v61  ;;  %v12433_v43 = vld [vmem:[%s14981_s0 + $0xa4] sm:$0xf] }
 0x195   :  { %v12426_v38 = vsel %vm11215_vm8, %v7411_v8, %v7412_v26  ;;  %v7414_v20 = vrot.slane %v7412_v26, 4  ;;  %v4910_v33 = vsel %vm11767_vm11, %v4908_v54, %v4909_v21  ;;  %v4911_v17 = vrot.slane %v4909_v21, 4  ;;  %v3365_v31 = vld [vmem:[%s14981_s0 + $0xa8] sm:$0x1]  ;;  %9576 = vmatprep.subr.bf16.mxu1 %v10464_v23  ;;  %v12445_v21 = vld [vmem:[%s14981_s0 + $0xb8] sm:$0xf] }
 0x196   :  { %15162 = vst [vmem:[#allocation18_spill] sm:$0xff] %v12418_v5  ;;  %15163 = vst [vmem:[#allocation17_spill] sm:$0xff] %v12426_v38  ;;  %9805 = vmatmul.mubr.bf16.gmra.mrb[24].mxu0 %v8723_v56  ;;  %v8477_v61 = vcombine.low %v176_v42, %v177_v58  ;;  %v179_v8 = vmul.bf16 %v11322_v29, %v27_v0  ;;  %v4746_v26 = vmul.bf16 %v11302_v18, %v12433_v43  ;;  %v28_v34 = vld [vmem:[%s14981_s0 + $0x34] sm:$0xf]  ;;  %v29_v54 = vld [vmem:[%s14981_s0 + $0x38] sm:$0xf] }
 0x197   :  { %v4747_v63 = vmul.bf16 %v11294_v59, %v3365_v31  ;;  %15164 = vst [vmem:[#allocation59_spill] sm:$0xff] %v12445_v21  ;;  %v12452_v56 = vsel %vm11215_vm8, %v7414_v20, %v7415_v11  ;;  %v4913_v0 = vsel %vm11767_vm11, %v4911_v17, %v4912_v9  ;;  %v4914_v58 = vrot.slane %v4912_v9, 4  ;;  %v30_v42 = vld [vmem:[%s14981_s0 + $0x3c] sm:$0xf] }
 0x198   :  { %15165 = vst [vmem:[#allocation60_spill] sm:$0xff] %v12452_v56  ;;  %v4748_v24 = vmul.bf16 %v11184_v15, %v4565_v22  ;;  %v10466_v31 = vld [vmem:[%s14980_s1 + $0x98] sm:$0xff]   ;;  %v8724_v11 = vcombine.low %v4910_v33, %v4913_v0  ;;  %9529 = vmatmul.mubr.bf16.gmra.mrb[4].mxu1 %v8477_v61  ;;  %v8478_v20 = vcombine.low %v178_v55, %v179_v8  ;;  %v4915_v5 = vrot.slane %v4746_v26, 5  ;;  %v31_v22 = vld [vmem:[%s14981_s0 + $0x40] sm:$0xf] }
 0x199   :  { %v4918_v17 = vrot.slane %v4747_v63, 5  ;;  %v12469_v9 = vld [vmem:[%s14981_s0 + $0xbc] sm:$0xf]  ;;  %v4749_v56 = vmul.bf16 %v11754_v60, %v12445_v21  ;;  %v180_v55 = vmul.bf16 %v15146_v50, %v28_v34  ;;  %9577 = vmatpush3.bf16.msra.mxu1 %v10464_v23  ;;  %v181_v26 = vmul.bf16 %v15147_v44, %v29_v54  ;;  %v12486_v0 = vld [vmem:[%s14981_s0 + $0xc0] sm:$0xf] }
 0x19a   :  { %15166 = vst [vmem:[#allocation61_spill] sm:$0xff] %v12469_v9  ;;  %v4750_v38 = vmul.bf16 %v11230_v27, %v12469_v9  ;;  %v8692_v33 = vrot.slane %v4748_v24, 9  ;;  %9808 = vmatprep.mubr.bf16.mxu0 %v8724_v11  ;;  %9532 = vmatprep.mubr.bf16.mxu1 %v8478_v20  ;;  %v4916_v61 = vsel %vm11767_vm11, %v4914_v58, %v4915_v5  ;;  %v4917_v8 = vrot.slane %v4915_v5, 4  ;;  %v10468_v34 = vld [vmem:[%s14980_s1 + $0xa0] sm:$0xff]   ;;  %v12502_v54 = vld [vmem:[%s14981_s0 + $0xc8] sm:$0xf] }
 0x19b   :  { %v182_v63 = vmul.bf16 %v15150_v25, %v30_v42  ;;  %15167 = vst [vmem:[#allocation62_spill] sm:$0xff] %v12486_v0  ;;  %v4922_v23 = vrot.slane %v4749_v56, 5  ;;  %v183_v11 = vmul.bf16 %v15151_v47, %v31_v22  ;;  %v12495_v5 = vld [vmem:[%s14981_s0 + $0xc4] sm:$0xf]  ;;  %v4751_v58 = vmul.bf16 %v11238_v41, %v12486_v0  ;;  %15169 = vst [vmem:[#allocation64_spill] sm:$0xff] %v12502_v54 }
 0x19c   :  { %v4925_v24 = vrot.slane %v4750_v38, 5  ;;  %15168 = vst [vmem:[#allocation63_spill] sm:$0xff] %v12495_v5  ;;  %9578 = vmatprep.subr.bf16.mxu1 %v10466_v31  ;;  %v4919_v56 = vsel %vm11767_vm11, %v4917_v8, %v4918_v17  ;;  %v8479_v38 = vcombine.low %v180_v55, %v181_v26  ;;  %v4752_v42 = vmul.bf16 %v11248_v53, %v12495_v5  ;;  %v32_v22 = vld [vmem:[%s14981_s0 + $0x44] sm:$0xf]  ;;  %v12521_v8 = vld [vmem:[%s14981_s0 + $0xcc] sm:$0xf] }
 0x19d   :  { %v4753_v20 = vmul.bf16 %v11267_v32, %v12502_v54  ;;  %v8725_v0 = vcombine.low %v4916_v61, %v4919_v56  ;;  %v4923_v40 = vsel %vm11767_vm11, %v8692_v33, %v4922_v23  ;;  %v4924_v17 = vrot.slane %v4922_v23, 4  ;;  %15170 = vst [vmem:[#allocation65_spill] sm:$0xff] %v12521_v8  ;;  %9579 = vmatpush3.bf16.msra.mxu1 %v10466_v31  ;;  %v34_v61 = vld [vmem:[%s14981_s0 + $0x58] sm:$0xf] }
 0x19e   :  { %v8480_v55 = vcombine.low %v182_v63, %v183_v11  ;;  %v4927_v26 = vrot.slane %v4925_v24, 4  ;;  %v4928_v54 = vrot.slane %v4751_v58, 5  ;;  %v4931_v5 = vrot.slane %v4752_v42, 5  ;;  %9580 = vmatprep.subr.bf16.mxu1 %v10468_v34  ;;  %v35_v11 = vld [vmem:[%s14981_s0 + $0x5c] sm:$0xf]  ;;  %v10470_v58 = vld [vmem:[%s14980_s1 + $0xa8] sm:$0xff]  }
 0x19f   :  { %v4754_v9 = vmul.bf16 %v11298_v35, %v12521_v8  ;;  %9809 = vmatmul.mubr.bf16.gmra.mrb[28].mxu0 %v8725_v0  ;;  %v4926_v33 = vsel %vm11767_vm11, %v4924_v17, %v4925_v24  ;;  %v4934_v63 = vrot.slane %v4753_v20, 5  ;;  %v184_v23 = vmul.bf16 %v15160_v37, %v32_v22  ;;  %v12544_v8 = vld [vmem:[%s14981_s0 + $0xd0] sm:$0xf] }
 0x1a0   :  { %v185_v31 = vmul.bf16 %v15161_v3, %v33_v39  ;;  %v8726_v56 = vcombine.low %v4923_v40, %v4926_v33  ;;  %9533 = vmatmul.mubr.bf16.gmra.mrb[8].mxu1 %v8479_v38  ;;  %v4929_v0 = vsel %vm11767_vm11, %v4927_v26, %v4928_v54  ;;  %v4930_v42 = vrot.slane %v4928_v54, 4  ;;  %15171 = vst [vmem:[#allocation66_spill] sm:$0xff] %v12544_v8  ;;  %v4566_v40 = vld [vmem:[%s14981_s0 + $0xe0] sm:$0xe] }
 0x1a1   :  { %v4933_v24 = vrot.slane %v4931_v5, 4  ;;  %9536 = vmatprep.mubr.bf16.mxu1 %v8480_v55  ;;  %v4936_v20 = vrot.slane %v4934_v63, 4  ;;  %v4937_v22 = vrot.slane %v4754_v9, 5  ;;  %v186_v39 = vmul.bf16 %v11330_v6, %v34_v61  ;;  %9581 = vmatpush3.bf16.msra.mxu1 %v10468_v34  ;;  %v3374_v55 = vld [vmem:[%s14981_s0 + $0xd4] sm:$0x1] }
 0x1a2   :  { %v8481_v17 = vcombine.low %v184_v23, %v185_v31  ;;  %9812 = vmatprep.mubr.bf16.mxu0 %v8726_v56  ;;  %v4932_v54 = vsel %vm11767_vm11, %v4930_v42, %v4931_v5  ;;  %v187_v38 = vmul.bf16 %v11322_v29, %v35_v11  ;;  %v4755_v26 = vmul.bf16 %v11302_v18, %v12544_v8  ;;  %v12562_v34 = vld [vmem:[%s14981_s0 + $0xe4] sm:$0xf]  ;;  %v36_v5 = vld [vmem:[%s14981_s0 + $0x60] sm:$0xf]  ;;  %v10472_v61 = vld [vmem:[%s14980_s1 + $0xb0] sm:$0xff]  }
 0x1a3   :  { %v4935_v9 = vsel %vm11767_vm11, %v4933_v24, %v4934_v63  ;;  %15172 = vst [vmem:[#allocation67_spill] sm:$0xff] %v12562_v34  ;;  %v8727_v33 = vcombine.low %v4929_v0, %v4932_v54  ;;  %v4938_v63 = vsel %vm11767_vm11, %v4936_v20, %v4937_v22  ;;  %v4756_v23 = vmul.bf16 %v11294_v59, %v3374_v55  ;;  %v12576_v11 = vld [vmem:[%s14981_s0 + $0xe8] sm:$0xf]  ;;  %v37_v56 = vld [vmem:[%s14981_s0 + $0x64] sm:$0xf] }
 0x1a4   :  { %v4939_v31 = vrot.slane %v4937_v22, 4  ;;  %15173 = vst [vmem:[#allocation68_spill] sm:$0xff] %v12576_v11  ;;  %9582 = vmatprep.subr.bf16.mxu1 %v10470_v58  ;;  %v8728_v42 = vcombine.low %v4935_v9, %v4938_v63  ;;  %v8482_v24 = vcombine.low %v186_v39, %v187_v38  ;;  %v4940_v8 = vrot.slane %v4755_v26, 5  ;;  %v38_v20 = vld [vmem:[%s14981_s0 + $0x68] sm:$0xf]  ;;  %v10474_v26 = vld [vmem:[%s14980_s1 + $0xb8] sm:$0xff]  }
 0x1a5   :  { %v4757_v0 = vmul.bf16 %v11184_v15, %v4566_v40  ;;  %v39_v22 = vld [vmem:[%s14981_s0 + $0x6c] sm:$0xf]  ;;  %v4943_v54 = vrot.slane %v4756_v23, 5  ;;  %v4758_v55 = vmul.bf16 %v11754_v60, %v12562_v34  ;;  %v4759_v21 = vmul.bf16 %v11230_v27, %v12576_v11  ;;  %9583 = vmatpush3.bf16.msra.mxu1 %v10470_v58  ;;  %v60_v34 = vld [vmem:[%s14981_s0 + $0xe4] sm:$0xf] }
 0x1a6   :  { %v188_v39 = vmul.bf16 %v15146_v50, %v36_v5  ;;  %v4941_v15 = vsel %vm11767_vm11, %v4939_v31, %v4940_v8  ;;  %v4942_v40 = vrot.slane %v4940_v8, 4  ;;  %v189_v38 = vmul.bf16 %v15147_v44, %v37_v56  ;;  %9584 = vmatprep.subr.bf16.mxu1 %v10472_v61  ;;  %v12604_v58 = vld [vmem:[%s14981_s0 + $0xec] sm:$0xf]  ;;  %v12609_v8 = vld [vmem:[%s14981_s0 + $0xf0] sm:$0xf] }
 0x1a7   :  { %v8693_v9 = vrot.slane %v4757_v0, 9  ;;  %9813 = vmatmul.mubr.bf16.gmra.mrb[32].mxu0 %v8727_v33  ;;  %v4947_v60 = vrot.slane %v4758_v55, 5  ;;  %v4950_v63 = vrot.slane %v4759_v21, 5  ;;  %v190_v27 = vmul.bf16 %v15150_v25, %v38_v20  ;;  %15174 = vst [vmem:[#allocation69_spill] sm:$0xff] %v12604_v58  ;;  %15175 = vst [vmem:[#allocation70_spill] sm:$0xff] %v12609_v8 }
 0x1a8   :  { %v191_v5 = vmul.bf16 %v15151_v47, %v39_v22  ;;  %9816 = vmatprep.mubr.bf16.mxu0 %v8728_v42  ;;  %9537 = vmatmul.mubr.bf16.gmra.mrb[12].mxu1 %v8481_v17  ;;  %v4944_v33 = vsel %vm11767_vm11, %v4942_v40, %v4943_v54  ;;  %v8483_v21 = vcombine.low %v188_v39, %v189_v38  ;;  %v40_v31 = vld [vmem:[%s14981_s0 + $0x70] sm:$0xf]  ;;  %v41_v56 = vld [vmem:[%s14981_s0 + $0x74] sm:$0xf]  ;;  %v12632_v54 = vld [vmem:[%s14981_s0 + $0xf8] sm:$0xf] }
 0x1a9   :  { %v4760_v23 = vmul.bf16 %v11238_v41, %v12604_v58  ;;  %9540 = vmatprep.mubr.bf16.mxu1 %v8482_v24  ;;  %v8729_v42 = vcombine.low %v4941_v15, %v4944_v33  ;;  %v4948_v17 = vsel %vm11767_vm11, %v8693_v9, %v4947_v60  ;;  %v4949_v20 = vrot.slane %v4947_v60, 4  ;;  %v12627_v41 = vld [vmem:[%s14981_s0 + $0xf4] sm:$0xf]  ;;  %15177 = vst [vmem:[#allocation72_spill] sm:$0xff] %v12632_v54  ;;  %v42_v40 = vld [vmem:[%s14981_s0 + $0x84] sm:$0xf] }
 0x1aa   :  { %v8484_v22 = vcombine.low %v190_v27, %v191_v5  ;;  %15176 = vst [vmem:[#allocation71_spill] sm:$0xff] %v12627_v41  ;;  %9585 = vmatpush3.bf16.msra.mxu1 %v10472_v61  ;;  %v4761_v24 = vmul.bf16 %v11248_v53, %v12609_v8  ;;  %v4952_v55 = vrot.slane %v4950_v63, 4  ;;  %v4762_v15 = vmul.bf16 %v11267_v32, %v12627_v41  ;;  %v12644_v9 = vld [vmem:[%s14980_s1 + $0xc0] sm:$0xff]   ;;  %v43_v60 = vld [vmem:[%s14981_s0 + $0x88] sm:$0xf] }
 0x1ab   :  { %v4953_v39 = vrot.slane %v4760_v23, 5  ;;  %9586 = vmatprep.subr.bf16.mxu1 %v10474_v26  ;;  %15178 = vst [vmem:[#allocation73_spill] sm:$0xff] %v12644_v9  ;;  %v4951_v61 = vsel %vm11767_vm11, %v4949_v20, %v4950_v63  ;;  %v4763_v53 = vmul.bf16 %v11298_v35, %v12632_v54  ;;  %v192_v38 = vmul.bf16 %v15160_v37, %v40_v31  ;;  %v12665_v31 = vld [vmem:[%s14981_s0 + $0xfc] sm:$0xf] }
 0x1ac   :  { %v193_v32 = vmul.bf16 %v15161_v3, %v41_v56  ;;  %v8730_v27 = vcombine.low %v4948_v17, %v4951_v61  ;;  %v4956_v23 = vrot.slane %v4761_v24, 5  ;;  %v4959_v0 = vrot.slane %v4762_v15, 5  ;;  %15179 = vst [vmem:[#allocation74_spill] sm:$0xff] %v12665_v31  ;;  %v3383_v24 = vld [vmem:[%s14981_s0 + $0x100] sm:$0x1] }
 0x1ad   :  { %v12657_v5 = vsel %vm11767_vm11, %v4952_v55, %v4953_v39  ;;  %v4955_v33 = vrot.slane %v4953_v39, 4  ;;  %v4962_v63 = vrot.slane %v4763_v53, 5  ;;  %v194_v35 = vmul.bf16 %v11330_v6, %v42_v40  ;;  %v44_v15 = vld [vmem:[%s14981_s0 + $0x8c] sm:$0xf] }
 0x1ae   :  { %v12659_v20 = vcombine.low %v192_v38, %v193_v32  ;;  %9587 = vmatpush3.bf16.msra.mxu1 %v10474_v26  ;;  %v4958_v17 = vrot.slane %v4956_v23, 4  ;;  %v195_v55 = vmul.bf16 %v11322_v29, %v43_v60  ;;  %v4764_v39 = vmul.bf16 %v11302_v18, %v12665_v31  ;;  %v45_v38 = vld [vmem:[%s14981_s0 + $0x90] sm:$0xf] }
 0x1af   :  { %v4957_v56 = vsel %vm11767_vm11, %v4955_v33, %v4956_v23  ;;  %9636 = vmatprep.subr.bf16.mxu1 %v12644_v9  ;;  %9817 = vmatmul.mubr.bf16.gmra.mrb[36].mxu0 %v8729_v42  ;;  %v4961_v40 = vrot.slane %v4959_v0, 4  ;;  %v4765_v61 = vmul.bf16 %v11294_v59, %v3383_v24  ;;  %v4964_v53 = vrot.slane %v4962_v63, 4  ;;  %v10521_v42 = vld [vmem:[%s14981_s0 + $0x8] sm:$0xf]  ;;  %v46_v59 = vld [vmem:[%s14981_s0 + $0x94] sm:$0xf] }
 0x1b0   :  { %v8731_v26 = vcombine.low %v12657_v5, %v4957_v56  ;;  %9820 = vmatprep.mubr.bf16.mxu0 %v8730_v27  ;;  %9541 = vmatmul.mubr.bf16.gmra.mrb[16].mxu1 %v8483_v21  ;;  %v4960_v18 = vsel %vm11767_vm11, %v4958_v17, %v4959_v0  ;;  %v8486_v32 = vcombine.low %v194_v35, %v195_v55  ;;  %v4965_v60 = vrot.slane %v4764_v39, 5  ;;  %v15180_v5 = vld [vmem:[#allocation20_spill] sm:$0xff]  ;;  %v47_v27 = vld [vmem:[%s14981_s0 + $0x98] sm:$0xf]  ;;  %v10522_v23 = vld [vmem:[%s14981_s0 + $0xc] sm:$0xf] }
 0x1b1   :  { %v5515_v33 = vmul.bf16 %v10521_v42, %v15180_v5  ;;  %9544 = vmatprep.mubr.bf16.mxu1 %v8484_v22  ;;  %v4963_v21 = vsel %vm11767_vm11, %v4961_v40, %v4962_v63  ;;  %v4968_v0 = vrot.slane %v4765_v61, 5  ;;  %v15181_v35 = vld [vmem:[#allocation19_spill] sm:$0xff]  ;;  %v196_v17 = vmul.bf16 %v15146_v50, %v44_v15  ;;  %v48_v63 = vld [vmem:[%s14981_s0 + $0x9c] sm:$0xf]  ;;  %v10523_v15 = vld [vmem:[%s14981_s0 + $0x10] sm:$0xf] }
 0x1b2   :  { %v5516_v56 = vmul.bf16 %v10522_v23, %v15181_v35  ;;  %v8732_v55 = vcombine.low %v4960_v18, %v4963_v21  ;;  %v12705_v24 = vsel %vm11767_vm11, %v4964_v53, %v4965_v60  ;;  %v4967_v39 = vrot.slane %v4965_v60, 4  ;;  %v50_v18 = vld [vmem:[%s14981_s0 + $0xb0] sm:$0xf]  ;;  %v51_v60 = vld [vmem:[%s14981_s0 + $0xb4] sm:$0xf] }
 0x1b3   :  { %v197_v22 = vmul.bf16 %v15147_v44, %v45_v38  ;;  %v198_v61 = vmul.bf16 %v15150_v25, %v46_v59  ;;  %v199_v42 = vmul.bf16 %v15151_v47, %v47_v27  ;;  %v5517_v53 = vmul.bf16 %v10523_v15, %v11554_v14  ;;  %v49_v38 = vld [vmem:[%s14981_s0 + $0xa0] sm:$0xf]  ;;  %v10524_v27 = vld [vmem:[%s14981_s0 + $0x14] sm:$0xf]  ;;  %v10525_v23 = vld [vmem:[%s14981_s0 + $0x18] sm:$0xf] }
 0x1b4   :  { %v12711_v40 = vcombine.low %v5515_v33, %v5516_v56  ;;  %v12730_v33 = vsel %vm11767_vm11, %v4967_v39, %v4968_v0  ;;  %v5518_v21 = vmul.bf16 %v10524_v27, %v11548_v16  ;;  %v5519_v56 = vmul.bf16 %v10525_v23, %v11596_v19  ;;  %v5404_v15 = vld [vmem:[%s14981_s0 + $0x24] sm:$0xf]  ;;  %v10526_v39 = vld [vmem:[%s14981_s0 + $0x1c] sm:$0xf]  ;;  %v10528_v0 = vld [vmem:[%s14981_s0 + $0x34] sm:$0xf] }
 0x1b5   :  { %v12732_v59 = vcombine.low %v196_v17, %v197_v22  ;;  %v12747_v17 = vcombine.low %v198_v61, %v199_v42  ;;  %v15182_v22 = vld [vmem:[#allocation21_spill] sm:$0xff]  ;;  %v200_v9 = vmul.bf16 %v15160_v37, %v48_v63  ;;  %v201_v23 = vmul.bf16 %v15161_v3, %v49_v38  ;;  %v54_v63 = vld [vmem:[%s14981_s0 + $0xc0] sm:$0xf] }
 0x1b6   :  { %v5520_v27 = vmul.bf16 %v10526_v39, %v15182_v22  ;;  %v12754_v31 = vcombine.low %v5517_v53, %v5518_v21  ;;  %v202_v54 = vmul.bf16 %v11330_v6, %v50_v18  ;;  %v203_v41 = vmul.bf16 %v11322_v29, %v51_v60  ;;  %v52_v61 = vld [vmem:[%s14981_s0 + $0xb8] sm:$0xf]  ;;  %v53_v42 = vld [vmem:[%s14981_s0 + $0xbc] sm:$0xf]  ;;  %v10527_v38 = vld [vmem:[%s14981_s0 + $0x20] sm:$0xf] }
 0x1b7   :  { %9821 = vmatmul.mubr.bf16.gmra.mrb[40].mxu0 %v8731_v26  ;;  %v15183_v18 = vld [vmem:[#allocation23_spill] sm:$0xff]  ;;  %v15184_v21 = vld [vmem:[#allocation22_spill] sm:$0xff]  ;;  %v5523_v8 = vmul.bf16 %v10528_v0, %v15180_v5 }
 0x1b8   :  { %v12768_v53 = vcombine.low %v5519_v56, %v5520_v27  ;;  %v5521_v60 = vmul.bf16 %v10527_v38, %v15183_v18  ;;  %v5522_v39 = vmul.bf16 %v15184_v21, %v5404_v15  ;;  %v55_v26 = vld [vmem:[%s14981_s0 + $0xc4] sm:$0xf]  ;;  %9824 = vmatprep.mubr.bf16.mxu0 %v8732_v55  ;;  %9545 = vmatmul.mubr.bf16.gmra.mrb[20].mxu1 %v12659_v20  ;;  %v10529_v15 = vld [vmem:[%s14981_s0 + $0x38] sm:$0xf]  ;;  %v56_v0 = vld [vmem:[%s14981_s0 + $0xc8] sm:$0xf] }
 0x1b9   :  { %v12783_v56 = vcombine.low %v200_v9, %v201_v23  ;;  %v12785_v27 = vcombine.low %v202_v54, %v203_v41  ;;  %v5524_v38 = vmul.bf16 %v10529_v15, %v15181_v35  ;;  %9548 = vmatprep.mubr.bf16.mxu1 %v8486_v32  ;;  %v204_v9 = vmul.bf16 %v15146_v50, %v52_v61  ;;  %v57_v20 = vld [vmem:[%s14981_s0 + $0xcc] sm:$0xf]  ;;  %v58_v23 = vld [vmem:[%s14981_s0 + $0xdc] sm:$0xf] }
 0x1ba   :  { %v12795_v55 = vcombine.low %v5521_v60, %v5522_v39  ;;  %v205_v41 = vmul.bf16 %v15147_v44, %v53_v42  ;;  %v206_v54 = vmul.bf16 %v15150_v25, %v54_v63  ;;  %v207_v32 = vmul.bf16 %v15151_v47, %v55_v26  ;;  %v10530_v61 = vld [vmem:[%s14981_s0 + $0x3c] sm:$0xf]  ;;  %v10531_v63 = vld [vmem:[%s14981_s0 + $0x40] sm:$0xf] }
 0x1bb   :  { %v12806_v15 = vcombine.low %v5523_v8, %v5524_v38  ;;  %v5525_v42 = vmul.bf16 %v10530_v61, %v11554_v14  ;;  %v5526_v60 = vmul.bf16 %v10531_v63, %v11548_v16  ;;  %v59_v39 = vld [vmem:[%s14981_s0 + $0xe0] sm:$0xf]  ;;  %v5405_v8 = vld [vmem:[%s14981_s0 + $0x50] sm:$0xf]  ;;  %v10532_v38 = vld [vmem:[%s14981_s0 + $0x44] sm:$0xf]  ;;  %v208_v11 = vmul.bf16 %v15160_v37, %v56_v0 }
 0x1bc   :  { %15185 = vst [vmem:[#allocation20_spill] sm:$0xff] %v12795_v55  ;;  %v12823_v26 = vcombine.low %v204_v9, %v205_v41  ;;  %v5527_v61 = vmul.bf16 %v10532_v38, %v11596_v19  ;;  %v10533_v63 = vld [vmem:[%s14981_s0 + $0x48] sm:$0xf]  ;;  %v12837_v9 = vcombine.low %v206_v54, %v207_v32  ;;  %v210_v38 = vmul.bf16 %v11330_v6, %v58_v23  ;;  %v62_v0 = vld [vmem:[%s14981_s0 + $0xec] sm:$0xf] }
 0x1bd   :  { %15186 = vst [vmem:[#allocation19_spill] sm:$0xff] %v12806_v15  ;;  %v5528_v58 = vmul.bf16 %v10533_v63, %v15182_v22  ;;  %v12839_v41 = vcombine.low %v5525_v42, %v5526_v60  ;;  %v61_v15 = vld [vmem:[%s14981_s0 + $0xe8] sm:$0xf]  ;;  %v211_v55 = vmul.bf16 %v11322_v29, %v59_v39  ;;  %v10534_v54 = vld [vmem:[%s14981_s0 + $0x4c] sm:$0xf]  ;;  %v5530_v6 = vmul.bf16 %v15184_v21, %v5405_v8 }
 0x1be   :  { %15187 = vst [vmem:[#allocation21_spill] sm:$0xff] %v12823_v26  ;;  %v209_v26 = vmul.bf16 %v15161_v3, %v57_v20  ;;  %v5529_v20 = vmul.bf16 %v10534_v54, %v15183_v18  ;;  %v63_v23 = vld [vmem:[%s14981_s0 + $0xf0] sm:$0xf]  ;;  %v5532_v29 = vmul.bf16 %v12143_v57, %v15181_v35  ;;  %v212_v42 = vmul.bf16 %v15146_v50, %v60_v34  ;;  %v65_v57 = vld [vmem:[%s14981_s0 + $0xf8] sm:$0xf] }
 0x1bf   :  { %v12849_v63 = vcombine.low %v5527_v61, %v5528_v58  ;;  %v5531_v58 = vmul.bf16 %v12136_v12, %v15180_v5  ;;  %v15188_v60 = vcombine.low %v12705_v24, %v12730_v33  ;;  %v12870_v39 = vcombine.low %v210_v38, %v211_v55  ;;  %v64_v12 = vld [vmem:[%s14981_s0 + $0xf4] sm:$0xf]  ;;  %v10535_v54 = vld [vmem:[%s14981_s0 + $0x4] sm:$0xf] }
 0x1c0   :  { %v12860_v32 = vcombine.low %v208_v11, %v209_v26  ;;  %v12872_v8 = vcombine.low %v5529_v20, %v5530_v6  ;;  %v213_v61 = vmul.bf16 %v15147_v44, %v61_v15  ;;  %v214_v11 = vmul.bf16 %v15150_v25, %v62_v0  ;;  %9549 = vmatmul.mubr.bf16.gmra.mrb[24].mxu1 %v12732_v59  ;;  %v1840_v25 = vld [vmem:[%s14981_s0] sm:$0xe]  ;;  %v15189_v26 = vld [vmem:[#allocation24_spill] sm:$0xff]  ;;  %v10536_v20 = vld [vmem:[%s14981_s0 + $0x8] sm:$0xf] }
 0x1c1   :  { %9825 = vmatmul.mubr.bf16.gmra.mrb[44].mxu0 %v15188_v60  ;;  %v12884_v50 = vcombine.low %v5531_v58, %v5532_v29  ;;  %v215_v34 = vmul.bf16 %v15151_v47, %v63_v23  ;;  %v5533_v44 = vmul.bf16 %v12179_v13, %v11554_v14  ;;  %v2118_v24 = vrot.slane %v11819_v51, 4  ;;  %9552 = vmatprep.mubr.bf16.mxu1 %v12747_v17  ;;  %v5406_v13 = vld [vmem:[%s14981_s0 + $0x7c] sm:$0xf] }
 0x1c2   :  { %9844 = vmatprep.mubr.bf16.mxu0 %v12711_v40  ;;  %v12894_v33 = vcombine.low %v212_v42, %v213_v61  ;;  %v5534_v40 = vmul.bf16 %v12186_v36, %v11548_v16  ;;  %v5535_v59 = vmul.bf16 %v12211_v45, %v11596_v19  ;;  %v5536_v47 = vmul.bf16 %v12220_v1, %v15182_v22  ;;  %v15191_v6 = vld [vmem:[#allocation25_spill] sm:$0xff]  ;;  %v10471_v42 = vld [vmem:[%s14980_s1 + $0x1c8] sm:$0xff]  }
 0x1c3   :  { %v12905_v55 = vcombine.low %v214_v11, %v215_v34  ;;  %v216_v15 = vmul.bf16 %v15160_v37, %v64_v12  ;;  %v217_v17 = vmul.bf16 %v15161_v3, %v65_v57  ;;  %v15190_v38 = vrot.slane %v11688_v28, 4 }
 0x1c4   :  { %v12916_v45 = vcombine.low %v5533_v44, %v5534_v40  ;;  %v12918_v1 = vcombine.low %v5535_v59, %v5536_v47  ;;  %v1994_v0 = vmul.bf16 %v11688_v28, %v1840_v25  ;;  %v1996_v23 = vmul.bf16 %v10536_v20, %v15191_v6  ;;  %v10537_v25 = vld [vmem:[%s14981_s0 + $0x14] sm:$0xf] }
 0x1c5   :  { %v12914_v36 = vsel %vm11215_vm8, %v15190_v38, %v15189_v26  ;;  %v12925_v3 = vcombine.low %v216_v15, %v217_v17  ;;  %v5537_v58 = vmul.bf16 %v12251_v4, %v15183_v18  ;;  %v5538_v29 = vmul.bf16 %v15184_v21, %v5406_v13  ;;  %v15193_v40 = vld [vmem:[#allocation28_spill] sm:$0xff]  ;;  %v10538_v13 = vld [vmem:[%s14981_s0 + $0x18] sm:$0xf]  ;;  %v10539_v17 = vld [vmem:[%s14980_s1 + $0x1c0] sm:$0xff]  }
 0x1c6   :  { %v1995_v37 = vmul.bf16 %v10535_v54, %v12914_v36  ;;  %v8514_v60 = vrot.slane %v1994_v0, 9  ;;  %v5539_v11 = vmul.bf16 %v15180_v5, %v12281_v30  ;;  %v5540_v12 = vmul.bf16 %v15181_v35, %v12286_v46  ;;  %v10473_v54 = vld [vmem:[%s14980_s1 + $0x1d0] sm:$0xff]  }
 0x1c7   :  { %v2110_v57 = vrot.slane %v1996_v23, 5  ;;  %v12941_v34 = vcombine.low %v5537_v58, %v5538_v29  ;;  %v15192_v4 = vrot.slane %v11772_v62, 4  ;;  %v1999_v59 = vmul.bf16 %v10537_v25, %v15193_v40 }
 0x1c8   :  { %v2107_v61 = vrot.slane %v1995_v37, 5  ;;  %v12957_v47 = vcombine.low %v5539_v11, %v5540_v12  ;;  %v5541_v38 = vmul.bf16 %v11554_v14, %v12327_v48  ;;  %v5542_v0 = vmul.bf16 %v11548_v16, %v12332_v2  ;;  %9553 = vmatmul.mubr.bf16.gmra.mrb[28].mxu1 %v12783_v56  ;;  %v1841_v2 = vld [vmem:[%s14981_s0 + $0x2c] sm:$0xe]  ;;  %v10541_v12 = vld [vmem:[%s14981_s0 + $0x20] sm:$0x1] }
 0x1c9   :  { %v12948_v44 = vsel %vm11767_vm11, %v15192_v4, %v11819_v51  ;;  %9845 = vmatmul.mubr.bf16.vlgmr.msra.gmra.mrb[0].mxu0 %v12754_v31  ;;  %v15194_v51 = vld [vmem:[#allocation30_spill] sm:$0xff]  ;;  %v2112_v31 = vrot.slane %v2110_v57, 4  ;;  %v2119_v26 = vrot.slane %v1999_v59, 5  ;;  %v5544_v48 = vmul.bf16 %v15182_v22, %v12399_v52  ;;  %9556 = vmatprep.mubr.bf16.mxu1 %v12785_v27  ;;  %v10540_v27 = vld [vmem:[%s14981_s0 + $0x1c] sm:$0xf]  ;;  %v15208_v52 = vld [vmem:[#allocation64_spill] sm:$0xff] }
 0x1ca   :  { %v2108_v30 = vsel %vm11767_vm11, %v8514_v60, %v2107_v61  ;;  %v2109_v46 = vrot.slane %v2107_v61, 4  ;;  %v2000_v15 = vmul.bf16 %v10538_v13, %v15194_v51  ;;  %9893 = vmatpush3.bf16.msra.mxu0 %v10539_v17  ;;  %9848 = vmatprep.mubr.bf16.mxu0 %v12768_v53  ;;  %v5543_v53 = vmul.bf16 %v11596_v19, %v12369_v49  ;;  %v15195_v61 = vld [vmem:[#allocation31_spill] sm:$0xff]  ;;  %v10542_v13 = vld [vmem:[%s14981_s0 + $0x30] sm:$0xf]  ;;  %v10543_v17 = vld [vmem:[%s14981_s0 + $0x34] sm:$0xf] }
 0x1cb   :  { %9894 = vmatprep.subr.bf16.mxu0 %v10471_v42  ;;  %v12990_v23 = vsel %vm11767_vm11, %v2112_v31, %v11772_v62  ;;  %v12994_v58 = vsel %vm11767_vm11, %v2118_v24, %v2119_v26  ;;  %v2121_v49 = vrot.slane %v2119_v26, 4  ;;  %v12998_v29 = vcombine.low %v5541_v38, %v5542_v0  ;;  %v5407_v62 = vld [vmem:[%s14981_s0 + $0xa8] sm:$0xf] }
 0x1cc   :  { %v2111_v37 = vsel %vm11767_vm11, %v2109_v46, %v2110_v57  ;;  %v2122_v20 = vrot.slane %v2000_v15, 5  ;;  %v13000_v60 = vcombine.low %v5543_v53, %v5544_v48  ;;  %v2001_v11 = vmul.bf16 %v10540_v27, %v15195_v61  ;;  %v15196_v57 = vld [vmem:[#allocation29_spill] sm:$0xff]  ;;  %v15198_v27 = vld [vmem:[#allocation19_spill] sm:$0xff] }
 0x1cd   :  { %v12985_v56 = vcombine.low %v2108_v30, %v2111_v37  ;;  %v2002_v4 = vmul.bf16 %v10541_v12, %v15196_v57  ;;  %v2003_v59 = vmul.bf16 %v11688_v28, %v1841_v2  ;;  %v10475_v30 = vld [vmem:[%s14980_s1 + $0x1d8] sm:$0xff]   ;;  %v2004_v15 = vmul.bf16 %v10542_v13, %v12914_v36  ;;  %v15199_v12 = vld [vmem:[#allocation59_spill] sm:$0xff] }
 0x1ce   :  { %9895 = vmatpush3.bf16.msra.mxu0 %v10471_v42  ;;  %v13011_v24 = vsel %vm11767_vm11, %v2121_v49, %v2122_v20  ;;  %v2124_v25 = vrot.slane %v2122_v20, 4  ;;  %v2125_v46 = vrot.slane %v2001_v11, 5  ;;  %v2005_v31 = vmul.bf16 %v10543_v17, %v15191_v6  ;;  %v15197_v20 = vld [vmem:[#allocation20_spill] sm:$0xff]  ;;  %v15202_v17 = vld [vmem:[#allocation21_spill] sm:$0xff] }
 0x1cf   :  { %9896 = vmatprep.subr.bf16.mxu0 %v10473_v54  ;;  %v2128_v26 = vrot.slane %v2002_v4, 5  ;;  %v8515_v38 = vrot.slane %v2003_v59, 9  ;;  %v5545_v0 = vmul.bf16 %v15183_v18, %v12433_v43  ;;  %v5546_v37 = vmul.bf16 %v15184_v21, %v5407_v62  ;;  %v15200_v43 = vld [vmem:[#allocation61_spill] sm:$0xff]  ;;  %v15201_v59 = vld [vmem:[#allocation51_spill] sm:$0xff] }
 0x1d0   :  { %v13037_v53 = vsel %vm11767_vm11, %v2124_v25, %v2125_v46  ;;  %v2127_v48 = vrot.slane %v2125_v46, 4  ;;  %v2132_v2 = vrot.slane %v2004_v15, 5  ;;  %v2135_v49 = vrot.slane %v2005_v31, 5  ;;  %9557 = vmatmul.mubr.bf16.gmra.mrb[32].mxu1 %v15202_v17  ;;  %v10477_v25 = vld [vmem:[%s14980_s1 + $0x1e0] sm:$0xff]   ;;  %v10544_v31 = vld [vmem:[%s14981_s0 + $0x38] sm:$0xf] }
 0x1d1   :  { %9849 = vmatmul.mubr.bf16.gmra.mrb[4].mxu0 %v15197_v20  ;;  %v13040_v11 = vcombine.low %v5545_v0, %v5546_v37  ;;  %v5547_v4 = vmul.bf16 %v15180_v5, %v15199_v12  ;;  %v5548_v62 = vmul.bf16 %v15181_v35, %v15200_v43  ;;  %v15203_v0 = vld [vmem:[#allocation26_spill] sm:$0xff]  ;;  %9560 = vmatprep.mubr.bf16.mxu1 %v12837_v9  ;;  %v15209_v13 = vld [vmem:[#allocation65_spill] sm:$0xff] }
 0x1d2   :  { %9852 = vmatprep.mubr.bf16.mxu0 %v15198_v27  ;;  %9897 = vmatpush3.bf16.msra.mxu0 %v10473_v54  ;;  %v13053_v54 = vsel %vm11767_vm11, %v2127_v48, %v2128_v26  ;;  %v2133_v46 = vsel %vm11767_vm11, %v8515_v38, %v2132_v2  ;;  %v2134_v15 = vrot.slane %v2132_v2, 4  ;;  %v2006_v37 = vmul.bf16 %v10544_v31, %v15203_v0  ;;  %v10545_v26 = vld [vmem:[%s14981_s0 + $0x3c] sm:$0xf]  ;;  %v15204_v48 = vld [vmem:[#allocation27_spill] sm:$0xff]  ;;  %v10546_v9 = vld [vmem:[%s14981_s0 + $0x40] sm:$0xf] }
 0x1d3   :  { %9898 = vmatprep.subr.bf16.mxu0 %v10475_v30  ;;  %v13064_v27 = vcombine.low %v5547_v4, %v5548_v62  ;;  %v2007_v38 = vmul.bf16 %v10545_v26, %v15204_v48  ;;  %v2137_v2 = vrot.slane %v2135_v49, 4  ;;  %v2008_v17 = vmul.bf16 %v10546_v9, %v15193_v40  ;;  %v10547_v4 = vld [vmem:[%s14981_s0 + $0x44] sm:$0xf]  ;;  %v10479_v9 = vld [vmem:[%s14980_s1 + $0x1e8] sm:$0xff]  }
 0x1d4   :  { %v2136_v12 = vsel %vm11767_vm11, %v2134_v15, %v2135_v49  ;;  %v2138_v43 = vrot.slane %v2006_v37, 5  ;;  %v2009_v62 = vmul.bf16 %v10547_v4, %v15194_v51  ;;  %v15205_v20 = vld [vmem:[#allocation62_spill] sm:$0xff]  ;;  %v15206_v15 = vld [vmem:[#allocation63_spill] sm:$0xff] }
 0x1d5   :  { %v13080_v31 = vcombine.low %v2133_v46, %v2136_v12  ;;  %v2141_v26 = vrot.slane %v2007_v38, 5  ;;  %v5549_v49 = vmul.bf16 %v11554_v14, %v15205_v20  ;;  %v5550_v37 = vmul.bf16 %v11548_v16, %v15206_v15 }
 0x1d6   :  { %9899 = vmatpush3.bf16.msra.mxu0 %v10475_v30  ;;  %v13091_v42 = vsel %vm11767_vm11, %v2137_v2, %v2138_v43  ;;  %v2140_v4 = vrot.slane %v2138_v43, 4  ;;  %v2144_v30 = vrot.slane %v2008_v17, 5  ;;  %v2147_v46 = vrot.slane %v2009_v62, 5  ;;  %v10548_v17 = vld [vmem:[%s14981_s0 + $0x48] sm:$0xf] }
 0x1d7   :  { %9900 = vmatprep.subr.bf16.mxu0 %v10477_v25  ;;  %v2143_v12 = vrot.slane %v2141_v26, 4  ;;  %v13093_v38 = vcombine.low %v5549_v49, %v5550_v37  ;;  %v5551_v20 = vmul.bf16 %v11596_v19, %v15208_v52  ;;  %v5552_v15 = vmul.bf16 %v15182_v22, %v15209_v13  ;;  %v10549_v13 = vld [vmem:[%s14981_s0 + $0x4c] sm:$0x1] }
 0x1d8   :  { %v13105_v2 = vsel %vm11767_vm11, %v2140_v4, %v2141_v26  ;;  %v2146_v43 = vrot.slane %v2144_v30, 4  ;;  %v2010_v52 = vmul.bf16 %v10548_v17, %v15195_v61  ;;  %v2011_v62 = vmul.bf16 %v10549_v13, %v15196_v57  ;;  %v5408_v4 = vld [vmem:[%s14981_s0 + $0xd4] sm:$0xf]  ;;  %9561 = vmatmul.mubr.bf16.gmra.mrb[36].mxu1 %v12860_v32  ;;  %v10550_v32 = vld [vmem:[%s14981_s0 + $0x5c] sm:$0xf] }
 0x1d9   :  { %15207 = vst [vmem:[#allocation23_spill] sm:$0xff] %v13093_v38  ;;  %9853 = vmatmul.mubr.bf16.gmra.mrb[8].mxu0 %v12839_v41  ;;  %v13120_v26 = vsel %vm11767_vm11, %v2143_v12, %v2144_v30  ;;  %v13122_v49 = vcombine.low %v5551_v20, %v5552_v15  ;;  %v2149_v37 = vrot.slane %v2147_v46, 4  ;;  %v2012_v13 = vmul.bf16 %v11688_v28, %v1842_v7  ;;  %v10481_v30 = vld [vmem:[%s14980_s1 + $0x1f0] sm:$0xff]   ;;  %v10551_v20 = vld [vmem:[%s14981_s0 + $0x60] sm:$0xf] }
 0x1da   :  { %9856 = vmatprep.mubr.bf16.mxu0 %v12849_v63  ;;  %9901 = vmatpush3.bf16.msra.mxu0 %v10477_v25  ;;  %v13130_v63 = vsel %vm11767_vm11, %v2146_v43, %v2147_v46  ;;  %v2150_v25 = vrot.slane %v2010_v52, 5  ;;  %v2153_v17 = vrot.slane %v2011_v62, 5  ;;  %v2013_v46 = vmul.bf16 %v10550_v32, %v12914_v36  ;;  %v15212_v15 = vld [vmem:[#allocation66_spill] sm:$0xff] }
 0x1db   :  { %15210 = vst [vmem:[#allocation22_spill] sm:$0xff] %v13122_v49  ;;  %9902 = vmatprep.subr.bf16.mxu0 %v10479_v9  ;;  %15211 = vst [vmem:[#allocation24_spill] sm:$0xff] %v13130_v63  ;;  %9564 = vmatprep.mubr.bf16.mxu1 %v12870_v39  ;;  %v2014_v7 = vmul.bf16 %v10551_v20, %v15191_v6  ;;  %v5553_v43 = vmul.bf16 %v15183_v18, %v15212_v15  ;;  %v8516_v62 = vrot.slane %v2012_v13, 9  ;;  %v15213_v49 = vld [vmem:[#allocation67_spill] sm:$0xff]  ;;  %v15214_v63 = vld [vmem:[#allocation68_spill] sm:$0xff] }
 0x1dc   :  { %v13151_v39 = vsel %vm11767_vm11, %v2149_v37, %v2150_v25  ;;  %v2152_v52 = vrot.slane %v2150_v25, 4  ;;  %v5554_v12 = vmul.bf16 %v15184_v21, %v5408_v4  ;;  %v2157_v41 = vrot.slane %v2013_v46, 5  ;;  %v10552_v4 = vld [vmem:[%s14981_s0 + $0x64] sm:$0xf] }
 0x1dd   :  { %v2160_v32 = vrot.slane %v2014_v7, 5  ;;  %v5555_v38 = vmul.bf16 %v15180_v5, %v15213_v49  ;;  %v5556_v20 = vmul.bf16 %v15181_v35, %v15214_v63  ;;  %v10553_v5 = vld [vmem:[%s14981_s0 + $0x68] sm:$0xf]  ;;  %v10483_v35 = vld [vmem:[%s14980_s1 + $0x1f8] sm:$0xff]  }
 0x1de   :  { %9903 = vmatpush3.bf16.msra.mxu0 %v10479_v9  ;;  %v13160_v15 = vsel %vm11767_vm11, %v2152_v52, %v2153_v17  ;;  %v13162_v37 = vcombine.low %v5553_v43, %v5554_v12  ;;  %v2015_v9 = vmul.bf16 %v10552_v4, %v15203_v0  ;;  %v2016_v49 = vmul.bf16 %v10553_v5, %v15204_v48  ;;  %v10554_v43 = vld [vmem:[%s14981_s0 + $0x6c] sm:$0xf] }
 0x1df   :  { %9904 = vmatprep.subr.bf16.mxu0 %v10481_v30  ;;  %v2158_v25 = vsel %vm11767_vm11, %v8516_v62, %v2157_v41  ;;  %v2159_v17 = vrot.slane %v2157_v41, 4  ;;  %v13179_v13 = vcombine.low %v5555_v38, %v5556_v20  ;;  %v2162_v12 = vrot.slane %v2160_v32, 4  ;;  %v10555_v38 = vld [vmem:[%s14981_s0 + $0x70] sm:$0xf]  ;;  %v15215_v41 = vld [vmem:[#allocation69_spill] sm:$0xff] }
 0x1e0   :  { %v2163_v46 = vrot.slane %v2015_v9, 5  ;;  %v2166_v7 = vrot.slane %v2016_v49, 5  ;;  %v2017_v52 = vmul.bf16 %v10554_v43, %v15193_v40  ;;  %v5557_v62 = vmul.bf16 %v11554_v14, %v15215_v41  ;;  %9565 = vmatmul.mubr.bf16.gmra.mrb[40].mxu1 %v12894_v33  ;;  %v13209_v49 = vld [vmem:[%s14980_s1 + $0x200] sm:$0xff]   ;;  %v10556_v41 = vld [vmem:[%s14981_s0 + $0x74] sm:$0xf] }
 0x1e1   :  { %9857 = vmatmul.mubr.bf16.gmra.mrb[12].mxu0 %v12872_v8  ;;  %v2161_v4 = vsel %vm11767_vm11, %v2159_v17, %v2160_v32  ;;  %v2018_v8 = vmul.bf16 %v10555_v38, %v15194_v51  ;;  %v15216_v20 = vshll.u32 %v15201_v59, 16  ;;  %15217 = vst [vmem:[#allocation25_spill] sm:$0xff] %v13209_v49  ;;  %9568 = vmatprep.mubr.bf16.mxu1 %v12905_v55  ;;  %v15218_v43 = vld [vmem:[#allocation70_spill] sm:$0xff] }
 0x1e2   :  { %9860 = vmatprep.mubr.bf16.mxu0 %v12884_v50  ;;  %9905 = vmatpush3.bf16.msra.mxu0 %v10481_v30  ;;  %v13200_v50 = vcombine.low %v2158_v25, %v2161_v4  ;;  %v13204_v30 = vsel %vm11767_vm11, %v2162_v12, %v2163_v46  ;;  %v2165_v32 = vrot.slane %v2163_v46, 4  ;;  %v2168_v5 = vrot.slane %v2166_v7, 4  ;;  %v15219_v25 = vld [vmem:[#allocation71_spill] sm:$0xff]  ;;  %v15220_v46 = vld [vmem:[#allocation72_spill] sm:$0xff] }
 0x1e3   :  { %v13197_v9 = vrot.slane %v15216_v20, 5  ;;  %9906 = vmatprep.subr.bf16.mxu0 %v10483_v35  ;;  %v2169_v14 = vrot.slane %v2017_v52, 5  ;;  %v2172_v17 = vrot.slane %v2018_v8, 5  ;;  %v5558_v33 = vmul.bf16 %v11548_v16, %v15218_v43  ;;  %v10557_v16 = vld [vmem:[%s14981_s0 + $0x78] sm:$0x1] }
 0x1e4   :  { %v5559_v4 = vmul.bf16 %v11596_v19, %v15219_v25  ;;  %v13218_v12 = vsel %vm11767_vm11, %v2165_v32, %v2166_v7  ;;  %v5560_v38 = vmul.bf16 %v15182_v22, %v15220_v46  ;;  %v2019_v55 = vmul.bf16 %v10556_v41, %v15195_v61  ;;  %v1843_v19 = vld [vmem:[%s14981_s0 + $0x84] sm:$0xe]  ;;  %v5409_v41 = vld [vmem:[%s14981_s0 + $0x100] sm:$0xf] }
 0x1e5   :  { %v2020_v52 = vmul.bf16 %v10557_v16, %v15196_v57  ;;  %v13237_v22 = vsel %vm11767_vm11, %v2168_v5, %v2169_v14  ;;  %v2171_v8 = vrot.slane %v2169_v14, 4  ;;  %v13239_v20 = vcombine.low %v5557_v62, %v5558_v33  ;;  %v10559_v14 = vld [vmem:[%s14981_s0 + $0x8c] sm:$0xf] }
 0x1e6   :  { %9907 = vmatpush3.bf16.msra.mxu0 %v10483_v35  ;;  %v13241_v32 = vcombine.low %v5559_v4, %v5560_v38  ;;  %v2174_v43 = vrot.slane %v2172_v17, 4  ;;  %v2175_v25 = vrot.slane %v2019_v55, 5  ;;  %v2021_v5 = vmul.bf16 %v11688_v28, %v1843_v19  ;;  %v10558_v35 = vld [vmem:[%s14981_s0 + $0x88] sm:$0xf]  ;;  %v6047_v38 = vld [vmem:[%s14981_s0 + $0x10] sm:$0xf] }
 0x1e7   :  { %15221 = vst [vmem:[#allocation28_spill] sm:$0xff] %v13239_v20  ;;  %v2178_v46 = vrot.slane %v2020_v52, 5  ;;  %9956 = vmatprep.subr.bf16.mxu0 %v13209_v49  ;;  %v13249_v16 = vsel %vm11767_vm11, %v2171_v8, %v2172_v17  ;;  %v2022_v62 = vmul.bf16 %v10558_v35, %v12914_v36  ;;  %v2023_v33 = vmul.bf16 %v10559_v14, %v15191_v6  ;;  %v6045_v4 = vld [vmem:[%s14981_s0 + $0x8] sm:$0xf]  ;;  %v6046_v17 = vld [vmem:[%s14981_s0 + $0xc] sm:$0xf] }
 0x1e8   :  { %15222 = vst [vmem:[#allocation30_spill] sm:$0xff] %v13241_v32  ;;  %15223 = vst [vmem:[#allocation31_spill] sm:$0xff] %v13249_v16  ;;  %v13274_v52 = vsel %vm11767_vm11, %v2174_v43, %v2175_v25  ;;  %v2177_v19 = vrot.slane %v2175_v25, 4  ;;  %v15224_v8 = vld [vmem:[#allocation74_spill] sm:$0xff]  ;;  %v8517_v14 = vrot.slane %v2021_v5, 9  ;;  %v5562_v49 = vmul.bf16 %v15184_v21, %v5409_v41  ;;  %9569 = vmatmul.mubr.bf16.gmra.mrb[44].mxu1 %v12925_v3  ;;  %v15225_v55 = vld [vmem:[#allocation32_spill] sm:$0xff] }
 0x1e9   :  { %9861 = vmatmul.mubr.bf16.gmra.mrb[16].mxu0 %v12916_v45  ;;  %v5561_v35 = vmul.bf16 %v15183_v18, %v15224_v8  ;;  %v2182_v7 = vrot.slane %v2022_v62, 5  ;;  %v2185_v63 = vrot.slane %v2023_v33, 5  ;;  %v6284_v43 = vmul.bf16 %v15225_v55, %v6045_v4  ;;  %v15226_v32 = vld [vmem:[#allocation33_spill] sm:$0xff]  ;;  %v15227_v20 = vld [vmem:[#allocation34_spill] sm:$0xff]  ;;  %9588 = vmatprep.mubr.bf16.mxu1 %v12985_v56  ;;  %v10560_v56 = vld [vmem:[%s14981_s0 + $0x90] sm:$0xf] }
 0x1ea   :  { %9864 = vmatprep.mubr.bf16.mxu0 %v12918_v1  ;;  %v13283_v45 = vsel %vm11767_vm11, %v2177_v19, %v2178_v46  ;;  %v6285_v25 = vmul.bf16 %v15226_v32, %v6046_v17  ;;  %v6286_v16 = vmul.bf16 %v15227_v20, %v6047_v38  ;;  %v2024_v38 = vmul.bf16 %v10560_v56, %v15203_v0 }
 0x1eb   :  { %v2183_v21 = vsel %vm11767_vm11, %v8517_v14, %v2182_v7  ;;  %v2184_v1 = vrot.slane %v2182_v7, 4  ;;  %v13293_v3 = vcombine.low %v5561_v35, %v5562_v49  ;;  %v6339_v41 = vshrl.u32 %v6284_v43, 16 }
 0x1ec   :  { %v6342_v46 = vshll.u32 %v6284_v43, 16  ;;  %v6348_v5 = vshll.u32 %v6285_v25, 16  ;;  %v6352_v62 = vshrl.u32 %v6285_v25, 16  ;;  %v6358_v4 = vshll.u32 %v6286_v16, 16  ;;  %v10561_v25 = vld [vmem:[%s14981_s0 + $0x94] sm:$0xf] }
 0x1ed   :  { %v2186_v33 = vsel %vm11767_vm11, %v2184_v1, %v2185_v63  ;;  %v6362_v17 = vshrl.u32 %v6286_v16, 16  ;;  %v6341_v7 = vrot.slane %v6339_v41, 4  ;;  %v2025_v16 = vmul.bf16 %v10561_v25, %v15204_v48  ;;  %v10478_v1 = vld [vmem:[%s14980_s1 + $0xc8] sm:$0xff]   ;;  %v10480_v25 = vld [vmem:[%s14980_s1 + $0xd0] sm:$0xff]  }
 0x1ee   :  { %v13301_v19 = vcombine.low %v2183_v21, %v2186_v33  ;;  %v6344_v49 = vrot.slane %v6342_v46, 5  ;;  %v6350_v8 = vrot.slane %v6348_v5, 5  ;;  %v6354_v35 = vrot.slane %v6352_v62, 4  ;;  %v10562_v46 = vld [vmem:[%s14981_s0 + $0x98] sm:$0xf] }
 0x1ef   :  { %v6360_v14 = vrot.slane %v6358_v4, 5  ;;  %v6364_v43 = vrot.slane %v6362_v17, 4  ;;  %v2187_v33 = vrot.slane %v2185_v63, 4  ;;  %v2188_v41 = vrot.slane %v2024_v38, 5 }
 0x1f0   :  { %v6345_v21 = vor.u32 %v6344_v49, %v6341_v7  ;;  %v2026_v5 = vmul.bf16 %v10562_v46, %v15193_v40  ;;  %v6355_v62 = vor.u32 %v6354_v35, %v6350_v8  ;;  %v2191_v17 = vrot.slane %v2025_v16, 5 }
 0x1f1   :  { %9865 = vmatmul.mubr.bf16.gmra.mrb[20].mxu0 %v12941_v34  ;;  %v6365_v4 = vor.u32 %v6364_v43, %v6360_v14  ;;  %v10563_v34 = vld [vmem:[%s14981_s0 + $0x9c] sm:$0xf]  ;;  %v15228_v63 = vcombine.low %v12990_v23, %v12948_v44  ;;  %v13325_v7 = vsel %vm11767_vm11, %v2187_v33, %v2188_v41  ;;  %v2190_v49 = vrot.slane %v2188_v41, 4 }
 0x1f2   :  { %9868 = vmatprep.mubr.bf16.mxu0 %v12957_v47  ;;  %v2027_v56 = vmul.bf16 %v10563_v34, %v15194_v51  ;;  %v6346_v38 = vrot.slane %v6345_v21, 4  ;;  %v2194_v47 = vrot.slane %v2026_v5, 5  ;;  %v15229_v35 = vcombine.low %v12994_v58, %v13011_v24  ;;  %v15230_v43 = vld [vmem:[#allocation73_spill] sm:$0xff] }
 0x1f3   :  { %9589 = vmatmul.mubr.bf16.vlgmr.msra.gmra.mrb[0].mxu1 %v15228_v63  ;;  %v6356_v16 = vrot.slane %v6355_v62, 4  ;;  %v6366_v44 = vrot.slane %v6365_v4, 4  ;;  %v2193_v23 = vrot.slane %v2191_v17, 4  ;;  %v13338_v41 = vsel %vm11767_vm11, %v2190_v49, %v2191_v17  ;;  %v6050_v5 = vld [vmem:[%s14981_s0 + $0x1c] sm:$0xf] }
 0x1f4   :  { %9592 = vmatprep.mubr.bf16.mxu1 %v15229_v35  ;;  %9637 = vmatpush3.bf16.msra.mxu1 %v15230_v43  ;;  %v2197_v21 = vrot.slane %v2027_v56, 5  ;;  %v6351_v33 = vsel %vm11108_vm5, %v6346_v38, %v6350_v8  ;;  %v2196_v58 = vrot.slane %v2194_v47, 4  ;;  %v6372_v24 = vshrl.u32 %v15201_v59, 16  ;;  %v6051_v62 = vld [vmem:[%s14981_s0 + $0x20] sm:$0xf]  ;;  %v15234_v35 = vld [vmem:[#allocation37_spill] sm:$0xff] }
 0x1f5   :  { %9638 = vmatprep.subr.bf16.mxu1 %v10478_v1  ;;  %v6361_v4 = vsel %vm11108_vm5, %v6356_v16, %v6360_v14  ;;  %v13353_v17 = vsel %vm11767_vm11, %v2193_v23, %v2194_v47  ;;  %v6371_v59 = vsel %vm11108_vm5, %v6366_v44, %v13197_v9  ;;  %v15233_v38 = vld [vmem:[#allocation14_spill] sm:$0xff]  ;;  %v6289_v47 = vmul.bf16 %v15234_v35, %v6050_v5  ;;  %v15235_v43 = vld [vmem:[#allocation39_spill] sm:$0xff]  ;;  %v10482_v23 = vld [vmem:[%s14980_s1 + $0xd8] sm:$0xff]  }
 0x1f6   :  { %v13358_v34 = vcombine.low %v6351_v33, %v6361_v4  ;;  %v13362_v56 = vsel %vm11767_vm11, %v2196_v58, %v2197_v21  ;;  %v6374_v63 = vrot.slane %v6372_v24, 4  ;;  %v6378_v14 = vshll.u32 %v15233_v38, 16  ;;  %v10564_v58 = vld [vmem:[%s14981_s0 + $0xa0] sm:$0xf]  ;;  %v10565_v5 = vld [vmem:[%s14981_s0 + $0xa4] sm:$0x1] }
 0x1f7   :  { %15232 = vst [vmem:[#allocation29_spill] sm:$0xff] %v13362_v56  ;;  %v13369_v16 = vmul.bf16 %v15235_v43, %v6051_v62  ;;  %v6382_v44 = vshrl.u32 %v15233_v38, 16  ;;  %v2028_v24 = vmul.bf16 %v10564_v58, %v15195_v61  ;;  %v6388_v4 = vshll.u32 %v6289_v47, 16  ;;  %v6052_v56 = vld [vmem:[%s14981_s0 + $0x24] sm:$0xf] }
 0x1f8   :  { %9639 = vmatpush3.bf16.msra.mxu1 %v10478_v1  ;;  %v6375_v33 = vor.u32 %v6374_v63, %v13197_v9  ;;  %v6380_v1 = vrot.slane %v6378_v14, 5  ;;  %v6392_v38 = vshrl.u32 %v6289_v47, 16  ;;  %v1844_v63 = vld [vmem:[%s14981_s0 + $0xb0] sm:$0xe]  ;;  %v15236_v14 = vcombine.low %v13037_v53, %v13053_v54  ;;  %v10484_v53 = vld [vmem:[%s14980_s1 + $0xe0] sm:$0xff]  }
 0x1f9   :  { %9869 = vmatmul.mubr.bf16.gmra.mrb[24].mxu0 %v12998_v29  ;;  %9640 = vmatprep.subr.bf16.mxu1 %v10480_v25  ;;  %v2029_v29 = vmul.bf16 %v10565_v5, %v15196_v57  ;;  %v6384_v62 = vrot.slane %v6382_v44, 4  ;;  %v6398_v9 = vshll.u32 %v13369_v16, 16  ;;  %v2199_v49 = vrot.slane %v2197_v21, 4 }
 0x1fa   :  { %9872 = vmatprep.mubr.bf16.mxu0 %v13000_v60  ;;  %v6376_v58 = vrot.slane %v6375_v33, 4  ;;  %v2200_v8 = vrot.slane %v2028_v24, 5  ;;  %v6390_v44 = vrot.slane %v6388_v4, 5  ;;  %v6394_v47 = vrot.slane %v6392_v38, 4 }
 0x1fb   :  { %9593 = vmatmul.mubr.bf16.gmra.mrb[4].mxu1 %v15236_v14  ;;  %v2203_v18 = vrot.slane %v2029_v29, 5  ;;  %v6385_v60 = vor.u32 %v6384_v62, %v6380_v1  ;;  %v6400_v5 = vrot.slane %v6398_v9, 5  ;;  %v2030_v21 = vmul.bf16 %v11688_v28, %v1844_v63  ;;  %v10566_v62 = vld [vmem:[%s14981_s0 + $0xb4] sm:$0xf] }
 0x1fc   :  { %9596 = vmatprep.mubr.bf16.mxu1 %v13080_v31  ;;  %9641 = vmatpush3.bf16.msra.mxu1 %v10480_v25  ;;  %v6381_v54 = vsel %vm11108_vm5, %v6376_v58, %v6380_v1  ;;  %v13404_v31 = vsel %vm11767_vm11, %v2199_v49, %v2200_v8  ;;  %v2202_v25 = vrot.slane %v2200_v8, 4  ;;  %v6395_v29 = vor.u32 %v6394_v47, %v6390_v44  ;;  %v6053_v1 = vld [vmem:[%s14981_s0 + $0x28] sm:$0x1]  ;;  %v10567_v8 = vld [vmem:[%s14981_s0 + $0xb8] sm:$0xf]  ;;  %v15238_v9 = vld [vmem:[#allocation40_spill] sm:$0xff] }
 0x1fd   :  { %9642 = vmatprep.subr.bf16.mxu1 %v10482_v23  ;;  %v13407_v33 = vcombine.low %v6371_v59, %v6381_v54  ;;  %v6386_v24 = vrot.slane %v6385_v60, 4  ;;  %v2031_v4 = vmul.bf16 %v10566_v62, %v12914_v36  ;;  %v2032_v59 = vmul.bf16 %v10567_v8, %v15191_v6 }
 0x1fe   :  { %v13418_v49 = vsel %vm11767_vm11, %v2202_v25, %v2203_v18  ;;  %v8518_v38 = vrot.slane %v2030_v21, 9  ;;  %v6291_v63 = vmul.bf16 %v15238_v9, %v6052_v56  ;;  %v6396_v58 = vrot.slane %v6395_v29, 4  ;;  %v6054_v18 = vld [vmem:[%s14981_s0 + $0x34] sm:$0xf]  ;;  %v15239_v25 = vld [vmem:[#allocation38_spill] sm:$0xff] }
 0x1ff   :  { %15237 = vst [vmem:[#allocation20_spill] sm:$0xff] %v13418_v49  ;;  %v6391_v14 = vsel %vm11108_vm5, %v6386_v24, %v6390_v44  ;;  %v2207_v47 = vrot.slane %v2031_v4, 5  ;;  %v13433_v54 = vrot.slane %v2032_v59, 5  ;;  %v6292_v56 = vmul.bf16 %v15239_v25, %v6053_v1  ;;  %v6055_v44 = vld [vmem:[%s14981_s0 + $0x38] sm:$0xf]  ;;  %v10486_v24 = vld [vmem:[%s14980_s1 + $0xe8] sm:$0xff]  }
 0x200   :  { %9643 = vmatpush3.bf16.msra.mxu1 %v10482_v23  ;;  %v6402_v23 = vshrl.u32 %v13369_v16, 16  ;;  %v6408_v21 = vshll.u32 %v6291_v63, 16  ;;  %v6412_v4 = vshrl.u32 %v6291_v63, 16  ;;  %v6056_v16 = vld [vmem:[%s14981_s0 + $0x3c] sm:$0xf]  ;;  %v15240_v1 = vcombine.low %v13091_v42, %v13105_v2 }
 0x201   :  { %9873 = vmatmul.mubr.bf16.gmra.mrb[28].mxu0 %v13040_v11  ;;  %9644 = vmatprep.subr.bf16.mxu1 %v10484_v53  ;;  %v6401_v11 = vsel %vm11108_vm5, %v6396_v58, %v6400_v5  ;;  %v2208_v29 = vsel %vm11767_vm11, %v8518_v38, %v2207_v47  ;;  %v2209_v62 = vrot.slane %v2207_v47, 4  ;;  %v6418_v60 = vshll.u32 %v6292_v56, 16  ;;  %v15241_v58 = vld [vmem:[#allocation24_spill] sm:$0xff] }
 0x202   :  { %9876 = vmatprep.mubr.bf16.mxu0 %v13064_v27  ;;  %v13454_v8 = vcombine.low %v6391_v14, %v6401_v11  ;;  %v6404_v59 = vrot.slane %v6402_v23, 4  ;;  %v6410_v27 = vrot.slane %v6408_v21, 5  ;;  %v15242_v49 = vcombine.low %v13120_v26, %v15241_v58  ;;  %v10488_v26 = vld [vmem:[%s14980_s1 + $0xf0] sm:$0xff]  }
 0x203   :  { %9597 = vmatmul.mubr.bf16.gmra.mrb[8].mxu1 %v15240_v1  ;;  %v2211_v38 = vsel %vm11767_vm11, %v2209_v62, %v13433_v54  ;;  %v6414_v63 = vrot.slane %v6412_v4, 4  ;;  %v6293_v47 = vmul.bf16 %v15225_v55, %v6054_v18  ;;  %v6294_v42 = vmul.bf16 %v15226_v32, %v6055_v44 }
 0x204   :  { %9600 = vmatprep.mubr.bf16.mxu1 %v15242_v49  ;;  %9645 = vmatpush3.bf16.msra.mxu1 %v10484_v53  ;;  %v13464_v2 = vcombine.low %v2208_v29, %v2211_v38  ;;  %v6405_v14 = vor.u32 %v6404_v59, %v6400_v5  ;;  %v6420_v23 = vrot.slane %v6418_v60, 5  ;;  %v13467_v56 = vmul.bf16 %v15227_v20, %v6056_v16  ;;  %v10568_v5 = vld [vmem:[%s14981_s0 + $0xbc] sm:$0xf]  ;;  %v15243_v59 = vld [vmem:[#allocation23_spill] sm:$0xff] }
 0x205   :  { %9646 = vmatprep.subr.bf16.mxu1 %v10486_v24  ;;  %v6415_v53 = vor.u32 %v6414_v63, %v6410_v27  ;;  %v6423_v49 = vshrl.u32 %v6293_v47, 16  ;;  %v6426_v21 = vshll.u32 %v6293_v47, 16  ;;  %v6432_v11 = vshll.u32 %v6294_v42, 16  ;;  %v10569_v47 = vld [vmem:[%s14981_s0 + $0xc0] sm:$0xf] }
 0x206   :  { %v6406_v62 = vrot.slane %v6405_v14, 4  ;;  %v6436_v18 = vshrl.u32 %v6294_v42, 16  ;;  %v6442_v44 = vshll.u32 %v13467_v56, 16  ;;  %v2033_v60 = vmul.bf16 %v10568_v5, %v15203_v0  ;;  %v10490_v14 = vld [vmem:[%s14980_s1 + $0xf8] sm:$0xff]  }
 0x207   :  { %v6416_v29 = vrot.slane %v6415_v53, 4  ;;  %v6425_v4 = vrot.slane %v6423_v49, 4  ;;  %v6428_v16 = vrot.slane %v6426_v21, 5  ;;  %v6434_v1 = vrot.slane %v6432_v11, 5  ;;  %v6057_v11 = vld [vmem:[%s14981_s0 + $0x40] sm:$0xf] }
 0x208   :  { %9647 = vmatpush3.bf16.msra.mxu1 %v10486_v24  ;;  %v6411_v58 = vsel %vm11108_vm5, %v6406_v62, %v6410_v27  ;;  %v6438_v38 = vrot.slane %v6436_v18, 4  ;;  %v13480_v63 = vrot.slane %v6442_v44, 5  ;;  %v2034_v42 = vmul.bf16 %v10569_v47, %v15204_v48  ;;  %v15244_v24 = vld [vmem:[#allocation22_spill] sm:$0xff]  ;;  %v15246_v47 = vld [vmem:[#allocation35_spill] sm:$0xff] }
 0x209   :  { %9877 = vmatmul.mubr.bf16.gmra.mrb[32].mxu0 %v15243_v59  ;;  %9648 = vmatprep.subr.bf16.mxu1 %v10488_v26  ;;  %v6421_v53 = vsel %vm11108_vm5, %v6416_v29, %v6420_v23  ;;  %v6429_v27 = vor.u32 %v6428_v16, %v6425_v4  ;;  %v2212_v49 = vrot.slane %v13433_v54, 4  ;;  %v2213_v21 = vrot.slane %v2033_v60, 5  ;;  %v10570_v23 = vld [vmem:[%s14981_s0 + $0xc4] sm:$0xf]  ;;  %v10571_v4 = vld [vmem:[%s14981_s0 + $0xc8] sm:$0xf] }
 0x20a   :  { %9880 = vmatprep.mubr.bf16.mxu0 %v15244_v24  ;;  %v15245_v62 = vcombine.low %v13151_v39, %v13160_v15  ;;  %v13499_v18 = vcombine.low %v6411_v58, %v6421_v53  ;;  %v6439_v44 = vor.u32 %v6438_v38, %v6434_v1  ;;  %v2216_v5 = vrot.slane %v2034_v42, 5  ;;  %v6058_v54 = vld [vmem:[%s14981_s0 + $0x44] sm:$0xf] }
 0x20b   :  { %v2035_v29 = vmul.bf16 %v10570_v23, %v15193_v40  ;;  %v6430_v60 = vrot.slane %v6429_v27, 4  ;;  %v13511_v39 = vsel %vm11767_vm11, %v2212_v49, %v2213_v21  ;;  %v2215_v15 = vrot.slane %v2213_v21, 4  ;;  %v15247_v27 = vld [vmem:[#allocation36_spill] sm:$0xff]  ;;  %v6060_v21 = vld [vmem:[%s14981_s0 + $0x4c] sm:$0xf] }
 0x20c   :  { %9601 = vmatmul.mubr.bf16.gmra.mrb[12].mxu1 %v15245_v62  ;;  %v2036_v16 = vmul.bf16 %v10571_v4, %v15194_v51  ;;  %v6440_v59 = vrot.slane %v6439_v44, 4  ;;  %v2218_v58 = vrot.slane %v2216_v5, 4  ;;  %v6296_v42 = vmul.bf16 %v15246_v47, %v6057_v11 }
 0x20d   :  { %9604 = vmatprep.mubr.bf16.mxu1 %v13200_v50  ;;  %9649 = vmatpush3.bf16.msra.mxu1 %v10488_v26  ;;  %v2219_v38 = vrot.slane %v2035_v29, 5  ;;  %v6435_v50 = vsel %vm11108_vm5, %v6430_v60, %v6434_v1  ;;  %v13522_v24 = vsel %vm11767_vm11, %v2215_v15, %v2216_v5  ;;  %v6297_v49 = vmul.bf16 %v15247_v27, %v6058_v54  ;;  %v6059_v26 = vld [vmem:[%s14981_s0 + $0x48] sm:$0xf] }
 0x20e   :  { %9650 = vmatprep.subr.bf16.mxu1 %v10490_v14  ;;  %v13524_v53 = vrot.slane %v2036_v16, 5  ;;  %v6445_v1 = vsel %vm11108_vm5, %v6440_v59, %v13480_v63  ;;  %v6446_v23 = vshrl.u32 %v13467_v56, 16  ;;  %v6452_v29 = vshll.u32 %v6296_v42, 16  ;;  %v13558_v56 = vld [vmem:[%s14980_s1 + $0x100] sm:$0xff]  }
 0x20f   :  { %v13540_v62 = vsel %vm11767_vm11, %v2218_v58, %v2219_v38  ;;  %v2221_v44 = vrot.slane %v2219_v38, 4  ;;  %v13542_v5 = vcombine.low %v6435_v50, %v6445_v1  ;;  %v6456_v54 = vshrl.u32 %v6296_v42, 16  ;;  %v15249_v1 = vld [vmem:[#allocation31_spill] sm:$0xff] }
 0x210   :  { %v6462_v15 = vshll.u32 %v6297_v49, 16  ;;  %v6298_v4 = vmul.bf16 %v15234_v35, %v6059_v26  ;;  %v13553_v16 = vmul.bf16 %v15235_v43, %v6060_v21  ;;  %v6454_v59 = vrot.slane %v6452_v29, 5 }
 0x211   :  { %9651 = vmatpush3.bf16.msra.mxu1 %v10490_v14  ;;  %9881 = vmatmul.mubr.bf16.gmra.mrb[36].mxu0 %v13162_v37  ;;  %v13549_v60 = vsel %vm11767_vm11, %v2221_v44, %v13524_v53  ;;  %v6448_v14 = vrot.slane %v6446_v23, 4  ;;  %v6458_v58 = vrot.slane %v6456_v54, 4  ;;  %v15248_v38 = vcombine.low %v13204_v30, %v13218_v12  ;;  %v10573_v23 = vld [vmem:[%s14981_s0 + $0xcc] sm:$0xf]  ;;  %v10574_v54 = vld [vmem:[%s14981_s0 + $0xd0] sm:$0x1] }
 0x212   :  { %10020 = vmatprep.subr.bf16.mxu1 %v13558_v56  ;;  %9884 = vmatprep.mubr.bf16.mxu0 %v13179_v13  ;;  %v6464_v42 = vrot.slane %v6462_v15, 5  ;;  %v6466_v50 = vshrl.u32 %v6297_v49, 16  ;;  %v6472_v26 = vshll.u32 %v6298_v4, 16  ;;  %v6476_v21 = vshrl.u32 %v6298_v4, 16 }
 0x213   :  { %v15250_v44 = vcombine.low %v13237_v22, %v15249_v1  ;;  %v6449_v13 = vor.u32 %v6448_v14, %v13480_v63  ;;  %v6459_v11 = vor.u32 %v6458_v58, %v6454_v59  ;;  %v6482_v37 = vshll.u32 %v13553_v16, 16  ;;  %v1845_v63 = vld [vmem:[%s14981_s0 + $0xdc] sm:$0xe] }
 0x214   :  { %9605 = vmatmul.mubr.bf16.gmra.mrb[16].mxu1 %v15248_v38  ;;  %v2037_v30 = vmul.bf16 %v10573_v23, %v15195_v61  ;;  %v6468_v12 = vrot.slane %v6466_v50, 4  ;;  %v6474_v29 = vrot.slane %v6472_v26, 5  ;;  %v6478_v49 = vrot.slane %v6476_v21, 4 }
 0x215   :  { %9608 = vmatprep.mubr.bf16.mxu1 %v15250_v44  ;;  %v2038_v22 = vmul.bf16 %v10574_v54, %v15196_v57  ;;  %v6450_v15 = vrot.slane %v6449_v13, 4  ;;  %v6460_v4 = vrot.slane %v6459_v11, 4  ;;  %v13583_v14 = vrot.slane %v6482_v37, 5  ;;  %v10575_v11 = vld [vmem:[%s14981_s0 + $0xe0] sm:$0xf] }
 0x216   :  { %v2224_v58 = vrot.slane %v13524_v53, 4  ;;  %v6469_v38 = vor.u32 %v6468_v12, %v6464_v42  ;;  %v6479_v50 = vor.u32 %v6478_v49, %v6474_v29  ;;  %v2225_v26 = vrot.slane %v2037_v30, 5  ;;  %v6061_v53 = vld [vmem:[%s14981_s0 + $0x50] sm:$0xf]  ;;  %v6062_v13 = vld [vmem:[%s14981_s0 + $0x54] sm:$0x1] }
 0x217   :  { %v2228_v21 = vrot.slane %v2038_v22, 5  ;;  %v6455_v1 = vsel %vm11108_vm5, %v6450_v15, %v6454_v59  ;;  %v6465_v44 = vsel %vm11108_vm5, %v6460_v4, %v6464_v42  ;;  %v2039_v23 = vmul.bf16 %v11688_v28, %v1845_v63  ;;  %v15251_v59 = vld [vmem:[#allocation28_spill] sm:$0xff]  ;;  %v15252_v49 = vld [vmem:[#allocation30_spill] sm:$0xff] }
 0x218   :  { %v2040_v37 = vmul.bf16 %v10575_v11, %v12914_v36  ;;  %v13602_v30 = vcombine.low %v6455_v1, %v6465_v44  ;;  %v6470_v42 = vrot.slane %v6469_v38, 4  ;;  %v6480_v28 = vrot.slane %v6479_v50, 4  ;;  %v10576_v54 = vld [vmem:[%s14981_s0 + $0xe4] sm:$0xf] }
 0x219   :  { %9885 = vmatmul.mubr.bf16.gmra.mrb[40].mxu0 %v15251_v59  ;;  %v13606_v12 = vsel %vm11767_vm11, %v2224_v58, %v2225_v26  ;;  %v2227_v36 = vrot.slane %v2225_v26, 4  ;;  %v2041_v22 = vmul.bf16 %v10576_v54, %v15191_v6  ;;  %v8519_v63 = vrot.slane %v2039_v23, 9  ;;  %v6063_v6 = vld [vmem:[%s14981_s0 + $0x60] sm:$0xf]  ;;  %v6065_v23 = vld [vmem:[%s14981_s0 + $0x68] sm:$0xf] }
 0x21a   :  { %9888 = vmatprep.mubr.bf16.mxu0 %v15252_v49  ;;  %v2232_v15 = vrot.slane %v2040_v37, 5  ;;  %v15253_v4 = vcombine.low %v13274_v52, %v13283_v45  ;;  %v6475_v38 = vsel %vm11108_vm5, %v6470_v42, %v6474_v29  ;;  %v6485_v58 = vsel %vm11108_vm5, %v6480_v28, %v13583_v14  ;;  %v6064_v52 = vld [vmem:[%s14981_s0 + $0x64] sm:$0xf] }
 0x21b   :  { %v6300_v50 = vmul.bf16 %v15238_v9, %v6061_v53  ;;  %v6301_v26 = vmul.bf16 %v15239_v25, %v6062_v13  ;;  %v13630_v45 = vcombine.low %v6475_v38, %v6485_v58  ;;  %v13634_v29 = vsel %vm11767_vm11, %v2227_v36, %v2228_v21 }
 0x21c   :  { %9609 = vmatmul.mubr.bf16.gmra.mrb[20].mxu1 %v15253_v4  ;;  %v2233_v1 = vsel %vm11767_vm11, %v8519_v63, %v2232_v15  ;;  %v2234_v44 = vrot.slane %v2232_v15, 4  ;;  %v8555_v11 = vcombine.low %v13606_v12, %v13634_v29  ;;  %v2235_v37 = vrot.slane %v2041_v22, 5  ;;  %v10585_v12 = vld [vmem:[%s14981_s0 + $0xc] sm:$0xf]  ;;  %v15264_v29 = vld [vmem:[#allocation44_spill] sm:$0xff] }
 0x21d   :  { %9612 = vmatprep.mubr.bf16.mxu1 %v13301_v19  ;;  %v6486_v19 = vshrl.u32 %v13553_v16, 16  ;;  %v6492_v53 = vshll.u32 %v6300_v50, 16  ;;  %v6496_v13 = vshrl.u32 %v6300_v50, 16  ;;  %v6502_v59 = vshll.u32 %v6301_v26, 16 }
 0x21e   :  { %v6302_v21 = vmul.bf16 %v15225_v55, %v6063_v6  ;;  %v6303_v42 = vmul.bf16 %v15226_v32, %v6064_v52  ;;  %v2236_v28 = vsel %vm11767_vm11, %v2234_v44, %v2235_v37  ;;  %v13649_v54 = vmul.bf16 %v15227_v20, %v6065_v23 }
 0x21f   :  { %v6488_v49 = vrot.slane %v6486_v19, 4  ;;  %v6494_v36 = vrot.slane %v6492_v53, 5  ;;  %v13651_v63 = vcombine.low %v2233_v1, %v2236_v28  ;;  %v6498_v22 = vrot.slane %v6496_v13, 4  ;;  %v10577_v1 = vld [vmem:[%s14981_s0 + $0xe8] sm:$0xf] }
 0x220   :  { %v6504_v15 = vrot.slane %v6502_v59, 5  ;;  %v6507_v16 = vshrl.u32 %v6302_v21, 16  ;;  %v6510_v38 = vshll.u32 %v6302_v21, 16  ;;  %v6516_v58 = vshll.u32 %v6303_v42, 16 }
 0x221   :  { %9889 = vmatmul.mubr.bf16.gmra.mrb[44].mxu0 %v13293_v3  ;;  %v6489_v4 = vor.u32 %v6488_v49, %v13583_v14  ;;  %v6520_v50 = vshrl.u32 %v6303_v42, 16  ;;  %v6499_v26 = vor.u32 %v6498_v22, %v6494_v36  ;;  %v6526_v52 = vshll.u32 %v13649_v54, 16  ;;  %v10578_v42 = vld [vmem:[%s14981_s0 + $0xec] sm:$0xf] }
 0x222   :  { %9908 = vmatprep.mubr.bf16.mxu0 %v13358_v34  ;;  %v6509_v6 = vrot.slane %v6507_v16, 4  ;;  %v2042_v44 = vmul.bf16 %v10577_v1, %v15203_v0  ;;  %v15254_v3 = vcombine.low %v13325_v7, %v13338_v41  ;;  %v6512_v23 = vrot.slane %v6510_v38, 5  ;;  %v15255_v34 = vld [vmem:[#allocation29_spill] sm:$0xff] }
 0x223   :  { %v6490_v14 = vrot.slane %v6489_v4, 4  ;;  %v6518_v19 = vrot.slane %v6516_v58, 5  ;;  %v6522_v53 = vrot.slane %v6520_v50, 4  ;;  %v15256_v13 = vcombine.low %v13353_v17, %v15255_v34  ;;  %v10579_v4 = vld [vmem:[%s14981_s0 + $0xf0] sm:$0xf]  ;;  %v10487_v58 = vld [vmem:[%s14980_s1 + $0x208] sm:$0xff]  }
 0x224   :  { %9613 = vmatmul.mubr.bf16.gmra.mrb[24].mxu1 %v15254_v3  ;;  %v6500_v59 = vrot.slane %v6499_v26, 4  ;;  %v13667_v21 = vrot.slane %v6526_v52, 5  ;;  %v2043_v0 = vmul.bf16 %v10578_v42, %v15204_v48  ;;  %v2237_v28 = vrot.slane %v2235_v37, 4  ;;  %v10580_v48 = vld [vmem:[%s14981_s0 + $0xf4] sm:$0xf] }
 0x225   :  { %9616 = vmatprep.mubr.bf16.mxu1 %v15256_v13  ;;  %v6495_v7 = vsel %vm11108_vm5, %v6490_v14, %v6494_v36  ;;  %v6513_v41 = vor.u32 %v6512_v23, %v6509_v6  ;;  %v6523_v49 = vor.u32 %v6522_v53, %v6518_v19  ;;  %v2238_v22 = vrot.slane %v2042_v44, 5  ;;  %v6066_v36 = vld [vmem:[%s14981_s0 + $0x6c] sm:$0xf]  ;;  %v6068_v34 = vld [vmem:[%s14981_s0 + $0x74] sm:$0xf] }
 0x226   :  { %v6505_v17 = vsel %vm11108_vm5, %v6500_v59, %v6504_v15  ;;  %v2241_v16 = vrot.slane %v2043_v0, 5  ;;  %v2044_v38 = vmul.bf16 %v10579_v4, %v15193_v40  ;;  %v2045_v37 = vmul.bf16 %v10580_v48, %v15194_v51  ;;  %v6067_v15 = vld [vmem:[%s14981_s0 + $0x70] sm:$0xf]  ;;  %v6069_v13 = vld [vmem:[%s14981_s0 + $0x78] sm:$0xf] }
 0x227   :  { %v13694_v50 = vcombine.low %v6495_v7, %v6505_v17  ;;  %v6514_v40 = vrot.slane %v6513_v41, 4  ;;  %v6524_v26 = vrot.slane %v6523_v49, 4  ;;  %v13698_v6 = vsel %vm11767_vm11, %v2237_v28, %v2238_v22  ;;  %v15258_v28 = vld [vmem:[#allocation20_spill] sm:$0xff] }
 0x228   :  { %v2240_v51 = vrot.slane %v2238_v22, 4  ;;  %v2243_v52 = vrot.slane %v2241_v16, 4  ;;  %v2244_v1 = vrot.slane %v2044_v38, 5  ;;  %v13700_v44 = vrot.slane %v2045_v37, 5 }
 0x229   :  { %9909 = vmatmul.mubr.bf16.vlgmr.msra.gmra.mrb[0].mxu0 %v13407_v33  ;;  %v6519_v3 = vsel %vm11108_vm5, %v6514_v40, %v6518_v19  ;;  %v6529_v14 = vsel %vm11108_vm5, %v6524_v26, %v13667_v21  ;;  %v6305_v23 = vmul.bf16 %v15246_v47, %v6066_v36  ;;  %v6306_v53 = vmul.bf16 %v15247_v27, %v6067_v15  ;;  %v15257_v33 = vld [vmem:[#allocation25_spill] sm:$0xff] }
 0x22a   :  { %9957 = vmatpush3.bf16.msra.mxu0 %v15257_v33  ;;  %9912 = vmatprep.mubr.bf16.mxu0 %v13454_v8  ;;  %v13718_v19 = vcombine.low %v6519_v3, %v6529_v14  ;;  %v13722_v59 = vsel %vm11767_vm11, %v2240_v51, %v2241_v16  ;;  %v13726_v42 = vsel %vm11767_vm11, %v2243_v52, %v2244_v1  ;;  %v2246_v0 = vrot.slane %v2244_v1, 4  ;;  %v10489_v8 = vld [vmem:[%s14980_s1 + $0x210] sm:$0xff]   ;;  %v10491_v3 = vld [vmem:[%s14980_s1 + $0x218] sm:$0xff]  }
 0x22b   :  { %v15259_v7 = vcombine.low %v13404_v31, %v15258_v28  ;;  %9958 = vmatprep.subr.bf16.mxu0 %v10487_v58  ;;  %v8557_v41 = vcombine.low %v13698_v6, %v13722_v59  ;;  %v6530_v49 = vshrl.u32 %v13649_v54, 16  ;;  %v6536_v22 = vshll.u32 %v6305_v23, 16  ;;  %v10581_v14 = vld [vmem:[%s14981_s0 + $0xf8] sm:$0xf] }
 0x22c   :  { %v6540_v17 = vshrl.u32 %v6305_v23, 16  ;;  %v13741_v16 = vsel %vm11767_vm11, %v2246_v0, %v13700_v44  ;;  %v6546_v31 = vshll.u32 %v6306_v53, 16  ;;  %v6307_v4 = vmul.bf16 %v15234_v35, %v6068_v34 }
 0x22d   :  { %9617 = vmatmul.mubr.bf16.gmra.mrb[28].mxu1 %v15259_v7  ;;  %v6308_v38 = vmul.bf16 %v15235_v43, %v6069_v13  ;;  %v8558_v48 = vcombine.low %v13726_v42, %v13741_v16  ;;  %v6532_v37 = vrot.slane %v6530_v49, 4  ;;  %v6538_v36 = vrot.slane %v6536_v22, 5  ;;  %v10582_v13 = vld [vmem:[%s14981_s0 + $0xfc] sm:$0x1]  ;;  %v6079_v16 = vld [vmem:[%s14981_s0 + $0xa8] sm:$0xf] }
 0x22e   :  { %9620 = vmatprep.mubr.bf16.mxu1 %v13464_v2  ;;  %v6542_v54 = vrot.slane %v6540_v17, 4  ;;  %9959 = vmatpush3.bf16.msra.mxu0 %v10487_v58  ;;  %v6548_v15 = vrot.slane %v6546_v31, 5  ;;  %v6550_v40 = vshrl.u32 %v6306_v53, 16  ;;  %v6556_v2 = vshll.u32 %v6307_v4, 16  ;;  %v6070_v31 = vld [vmem:[%s14981_s0 + $0x7c] sm:$0xf] }
 0x22f   :  { %v6560_v26 = vshrl.u32 %v6307_v4, 16  ;;  %9960 = vmatprep.subr.bf16.mxu0 %v10489_v8  ;;  %v6533_v51 = vor.u32 %v6532_v37, %v13667_v21  ;;  %v6566_v1 = vshll.u32 %v6308_v38, 16  ;;  %v2046_v23 = vmul.bf16 %v10581_v14, %v15195_v61  ;;  %v15261_v4 = vld [vmem:[#allocation42_spill] sm:$0xff] }
 0x230   :  { %v6543_v52 = vor.u32 %v6542_v54, %v6538_v36  ;;  %v6552_v58 = vrot.slane %v6550_v40, 4  ;;  %v6558_v34 = vrot.slane %v6556_v2, 5  ;;  %v2047_v21 = vmul.bf16 %v10582_v13, %v15196_v57  ;;  %v6071_v57 = vld [vmem:[%s14981_s0 + $0x80] sm:$0x1]  ;;  %v6072_v40 = vld [vmem:[%s14981_s0 + $0x8c] sm:$0xf] }
 0x231   :  { %v6562_v53 = vrot.slane %v6560_v26, 4  ;;  %9913 = vmatmul.mubr.bf16.gmra.mrb[4].mxu0 %v13499_v18  ;;  %v6534_v33 = vrot.slane %v6533_v51, 4  ;;  %v6568_v28 = vrot.slane %v6566_v1, 5  ;;  %v2249_v7 = vrot.slane %v13700_v44, 4  ;;  %v10584_v51 = vld [vmem:[%s14981_s0 + $0x8] sm:$0xf] }
 0x232   :  { %v6544_v0 = vrot.slane %v6543_v52, 4  ;;  %9916 = vmatprep.mubr.bf16.mxu0 %v13542_v5  ;;  %9961 = vmatpush3.bf16.msra.mxu0 %v10489_v8  ;;  %v6553_v61 = vor.u32 %v6552_v58, %v6548_v15  ;;  %v2250_v22 = vrot.slane %v2046_v23, 5  ;;  %v2253_v17 = vrot.slane %v2047_v21, 5  ;;  %v10583_v8 = vld [vmem:[%s14981_s0 + $0x4] sm:$0xf]  ;;  %v15263_v52 = vld [vmem:[#allocation41_spill] sm:$0xff] }
 0x233   :  { %v6563_v49 = vor.u32 %v6562_v53, %v6558_v34  ;;  %v15260_v18 = vcombine.low %v13511_v39, %v13522_v24  ;;  %v6539_v5 = vsel %vm11108_vm5, %v6534_v33, %v6538_v36  ;;  %9962 = vmatprep.subr.bf16.mxu0 %v10491_v3  ;;  %v2800_v37 = vmul.bf16 %v10583_v8, %v15261_v4  ;;  %v10492_v39 = vld [vmem:[%s14980_s1 + $0x220] sm:$0xff]   ;;  %v6073_v53 = vld [vmem:[%s14981_s0 + $0x90] sm:$0xf]  ;;  %v6074_v13 = vld [vmem:[%s14981_s0 + $0x94] sm:$0xf] }
 0x234   :  { %v6549_v44 = vsel %vm11108_vm5, %v6544_v0, %v6548_v15  ;;  %v6570_v54 = vshrl.u32 %v6308_v38, 16  ;;  %v15262_v24 = vcombine.low %v13540_v62, %v13549_v60  ;;  %v6554_v15 = vrot.slane %v6553_v61, 4 }
 0x235   :  { %9621 = vmatmul.mubr.bf16.gmra.mrb[32].mxu1 %v15260_v18  ;;  %v13788_v36 = vcombine.low %v6539_v5, %v6549_v44  ;;  %v6564_v2 = vrot.slane %v6563_v49, 4  ;;  %v13792_v26 = vsel %vm11767_vm11, %v2249_v7, %v2250_v22  ;;  %v2252_v38 = vrot.slane %v2250_v22, 4  ;;  %v10493_v7 = vld [vmem:[%s14980_s1 + $0x228] sm:$0xff]  }
 0x236   :  { %9624 = vmatprep.mubr.bf16.mxu1 %v15262_v24  ;;  %v2801_v1 = vmul.bf16 %v10584_v51, %v15263_v52  ;;  %v6309_v14 = vmul.bf16 %v15238_v9, %v6070_v31  ;;  %v6310_v62 = vmul.bf16 %v15239_v25, %v6071_v57  ;;  %v6559_v60 = vsel %vm11108_vm5, %v6554_v15, %v6558_v34  ;;  %v10494_v15 = vld [vmem:[%s14980_s1 + $0x230] sm:$0xff]   ;;  %v6076_v51 = vld [vmem:[%s14981_s0 + $0x9c] sm:$0xf] }
 0x237   :  { %v6569_v23 = vsel %vm11108_vm5, %v6564_v2, %v6568_v28  ;;  %9963 = vmatpush3.bf16.msra.mxu0 %v10491_v3  ;;  %v6572_v58 = vrot.slane %v6570_v54, 4  ;;  %v6311_v21 = vmul.bf16 %v15225_v55, %v6072_v40  ;;  %v13815_v34 = vsel %vm11767_vm11, %v2252_v38, %v2253_v17  ;;  %v6075_v38 = vld [vmem:[%s14981_s0 + $0x98] sm:$0xf] }
 0x238   :  { %v13811_v33 = vcombine.low %v6559_v60, %v6569_v23  ;;  %v13817_v0 = vcombine.low %v2800_v37, %v2801_v1  ;;  %v6576_v3 = vshll.u32 %v6309_v14, 16  ;;  %9964 = vmatprep.subr.bf16.mxu0 %v10492_v39  ;;  %v8559_v61 = vcombine.low %v13792_v26, %v13815_v34  ;;  %v15265_v60 = vld [vmem:[#allocation43_spill] sm:$0xff] }
 0x239   :  { %v6573_v49 = vor.u32 %v6572_v58, %v6568_v28  ;;  %v6580_v22 = vshrl.u32 %v6309_v14, 16  ;;  %v6586_v31 = vshll.u32 %v6310_v62, 16  ;;  %9917 = vmatmul.mubr.bf16.gmra.mrb[8].mxu0 %v13602_v30  ;;  %v6312_v17 = vmul.bf16 %v15226_v32, %v6073_v53  ;;  %v10586_v62 = vld [vmem:[%s14981_s0 + $0x10] sm:$0xf] }
 0x23a   :  { %v6578_v57 = vrot.slane %v6576_v3, 5  ;;  %v6313_v18 = vmul.bf16 %v15227_v20, %v6074_v13  ;;  %v6591_v5 = vshrl.u32 %v6311_v21, 16  ;;  %9920 = vmatprep.mubr.bf16.mxu0 %v13630_v45  ;;  %v6594_v54 = vshll.u32 %v6311_v21, 16  ;;  %v10587_v13 = vld [vmem:[%s14981_s0 + $0x14] sm:$0xf]  ;;  %v15266_v21 = vld [vmem:[#allocation46_spill] sm:$0xff] }
 0x23b   :  { %v6574_v44 = vrot.slane %v6573_v49, 4  ;;  %v6582_v8 = vrot.slane %v6580_v22, 4  ;;  %v6588_v37 = vrot.slane %v6586_v31, 5  ;;  %9965 = vmatpush3.bf16.msra.mxu0 %v10492_v39  ;;  %v6600_v40 = vshll.u32 %v6312_v17, 16  ;;  %v10588_v49 = vld [vmem:[%s14981_s0 + $0x18] sm:$0xf] }
 0x23c   :  { %v6593_v28 = vrot.slane %v6591_v5, 4  ;;  %v6604_v30 = vshrl.u32 %v6312_v17, 16  ;;  %v6610_v24 = vshll.u32 %v6313_v18, 16  ;;  %9966 = vmatprep.subr.bf16.mxu0 %v10493_v7  ;;  %v6596_v39 = vrot.slane %v6594_v54, 5  ;;  %v15267_v22 = vld [vmem:[#allocation45_spill] sm:$0xff] }
 0x23d   :  { %9625 = vmatmul.mubr.bf16.gmra.mrb[36].mxu1 %v8555_v11  ;;  %v6579_v45 = vsel %vm11108_vm5, %v6574_v44, %v6578_v57  ;;  %v6583_v2 = vor.u32 %v6582_v8, %v6578_v57  ;;  %v2802_v11 = vmul.bf16 %v10585_v12, %v15264_v29  ;;  %v2803_v23 = vmul.bf16 %v10586_v62, %v15265_v60  ;;  %v6077_v8 = vld [vmem:[%s14981_s0 + $0xa0] sm:$0xf]  ;;  %v10495_v54 = vld [vmem:[%s14980_s1 + $0x238] sm:$0xff]  }
 0x23e   :  { %9628 = vmatprep.mubr.bf16.mxu1 %v13651_v63  ;;  %v6602_v63 = vrot.slane %v6600_v40, 5  ;;  %v6606_v1 = vrot.slane %v6604_v30, 4  ;;  %v6612_v14 = vrot.slane %v6610_v24, 5  ;;  %v6597_v53 = vor.u32 %v6596_v39, %v6593_v28  ;;  %v6078_v24 = vld [vmem:[%s14981_s0 + $0xa4] sm:$0xf] }
 0x23f   :  { %v6584_v58 = vrot.slane %v6583_v2, 4  ;;  %v2804_v3 = vmul.bf16 %v10587_v13, %v15266_v21  ;;  %v2805_v31 = vmul.bf16 %v10588_v49, %v15267_v22  ;;  %9967 = vmatpush3.bf16.msra.mxu0 %v10493_v7  ;;  %v13859_v17 = vcombine.low %v2802_v11, %v2803_v23  ;;  %v10589_v49 = vld [vmem:[%s14981_s0 + $0x1c] sm:$0xf] }
 0x240   :  { %v6607_v57 = vor.u32 %v6606_v1, %v6602_v63  ;;  %v6314_v5 = vmul.bf16 %v15246_v47, %v6075_v38  ;;  %v6315_v44 = vmul.bf16 %v15247_v27, %v6076_v51  ;;  %9968 = vmatprep.subr.bf16.mxu0 %v10494_v15  ;;  %v6598_v7 = vrot.slane %v6597_v53, 4 }
 0x241   :  { %v6589_v28 = vsel %vm11108_vm5, %v6584_v58, %v6588_v37  ;;  %v13871_v40 = vcombine.low %v2804_v3, %v2805_v31  ;;  %v6614_v30 = vshrl.u32 %v6313_v18, 16  ;;  %9921 = vmatmul.mubr.bf16.gmra.mrb[12].mxu0 %v13694_v50  ;;  %v6316_v18 = vmul.bf16 %v15234_v35, %v6077_v8  ;;  %v15268_v31 = vld [vmem:[#allocation48_spill] sm:$0xff] }
 0x242   :  { %v13877_v2 = vcombine.low %v6579_v45, %v6589_v28  ;;  %v6608_v39 = vrot.slane %v6607_v57, 4  ;;  %v6620_v12 = vshll.u32 %v6314_v5, 16  ;;  %v6624_v11 = vshrl.u32 %v6314_v5, 16  ;;  %9924 = vmatprep.mubr.bf16.mxu0 %v13718_v19  ;;  %v2689_v19 = vld [vmem:[%s14981_s0 + $0x20] sm:$0xf]  ;;  %v15269_v5 = vld [vmem:[#allocation47_spill] sm:$0xff] }
 0x243   :  { %v6603_v37 = vsel %vm11108_vm5, %v6598_v7, %v6602_v63  ;;  %v6616_v38 = vrot.slane %v6614_v30, 4  ;;  %v6630_v51 = vshll.u32 %v6315_v44, 16  ;;  %9969 = vmatpush3.bf16.msra.mxu0 %v10494_v15  ;;  %v6317_v62 = vmul.bf16 %v15235_v43, %v6078_v24  ;;  %v6080_v28 = vld [vmem:[%s14981_s0 + $0xac] sm:$0x1] }
 0x244   :  { %v6613_v50 = vsel %vm11108_vm5, %v6608_v39, %v6612_v14  ;;  %v6622_v45 = vrot.slane %v6620_v12, 5  ;;  %v6626_v1 = vrot.slane %v6624_v11, 4  ;;  %9970 = vmatprep.subr.bf16.mxu0 %v10495_v54  ;;  %v6640_v23 = vshll.u32 %v6316_v18, 16  ;;  %v10590_v39 = vld [vmem:[%s14981_s0 + $0x30] sm:$0xf] }
 0x245   :  { %9629 = vmatmul.mubr.bf16.gmra.mrb[40].mxu1 %v8557_v41  ;;  %v13895_v15 = vcombine.low %v6603_v37, %v6613_v50  ;;  %v6617_v6 = vor.u32 %v6616_v38, %v6612_v14  ;;  %v6632_v59 = vrot.slane %v6630_v51, 5  ;;  %v6634_v41 = vshrl.u32 %v6315_v44, 16  ;;  %v10591_v37 = vld [vmem:[%s14981_s0 + $0x34] sm:$0xf] }
 0x246   :  { %9632 = vmatprep.mubr.bf16.mxu1 %v8558_v48  ;;  %v6627_v63 = vor.u32 %v6626_v1, %v6622_v45  ;;  %v6644_v58 = vshrl.u32 %v6316_v18, 16  ;;  %v6650_v53 = vshll.u32 %v6317_v62, 16  ;;  %v2806_v57 = vmul.bf16 %v10589_v49, %v15268_v31  ;;  %v6081_v18 = vld [vmem:[%s14981_s0 + $0xb8] sm:$0xf] }
 0x247   :  { %v6618_v13 = vrot.slane %v6617_v6, 4  ;;  %v6636_v3 = vrot.slane %v6634_v41, 4  ;;  %v2807_v42 = vmul.bf16 %v15269_v5, %v2689_v19  ;;  %9971 = vmatpush3.bf16.msra.mxu0 %v10495_v54  ;;  %v6642_v14 = vrot.slane %v6640_v23, 5  ;;  %v6082_v19 = vld [vmem:[%s14981_s0 + $0xbc] sm:$0xf] }
 0x248   :  { %v6628_v48 = vrot.slane %v6627_v63, 4  ;;  %v6646_v44 = vrot.slane %v6644_v58, 4  ;;  %v6652_v8 = vrot.slane %v6650_v53, 5  ;;  %v2808_v54 = vmul.bf16 %v10590_v39, %v15261_v4 }
 0x249   :  { %v6623_v7 = vsel %vm11108_vm5, %v6618_v13, %v6622_v45  ;;  %v6637_v30 = vor.u32 %v6636_v3, %v6632_v59  ;;  %v13910_v24 = vcombine.low %v2806_v57, %v2807_v42  ;;  %9925 = vmatmul.mubr.bf16.gmra.mrb[16].mxu0 %v13788_v36  ;;  %v2809_v38 = vmul.bf16 %v10591_v37, %v15263_v52 }
 0x24a   :  { %v6633_v12 = vsel %vm11108_vm5, %v6628_v48, %v6632_v59  ;;  %v6647_v11 = vor.u32 %v6646_v44, %v6642_v14  ;;  %v6318_v51 = vmul.bf16 %v15238_v9, %v6079_v16  ;;  %9928 = vmatprep.mubr.bf16.mxu0 %v13811_v33  ;;  %v6319_v45 = vmul.bf16 %v15239_v25, %v6080_v28  ;;  %v6083_v33 = vld [vmem:[%s14981_s0 + $0xc0] sm:$0xf] }
 0x24b   :  { %v13928_v50 = vcombine.low %v6623_v7, %v6633_v12  ;;  %v6638_v36 = vrot.slane %v6637_v30, 4  ;;  %v6654_v1 = vshrl.u32 %v6317_v62, 16  ;;  %v13937_v59 = vcombine.low %v2808_v54, %v2809_v38  ;;  %v10592_v30 = vld [vmem:[%s14981_s0 + $0x38] sm:$0xf] }
 0x24c   :  { %v6648_v6 = vrot.slane %v6647_v11, 4  ;;  %v6660_v41 = vshll.u32 %v6318_v51, 16  ;;  %v6664_v63 = vshrl.u32 %v6318_v51, 16  ;;  %v6670_v58 = vshll.u32 %v6319_v45, 16  ;;  %v6085_v45 = vld [vmem:[%s14981_s0 + $0xc8] sm:$0xf] }
 0x24d   :  { %9633 = vmatmul.mubr.bf16.gmra.mrb[44].mxu1 %v8559_v61  ;;  %v6643_v62 = vsel %vm11108_vm5, %v6638_v36, %v6642_v14  ;;  %v6656_v23 = vrot.slane %v6654_v1, 4  ;;  %v6320_v53 = vmul.bf16 %v15225_v55, %v6081_v18  ;;  %v6321_v13 = vmul.bf16 %v15226_v32, %v6082_v19  ;;  %v10593_v18 = vld [vmem:[%s14981_s0 + $0x3c] sm:$0xf]  ;;  %v10594_v19 = vld [vmem:[%s14981_s0 + $0x40] sm:$0xf] }
 0x24e   :  { %9652 = vmatprep.mubr.bf16.mxu1 %v13817_v0  ;;  %v6653_v26 = vsel %vm11108_vm5, %v6648_v6, %v6652_v8  ;;  %v6662_v34 = vrot.slane %v6660_v41, 5  ;;  %v6666_v61 = vrot.slane %v6664_v63, 4  ;;  %v6672_v57 = vrot.slane %v6670_v58, 5  ;;  %v10595_v41 = vld [vmem:[%s14981_s0 + $0x44] sm:$0xf] }
 0x24f   :  { %v13949_v3 = vcombine.low %v6643_v62, %v6653_v26  ;;  %v6657_v49 = vor.u32 %v6656_v23, %v6652_v8  ;;  %v6322_v0 = vmul.bf16 %v15227_v20, %v6083_v33  ;;  %v6675_v16 = vshrl.u32 %v6320_v53, 16  ;;  %v6087_v33 = vld [vmem:[%s14981_s0 + $0xd0] sm:$0xf] }
 0x250   :  { %v6667_v42 = vor.u32 %v6666_v61, %v6662_v34  ;;  %v6678_v48 = vshll.u32 %v6320_v53, 16  ;;  %v6684_v14 = vshll.u32 %v6321_v13, 16  ;;  %v6688_v28 = vshrl.u32 %v6321_v13, 16 }
 0x251   :  { %v6658_v44 = vrot.slane %v6657_v49, 4  ;;  %v6694_v7 = vshll.u32 %v6322_v0, 16  ;;  %v2810_v39 = vmul.bf16 %v10592_v30, %v15264_v29  ;;  %9929 = vmatmul.mubr.bf16.gmra.mrb[20].mxu0 %v13877_v2  ;;  %v6677_v8 = vrot.slane %v6675_v16, 4  ;;  %v6084_v2 = vld [vmem:[%s14981_s0 + $0xc4] sm:$0xf] }
 0x252   :  { %v6668_v54 = vrot.slane %v6667_v42, 4  ;;  %v6680_v12 = vrot.slane %v6678_v48, 5  ;;  %v6686_v11 = vrot.slane %v6684_v14, 5  ;;  %9932 = vmatprep.mubr.bf16.mxu0 %v13895_v15  ;;  %v6690_v38 = vrot.slane %v6688_v28, 4 }
 0x253   :  { %v6663_v37 = vsel %vm11108_vm5, %v6658_v44, %v6662_v34  ;;  %v6696_v51 = vrot.slane %v6694_v7, 5  ;;  %v2811_v36 = vmul.bf16 %v10593_v18, %v15265_v60  ;;  %v2812_v6 = vmul.bf16 %v10594_v19, %v15266_v21  ;;  %v10596_v34 = vld [vmem:[%s14980_s1 + $0x108] sm:$0xff]   ;;  %v6089_v19 = vld [vmem:[%s14981_s0 + $0xd8] sm:$0x1] }
 0x254   :  { %v6673_v15 = vsel %vm11108_vm5, %v6668_v54, %v6672_v57  ;;  %v6681_v1 = vor.u32 %v6680_v12, %v6677_v8  ;;  %v2813_v63 = vmul.bf16 %v10595_v41, %v15267_v22  ;;  %v6691_v23 = vor.u32 %v6690_v38, %v6686_v11 }
 0x255   :  { %9653 = vmatmul.mubr.bf16.vlgmr.msra.gmra.mrb[0].mxu1 %v13859_v17  ;;  %v6086_v17 = vld [vmem:[%s14981_s0 + $0xcc] sm:$0xf]  ;;  %v13989_v62 = vcombine.low %v6663_v37, %v6673_v15  ;;  %v13991_v58 = vcombine.low %v2810_v39, %v2811_v36  ;;  %v6698_v53 = vshrl.u32 %v6322_v0, 16  ;;  %v6323_v13 = vmul.bf16 %v15246_v47, %v6084_v2  ;;  %v10597_v37 = vld [vmem:[%s14980_s1 + $0x110] sm:$0xff]  }
 0x256   :  { %9656 = vmatprep.mubr.bf16.mxu1 %v13871_v40  ;;  %10028 = vmatpush3.bf16.msra.mxu1 %v13558_v56  ;;  %v6682_v26 = vrot.slane %v6681_v1, 4  ;;  %v13996_v61 = vcombine.low %v2812_v6, %v2813_v63  ;;  %v6324_v40 = vmul.bf16 %v15247_v27, %v6085_v45  ;;  %v6692_v49 = vrot.slane %v6691_v23, 4  ;;  %v2690_v39 = vld [vmem:[%s14981_s0 + $0x4c] sm:$0xf]  ;;  %v10599_v63 = vld [vmem:[%s14981_s0 + $0x5c] sm:$0xf] }
 0x257   :  { %10021 = vmatprep.subr.bf16.mxu1 %v10596_v34  ;;  %v6700_v56 = vrot.slane %v6698_v53, 4  ;;  %v6325_v57 = vmul.bf16 %v15234_v35, %v6086_v17  ;;  %v6326_v42 = vmul.bf16 %v15235_v43, %v6087_v33  ;;  %v6704_v16 = vshll.u32 %v6323_v13, 16  ;;  %v6090_v33 = vld [vmem:[%s14981_s0 + $0xe4] sm:$0xf] }
 0x258   :  { %v6687_v0 = vsel %vm11108_vm5, %v6682_v26, %v6686_v11  ;;  %v6708_v48 = vshrl.u32 %v6323_v13, 16  ;;  %v6714_v14 = vshll.u32 %v6324_v40, 16  ;;  %v6697_v44 = vsel %vm11108_vm5, %v6692_v49, %v6696_v51  ;;  %v10601_v13 = vld [vmem:[%s14980_s1 + $0x118] sm:$0xff]  }
 0x259   :  { %v6701_v28 = vor.u32 %v6700_v56, %v6696_v51  ;;  %v6718_v7 = vshrl.u32 %v6324_v40, 16  ;;  %v6724_v30 = vshll.u32 %v6325_v57, 16  ;;  %9933 = vmatmul.mubr.bf16.gmra.mrb[24].mxu0 %v13928_v50  ;;  %v8838_v54 = vcombine.low %v6687_v0, %v6697_v44  ;;  %v10598_v50 = vld [vmem:[%s14981_s0 + $0x48] sm:$0xf]  ;;  %v6092_v44 = vld [vmem:[%s14981_s0 + $0xec] sm:$0xf] }
 0x25a   :  { %10029 = vmatpush3.bf16.msra.mxu1 %v10596_v34  ;;  %v6706_v8 = vrot.slane %v6704_v16, 5  ;;  %v6710_v12 = vrot.slane %v6708_v48, 4  ;;  %v6716_v11 = vrot.slane %v6714_v14, 5  ;;  %9936 = vmatprep.mubr.bf16.mxu0 %v13949_v3  ;;  %v6728_v36 = vshrl.u32 %v6325_v57, 16  ;;  %v6088_v3 = vld [vmem:[%s14981_s0 + $0xd4] sm:$0xf] }
 0x25b   :  { %10022 = vmatprep.subr.bf16.mxu1 %v10597_v37  ;;  %v6702_v38 = vrot.slane %v6701_v28, 4  ;;  %v6720_v51 = vrot.slane %v6718_v7, 4  ;;  %v6726_v18 = vrot.slane %v6724_v30, 5  ;;  %v6734_v45 = vshll.u32 %v6326_v42, 16  ;;  %v6091_v0 = vld [vmem:[%s14981_s0 + $0xe8] sm:$0xf] }
 0x25c   :  { %v6711_v2 = vor.u32 %v6710_v12, %v6706_v8  ;;  %v2814_v15 = vmul.bf16 %v10598_v50, %v15268_v31  ;;  %v2815_v1 = vmul.bf16 %v15269_v5, %v2690_v39  ;;  %v6730_v41 = vrot.slane %v6728_v36, 4 }
 0x25d   :  { %9657 = vmatmul.mubr.bf16.gmra.mrb[4].mxu1 %v13910_v24  ;;  %v6707_v24 = vsel %vm11108_vm5, %v6702_v38, %v6706_v8  ;;  %v6721_v6 = vor.u32 %v6720_v51, %v6716_v11  ;;  %v2816_v17 = vmul.bf16 %v10599_v63, %v15261_v4  ;;  %v6736_v53 = vrot.slane %v6734_v45, 5  ;;  %v10602_v38 = vld [vmem:[%s14980_s1 + $0x120] sm:$0xff]  }
 0x25e   :  { %9660 = vmatprep.mubr.bf16.mxu1 %v13937_v59  ;;  %10030 = vmatpush3.bf16.msra.mxu1 %v10597_v37  ;;  %v6712_v23 = vrot.slane %v6711_v2, 4  ;;  %v14036_v26 = vcombine.low %v2814_v15, %v2815_v1  ;;  %v10600_v59 = vld [vmem:[%s14981_s0 + $0x60] sm:$0xf]  ;;  %v6731_v49 = vor.u32 %v6730_v41, %v6726_v18  ;;  %v6327_v56 = vmul.bf16 %v15238_v9, %v6088_v3 }
 0x25f   :  { %v2817_v34 = vmul.bf16 %v10600_v59, %v15263_v52  ;;  %10023 = vmatprep.subr.bf16.mxu1 %v10601_v13  ;;  %v6722_v40 = vrot.slane %v6721_v6, 4  ;;  %v6328_v57 = vmul.bf16 %v15239_v25, %v6089_v19  ;;  %v6738_v14 = vshrl.u32 %v6326_v42, 16  ;;  %v6093_v6 = vld [vmem:[%s14981_s0 + $0xf0] sm:$0xf] }
 0x260   :  { %v6717_v16 = vsel %vm11108_vm5, %v6712_v23, %v6716_v11  ;;  %v6329_v28 = vmul.bf16 %v15225_v55, %v6090_v33  ;;  %v6732_v39 = vrot.slane %v6731_v49, 4  ;;  %v6744_v8 = vshll.u32 %v6327_v56, 16  ;;  %v10605_v33 = vld [vmem:[%s14981_s0 + $0x68] sm:$0xf] }
 0x261   :  { %v14052_v48 = vcombine.low %v2816_v17, %v2817_v34  ;;  %v8839_v7 = vcombine.low %v6707_v24, %v6717_v16  ;;  %v6727_v30 = vsel %vm11108_vm5, %v6722_v40, %v6726_v18  ;;  %9937 = vmatmul.mubr.bf16.gmra.mrb[28].mxu0 %v13989_v62  ;;  %v6740_v12 = vrot.slane %v6738_v14, 4  ;;  %v10606_v40 = vld [vmem:[%s14981_s0 + $0x6c] sm:$0xf]  ;;  %v10607_v16 = vld [vmem:[%s14981_s0 + $0x70] sm:$0xf] }
 0x262   :  { %10031 = vmatpush3.bf16.msra.mxu1 %v10601_v13  ;;  %v6748_v11 = vshrl.u32 %v6327_v56, 16  ;;  %v6754_v37 = vshll.u32 %v6328_v57, 16  ;;  %v6330_v42 = vmul.bf16 %v15226_v32, %v6091_v0  ;;  %9940 = vmatprep.mubr.bf16.mxu0 %v8838_v54  ;;  %v6737_v55 = vsel %vm11108_vm5, %v6732_v39, %v6736_v53 }
 0x263   :  { %10024 = vmatprep.subr.bf16.mxu1 %v10602_v38  ;;  %v6746_v51 = vrot.slane %v6744_v8, 5  ;;  %v6331_v18 = vmul.bf16 %v15227_v20, %v6092_v44  ;;  %v6759_v36 = vshrl.u32 %v6329_v28, 16  ;;  %v8840_v62 = vcombine.low %v6727_v30, %v6737_v55  ;;  %v10603_v20 = vld [vmem:[%s14981_s0 + $0x64] sm:$0xf]  ;;  %v6095_v8 = vld [vmem:[%s14981_s0 + $0xf8] sm:$0xf] }
 0x264   :  { %v6741_v2 = vor.u32 %v6740_v12, %v6736_v53  ;;  %v6750_v45 = vrot.slane %v6748_v11, 4  ;;  %v6756_v50 = vrot.slane %v6754_v37, 5  ;;  %v6762_v15 = vshll.u32 %v6329_v28, 16  ;;  %v6094_v53 = vld [vmem:[%s14981_s0 + $0xf4] sm:$0xf] }
 0x265   :  { %9661 = vmatmul.mubr.bf16.gmra.mrb[8].mxu1 %v13991_v58  ;;  %v6761_v32 = vrot.slane %v6759_v36, 4  ;;  %v6768_v1 = vshll.u32 %v6330_v42, 16  ;;  %v6772_v3 = vshrl.u32 %v6330_v42, 16  ;;  %v6778_v24 = vshll.u32 %v6331_v18, 16  ;;  %v6096_v12 = vld [vmem:[%s14981_s0 + $0xfc] sm:$0xf] }
 0x266   :  { %9664 = vmatprep.mubr.bf16.mxu1 %v13996_v61  ;;  %10032 = vmatpush3.bf16.msra.mxu1 %v10602_v38  ;;  %v6742_v54 = vrot.slane %v6741_v2, 4  ;;  %v6751_v19 = vor.u32 %v6750_v45, %v6746_v51  ;;  %v2818_v58 = vmul.bf16 %v10603_v20, %v15264_v29  ;;  %v10604_v61 = vld [vmem:[%s14980_s1 + $0x128] sm:$0xff]   ;;  %v6764_v41 = vrot.slane %v6762_v15, 5  ;;  %v2691_v15 = vld [vmem:[%s14981_s0 + $0x78] sm:$0xf] }
 0x267   :  { %10025 = vmatprep.subr.bf16.mxu1 %v10604_v61  ;;  %v6770_v63 = vrot.slane %v6768_v1, 5  ;;  %v6774_v17 = vrot.slane %v6772_v3, 4  ;;  %v2819_v23 = vmul.bf16 %v10605_v33, %v15265_v60  ;;  %v6780_v13 = vrot.slane %v6778_v24, 5  ;;  %v10610_v20 = vld [vmem:[%s14981_s0 + $0x74] sm:$0xf] }
 0x268   :  { %v6747_v59 = vsel %vm11108_vm5, %v6742_v54, %v6746_v51  ;;  %v6752_v34 = vrot.slane %v6751_v19, 4  ;;  %v2820_v49 = vmul.bf16 %v10606_v40, %v15266_v21  ;;  %v6765_v56 = vor.u32 %v6764_v41, %v6761_v32  ;;  %v10609_v19 = vld [vmem:[%s14980_s1 + $0x138] sm:$0xff]   ;;  %v6097_v33 = vld [vmem:[%s14981_s0 + $0x100] sm:$0xf] }
 0x269   :  { %v6775_v57 = vor.u32 %v6774_v17, %v6770_v63  ;;  %v14093_v0 = vcombine.low %v2818_v58, %v2819_v23  ;;  %v2821_v14 = vmul.bf16 %v10607_v16, %v15267_v22  ;;  %9941 = vmatmul.mubr.bf16.gmra.mrb[32].mxu0 %v8839_v7  ;;  %v6332_v28 = vmul.bf16 %v15246_v47, %v6093_v6  ;;  %v10608_v7 = vld [vmem:[%s14980_s1 + $0x130] sm:$0xff]   ;;  %v6098_v6 = vld [vmem:[%s14981_s0 + $0x104] sm:$0x1] }
 0x26a   :  { %10033 = vmatpush3.bf16.msra.mxu1 %v10604_v61  ;;  %v6757_v44 = vsel %vm11108_vm5, %v6752_v34, %v6756_v50  ;;  %v6333_v30 = vmul.bf16 %v15247_v27, %v6094_v53  ;;  %v6782_v39 = vshrl.u32 %v6331_v18, 16  ;;  %9944 = vmatprep.mubr.bf16.mxu0 %v8840_v62  ;;  %v6766_v37 = vrot.slane %v6765_v56, 4  ;;  %v10611_v34 = vld [vmem:[%s14981_s0 + $0x88] sm:$0xf] }
 0x26b   :  { %10026 = vmatprep.subr.bf16.mxu1 %v10608_v7  ;;  %v8841_v11 = vcombine.low %v6747_v59, %v6757_v44  ;;  %v6776_v47 = vrot.slane %v6775_v57, 4  ;;  %v8602_v42 = vcombine.low %v2820_v49, %v2821_v14  ;;  %v6788_v38 = vshll.u32 %v6332_v28, 16  ;;  %v10612_v57 = vld [vmem:[%s14981_s0 + $0x8c] sm:$0xf] }
 0x26c   :  { %v6784_v27 = vrot.slane %v6782_v39, 4  ;;  %v6792_v55 = vshrl.u32 %v6332_v28, 16  ;;  %v6798_v51 = vshll.u32 %v6333_v30, 16  ;;  %v6771_v18 = vsel %vm11108_vm5, %v6766_v37, %v6770_v63  ;;  %v7276_v39 = vld [vmem:[%s14981_s0 + $0x8] sm:$0xe] }
 0x26d   :  { %9665 = vmatmul.mubr.bf16.gmra.mrb[12].mxu1 %v14036_v26  ;;  %v6781_v36 = vsel %vm11108_vm5, %v6776_v47, %v6780_v13  ;;  %v6334_v62 = vmul.bf16 %v15234_v35, %v6095_v8  ;;  %v6335_v2 = vmul.bf16 %v15235_v43, %v6096_v12  ;;  %v6790_v32 = vrot.slane %v6788_v38, 5 }
 0x26e   :  { %9668 = vmatprep.mubr.bf16.mxu1 %v14052_v48  ;;  %v8842_v45 = vcombine.low %v6771_v18, %v6781_v36  ;;  %v6785_v50 = vor.u32 %v6784_v27, %v6780_v13  ;;  %v6794_v26 = vrot.slane %v6792_v55, 4  ;;  %10034 = vmatpush3.bf16.msra.mxu1 %v10608_v7  ;;  %v6800_v48 = vrot.slane %v6798_v51, 5 }
 0x26f   :  { %v6802_v1 = vshrl.u32 %v6333_v30, 16  ;;  %v6808_v3 = vshll.u32 %v6334_v62, 16  ;;  %v6812_v54 = vshrl.u32 %v6334_v62, 16  ;;  %10027 = vmatprep.subr.bf16.mxu1 %v10609_v19  ;;  %v6818_v24 = vshll.u32 %v6335_v2, 16 }
 0x270   :  { %v6786_v35 = vrot.slane %v6785_v50, 4  ;;  %v6795_v43 = vor.u32 %v6794_v26, %v6790_v32  ;;  %v2822_v58 = vmul.bf16 %v10610_v20, %v15268_v31  ;;  %v2823_v17 = vmul.bf16 %v15269_v5, %v2691_v15  ;;  %v10613_v26 = vld [vmem:[%s14981_s0 + $0x10] sm:$0xf] }
 0x271   :  { %v6804_v61 = vrot.slane %v6802_v1, 4  ;;  %v6810_v41 = vrot.slane %v6808_v3, 5  ;;  %v6814_v63 = vrot.slane %v6812_v54, 4  ;;  %9945 = vmatmul.mubr.bf16.gmra.mrb[36].mxu0 %v8841_v11  ;;  %v6820_v59 = vrot.slane %v6818_v24, 5  ;;  %v15273_v15 = vld [vmem:[#allocation52_spill] sm:$0xff] }
 0x272   :  { %v6791_v23 = vsel %vm11108_vm5, %v6786_v35, %v6790_v32  ;;  %v6796_v53 = vrot.slane %v6795_v43, 4  ;;  %v2824_v13 = vmul.bf16 %v10611_v34, %v15261_v4  ;;  %10035 = vmatpush3.bf16.msra.mxu1 %v10609_v19  ;;  %9948 = vmatprep.mubr.bf16.mxu0 %v8842_v45  ;;  %v8603_v56 = vcombine.low %v2822_v58, %v2823_v17  ;;  %v15271_v45 = vld [vmem:[#allocation49_spill] sm:$0xff]  ;;  %v10614_v19 = vld [vmem:[%s14981_s0 + $0xc] sm:$0xf]  ;;  %v10615_v43 = vld [vmem:[%s14981_s0 + $0x90] sm:$0xf] }
 0x273   :  { %v6805_v40 = vor.u32 %v6804_v61, %v6800_v48  ;;  %v6815_v49 = vor.u32 %v6814_v63, %v6810_v41  ;;  %v2825_v16 = vmul.bf16 %v10612_v57, %v15263_v52  ;;  %v6336_v44 = vmul.bf16 %v15238_v9, %v6097_v33  ;;  %v10616_v58 = vld [vmem:[%s14981_s0 + $0x94] sm:$0xf]  ;;  %v10617_v61 = vld [vmem:[%s14981_s0 + $0x98] sm:$0xf]  ;;  %v10618_v63 = vld [vmem:[%s14981_s0 + $0x9c] sm:$0xf] }
 0x274   :  { %v6801_v14 = vsel %vm11108_vm5, %v6796_v53, %v6800_v48  ;;  %v6337_v28 = vmul.bf16 %v15239_v25, %v6098_v6  ;;  %v6822_v30 = vshrl.u32 %v6335_v2, 16  ;;  %v15270_v25 = vld [vmem:[#allocation50_spill] sm:$0xff]  ;;  %v7429_v48 = vmul.bf16 %v10613_v26, %v15273_v15  ;;  %v10619_v57 = vld [vmem:[%s14981_s0 + $0x1c] sm:$0xf] }
 0x275   :  { %9669 = vmatmul.mubr.bf16.gmra.mrb[16].mxu1 %v14093_v0  ;;  %v8843_v8 = vcombine.low %v6791_v23, %v6801_v14  ;;  %v6806_v12 = vrot.slane %v6805_v40, 4  ;;  %v6816_v7 = vrot.slane %v6815_v49, 4  ;;  %v8604_v11 = vcombine.low %v2824_v13, %v2825_v16  ;;  %v15275_v16 = vld [vmem:[#allocation54_spill] sm:$0xff] }
 0x276   :  { %9672 = vmatprep.mubr.bf16.mxu1 %v8602_v42  ;;  %v6824_v37 = vrot.slane %v6822_v30, 4  ;;  %v6828_v47 = vshll.u32 %v6336_v44, 16  ;;  %v6832_v0 = vshrl.u32 %v6336_v44, 16  ;;  %v6838_v27 = vshll.u32 %v6337_v28, 16  ;;  %v15276_v30 = vld [vmem:[#allocation57_spill] sm:$0xff] }
 0x277   :  { %v6811_v38 = vsel %vm11108_vm5, %v6806_v12, %v6810_v41  ;;  %v6821_v9 = vsel %vm11108_vm5, %v6816_v7, %v6820_v59  ;;  %v7396_v55 = vrot.slane %v15270_v25, 4  ;;  %v7427_v51 = vmul.bf16 %v15270_v25, %v7276_v39 }
 0x278   :  { %v8844_v18 = vcombine.low %v6811_v38, %v6821_v9  ;;  %v6825_v42 = vor.u32 %v6824_v37, %v6820_v59  ;;  %v6830_v36 = vrot.slane %v6828_v47, 5  ;;  %v6834_v62 = vrot.slane %v6832_v0, 4  ;;  %v15274_v59 = vld [vmem:[#allocation15_spill] sm:$0xff]  ;;  %v15277_v37 = vld [vmem:[#allocation17_spill] sm:$0xff] }
 0x279   :  { %v6840_v2 = vrot.slane %v6838_v27, 5  ;;  %v14164_v32 = vsel %vm11215_vm8, %v7396_v55, %v15271_v45  ;;  %v8862_v1 = vrot.slane %v7427_v51, 9  ;;  %9949 = vmatmul.mubr.bf16.gmra.mrb[40].mxu0 %v8843_v8  ;;  %v2826_v24 = vmul.bf16 %v10615_v43, %v15264_v29  ;;  %v2692_v8 = vld [vmem:[%s14981_s0 + $0xa4] sm:$0xf]  ;;  %v10621_v55 = vld [vmem:[%s14981_s0 + $0xa0] sm:$0xf] }
 0x27a   :  { %v6826_v3 = vrot.slane %v6825_v42, 4  ;;  %v6835_v54 = vor.u32 %v6834_v62, %v6830_v36  ;;  %v7428_v35 = vmul.bf16 %v10614_v19, %v14164_v32  ;;  %9952 = vmatprep.mubr.bf16.mxu0 %v8844_v18  ;;  %v7540_v20 = vrot.slane %v7429_v48, 5  ;;  %v7277_v18 = vld [vmem:[%s14981_s0 + $0x34] sm:$0xe]  ;;  %v10623_v48 = vld [vmem:[%s14981_s0 + $0xb8] sm:$0xf] }
 0x27b   :  { %v2827_v6 = vmul.bf16 %v10616_v58, %v15265_v60  ;;  %v2828_v41 = vmul.bf16 %v10617_v61, %v15266_v21  ;;  %v2829_v17 = vmul.bf16 %v10618_v63, %v15267_v22  ;;  %v7545_v34 = vrot.slane %v15274_v59, 4  ;;  %v10625_v43 = vld [vmem:[%s14981_s0 + $0x28] sm:$0x1] }
 0x27c   :  { %v6831_v33 = vsel %vm11108_vm5, %v6826_v3, %v6830_v36  ;;  %v6836_v23 = vrot.slane %v6835_v54, 4  ;;  %v7537_v53 = vrot.slane %v7428_v35, 5  ;;  %v7542_v13 = vrot.slane %v7540_v20, 4  ;;  %v10624_v3 = vld [vmem:[%s14981_s0 + $0x24] sm:$0xf]  ;;  %v15278_v54 = vld [vmem:[#allocation60_spill] sm:$0xff] }
 0x27d   :  { %9673 = vmatmul.mubr.bf16.gmra.mrb[20].mxu1 %v8603_v56  ;;  %v8605_v40 = vcombine.low %v2826_v24, %v2827_v6  ;;  %v8606_v49 = vcombine.low %v2828_v41, %v2829_v17  ;;  %v7432_v14 = vmul.bf16 %v10619_v57, %v15275_v16  ;;  %v14204_v39 = vsel %vm11767_vm11, %v7545_v34, %v15276_v30  ;;  %v15279_v24 = vld [vmem:[#allocation18_spill] sm:$0xff]  ;;  %v10626_v17 = vld [vmem:[%s14981_s0 + $0x38] sm:$0xf] }
 0x27e   :  { %9676 = vmatprep.mubr.bf16.mxu1 %v8604_v11  ;;  %v6841_v56 = vsel %vm11108_vm5, %v6836_v23, %v6840_v2  ;;  %v7538_v44 = vsel %vm11767_vm11, %v8862_v1, %v7537_v53  ;;  %v7539_v28 = vrot.slane %v7537_v53, 4  ;;  %v14212_v7 = vsel %vm11767_vm11, %v7542_v13, %v15274_v59  ;;  %v10620_v11 = vld [vmem:[%s14981_s0 + $0x20] sm:$0xf]  ;;  %v10622_v2 = vld [vmem:[%s14981_s0 + $0xb4] sm:$0xf] }
 0x27f   :  { %v8845_v12 = vcombine.low %v6831_v33, %v6841_v56  ;;  %v7433_v47 = vmul.bf16 %v10620_v11, %v15277_v37  ;;  %v7548_v0 = vrot.slane %v15276_v30, 4  ;;  %v8885_v38 = vcombine.low %v14212_v7, %v14204_v39  ;;  %v10627_v59 = vld [vmem:[%s14981_s0 + $0x3c] sm:$0xf]  ;;  %v10630_v39 = vld [vmem:[%s14981_s0 + $0xc4] sm:$0xf] }
 0x280   :  { %v7541_v27 = vsel %vm11767_vm11, %v7539_v28, %v7540_v20  ;;  %v7549_v9 = vrot.slane %v7432_v14, 5  ;;  %v2830_v51 = vmul.bf16 %v10621_v55, %v15268_v31  ;;  %v2831_v62 = vmul.bf16 %v15269_v5, %v2692_v8  ;;  %v10628_v56 = vld [vmem:[%s14981_s0 + $0xbc] sm:$0xf]  ;;  %v10629_v28 = vld [vmem:[%s14981_s0 + $0xc0] sm:$0xf] }
 0x281   :  { %v8884_v42 = vcombine.low %v7538_v44, %v7541_v27  ;;  %v7552_v36 = vrot.slane %v7433_v47, 5  ;;  %v2832_v45 = vmul.bf16 %v10622_v2, %v15261_v4  ;;  %9953 = vmatmul.mubr.bf16.gmra.mrb[44].mxu0 %v8845_v12  ;;  %v2833_v1 = vmul.bf16 %v10623_v48, %v15263_v52  ;;  %v10631_v12 = vld [vmem:[%s14981_s0 + $0xc8] sm:$0xf]  ;;  %v10632_v27 = vld [vmem:[%s14981_s0 + $0x40] sm:$0xf] }
 0x282   :  { %v7550_v50 = vsel %vm11767_vm11, %v7548_v0, %v7549_v9  ;;  %v7551_v26 = vrot.slane %v7549_v9, 4  ;;  %v7434_v19 = vmul.bf16 %v10624_v3, %v15278_v54  ;;  %v8607_v35 = vcombine.low %v2830_v51, %v2831_v62  ;;  %v15280_v9 = vld [vmem:[#allocation13_spill] sm:$0xff] }
 0x283   :  { %9972 = vmatprep.mubr.bf16.mxu0 %v8884_v42  ;;  %v7435_v20 = vmul.bf16 %v10625_v43, %v15279_v24  ;;  %v7554_v58 = vrot.slane %v7552_v36, 4  ;;  %v7436_v6 = vmul.bf16 %v15270_v25, %v7277_v18  ;;  %v8608_v41 = vcombine.low %v2832_v45, %v2833_v1  ;;  %v15281_v62 = vld [vmem:[#allocation53_spill] sm:$0xff]  ;;  %v2693_v45 = vld [vmem:[%s14981_s0 + $0xd0] sm:$0xf]  ;;  %v10634_v1 = vld [vmem:[%s14981_s0 + $0x48] sm:$0xf] }
 0x284   :  { %v7553_v61 = vsel %vm11767_vm11, %v7551_v26, %v7552_v36  ;;  %v7555_v63 = vrot.slane %v7434_v19, 5  ;;  %v7437_v33 = vmul.bf16 %v10626_v17, %v14164_v32  ;;  %v7438_v34 = vmul.bf16 %v10627_v59, %v15273_v15  ;;  %v10633_v36 = vld [vmem:[%s14981_s0 + $0x44] sm:$0xf]  ;;  %v10637_v59 = vld [vmem:[%s14981_s0 + $0xe0] sm:$0xf] }
 0x285   :  { %9677 = vmatmul.mubr.bf16.gmra.mrb[24].mxu1 %v8605_v40  ;;  %v8886_v23 = vcombine.low %v7550_v50, %v7553_v61  ;;  %v7558_v53 = vrot.slane %v7435_v20, 5  ;;  %v8863_v13 = vrot.slane %v7436_v6, 9  ;;  %v2835_v30 = vmul.bf16 %v10629_v28, %v15265_v60  ;;  %v10635_v20 = vld [vmem:[%s14981_s0 + $0x4c] sm:$0xf]  ;;  %v10640_v28 = vld [vmem:[%s14981_s0 + $0x54] sm:$0x1] }
 0x286   :  { %9680 = vmatprep.mubr.bf16.mxu1 %v8606_v49  ;;  %v14262_v40 = vsel %vm11767_vm11, %v7554_v58, %v7555_v63  ;;  %v7557_v57 = vrot.slane %v7555_v63, 4  ;;  %v7562_v14 = vrot.slane %v7437_v33, 5  ;;  %v2834_v49 = vmul.bf16 %v10628_v56, %v15264_v29  ;;  %v10636_v58 = vld [vmem:[%s14981_s0 + $0xcc] sm:$0xf] }
 0x287   :  { %v7565_v44 = vrot.slane %v7438_v34, 5  ;;  %v2836_v8 = vmul.bf16 %v10630_v39, %v15266_v21  ;;  %v2837_v7 = vmul.bf16 %v10631_v12, %v15267_v22  ;;  %v7439_v55 = vmul.bf16 %v10632_v27, %v15280_v9 }
 0x288   :  { %v7559_v11 = vsel %vm11767_vm11, %v7557_v57, %v7558_v53  ;;  %v7563_v47 = vsel %vm11767_vm11, %v8863_v13, %v7562_v14  ;;  %v7564_v0 = vrot.slane %v7562_v14, 4  ;;  %v14289_v18 = vcombine.low %v2834_v49, %v2835_v30 }
 0x289   :  { %v8887_v51 = vcombine.low %v14262_v40, %v7559_v11  ;;  %v14291_v42 = vcombine.low %v2836_v8, %v2837_v7  ;;  %v7440_v2 = vmul.bf16 %v10633_v36, %v15281_v62  ;;  %9973 = vmatmul.mubr.bf16.vlgmr.msra.gmra.mrb[0].mxu0 %v8885_v38  ;;  %v7567_v26 = vrot.slane %v7565_v44, 4  ;;  %v7278_v40 = vld [vmem:[%s14981_s0 + $0x60] sm:$0xe] }
 0x28a   :  { %v7566_v50 = vsel %vm11767_vm11, %v7564_v0, %v7565_v44  ;;  %v7568_v48 = vrot.slane %v7439_v55, 5  ;;  %v7441_v3 = vmul.bf16 %v10634_v1, %v15275_v16  ;;  %9976 = vmatprep.mubr.bf16.mxu0 %v8886_v23  ;;  %v7442_v38 = vmul.bf16 %v10635_v20, %v15277_v37  ;;  %v10641_v0 = vld [vmem:[%s14981_s0 + $0x64] sm:$0xf]  ;;  %v10642_v55 = vld [vmem:[%s14981_s0 + $0x68] sm:$0xf] }
 0x28b   :  { %v8888_v19 = vcombine.low %v7563_v47, %v7566_v50  ;;  %v7571_v43 = vrot.slane %v7440_v2, 5  ;;  %v2838_v6 = vmul.bf16 %v10636_v58, %v15268_v31  ;;  %v2839_v33 = vmul.bf16 %v15269_v5, %v2693_v45  ;;  %v10645_v20 = vld [vmem:[%s14981_s0 + $0xf0] sm:$0xf] }
 0x28c   :  { %v14316_v61 = vsel %vm11767_vm11, %v7567_v26, %v7568_v48  ;;  %v7570_v63 = vrot.slane %v7568_v48, 4  ;;  %v7574_v17 = vrot.slane %v7441_v3, 5  ;;  %v7577_v53 = vrot.slane %v7442_v38, 5  ;;  %v10643_v26 = vld [vmem:[%s14981_s0 + $0xe8] sm:$0xf] }
 0x28d   :  { %9681 = vmatmul.mubr.bf16.gmra.mrb[28].mxu1 %v8607_v35  ;;  %v7573_v23 = vrot.slane %v7571_v43, 4  ;;  %v2840_v34 = vmul.bf16 %v10637_v59, %v15261_v4  ;;  %v10638_v35 = vld [vmem:[%s14981_s0 + $0xe4] sm:$0xf]  ;;  %v14334_v14 = vcombine.low %v2838_v6, %v2839_v33  ;;  %v10639_v4 = vld [vmem:[%s14981_s0 + $0x50] sm:$0xf]  ;;  %v7444_v30 = vmul.bf16 %v10640_v28, %v15279_v24 }
 0x28e   :  { %9684 = vmatprep.mubr.bf16.mxu1 %v8608_v41  ;;  %v2841_v13 = vmul.bf16 %v10638_v35, %v15263_v52  ;;  %v14332_v41 = vsel %vm11767_vm11, %v7570_v63, %v7571_v43  ;;  %v7576_v57 = vrot.slane %v7574_v17, 4  ;;  %v7443_v56 = vmul.bf16 %v10639_v4, %v15278_v54  ;;  %v10644_v43 = vld [vmem:[%s14981_s0 + $0xec] sm:$0xf]  ;;  %v3357_v33 = vld [vmem:[%s14981_s0 + $0x88] sm:$0xf] }
 0x28f   :  { %v8889_v52 = vcombine.low %v14316_v61, %v14332_v41  ;;  %v14344_v49 = vsel %vm11767_vm11, %v7573_v23, %v7574_v17  ;;  %v7579_v8 = vrot.slane %v7577_v53, 4  ;;  %v7445_v7 = vmul.bf16 %v15270_v25, %v7278_v40  ;;  %v10650_v41 = vld [vmem:[%s14981_s0 + $0x78] sm:$0xf] }
 0x290   :  { %v14346_v44 = vcombine.low %v2840_v34, %v2841_v13  ;;  %v14354_v39 = vsel %vm11767_vm11, %v7576_v57, %v7577_v53  ;;  %v7580_v12 = vrot.slane %v7443_v56, 5  ;;  %v7583_v47 = vrot.slane %v7444_v30, 5  ;;  %v10649_v13 = vld [vmem:[%s14981_s0 + $0x74] sm:$0xf]  ;;  %v10651_v4 = vld [vmem:[%s14981_s0 + $0xf8] sm:$0xf] }
 0x291   :  { %v8890_v11 = vcombine.low %v14344_v49, %v14354_v39  ;;  %v7446_v27 = vmul.bf16 %v10641_v0, %v14164_v32  ;;  %v7447_v36 = vmul.bf16 %v10642_v55, %v15273_v15  ;;  %9977 = vmatmul.mubr.bf16.gmra.mrb[4].mxu0 %v8887_v51  ;;  %v8864_v50 = vrot.slane %v7445_v7, 9  ;;  %v15283_v55 = vld [vmem:[#allocation3_spill] sm:$0xff] }
 0x292   :  { %v14369_v2 = vsel %vm11767_vm11, %v7579_v8, %v7580_v12  ;;  %v7582_v45 = vrot.slane %v7580_v12, 4  ;;  %v2842_v48 = vmul.bf16 %v10643_v26, %v15264_v29  ;;  %9980 = vmatprep.mubr.bf16.mxu0 %v8888_v19  ;;  %v2843_v51 = vmul.bf16 %v10644_v43, %v15265_v60  ;;  %v10646_v19 = vld [vmem:[%s14981_s0 + $0xf4] sm:$0xf]  ;;  %v10647_v60 = vld [vmem:[%s14981_s0 + $0x6c] sm:$0xf] }
 0x293   :  { %v7587_v1 = vrot.slane %v7446_v27, 5  ;;  %v7590_v3 = vrot.slane %v7447_v36, 5  ;;  %v2844_v38 = vmul.bf16 %v10645_v20, %v15266_v21  ;;  %v2845_v58 = vmul.bf16 %v10646_v19, %v15267_v22  ;;  %v10648_v21 = vld [vmem:[%s14981_s0 + $0x70] sm:$0xf] }
 0x294   :  { %v14386_v29 = vsel %vm11767_vm11, %v7582_v45, %v7583_v47  ;;  %v7448_v6 = vmul.bf16 %v10647_v60, %v15280_v9  ;;  %v14405_v17 = vcombine.low %v2842_v48, %v2843_v51  ;;  %v7450_v40 = vmul.bf16 %v10649_v13, %v15275_v16  ;;  %v15282_v47 = vld [vmem:[#allocation2_spill] sm:$0xff]  ;;  %v10653_v45 = vld [vmem:[%s14981_s0 + $0x90] sm:$0xf] }
 0x295   :  { %9685 = vmatmul.mubr.bf16.gmra.mrb[32].mxu1 %v14289_v18  ;;  %v7449_v18 = vmul.bf16 %v10648_v21, %v15281_v62  ;;  %v8891_v61 = vcombine.low %v14369_v2, %v14386_v29  ;;  %v7588_v22 = vsel %vm11767_vm11, %v8864_v50, %v7587_v1  ;;  %v7589_v63 = vrot.slane %v7587_v1, 4  ;;  %v15284_v50 = vld [vmem:[#allocation4_spill] sm:$0xff]  ;;  %v15285_v29 = vld [vmem:[#allocation55_spill] sm:$0xff] }
 0x296   :  { %9688 = vmatprep.mubr.bf16.mxu1 %v14291_v42  ;;  %v14410_v23 = vcombine.low %v2844_v38, %v2845_v58  ;;  %v7592_v53 = vrot.slane %v7590_v3, 4  ;;  %v7593_v59 = vrot.slane %v7448_v6, 5  ;;  %v2694_v42 = vld [vmem:[%s14981_s0 + $0xfc] sm:$0xf]  ;;  %v7451_v57 = vmul.bf16 %v10650_v41, %v15277_v37  ;;  %v10655_v6 = vld [vmem:[%s14981_s0 + $0x80] sm:$0x1] }
 0x297   :  { %v7596_v34 = vrot.slane %v7449_v18, 5  ;;  %v7591_v35 = vsel %vm11767_vm11, %v7589_v63, %v7590_v3  ;;  %v2846_v56 = vmul.bf16 %v10651_v4, %v15268_v31  ;;  %v7599_v8 = vrot.slane %v7450_v40, 5  ;;  %v10652_v31 = vld [vmem:[%s14981_s0 + $0x8c] sm:$0xf]  ;;  %v10656_v4 = vld [vmem:[%s14981_s0 + $0x90] sm:$0xf] }
 0x298   :  { %v8892_v49 = vcombine.low %v7588_v22, %v7591_v35  ;;  %v14431_v28 = vsel %vm11767_vm11, %v7592_v53, %v7593_v59  ;;  %v7595_v30 = vrot.slane %v7593_v59, 4  ;;  %v7602_v12 = vrot.slane %v7451_v57, 5 }
 0x299   :  { %v7598_v39 = vrot.slane %v7596_v34, 4  ;;  %v2847_v7 = vmul.bf16 %v15269_v5, %v2694_v42  ;;  %v3596_v0 = vmul.bf16 %v15282_v47, %v3357_v33  ;;  %9981 = vmatmul.mubr.bf16.gmra.mrb[8].mxu0 %v8889_v52  ;;  %v3597_v36 = vmul.bf16 %v10652_v31, %v15283_v55  ;;  %v10654_v5 = vld [vmem:[%s14981_s0 + $0x7c] sm:$0xf] }
 0x29a   :  { %v14437_v27 = vsel %vm11767_vm11, %v7595_v30, %v7596_v34  ;;  %v3598_v26 = vmul.bf16 %v10653_v45, %v15284_v50  ;;  %v7452_v52 = vmul.bf16 %v10654_v5, %v15278_v54  ;;  %9984 = vmatprep.mubr.bf16.mxu0 %v8890_v11  ;;  %v7601_v3 = vrot.slane %v7599_v8, 4  ;;  %v10657_v30 = vld [vmem:[%s14981_s0 + $0x94] sm:$0xf] }
 0x29b   :  { %v8893_v48 = vcombine.low %v14431_v28, %v14437_v27  ;;  %v14455_v1 = vsel %vm11767_vm11, %v7598_v39, %v7599_v8  ;;  %v14457_v43 = vcombine.low %v2846_v56, %v2847_v7  ;;  %v3876_v51 = vshrl.u32 %v3596_v0, 16  ;;  %v10663_v27 = vld [vmem:[%s14981_s0 + $0xa4] sm:$0xf] }
 0x29c   :  { %v3879_v20 = vshll.u32 %v3596_v0, 16  ;;  %v3885_v38 = vshll.u32 %v3597_v36, 16  ;;  %v3889_v19 = vshrl.u32 %v3597_v36, 16  ;;  %v14463_v11 = vsel %vm11767_vm11, %v7601_v3, %v7602_v12 }
 0x29d   :  { %9689 = vmatmul.mubr.bf16.gmra.mrb[36].mxu1 %v14334_v14  ;;  %v3895_v58 = vshll.u32 %v3598_v26, 16  ;;  %v3899_v60 = vshrl.u32 %v3598_v26, 16  ;;  %v7453_v21 = vmul.bf16 %v10655_v6, %v15279_v24  ;;  %v7279_v14 = vld [vmem:[%s14981_s0 + $0x8c] sm:$0xe]  ;;  %v8894_v18 = vcombine.low %v14455_v1, %v14463_v11  ;;  %v15287_v1 = vld [vmem:[#allocation8_spill] sm:$0xff] }
 0x29e   :  { %9692 = vmatprep.mubr.bf16.mxu1 %v14346_v44  ;;  %v3878_v44 = vrot.slane %v3876_v51, 4  ;;  %v3881_v22 = vrot.slane %v3879_v20, 5  ;;  %v3887_v63 = vrot.slane %v3885_v38, 5  ;;  %v3891_v33 = vrot.slane %v3889_v19, 4 }
 0x29f   :  { %v3897_v53 = vrot.slane %v3895_v58, 5  ;;  %v3901_v59 = vrot.slane %v3899_v60, 4  ;;  %v7604_v34 = vrot.slane %v7602_v12, 4  ;;  %v7605_v35 = vrot.slane %v7452_v52, 5  ;;  %v15288_v60 = vld [vmem:[#allocation10_spill] sm:$0xff] }
 0x2a0   :  { %v3882_v42 = vor.u32 %v3881_v22, %v3878_v44  ;;  %v7608_v13 = vrot.slane %v7453_v21, 5  ;;  %v7454_v40 = vmul.bf16 %v15270_v25, %v7279_v14  ;;  %v3892_v41 = vor.u32 %v3891_v33, %v3887_v63  ;;  %v15289_v14 = vld [vmem:[#allocation16_spill] sm:$0xff] }
 0x2a1   :  { %v3902_v57 = vor.u32 %v3901_v59, %v3897_v53  ;;  %v7455_v56 = vmul.bf16 %v10656_v4, %v14164_v32  ;;  %v7456_v39 = vmul.bf16 %v10657_v30, %v15273_v15  ;;  %9985 = vmatmul.mubr.bf16.gmra.mrb[12].mxu0 %v8891_v61  ;;  %v14488_v12 = vsel %vm11767_vm11, %v7604_v34, %v7605_v35  ;;  %v15286_v61 = vld [vmem:[#allocation56_spill] sm:$0xff] }
 0x2a2   :  { %v3883_v8 = vrot.slane %v3882_v42, 4  ;;  %v7607_v7 = vrot.slane %v7605_v35, 4  ;;  %v8865_v0 = vrot.slane %v7454_v40, 9  ;;  %9988 = vmatprep.mubr.bf16.mxu0 %v8892_v49  ;;  %v3893_v31 = vrot.slane %v3892_v41, 4  ;;  %v10658_v49 = vld [vmem:[%s14981_s0 + $0x9c] sm:$0xf] }
 0x2a3   :  { %v3903_v36 = vrot.slane %v3902_v57, 4  ;;  %v7612_v45 = vrot.slane %v7455_v56, 5  ;;  %v7615_v26 = vrot.slane %v7456_v39, 5  ;;  %v3912_v52 = vor.u32 %v15286_v61, %v15285_v29  ;;  %v10660_v42 = vld [vmem:[%s14981_s0 + $0x98] sm:$0xf] }
 0x2a4   :  { %v3888_v5 = vsel %vm11108_vm5, %v3883_v8, %v3887_v63  ;;  %v14495_v2 = vsel %vm11767_vm11, %v7607_v7, %v7608_v13  ;;  %v3601_v3 = vmul.bf16 %v10658_v49, %v15287_v1  ;;  %v3919_v44 = vshrl.u32 %v15289_v14, 16  ;;  %v10661_v56 = vld [vmem:[%s14981_s0 + $0x9c] sm:$0xf] }
 0x2a5   :  { %9693 = vmatmul.mubr.bf16.gmra.mrb[40].mxu1 %v14405_v17  ;;  %v3898_v17 = vsel %vm11108_vm5, %v3893_v31, %v3897_v53  ;;  %v8895_v51 = vcombine.low %v14488_v12, %v14495_v2  ;;  %v7613_v20 = vsel %vm11767_vm11, %v8865_v0, %v7612_v45  ;;  %v7614_v38 = vrot.slane %v7612_v45, 4  ;;  %v15290_v53 = vld [vmem:[#allocation58_spill] sm:$0xff] }
 0x2a6   :  { %9696 = vmatprep.mubr.bf16.mxu1 %v14410_v23  ;;  %v8660_v19 = vcombine.low %v3888_v5, %v3898_v17  ;;  %v3908_v11 = vsel %vm11108_vm5, %v3903_v36, %v15285_v29  ;;  %v3913_v58 = vrot.slane %v3912_v52, 4  ;;  %v10659_v23 = vld [vmem:[%s14981_s0 + $0xa0] sm:$0xf]  ;;  %v3925_v22 = vshll.u32 %v3601_v3, 16  ;;  %v15291_v5 = vld [vmem:[#allocation11_spill] sm:$0xff] }
 0x2a7   :  { %v3602_v6 = vmul.bf16 %v10659_v23, %v15288_v60  ;;  %v7616_v21 = vsel %vm11767_vm11, %v7614_v38, %v7615_v26  ;;  %v3929_v63 = vshrl.u32 %v3601_v3, 16  ;;  %v7457_v35 = vmul.bf16 %v10660_v42, %v15280_v9  ;;  %v10662_v31 = vld [vmem:[%s14981_s0 + $0xa0] sm:$0xf]  ;;  %v15292_v38 = vld [vmem:[#allocation9_spill] sm:$0xff] }
 0x2a8   :  { %v8896_v33 = vcombine.low %v7613_v20, %v7616_v21  ;;  %v3918_v59 = vsel %vm11108_vm5, %v3913_v58, %v15290_v53  ;;  %v3921_v40 = vrot.slane %v3919_v44, 4  ;;  %v3927_v41 = vrot.slane %v3925_v22, 5  ;;  %v10665_v20 = vld [vmem:[%s14981_s0 + $0xa8] sm:$0x1] }
 0x2a9   :  { %v3935_v34 = vshll.u32 %v3602_v6, 16  ;;  %v8661_v13 = vcombine.low %v3908_v11, %v3918_v59  ;;  %v3931_v57 = vrot.slane %v3929_v63, 4  ;;  %9989 = vmatmul.mubr.bf16.gmra.mrb[16].mxu0 %v8893_v48  ;;  %v7458_v30 = vmul.bf16 %v10661_v56, %v15281_v62  ;;  %v10666_v56 = vld [vmem:[%s14981_s0 + $0xb8] sm:$0xf] }
 0x2aa   :  { %v7617_v39 = vrot.slane %v7615_v26, 4  ;;  %v7618_v8 = vrot.slane %v7457_v35, 5  ;;  %9992 = vmatprep.mubr.bf16.mxu0 %v8894_v18  ;;  %v3922_v7 = vor.u32 %v3921_v40, %v15290_v53  ;;  %v7459_v28 = vmul.bf16 %v10662_v31, %v15275_v16  ;;  %v10664_v26 = vld [vmem:[%s14981_s0 + $0xa4] sm:$0xf] }
 0x2ab   :  { %v3937_v4 = vrot.slane %v3935_v34, 5  ;;  %v3932_v0 = vor.u32 %v3931_v57, %v3927_v41  ;;  %v7460_v48 = vmul.bf16 %v10663_v27, %v15277_v37  ;;  %v7621_v45 = vrot.slane %v7458_v30, 5 }
 0x2ac   :  { %v14546_v18 = vsel %vm11767_vm11, %v7617_v39, %v7618_v8  ;;  %v7620_v36 = vrot.slane %v7618_v8, 4  ;;  %v3603_v29 = vmul.bf16 %v10664_v26, %v15291_v5  ;;  %v3923_v61 = vrot.slane %v3922_v7, 4  ;;  %v10667_v7 = vld [vmem:[%s14981_s0 + $0xbc] sm:$0xf] }
 0x2ad   :  { %9697 = vmatmul.mubr.bf16.gmra.mrb[44].mxu1 %v14457_v43  ;;  %v3933_v52 = vrot.slane %v3932_v0, 4  ;;  %v7624_v49 = vrot.slane %v7459_v28, 5  ;;  %v14552_v3 = vrot.slane %v7460_v48, 5  ;;  %v7623_v17 = vrot.slane %v7621_v45, 4  ;;  %v10668_v48 = vld [vmem:[%s14981_s0 + $0xa8] sm:$0xf] }
 0x2ae   :  { %9740 = vmatprep.mubr.bf16.mxu1 %v8660_v19  ;;  %v7622_v43 = vsel %vm11767_vm11, %v7620_v36, %v7621_v45  ;;  %v3604_v11 = vmul.bf16 %v10665_v20, %v15292_v38  ;;  %v3939_v58 = vshrl.u32 %v3602_v6, 16  ;;  %v3366_v19 = vld [vmem:[%s14981_s0 + $0xb4] sm:$0xf]  ;;  %v3928_v23 = vsel %vm11108_vm5, %v3923_v61, %v3927_v41  ;;  %v7280_v36 = vld [vmem:[%s14981_s0 + $0xb8] sm:$0xe] }
 0x2af   :  { %v3938_v21 = vsel %vm11108_vm5, %v3933_v52, %v3937_v4  ;;  %v8897_v14 = vcombine.low %v14546_v18, %v7622_v43  ;;  %v7626_v44 = vrot.slane %v7624_v49, 4  ;;  %v7625_v63 = vsel %vm11767_vm11, %v7623_v17, %v7624_v49  ;;  %v10669_v49 = vld [vmem:[%s14981_s0 + $0xac] sm:$0x1] }
 0x2b0   :  { %v8662_v22 = vcombine.low %v3928_v23, %v3938_v21  ;;  %v3941_v53 = vrot.slane %v3939_v58, 4  ;;  %v3945_v59 = vshll.u32 %v3603_v29, 16  ;;  %v3949_v34 = vshrl.u32 %v3603_v29, 16 }
 0x2b1   :  { %v7628_v6 = vsel %vm11767_vm11, %v7626_v44, %v14552_v3  ;;  %v3955_v42 = vshll.u32 %v3604_v11, 16  ;;  %v3605_v35 = vmul.bf16 %v15282_v47, %v3366_v19  ;;  %9993 = vmatmul.mubr.bf16.gmra.mrb[20].mxu0 %v8895_v51  ;;  %v3606_v30 = vmul.bf16 %v10666_v56, %v15283_v55  ;;  %v10670_v44 = vld [vmem:[%s14981_s0 + $0xbc] sm:$0xf] }
 0x2b2   :  { %v8898_v40 = vcombine.low %v7625_v63, %v7628_v6  ;;  %v3942_v41 = vor.u32 %v3941_v53, %v3937_v4  ;;  %v3947_v57 = vrot.slane %v3945_v59, 5  ;;  %9996 = vmatprep.mubr.bf16.mxu0 %v8896_v33  ;;  %v3951_v39 = vrot.slane %v3949_v34, 4  ;;  %v10671_v63 = vld [vmem:[%s14981_s0 + $0xc0] sm:$0xf] }
 0x2b3   :  { %v3957_v8 = vrot.slane %v3955_v42, 5  ;;  %v14585_v0 = vmul.bf16 %v10667_v7, %v15284_v50  ;;  %v3960_v12 = vshrl.u32 %v3605_v35, 16  ;;  %v3963_v51 = vshll.u32 %v3605_v35, 16  ;;  %v15294_v7 = vld [vmem:[#allocation6_spill] sm:$0xff] }
 0x2b4   :  { %v3943_v2 = vrot.slane %v3942_v41, 4  ;;  %v3969_v4 = vshll.u32 %v3606_v30, 16  ;;  %v3973_v31 = vshrl.u32 %v3606_v30, 16  ;;  %v3952_v28 = vor.u32 %v3951_v39, %v3947_v57  ;;  %v15293_v39 = vld [vmem:[#allocation5_spill] sm:$0xff] }
 0x2b5   :  { %9741 = vmatmul.mubr.bf16.vlgmr.msra.gmra.mrb[24].mxu1 %v8661_v13  ;;  %v3962_v27 = vrot.slane %v3960_v12, 4  ;;  %v3979_v33 = vshll.u32 %v14585_v0, 16  ;;  %v7461_v18 = vmul.bf16 %v10668_v48, %v15278_v54  ;;  %v3965_v45 = vrot.slane %v3963_v51, 5 }
 0x2b6   :  { %9744 = vmatprep.mubr.bf16.mxu1 %v8662_v22  ;;  %v3948_v13 = vsel %vm11108_vm5, %v3943_v2, %v3947_v57  ;;  %v3971_v26 = vrot.slane %v3969_v4, 5  ;;  %v3975_v29 = vrot.slane %v3973_v31, 4  ;;  %v3953_v61 = vrot.slane %v3952_v28, 4 }
 0x2b7   :  { %v14597_v52 = vrot.slane %v3979_v33, 5  ;;  %v7462_v43 = vmul.bf16 %v10669_v49, %v15279_v24  ;;  %v7629_v17 = vrot.slane %v14552_v3, 4  ;;  %v3966_v20 = vor.u32 %v3965_v45, %v3962_v27 }
 0x2b8   :  { %v3976_v11 = vor.u32 %v3975_v29, %v3971_v26  ;;  %v7630_v58 = vrot.slane %v7461_v18, 5  ;;  %v7463_v19 = vmul.bf16 %v15270_v25, %v7280_v36  ;;  %v3958_v23 = vsel %vm11108_vm5, %v3953_v61, %v3957_v8 }
 0x2b9   :  { %v7633_v21 = vrot.slane %v7462_v43, 5  ;;  %v7464_v22 = vmul.bf16 %v10670_v44, %v14164_v32  ;;  %v7465_v3 = vmul.bf16 %v10671_v63, %v15273_v15  ;;  %9997 = vmatmul.mubr.bf16.gmra.mrb[24].mxu0 %v8897_v14  ;;  %v8663_v53 = vcombine.low %v3948_v13, %v3958_v23  ;;  %v10672_v14 = vld [vmem:[%s14981_s0 + $0xc0] sm:$0xf]  ;;  %v10674_v13 = vld [vmem:[%s14981_s0 + $0xc8] sm:$0xf] }
 0x2ba   :  { %v3967_v59 = vrot.slane %v3966_v20, 4  ;;  %v3977_v6 = vrot.slane %v3976_v11, 4  ;;  %v7631_v34 = vsel %vm11767_vm11, %v7629_v17, %v7630_v58  ;;  %10000 = vmatprep.mubr.bf16.mxu0 %v8898_v40  ;;  %v7632_v42 = vrot.slane %v7630_v58, 4  ;;  %v10673_v40 = vld [vmem:[%s14981_s0 + $0xc4] sm:$0xf] }
 0x2bb   :  { %v8866_v35 = vrot.slane %v7463_v19, 9  ;;  %v7637_v41 = vrot.slane %v7464_v22, 5  ;;  %v7640_v57 = vrot.slane %v7465_v3, 5  ;;  %v3608_v8 = vmul.bf16 %v10672_v14, %v15293_v39  ;;  %v10676_v44 = vld [vmem:[%s14981_s0 + $0xc4] sm:$0xf] }
 0x2bc   :  { %v3972_v56 = vsel %vm11108_vm5, %v3967_v59, %v3971_v26  ;;  %v3982_v30 = vsel %vm11108_vm5, %v3977_v6, %v14597_v52  ;;  %v3609_v12 = vmul.bf16 %v10673_v40, %v15294_v7  ;;  %v7634_v51 = vsel %vm11767_vm11, %v7632_v42, %v7633_v21  ;;  %v10675_v26 = vld [vmem:[%s14981_s0 + $0xcc] sm:$0xf]  ;;  %v10677_v59 = vld [vmem:[%s14981_s0 + $0xc8] sm:$0xf] }
 0x2bd   :  { %9745 = vmatmul.mubr.bf16.gmra.mrb[28].mxu1 %v8663_v53  ;;  %v8664_v2 = vcombine.low %v3972_v56, %v3982_v30  ;;  %v7638_v4 = vsel %vm11767_vm11, %v8866_v35, %v7637_v41  ;;  %v7639_v31 = vrot.slane %v7637_v41, 4  ;;  %v8899_v28 = vcombine.low %v7631_v34, %v7634_v51 }
 0x2be   :  { %v3983_v27 = vshrl.u32 %v14585_v0, 16  ;;  %v3989_v33 = vshll.u32 %v3608_v8, 16  ;;  %v3993_v48 = vshrl.u32 %v3608_v8, 16  ;;  %v3999_v36 = vshll.u32 %v3609_v12, 16 }
 0x2bf   :  { %9748 = vmatprep.mubr.bf16.mxu1 %v8664_v2  ;;  %v7641_v18 = vsel %vm11767_vm11, %v7639_v31, %v7640_v57  ;;  %v3610_v45 = vmul.bf16 %v10674_v13, %v15287_v1  ;;  %v14645_v29 = vmul.bf16 %v10675_v26, %v15288_v60  ;;  %v4003_v20 = vshrl.u32 %v3609_v12, 16  ;;  %v10678_v12 = vld [vmem:[%s14981_s0 + $0xcc] sm:$0xf]  ;;  %v10680_v26 = vld [vmem:[%s14981_s0 + $0xd0] sm:$0xf] }
 0x2c0   :  { %v8900_v0 = vcombine.low %v7638_v4, %v7641_v18  ;;  %v3985_v61 = vrot.slane %v3983_v27, 4  ;;  %v3991_v49 = vrot.slane %v3989_v33, 5  ;;  %v3995_v43 = vrot.slane %v3993_v48, 4 }
 0x2c1   :  { %v4001_v17 = vrot.slane %v3999_v36, 5  ;;  %v4009_v11 = vshll.u32 %v3610_v45, 16  ;;  %v4013_v58 = vshrl.u32 %v3610_v45, 16  ;;  %10001 = vmatmul.mubr.bf16.gmra.mrb[28].mxu0 %v8899_v28  ;;  %v4019_v21 = vshll.u32 %v14645_v29, 16 }
 0x2c2   :  { %v3986_v19 = vor.u32 %v3985_v61, %v14597_v52  ;;  %v3996_v23 = vor.u32 %v3995_v43, %v3991_v49  ;;  %v7466_v22 = vmul.bf16 %v10676_v44, %v15280_v9  ;;  %10004 = vmatprep.mubr.bf16.mxu0 %v8900_v0  ;;  %v4005_v63 = vrot.slane %v4003_v20, 4  ;;  %v10681_v61 = vld [vmem:[%s14981_s0 + $0xd4] sm:$0x1]  ;;  %v3375_v43 = vld [vmem:[%s14981_s0 + $0xe0] sm:$0xf] }
 0x2c3   :  { %v4011_v3 = vrot.slane %v4009_v11, 5  ;;  %v4015_v53 = vrot.slane %v4013_v58, 4  ;;  %v7467_v6 = vmul.bf16 %v10677_v59, %v15281_v62  ;;  %v4021_v42 = vrot.slane %v4019_v21, 5 }
 0x2c4   :  { %v3987_v52 = vrot.slane %v3986_v19, 4  ;;  %v3997_v34 = vrot.slane %v3996_v23, 4  ;;  %v7642_v35 = vrot.slane %v7640_v57, 4  ;;  %v4006_v41 = vor.u32 %v4005_v63, %v4001_v17  ;;  %v10679_v57 = vld [vmem:[%s14981_s0 + $0xd0] sm:$0xf] }
 0x2c5   :  { %v4016_v56 = vor.u32 %v4015_v53, %v4011_v3  ;;  %v7643_v30 = vrot.slane %v7466_v22, 5  ;;  %v7646_v14 = vrot.slane %v7467_v6, 5  ;;  %v7468_v2 = vmul.bf16 %v10678_v12, %v15275_v16  ;;  %v10682_v53 = vld [vmem:[%s14981_s0 + $0xe4] sm:$0xf] }
 0x2c6   :  { %v3992_v8 = vsel %vm11108_vm5, %v3987_v52, %v3991_v49  ;;  %v4002_v40 = vsel %vm11108_vm5, %v3997_v34, %v4001_v17  ;;  %v7469_v51 = vmul.bf16 %v10679_v57, %v15277_v37  ;;  %v4007_v31 = vrot.slane %v4006_v41, 4  ;;  %v10683_v41 = vld [vmem:[%s14981_s0 + $0xe8] sm:$0xf] }
 0x2c7   :  { %v8665_v4 = vcombine.low %v3992_v8, %v4002_v40  ;;  %v4017_v28 = vrot.slane %v4016_v56, 4  ;;  %v7644_v27 = vsel %vm11767_vm11, %v7642_v35, %v7643_v30  ;;  %v7645_v33 = vrot.slane %v7643_v30, 4 }
 0x2c8   :  { %v7648_v48 = vrot.slane %v7646_v14, 4  ;;  %v7649_v18 = vrot.slane %v7468_v2, 5  ;;  %v14671_v36 = vrot.slane %v7469_v51, 5  ;;  %v4012_v13 = vsel %vm11108_vm5, %v4007_v31, %v4011_v3  ;;  %v10684_v51 = vld [vmem:[%s14981_s0 + $0xd4] sm:$0xf] }
 0x2c9   :  { %9749 = vmatmul.mubr.bf16.gmra.mrb[32].mxu1 %v8665_v4  ;;  %v4022_v45 = vsel %vm11108_vm5, %v4017_v28, %v4021_v42  ;;  %v3612_v0 = vmul.bf16 %v10680_v26, %v15291_v5  ;;  %v3613_v49 = vmul.bf16 %v10681_v61, %v15292_v38  ;;  %v7647_v20 = vsel %vm11767_vm11, %v7645_v33, %v7646_v14 }
 0x2ca   :  { %v8666_v17 = vcombine.low %v4012_v13, %v4022_v45  ;;  %v7650_v11 = vsel %vm11767_vm11, %v7648_v48, %v7649_v18  ;;  %v7651_v58 = vrot.slane %v7649_v18, 4  ;;  %v8901_v19 = vcombine.low %v7644_v27, %v7647_v20  ;;  %v10685_v18 = vld [vmem:[%s14981_s0 + $0xd8] sm:$0x1] }
 0x2cb   :  { %v4023_v23 = vshrl.u32 %v14645_v29, 16  ;;  %v4029_v21 = vshll.u32 %v3612_v0, 16  ;;  %v4033_v44 = vshrl.u32 %v3612_v0, 16  ;;  %v4039_v63 = vshll.u32 %v3613_v49, 16 }
 0x2cc   :  { %9752 = vmatprep.mubr.bf16.mxu1 %v8666_v17  ;;  %v7653_v22 = vsel %vm11767_vm11, %v7651_v58, %v14671_v36  ;;  %v3614_v3 = vmul.bf16 %v15282_v47, %v3375_v43  ;;  %v3615_v59 = vmul.bf16 %v10682_v53, %v15283_v55  ;;  %10005 = vmatmul.mubr.bf16.gmra.mrb[32].mxu0 %v8901_v19  ;;  %v7654_v45 = vrot.slane %v14671_v36, 4  ;;  %v10686_v36 = vld [vmem:[%s14981_s0 + $0xe8] sm:$0xf] }
 0x2cd   :  { %v8902_v6 = vcombine.low %v7650_v11, %v7653_v22  ;;  %v4025_v52 = vrot.slane %v4023_v23, 4  ;;  %v4031_v29 = vrot.slane %v4029_v21, 5  ;;  %v4035_v34 = vrot.slane %v4033_v44, 4  ;;  %v10687_v22 = vld [vmem:[%s14981_s0 + $0xec] sm:$0xf] }
 0x2ce   :  { %v4041_v35 = vrot.slane %v4039_v63, 5  ;;  %v3616_v56 = vmul.bf16 %v10683_v41, %v15284_v50  ;;  %v4044_v30 = vshrl.u32 %v3614_v3, 16  ;;  %v4047_v47 = vshll.u32 %v3614_v3, 16  ;;  %v10688_v3 = vld [vmem:[%s14981_s0 + $0xec] sm:$0xf] }
 0x2cf   :  { %10008 = vmatprep.mubr.bf16.mxu0 %v8902_v6  ;;  %v4026_v14 = vor.u32 %v4025_v52, %v4021_v42  ;;  %v4036_v8 = vor.u32 %v4035_v34, %v4031_v29  ;;  %v4053_v40 = vshll.u32 %v3615_v59, 16  ;;  %v4057_v12 = vshrl.u32 %v3615_v59, 16  ;;  %v7281_v42 = vld [vmem:[%s14981_s0 + $0xe4] sm:$0xe]  ;;  %v10689_v52 = vld [vmem:[%s14981_s0 + $0xf0] sm:$0xf] }
 0x2d0   :  { %v4046_v55 = vrot.slane %v4044_v30, 4  ;;  %v4049_v2 = vrot.slane %v4047_v47, 5  ;;  %v4063_v57 = vshll.u32 %v3616_v56, 16  ;;  %v7470_v4 = vmul.bf16 %v10684_v51, %v15278_v54 }
 0x2d1   :  { %v4027_v31 = vrot.slane %v4026_v14, 4  ;;  %v4037_v28 = vrot.slane %v4036_v8, 4  ;;  %v4055_v27 = vrot.slane %v4053_v40, 5  ;;  %v4059_v50 = vrot.slane %v4057_v12, 4  ;;  %v10690_v12 = vld [vmem:[%s14981_s0 + $0xf4] sm:$0xf] }
 0x2d2   :  { %v4050_v33 = vor.u32 %v4049_v2, %v4046_v55  ;;  %v4065_v48 = vrot.slane %v4063_v57, 5  ;;  %v7471_v13 = vmul.bf16 %v10685_v18, %v15279_v24  ;;  %v7655_v49 = vrot.slane %v7470_v4, 5 }
 0x2d3   :  { %v4032_v26 = vsel %vm11108_vm5, %v4027_v31, %v4031_v29  ;;  %v4042_v0 = vsel %vm11108_vm5, %v4037_v28, %v4041_v35  ;;  %v4060_v61 = vor.u32 %v4059_v50, %v4055_v27  ;;  %v7472_v11 = vmul.bf16 %v15270_v25, %v7281_v42 }
 0x2d4   :  { %v8667_v43 = vcombine.low %v4032_v26, %v4042_v0  ;;  %v4051_v17 = vrot.slane %v4050_v33, 4  ;;  %v7658_v20 = vrot.slane %v7471_v13, 5  ;;  %v7656_v19 = vsel %vm11767_vm11, %v7654_v45, %v7655_v49 }
 0x2d5   :  { %v4061_v58 = vrot.slane %v4060_v61, 4  ;;  %v7657_v23 = vrot.slane %v7655_v49, 4  ;;  %v7473_v21 = vmul.bf16 %v10686_v36, %v14164_v32  ;;  %v7474_v25 = vmul.bf16 %v10687_v22, %v15273_v15 }
 0x2d6   :  { %9753 = vmatmul.mubr.bf16.gmra.mrb[36].mxu1 %v8667_v43  ;;  %v4056_v44 = vsel %vm11108_vm5, %v4051_v17, %v4055_v27  ;;  %v8867_v63 = vrot.slane %v7472_v11, 9  ;;  %v3617_v53 = vmul.bf16 %v10688_v3, %v15293_v39  ;;  %v3618_v15 = vmul.bf16 %v10689_v52, %v15294_v7 }
 0x2d7   :  { %v4066_v32 = vsel %vm11108_vm5, %v4061_v58, %v4065_v48  ;;  %v7659_v59 = vsel %vm11767_vm11, %v7657_v23, %v7658_v20  ;;  %v7662_v6 = vrot.slane %v7473_v21, 5  ;;  %v7665_v35 = vrot.slane %v7474_v25, 5  ;;  %v10694_v21 = vld [vmem:[%s14981_s0 + $0xf8] sm:$0xf] }
 0x2d8   :  { %v8668_v29 = vcombine.low %v4056_v44, %v4066_v32  ;;  %v8903_v34 = vcombine.low %v7656_v19, %v7659_v59  ;;  %v4067_v41 = vshrl.u32 %v3616_v56, 16  ;;  %v4073_v47 = vshll.u32 %v3617_v53, 16  ;;  %v10691_v56 = vld [vmem:[%s14981_s0 + $0xf8] sm:$0xf] }
 0x2d9   :  { %v7663_v39 = vsel %vm11767_vm11, %v8867_v63, %v7662_v6  ;;  %v7664_v30 = vrot.slane %v7662_v6, 4  ;;  %v4077_v14 = vshrl.u32 %v3617_v53, 16  ;;  %v4083_v40 = vshll.u32 %v3618_v15, 16  ;;  %v10695_v63 = vld [vmem:[%s14981_s0 + $0xfc] sm:$0xf] }
 0x2da   :  { %9756 = vmatprep.mubr.bf16.mxu1 %v8668_v29  ;;  %10009 = vmatmul.mubr.bf16.gmra.mrb[36].mxu0 %v8903_v34  ;;  %v4069_v8 = vrot.slane %v4067_v41, 4  ;;  %v3619_v7 = vmul.bf16 %v10690_v12, %v15287_v1  ;;  %v14756_v55 = vmul.bf16 %v10691_v56, %v15288_v60  ;;  %v4075_v57 = vrot.slane %v4073_v47, 5  ;;  %v10692_v60 = vld [vmem:[%s14981_s0 + $0xf0] sm:$0xf]  ;;  %v10699_v56 = vld [vmem:[%s14981_s0 + $0x104] sm:$0x1] }
 0x2db   :  { %v7666_v2 = vsel %vm11767_vm11, %v7664_v30, %v7665_v35  ;;  %v4079_v51 = vrot.slane %v4077_v14, 4  ;;  %v4087_v4 = vshrl.u32 %v3618_v15, 16  ;;  %v4085_v27 = vrot.slane %v4083_v40, 5  ;;  %v10696_v15 = vld [vmem:[%s14981_s0 + $0xfc] sm:$0xf] }
 0x2dc   :  { %v8904_v31 = vcombine.low %v7663_v39, %v7666_v2  ;;  %v4070_v28 = vor.u32 %v4069_v8, %v4065_v48  ;;  %v4093_v50 = vshll.u32 %v3619_v7, 16  ;;  %v4097_v1 = vshrl.u32 %v3619_v7, 16  ;;  %v10693_v48 = vld [vmem:[%s14981_s0 + $0xf4] sm:$0xf] }
 0x2dd   :  { %v4080_v42 = vor.u32 %v4079_v51, %v4075_v57  ;;  %v4089_v33 = vrot.slane %v4087_v4, 4  ;;  %v4103_v18 = vshll.u32 %v14756_v55, 16  ;;  %v7475_v26 = vmul.bf16 %v10692_v60, %v15280_v9 }
 0x2de   :  { %10012 = vmatprep.mubr.bf16.mxu0 %v8904_v31  ;;  %v4071_v13 = vrot.slane %v4070_v28, 4  ;;  %v4095_v45 = vrot.slane %v4093_v50, 5  ;;  %v7476_v0 = vmul.bf16 %v10693_v48, %v15281_v62  ;;  %v4099_v43 = vrot.slane %v4097_v1, 4 }
 0x2df   :  { %v4081_v61 = vrot.slane %v4080_v42, 4  ;;  %v4090_v49 = vor.u32 %v4089_v33, %v4085_v27  ;;  %v4105_v17 = vrot.slane %v4103_v18, 5  ;;  %v7667_v11 = vrot.slane %v7665_v35, 4 }
 0x2e0   :  { %v4076_v20 = vsel %vm11108_vm5, %v4071_v13, %v4075_v57  ;;  %v7668_v58 = vrot.slane %v7475_v26, 5  ;;  %v7671_v19 = vrot.slane %v7476_v0, 5  ;;  %v4100_v36 = vor.u32 %v4099_v43, %v4095_v45 }
 0x2e1   :  { %v4086_v23 = vsel %vm11108_vm5, %v4081_v61, %v4085_v27  ;;  %v4091_v9 = vrot.slane %v4090_v49, 4  ;;  %v7477_v62 = vmul.bf16 %v10694_v21, %v15275_v16  ;;  %v7478_v3 = vmul.bf16 %v10695_v63, %v15277_v37  ;;  %v10697_v37 = vld [vmem:[%s14981_s0 + $0x100] sm:$0x1] }
 0x2e2   :  { %v8669_v44 = vcombine.low %v4076_v20, %v4086_v23  ;;  %v7669_v22 = vsel %vm11767_vm11, %v7667_v11, %v7668_v58  ;;  %v7670_v25 = vrot.slane %v7668_v58, 4  ;;  %v4101_v32 = vrot.slane %v4100_v36, 4 }
 0x2e3   :  { %v4096_v53 = vsel %vm11108_vm5, %v4091_v9, %v4095_v45  ;;  %v7673_v59 = vrot.slane %v7671_v19, 4  ;;  %v7674_v6 = vrot.slane %v7477_v62, 5  ;;  %v7677_v52 = vrot.slane %v7478_v3, 5 }
 0x2e4   :  { %9757 = vmatmul.mubr.bf16.gmra.mrb[40].mxu1 %v8669_v44  ;;  %v7672_v16 = vsel %vm11767_vm11, %v7670_v25, %v7671_v19  ;;  %v3621_v29 = vmul.bf16 %v10696_v15, %v15291_v5  ;;  %v3622_v34 = vmul.bf16 %v10697_v37, %v15292_v38  ;;  %v4106_v35 = vsel %vm11108_vm5, %v4101_v32, %v4105_v17  ;;  %v10698_v38 = vld [vmem:[%s14981_s0 + $0x100] sm:$0xf] }
 0x2e5   :  { %v8905_v41 = vcombine.low %v7669_v22, %v7672_v16  ;;  %v7675_v39 = vsel %vm11767_vm11, %v7673_v59, %v7674_v6  ;;  %v7676_v30 = vrot.slane %v7674_v6, 4  ;;  %v8670_v47 = vcombine.low %v4096_v53, %v4106_v35  ;;  %v14845_v15 = vld [vmem:[%s14982_s3] ss:$0 sm:$0xff] }
 0x2e6   :  { %v4107_v14 = vshrl.u32 %v14756_v55, 16  ;;  %v4113_v8 = vshll.u32 %v3621_v29, 16  ;;  %v4117_v40 = vshrl.u32 %v3621_v29, 16  ;;  %v4123_v12 = vshll.u32 %v3622_v34, 16 }
 0x2e7   :  { %10013 = vmatmul.mubr.bf16.gmra.mrb[40].mxu0 %v8905_v41  ;;  %v7678_v5 = vsel %vm11767_vm11, %v7676_v30, %v7677_v52  ;;  %v7479_v7 = vmul.bf16 %v10698_v38, %v15278_v54  ;;  %v7480_v2 = vmul.bf16 %v10699_v56, %v15279_v24  ;;  %9760 = vmatprep.mubr.bf16.mxu1 %v8670_v47  ;;  %v7679_v31 = vrot.slane %v7677_v52, 4 }
 0x2e8   :  { %v8906_v55 = vcombine.low %v7675_v39, %v7678_v5  ;;  %v4109_v57 = vrot.slane %v4107_v14, 4  ;;  %v4115_v51 = vrot.slane %v4113_v8, 5  ;;  %v4119_v4 = vrot.slane %v4117_v40, 4 }
 0x2e9   :  { %v7680_v28 = vrot.slane %v7479_v7, 5  ;;  %v7683_v33 = vrot.slane %v7480_v2, 5  ;;  %v4125_v18 = vrot.slane %v4123_v12, 5 }
 0x2ea   :  { %10016 = vmatprep.mubr.bf16.mxu0 %v8906_v55  ;;  %v4110_v27 = vor.u32 %v4109_v57, %v4105_v17  ;;  %v4120_v50 = vor.u32 %v4119_v4, %v4115_v51 }
 0x2eb   :  { %v7682_v42 = vrot.slane %v7680_v28, 4  ;;  %v7681_v13 = vsel %vm11767_vm11, %v7679_v31, %v7680_v28 }
 0x2ec   :  { %v4111_v1 = vrot.slane %v4110_v27, 4  ;;  %v4121_v54 = vrot.slane %v4120_v50, 4 }
 0x2ed   :  { %v7684_v24 = vsel %vm11767_vm11, %v7682_v42, %v7683_v33 }
 0x2ee   :  { %v4116_v45 = vsel %vm11108_vm5, %v4111_v1, %v4115_v51  ;;  %v4126_v60 = vsel %vm11108_vm5, %v4121_v54, %v4125_v18  ;;  %v8907_v26 = vcombine.low %v7681_v13, %v7684_v24 }
 0x2ef   :  { %v8671_v48 = vcombine.low %v4116_v45, %v4126_v60 }
 0x2f0   :  { %10017 = vmatmul.mubr.bf16.gmra.mrb[44].mxu0 %v8907_v26 }
 0x2f1   :  { %9761 = vmatmul.mubr.bf16.gmra.mrb[44].mxu1 %v8671_v48 }
 0x328   :  { %v9654_v0 = vpop.f32.mrb[0].mxu1 }
 0x329   :  { %v3091_v61 = vpop.f32.mrb[1].mxu1 }
 0x32a   :  { %v9655_v49 = vpop.f32.mrb[2].mxu1 }
 0x32b   :  { %v3094_v43 = vpop.f32.mrb[3].mxu1 }
 0x330   :  { %v9658_v17 = vpop.f32.mrb[4].mxu1 }
 0x331   :  { %v3107_v20 = vpop.f32.mrb[5].mxu1 }
 0x332   :  { %v9659_v11 = vpop.f32.mrb[6].mxu1 }
 0x333   :  { %v3110_v58 = vpop.f32.mrb[7].mxu1 }
 0x338   :  { %v9662_v10 = vpop.f32.mrb[8].mxu1 }
 0x339   :  { %v3123_v19 = vpop.f32.mrb[9].mxu1 }
 0x33a   :  { %v9663_v23 = vpop.f32.mrb[10].mxu1 }
 0x33b   :  { %v3126_v9 = vpop.f32.mrb[11].mxu1 }
 0x340   :  { %v14818_v36 = vpop.f32.mrb[12].mxu1 }
 0x341   :  { %v14820_v46 = vpop.f32.mrb[13].mxu1 }
 0x342   :  { %v14822_v21 = vpop.f32.mrb[14].mxu1 }
 0x343   :  { %v14824_v62 = vpop.f32.mrb[15].mxu1 }
 0x348   :  { %v14826_v44 = vpop.f32.mrb[16].mxu1 }
 0x349   :  { %v14828_v22 = vpop.f32.mrb[17].mxu1 }
 0x34a   :  { %v14830_v25 = vpop.f32.mrb[18].mxu1 }
 0x34b   :  { %v14832_v63 = vpop.f32.mrb[19].mxu1 }
 0x350   :  { %v14834_v3 = vpop.f32.mrb[20].mxu1 }
 0x351   :  { %v14836_v53 = vpop.f32.mrb[21].mxu1 }
 0x352   :  { %v14838_v32 = vpop.f32.mrb[22].mxu1 }
 0x353   :  { %v14840_v59 = vpop.f32.mrb[23].mxu1 }
 0x35c   :  { %v9974_v6 = vpop.f32.mrb[0].mxu0 }
 0x35d   :  { %v10036_v16 = vadd.f32 %v9974_v6, %v9654_v0  ;;  %v7880_v52 = vpop.f32.mrb[1].mxu0 }
 0x35e   :  { %v10037_v29 = vadd.f32 %v7880_v52, %v3091_v61  ;;  %v9975_v37 = vpop.f32.mrb[2].mxu0 }
 0x35f   :  { %v10038_v34 = vadd.f32 %v9975_v37, %v9655_v49  ;;  %v7883_v35 = vpop.f32.mrb[3].mxu0  ;;  %v8128_v39 = vadd.f32 %v10036_v16, %v14845_v15 }
 0x360   :  { %v10039_v41 = vadd.f32 %v7883_v35, %v3094_v43  ;;  %v8126_v47 = vadd.f32 %v10037_v29, %v14845_v15 }
 0x361   :  { %v8129_v30 = vadd.f32 %v10038_v34, %v14845_v15 }
 0x362   :  { %v8127_v14 = vadd.f32 %v10039_v41, %v14845_v15 }
 0x363   :  { %v9021_v8 = vpack.c.bf16 %v8129_v30, %v8128_v39 }
 0x364   :  { %v9016_v40 = vpack.c.bf16 %v8127_v14, %v8126_v47  ;;  %v9978_v5 = vpop.f32.mrb[4].mxu0 }
 0x365   :  { %9133 = vst [vmem:[%s14983_s4 + $0x8] sm:$0xff] %v9021_v8   ;;  %v10040_v12 = vadd.f32 %v9978_v5, %v9658_v17  ;;  %v7896_v38 = vpop.f32.mrb[5].mxu0 }
 0x366   :  { %9017 = vst [vmem:[%s14983_s4] sm:$0xff] %v9016_v40   ;;  %v10041_v7 = vadd.f32 %v7896_v38, %v3107_v20  ;;  %v9979_v56 = vpop.f32.mrb[6].mxu0 }
 0x367   :  { %v10042_v2 = vadd.f32 %v9979_v56, %v9659_v11  ;;  %v7899_v55 = vpop.f32.mrb[7].mxu0  ;;  %v8132_v51 = vadd.f32 %v10040_v12, %v14845_v15 }
 0x368   :  { %v10043_v57 = vadd.f32 %v7899_v55, %v3110_v58  ;;  %v8130_v31 = vadd.f32 %v10041_v7, %v14845_v15 }
 0x369   :  { %v8133_v4 = vadd.f32 %v10042_v2, %v14845_v15 }
 0x36a   :  { %v8131_v28 = vadd.f32 %v10043_v57, %v14845_v15 }
 0x36b   :  { %v9031_v27 = vpack.c.bf16 %v8133_v4, %v8132_v51 }
 0x36c   :  { %v9026_v50 = vpack.c.bf16 %v8131_v28, %v8130_v31  ;;  %v9982_v42 = vpop.f32.mrb[8].mxu0 }
 0x36d   :  { %9135 = vst [vmem:[%s14983_s4 + $0x18] sm:$0xff] %v9031_v27   ;;  %v10044_v33 = vadd.f32 %v9982_v42, %v9662_v10  ;;  %v7912_v1 = vpop.f32.mrb[9].mxu0 }
 0x36e   :  { %9134 = vst [vmem:[%s14983_s4 + $0x10] sm:$0xff] %v9026_v50   ;;  %v10045_v54 = vadd.f32 %v7912_v1, %v3123_v19  ;;  %v9983_v18 = vpop.f32.mrb[10].mxu0 }
 0x36f   :  { %v10046_v13 = vadd.f32 %v9983_v18, %v9663_v23  ;;  %v7915_v24 = vpop.f32.mrb[11].mxu0  ;;  %v8136_v60 = vadd.f32 %v10044_v33, %v14845_v15 }
 0x370   :  { %v10047_v45 = vadd.f32 %v7915_v24, %v3126_v9  ;;  %v8134_v48 = vadd.f32 %v10045_v54, %v14845_v15 }
 0x371   :  { %v8137_v26 = vadd.f32 %v10046_v13, %v14845_v15 }
 0x372   :  { %v8135_v0 = vadd.f32 %v10047_v45, %v14845_v15 }
 0x373   :  { %v9041_v61 = vpack.c.bf16 %v8137_v26, %v8136_v60 }
 0x374   :  { %v9036_v49 = vpack.c.bf16 %v8135_v0, %v8134_v48  ;;  %v9986_v43 = vpop.f32.mrb[12].mxu0 }
 0x375   :  { %9137 = vst [vmem:[%s14983_s4 + $0x28] sm:$0xff] %v9041_v61   ;;  %v10048_v17 = vadd.f32 %v9986_v43, %v14818_v36  ;;  %v7928_v20 = vpop.f32.mrb[13].mxu0 }
 0x376   :  { %9136 = vst [vmem:[%s14983_s4 + $0x20] sm:$0xff] %v9036_v49   ;;  %v10049_v11 = vadd.f32 %v7928_v20, %v14820_v46  ;;  %v9987_v58 = vpop.f32.mrb[14].mxu0 }
 0x377   :  { %v10050_v10 = vadd.f32 %v9987_v58, %v14822_v21  ;;  %v7931_v19 = vpop.f32.mrb[15].mxu0  ;;  %v8140_v9 = vadd.f32 %v10048_v17, %v14845_v15 }
 0x378   :  { %v10051_v23 = vadd.f32 %v7931_v19, %v14824_v62  ;;  %v8138_v16 = vadd.f32 %v10049_v11, %v14845_v15 }
 0x379   :  { %v8141_v6 = vadd.f32 %v10050_v10, %v14845_v15 }
 0x37a   :  { %v8139_v36 = vadd.f32 %v10051_v23, %v14845_v15 }
 0x37b   :  { %v9051_v52 = vpack.c.bf16 %v8141_v6, %v8140_v9 }
 0x37c   :  { %v9046_v29 = vpack.c.bf16 %v8139_v36, %v8138_v16  ;;  %v9990_v37 = vpop.f32.mrb[16].mxu0 }
 0x37d   :  { %9139 = vst [vmem:[%s14983_s4 + $0x38] sm:$0xff] %v9051_v52   ;;  %v10052_v46 = vadd.f32 %v9990_v37, %v14826_v44  ;;  %v7944_v21 = vpop.f32.mrb[17].mxu0 }
 0x37e   :  { %9138 = vst [vmem:[%s14983_s4 + $0x30] sm:$0xff] %v9046_v29   ;;  %v10053_v62 = vadd.f32 %v7944_v21, %v14828_v22  ;;  %v9991_v34 = vpop.f32.mrb[18].mxu0 }
 0x37f   :  { %v10054_v35 = vadd.f32 %v9991_v34, %v14830_v25  ;;  %v7947_v41 = vpop.f32.mrb[19].mxu0  ;;  %v8144_v30 = vadd.f32 %v10052_v46, %v14845_v15 }
 0x380   :  { %v10055_v39 = vadd.f32 %v7947_v41, %v14832_v63  ;;  %v8142_v14 = vadd.f32 %v10053_v62, %v14845_v15 }
 0x381   :  { %v8145_v47 = vadd.f32 %v10054_v35, %v14845_v15 }
 0x382   :  { %v8143_v44 = vadd.f32 %v10055_v39, %v14845_v15 }
 0x383   :  { %v9061_v8 = vpack.c.bf16 %v8145_v47, %v8144_v30 }
 0x384   :  { %v9056_v40 = vpack.c.bf16 %v8143_v44, %v8142_v14  ;;  %v9994_v5 = vpop.f32.mrb[20].mxu0 }
 0x385   :  { %9141 = vst [vmem:[%s14983_s4 + $0x48] sm:$0xff] %v9061_v8   ;;  %v10056_v22 = vadd.f32 %v9994_v5, %v14834_v3  ;;  %v7960_v25 = vpop.f32.mrb[21].mxu0 }
 0x386   :  { %9140 = vst [vmem:[%s14983_s4 + $0x40] sm:$0xff] %v9056_v40   ;;  %v10057_v63 = vadd.f32 %v7960_v25, %v14836_v53  ;;  %v9995_v12 = vpop.f32.mrb[22].mxu0 }
 0x387   :  { %v10058_v7 = vadd.f32 %v9995_v12, %v14838_v32  ;;  %v7963_v56 = vpop.f32.mrb[23].mxu0  ;;  %v8148_v51 = vadd.f32 %v10056_v22, %v14845_v15 }
 0x388   :  { %v9742_v38 = vpop.f32.mrb[24].mxu1  ;;  %v10059_v55 = vadd.f32 %v7963_v56, %v14840_v59  ;;  %v8146_v31 = vadd.f32 %v10057_v63, %v14845_v15 }
 0x389   :  { %v4418_v2 = vpop.f32.mrb[25].mxu1  ;;  %v8149_v3 = vadd.f32 %v10058_v7, %v14845_v15 }
 0x38a   :  { %v9743_v57 = vpop.f32.mrb[26].mxu1  ;;  %v8147_v28 = vadd.f32 %v10059_v55, %v14845_v15 }
 0x38b   :  { %v4421_v4 = vpop.f32.mrb[27].mxu1  ;;  %v9071_v27 = vpack.c.bf16 %v8149_v3, %v8148_v51 }
 0x38c   :  { %v9066_v53 = vpack.c.bf16 %v8147_v28, %v8146_v31  ;;  %v9998_v50 = vpop.f32.mrb[24].mxu0 }
 0x38d   :  { %9143 = vst [vmem:[%s14983_s4 + $0x58] sm:$0xff] %v9071_v27   ;;  %v10060_v32 = vadd.f32 %v9998_v50, %v9742_v38  ;;  %v7976_v42 = vpop.f32.mrb[25].mxu0 }
 0x38e   :  { %9142 = vst [vmem:[%s14983_s4 + $0x50] sm:$0xff] %v9066_v53   ;;  %v10061_v59 = vadd.f32 %v7976_v42, %v4418_v2  ;;  %v9999_v33 = vpop.f32.mrb[26].mxu0 }
 0x38f   :  { %v10062_v54 = vadd.f32 %v9999_v33, %v9743_v57  ;;  %v7979_v18 = vpop.f32.mrb[27].mxu0  ;;  %v8152_v60 = vadd.f32 %v10060_v32, %v14845_v15 }
 0x390   :  { %v9746_v1 = vpop.f32.mrb[28].mxu1  ;;  %v10063_v24 = vadd.f32 %v7979_v18, %v4421_v4  ;;  %v8150_v0 = vadd.f32 %v10061_v59, %v14845_v15 }
 0x391   :  { %v4434_v13 = vpop.f32.mrb[29].mxu1  ;;  %v8153_v26 = vadd.f32 %v10062_v54, %v14845_v15 }
 0x392   :  { %v9747_v45 = vpop.f32.mrb[30].mxu1  ;;  %v8151_v61 = vadd.f32 %v10063_v24, %v14845_v15 }
 0x393   :  { %v4437_v48 = vpop.f32.mrb[31].mxu1  ;;  %v9081_v49 = vpack.c.bf16 %v8153_v26, %v8152_v60 }
 0x394   :  { %v9076_v43 = vpack.c.bf16 %v8151_v61, %v8150_v0  ;;  %v10002_v17 = vpop.f32.mrb[28].mxu0 }
 0x395   :  { %9145 = vst [vmem:[%s14983_s4 + $0x68] sm:$0xff] %v9081_v49   ;;  %v10064_v20 = vadd.f32 %v10002_v17, %v9746_v1  ;;  %v7992_v11 = vpop.f32.mrb[29].mxu0 }
 0x396   :  { %9144 = vst [vmem:[%s14983_s4 + $0x60] sm:$0xff] %v9076_v43   ;;  %v10065_v58 = vadd.f32 %v7992_v11, %v4434_v13  ;;  %v10003_v10 = vpop.f32.mrb[30].mxu0 }
 0x397   :  { %v10066_v19 = vadd.f32 %v10003_v10, %v9747_v45  ;;  %v7995_v23 = vpop.f32.mrb[31].mxu0  ;;  %v8156_v6 = vadd.f32 %v10064_v20, %v14845_v15 }
 0x398   :  { %v10067_v9 = vadd.f32 %v7995_v23, %v4437_v48  ;;  %v8154_v36 = vadd.f32 %v10065_v58, %v14845_v15 }
 0x399   :  { %v8157_v16 = vadd.f32 %v10066_v19, %v14845_v15 }
 0x39a   :  { %v8155_v52 = vadd.f32 %v10067_v9, %v14845_v15 }
 0x39b   :  { %v9091_v29 = vpack.c.bf16 %v8157_v16, %v8156_v6 }
 0x39c   :  { %v9750_v37 = vpop.f32.mrb[32].mxu1  ;;  %v9086_v46 = vpack.c.bf16 %v8155_v52, %v8154_v36 }
 0x39d   :  { %v4450_v21 = vpop.f32.mrb[33].mxu1  ;;  %9147 = vst [vmem:[%s14983_s4 + $0x78] sm:$0xff] %v9091_v29  }
 0x39e   :  { %v9751_v62 = vpop.f32.mrb[34].mxu1  ;;  %9146 = vst [vmem:[%s14983_s4 + $0x70] sm:$0xff] %v9086_v46  }
 0x39f   :  { %v4453_v34 = vpop.f32.mrb[35].mxu1  ;;  %v10006_v35 = vpop.f32.mrb[32].mxu0 }
 0x3a0   :  { %v10068_v41 = vadd.f32 %v10006_v35, %v9750_v37  ;;  %v8008_v39 = vpop.f32.mrb[33].mxu0 }
 0x3a1   :  { %v10069_v30 = vadd.f32 %v8008_v39, %v4450_v21  ;;  %v10007_v47 = vpop.f32.mrb[34].mxu0 }
 0x3a2   :  { %v10070_v14 = vadd.f32 %v10007_v47, %v9751_v62  ;;  %v8011_v44 = vpop.f32.mrb[35].mxu0  ;;  %v8160_v40 = vadd.f32 %v10068_v41, %v14845_v15 }
 0x3a3   :  { %v10071_v8 = vadd.f32 %v8011_v44, %v4453_v34  ;;  %v8158_v22 = vadd.f32 %v10069_v30, %v14845_v15 }
 0x3a4   :  { %v8161_v5 = vadd.f32 %v10070_v14, %v14845_v15 }
 0x3a5   :  { %v8159_v25 = vadd.f32 %v10071_v8, %v14845_v15 }
 0x3a6   :  { %v9101_v63 = vpack.c.bf16 %v8161_v5, %v8160_v40 }
 0x3a7   :  { %v9096_v12 = vpack.c.bf16 %v8159_v25, %v8158_v22 }
 0x3a8   :  { %9149 = vst [vmem:[%s14983_s4 + $0x88] sm:$0xff] %v9101_v63  }
 0x3a9   :  { %v9754_v38 = vpop.f32.mrb[36].mxu1  ;;  %9148 = vst [vmem:[%s14983_s4 + $0x80] sm:$0xff] %v9096_v12  }
 0x3aa   :  { %v4466_v7 = vpop.f32.mrb[37].mxu1 }
 0x3ab   :  { %v9755_v56 = vpop.f32.mrb[38].mxu1 }
 0x3ac   :  { %v4469_v2 = vpop.f32.mrb[39].mxu1 }
 0x3ad   :  { %v10010_v55 = vpop.f32.mrb[36].mxu0 }
 0x3ae   :  { %v10072_v57 = vadd.f32 %v10010_v55, %v9754_v38  ;;  %v8024_v51 = vpop.f32.mrb[37].mxu0 }
 0x3af   :  { %v10073_v3 = vadd.f32 %v8024_v51, %v4466_v7  ;;  %v10011_v4 = vpop.f32.mrb[38].mxu0 }
 0x3b0   :  { %v10074_v31 = vadd.f32 %v10011_v4, %v9755_v56  ;;  %v8027_v28 = vpop.f32.mrb[39].mxu0  ;;  %v8164_v53 = vadd.f32 %v10072_v57, %v14845_v15 }
 0x3b1   :  { %v10075_v27 = vadd.f32 %v8027_v28, %v4469_v2  ;;  %v8162_v32 = vadd.f32 %v10073_v3, %v14845_v15 }
 0x3b2   :  { %v8165_v50 = vadd.f32 %v10074_v31, %v14845_v15 }
 0x3b3   :  { %v8163_v42 = vadd.f32 %v10075_v27, %v14845_v15 }
 0x3b4   :  { %v9111_v59 = vpack.c.bf16 %v8165_v50, %v8164_v53 }
 0x3b5   :  { %v9106_v33 = vpack.c.bf16 %v8163_v42, %v8162_v32 }
 0x3b6   :  { %9151 = vst [vmem:[%s14983_s4 + $0x98] sm:$0xff] %v9111_v59  }
 0x3b7   :  { %9150 = vst [vmem:[%s14983_s4 + $0x90] sm:$0xff] %v9106_v33   ;;  %v9758_v1 = vpop.f32.mrb[40].mxu1 }
 0x3b8   :  { %v4482_v54 = vpop.f32.mrb[41].mxu1 }
 0x3b9   :  { %v9759_v18 = vpop.f32.mrb[42].mxu1 }
 0x3ba   :  { %v4485_v13 = vpop.f32.mrb[43].mxu1  ;;  %v10014_v24 = vpop.f32.mrb[40].mxu0 }
 0x3bb   :  { %v10076_v45 = vadd.f32 %v10014_v24, %v9758_v1  ;;  %v8040_v60 = vpop.f32.mrb[41].mxu0 }
 0x3bc   :  { %v10077_v26 = vadd.f32 %v8040_v60, %v4482_v54  ;;  %v10015_v48 = vpop.f32.mrb[42].mxu0 }
 0x3bd   :  { %v10078_v0 = vadd.f32 %v10015_v48, %v9759_v18  ;;  %v8043_v61 = vpop.f32.mrb[43].mxu0  ;;  %v8168_v43 = vadd.f32 %v10076_v45, %v14845_v15 }
 0x3be   :  { %v10079_v49 = vadd.f32 %v8043_v61, %v4485_v13  ;;  %v8166_v20 = vadd.f32 %v10077_v26, %v14845_v15 }
 0x3bf   :  { %v8169_v17 = vadd.f32 %v10078_v0, %v14845_v15 }
 0x3c0   :  { %v8167_v11 = vadd.f32 %v10079_v49, %v14845_v15 }
 0x3c1   :  { %v9121_v58 = vpack.c.bf16 %v8169_v17, %v8168_v43 }
 0x3c2   :  { %v9116_v10 = vpack.c.bf16 %v8167_v11, %v8166_v20 }
 0x3c3   :  { %9153 = vst [vmem:[%s14983_s4 + $0xa8] sm:$0xff] %v9121_v58   ;;  %v10018_v19 = vpop.f32.mrb[44].mxu0 }
 0x3c4   :  { %9152 = vst [vmem:[%s14983_s4 + $0xa0] sm:$0xff] %v9116_v10   ;;  %v9762_v23 = vpop.f32.mrb[44].mxu1  ;;  %v8056_v9 = vpop.f32.mrb[45].mxu0 }
 0x3c5   :  { %v4498_v6 = vpop.f32.mrb[45].mxu1  ;;  %v10080_v16 = vadd.f32 %v10018_v19, %v9762_v23  ;;  %v10019_v36 = vpop.f32.mrb[46].mxu0 }
 0x3c6   :  { %v9763_v52 = vpop.f32.mrb[46].mxu1  ;;  %v10081_v29 = vadd.f32 %v8056_v9, %v4498_v6  ;;  %v8059_v37 = vpop.f32.mrb[47].mxu0 }
 0x3c7   :  { %v4501_v46 = vpop.f32.mrb[47].mxu1  ;;  %v10082_v21 = vadd.f32 %v10019_v36, %v9763_v52  ;;  %v8172_v34 = vadd.f32 %v10080_v16, %v14845_v15 }
 0x3c8   :  { %v10083_v62 = vadd.f32 %v8059_v37, %v4501_v46  ;;  %v8170_v41 = vadd.f32 %v10081_v29, %v14845_v15 }
 0x3c9   :  { %v8173_v35 = vadd.f32 %v10082_v21, %v14845_v15 }
 0x3ca   :  { %v8171_v39 = vadd.f32 %v10083_v62, %v14845_v15 }
 0x3cb   :  { %v9131_v30 = vpack.c.bf16 %v8173_v35, %v8172_v34 }
 0x3cc   :  { %v9126_v47 = vpack.c.bf16 %v8171_v39, %v8170_v41 }
 0x3cd   :  { %9155 = vst [vmem:[%s14983_s4 + $0xb8] sm:$0xff] %v9131_v30  }
 0x3ce   :  { %9154 = vst [vmem:[%s14983_s4 + $0xb0] sm:$0xff] %v9126_v47  }

</bundles_post_ra>
